<compile_context>
chip_gen: v5e
topology: v5e:2x2
jax: 0.10.0
libtpu: 0.0.40
codegen_flags: <defaults>
</compile_context>

<pallas_src>
import functools

import jax
import jax.numpy as jnp
from jax.experimental import pallas as pl
from jax.experimental.pallas import tpu as pltpu


def _residual_block_kernel(x_ref, w_ref, o_ref, xp_ref, h_ref, *,
                           H, W, C, CH, cdtype):
    """Fused ResidualBlock for one batch element (batch dim squeezed).

    x_ref : (H, W, C)        input block (also the residual)
    w_ref : (2, 9*C, C)      im2col weights, row index = (ky*3 + kx)*C + c_in
    o_ref : (H, W, C)        output block
    xp_ref: (H+2, W+2, C)    reflect-padded conv input scratch (reused by conv2)
    h_ref : (H*W, C) f32     raw conv output scratch (reused by conv2)
    """
    f32 = jnp.float32
    n_chunks = H // CH
    inv_n = 1.0 / float(H * W)

    def loop_chunks(body, init):
        # Single-chunk images trace the body inline (no loop overhead); larger
        # images run a fori_loop, unrolled when short for scheduler visibility.
        if n_chunks == 1:
            return body(0, init)
        return jax.lax.fori_loop(0, n_chunks, body, init,
                                 unroll=(n_chunks <= 8))

    def fill_halo():
        # 1-pixel reflect halo (PyTorch padding_mode='reflect', padding=1):
        # padded row 0 == padded row 2, padded row H+1 == padded row H-1;
        # same for columns (corners fall out of the column copy).
        xp_ref[0:1, 1:W + 1, :] = xp_ref[2:3, 1:W + 1, :]
        xp_ref[H + 1:H + 2, 1:W + 1, :] = xp_ref[H - 1:H, 1:W + 1, :]
        xp_ref[:, 0:1, :] = xp_ref[:, 2:3, :]
        xp_ref[:, W + 1:W + 2, :] = xp_ref[:, W - 1:W, :]

    def conv3x3(w):
        """3x3 conv of xp_ref with w; raw f32 output -> h_ref; returns IN stats."""
        def body(i, carry):
            s, ss = carry
            r0 = i * CH
            # Per-chunk im2col: 9 shifted (CH*W, C) windows read straight from
            # the padded scratch -> one bounded (CH*W, 9C) patch tile.
            cols = []
            for dy in range(3):
                for dx in range(3):
                    win = xp_ref[pl.ds(r0 + dy, CH), dx:dx + W, :]
                    cols.append(win.reshape(CH * W, C))
            patches = jnp.concatenate(cols, axis=1)              # (CH*W, 9C)
            # Single MXU matmul per chunk, K = 9*C, f32 accumulation.
            acc = jnp.dot(patches, w, preferred_element_type=f32)
            h_ref[pl.ds(r0 * W, CH * W), :] = acc
            # InstanceNorm statistics fused into the same chunk loop.
            s = s + jnp.sum(acc, axis=0, keepdims=True)
            ss = ss + jnp.sum(acc * acc, axis=0, keepdims=True)
            return s, ss

        zero = jnp.zeros((1, C), f32)
        s, ss = loop_chunks(body, (zero, zero))
        mean = s * inv_n
        var = jnp.maximum(ss * inv_n - mean * mean, 0.0)  # guard cancellation
        return mean, jax.lax.rsqrt(var + 1e-5)

    # ---- ConvBlock 1: reflect-pad(x) -> conv3x3 -> IN -> ReLU ---------------
    xp_ref[1:H + 1, 1:W + 1, :] = x_ref[...].astype(cdtype)
    fill_halo()
    mean1, rstd1 = conv3x3(w_ref[0])

    # Normalize + ReLU chunk-wise, writing straight back into the (reused)
    # padded scratch as conv2's input: the intermediate never leaves VMEM.
    def norm_relu_body(i, carry):
        r0 = i * CH
        hv = h_ref[pl.ds(r0 * W, CH * W), :].reshape(CH, W, C)
        hv = jnp.maximum((hv - mean1) * rstd1, 0.0)
        xp_ref[pl.ds(r0 + 1, CH), 1:W + 1, :] = hv.astype(cdtype)
        return carry
    loop_chunks(norm_relu_body, 0)
    fill_halo()

    # ---- ConvBlock 2 (no activation) + residual add + store ----------------
    mean2, rstd2 = conv3x3(w_ref[1])

    def out_body(i, carry):
        r0 = i * CH
        yv = h_ref[pl.ds(r0 * W, CH * W), :].reshape(CH, W, C)
        yv = (yv - mean2) * rstd2 + x_ref[pl.ds(r0, CH), :, :].astype(f32)
        o_ref[pl.ds(r0, CH), :, :] = yv.astype(o_ref.dtype)
        return carry
    loop_chunks(out_body, 0)


def _pick_chunk_rows(H, W, C, itemsize, budget_bytes=2 * 1024 * 1024):
    """Largest divisor of H whose (CH*W, 9C) im2col patch tile fits the budget."""
    best = 1
    for ch in range(1, H + 1):
        if H % ch == 0 and ch * W * 9 * C * itemsize <= budget_bytes:
            best = ch
    return best


def residual_block(x, params, *, compute_dtype=None):
    """x: (N, H, W, C) NHWC.  Returns x + IN(conv2(relu(IN(conv1(x)))))."""
    N, H, W, C = x.shape
    assert H >= 2 and W >= 2, "reflect padding needs H >= 2 and W >= 2"
    cdtype = jnp.dtype(compute_dtype) if compute_dtype is not None else x.dtype

    # im2col weight layout: (ky, kx, C_in, C_out) -> (9*C_in, C_out); both convs
    # packed into ONE grid-invariant input (one DMA / double-buffer, not two).
    w = jnp.stack([params["w1"].reshape(9 * C, C),
                   params["w2"].reshape(9 * C, C)]).astype(cdtype)
    # b1/b2 intentionally not passed: exactly cancelled by InstanceNorm's mean.

    CH = _pick_chunk_rows(H, W, C, cdtype.itemsize)

    # Generation-aware VMEM budget: ~3/4 of physical VMEM, capped at 100 MiB
    # (v5e/v6e: 128 MiB -> 96 MiB; v7x: 64 MiB -> 48 MiB).
    cap = 64 * 1024 * 1024
    try:
        cap = int(getattr(pltpu.get_tpu_info(), "vmem_capacity_bytes", cap))
    except Exception:
        pass
    vmem_limit = int(min(cap * 3 // 4, 100 * 1024 * 1024))

    kernel = functools.partial(_residual_block_kernel,
                               H=H, W=W, C=C, CH=CH, cdtype=cdtype)
    return pl.pallas_call(
        kernel,
        out_shape=jax.ShapeDtypeStruct((N, H, W, C), x.dtype),
        grid=(N,),
        in_specs=[
            pl.BlockSpec((None, H, W, C), lambda i: (i, 0, 0, 0)),
            pl.BlockSpec((2, 9 * C, C), lambda i: (0, 0, 0)),
        ],
        out_specs=pl.BlockSpec((None, H, W, C), lambda i: (i, 0, 0, 0)),
        scratch_shapes=[
            pltpu.VMEM((H + 2, W + 2, C), cdtype),   # padded conv input (reused by both convs)
            pltpu.VMEM((H * W, C), jnp.float32),     # raw conv output (reused by both convs)
        ],
        compiler_params=pltpu.CompilerParams(
            dimension_semantics=("parallel",),
            vmem_limit_bytes=vmem_limit,
        ),
    )(x, w)


def init_params(key, channels):
    k1, k2, k3, k4 = jax.random.split(key, 4)
    # weights in (ky, kx, C_in, C_out) layout
    w1 = jax.random.normal(k1, (3, 3, channels, channels), jnp.float32) * 0.1
    b1 = jax.random.normal(k2, (channels,), jnp.float32) * 0.1
    w2 = jax.random.normal(k3, (3, 3, channels, channels), jnp.float32) * 0.1
    b2 = jax.random.normal(k4, (channels,), jnp.float32) * 0.1
    # b1/b2 mirror the PyTorch module's parameters but cannot affect the
    # forward output (cancelled by InstanceNorm); only the reference uses them.
    return {"w1": w1, "b1": b1, "w2": w2, "b2": b2}


def _reference(x, params):
    """Pure-JAX reference of the PyTorch ResidualBlock forward (biases included)."""
    def conv_block(v, w, b, use_act):
        vp = jnp.pad(v, ((0, 0), (1, 1), (1, 1), (0, 0)), mode="reflect")
        y = jax.lax.conv_general_dilated(
            vp, w, window_strides=(1, 1), padding="VALID",
            dimension_numbers=("NHWC", "HWIO", "NHWC"))
        y = y + b  # bias kept here: proves the kernel's bias omission is exact
        mean = jnp.mean(y, axis=(1, 2), keepdims=True)
        var = jnp.mean((y - mean) ** 2, axis=(1, 2), keepdims=True)
        y = (y - mean) * jax.lax.rsqrt(var + 1e-5)
        return jnp.maximum(y, 0.0) if use_act else y

    h = conv_block(x, params["w1"], params["b1"], True)
    return x + conv_block(h, params["w2"], params["b2"], False)


if __name__ == "__main__":
    key = jax.random.PRNGKey(0)
    kx, kp = jax.random.split(key)

    # PyTorch NCHW (2, 4, 16, 16)  ->  NHWC (2, 16, 16, 4) here.
    N, C, H, W = 2, 4, 16, 16
    x = jax.random.normal(kx, (N, H, W, C), jnp.float32)
    params = init_params(kp, C)

    ref = _reference(x, params)

    # f32 matmul path: tight check against the pure-JAX reference.
    out = jax.jit(residual_block)(x, params)
    jax.block_until_ready(out)
    assert out.shape == (N, H, W, C) and out.dtype == x.dtype
    err = float(jnp.max(jnp.abs(out - ref)))
    assert err < 2e-3, f"f32 kernel mismatch vs reference: max abs err = {err}"

    # bf16 matmul path (production MXU configuration; IN/residual stay f32).
    out_bf16 = jax.jit(functools.partial(residual_block,
                                         compute_dtype=jnp.bfloat16))(x, params)
    jax.block_until_ready(out_bf16)
    err_bf16 = float(jnp.max(jnp.abs(out_bf16 - ref)))
    assert err_bf16 < 2e-1, f"bf16 kernel mismatch vs reference: max abs err = {err_bf16}"

    print("KERNEL_OK")
</pallas_src>

<mosaic_0001>
module attributes {stable_mosaic.version = 11 : i64} {
  func.func @_residual_block_kernel(%arg0: i32, %arg1: memref<1x16x16x4xf32, #tpu.memory_space<vmem>>, %arg2: memref<2x36x4xf32, #tpu.memory_space<vmem>>, %arg3: memref<1x16x16x4xf32, #tpu.memory_space<vmem>>, %arg4: memref<18x18x4xf32, #tpu.memory_space<vmem>>, %arg5: memref<256x4xf32, #tpu.memory_space<vmem>>) attributes {dimension_semantics = [#tpu.dimension_semantics<parallel>], iteration_bounds = array<i64: 2>, scalar_prefetch = 0 : i64, scratch_operands = 2 : i64, tpu.core_type = #tpu.core_type<tc>, window_params = [{transform_indices = @transform_0, window_bounds = array<i64: 1, 16, 16, 4>}, {pipeline_mode = #tpu.pipeline_mode<synchronous>, transform_indices = @transform_1, window_bounds = array<i64: 2, 36, 4>}, {transform_indices = @transform_2, window_bounds = array<i64: 1, 16, 16, 4>}]} {
    %c0 = arith.constant 0 : index
    %c0_0 = arith.constant 0 : index
    %c0_1 = arith.constant 0 : index
    %c0_2 = arith.constant 0 : index
    %0 = vector.load %arg1[%c0, %c0_0, %c0_1, %c0_2] : memref<1x16x16x4xf32, #tpu.memory_space<vmem>>, vector<1x16x16x4xf32>
    %1 = vector.shape_cast %0 : vector<1x16x16x4xf32> to vector<16x16x4xf32>
    %c1 = arith.constant 1 : index
    %c1_3 = arith.constant 1 : index
    %c0_4 = arith.constant 0 : index
    %2 = vector.load %arg4[%c1, %c1_3, %c0_4] : memref<18x18x4xf32, #tpu.memory_space<vmem>>, vector<16x16x4xf32>
    tpu.vector_store %arg4[%c1, %c1_3, %c0_4], %1 {strides = array<i32>} : memref<18x18x4xf32, #tpu.memory_space<vmem>>, vector<16x16x4xf32>,
    %c2 = arith.constant 2 : index
    %c1_5 = arith.constant 1 : index
    %c0_6 = arith.constant 0 : index
    %3 = vector.load %arg4[%c2, %c1_5, %c0_6] : memref<18x18x4xf32, #tpu.memory_space<vmem>>, vector<1x16x4xf32>
    %c0_7 = arith.constant 0 : index
    %c1_8 = arith.constant 1 : index
    %c0_9 = arith.constant 0 : index
    %4 = vector.load %arg4[%c0_7, %c1_8, %c0_9] : memref<18x18x4xf32, #tpu.memory_space<vmem>>, vector<1x16x4xf32>
    tpu.vector_store %arg4[%c0_7, %c1_8, %c0_9], %3 {strides = array<i32>} : memref<18x18x4xf32, #tpu.memory_space<vmem>>, vector<1x16x4xf32>,
    %c15 = arith.constant 15 : index
    %c1_10 = arith.constant 1 : index
    %c0_11 = arith.constant 0 : index
    %5 = vector.load %arg4[%c15, %c1_10, %c0_11] : memref<18x18x4xf32, #tpu.memory_space<vmem>>, vector<1x16x4xf32>
    %c17 = arith.constant 17 : index
    %c1_12 = arith.constant 1 : index
    %c0_13 = arith.constant 0 : index
    %6 = vector.load %arg4[%c17, %c1_12, %c0_13] : memref<18x18x4xf32, #tpu.memory_space<vmem>>, vector<1x16x4xf32>
    tpu.vector_store %arg4[%c17, %c1_12, %c0_13], %5 {strides = array<i32>} : memref<18x18x4xf32, #tpu.memory_space<vmem>>, vector<1x16x4xf32>,
    %c0_14 = arith.constant 0 : index
    %c2_15 = arith.constant 2 : index
    %c0_16 = arith.constant 0 : index
    %7 = vector.load %arg4[%c0_14, %c2_15, %c0_16] : memref<18x18x4xf32, #tpu.memory_space<vmem>>, vector<18x1x4xf32>
    %c0_17 = arith.constant 0 : index
    %c0_18 = arith.constant 0 : index
    %c0_19 = arith.constant 0 : index
    %8 = vector.load %arg4[%c0_17, %c0_18, %c0_19] : memref<18x18x4xf32, #tpu.memory_space<vmem>>, vector<18x1x4xf32>
    tpu.vector_store %arg4[%c0_17, %c0_18, %c0_19], %7 {strides = array<i32>} : memref<18x18x4xf32, #tpu.memory_space<vmem>>, vector<18x1x4xf32>,
    %c0_20 = arith.constant 0 : index
    %c15_21 = arith.constant 15 : index
    %c0_22 = arith.constant 0 : index
    %9 = vector.load %arg4[%c0_20, %c15_21, %c0_22] : memref<18x18x4xf32, #tpu.memory_space<vmem>>, vector<18x1x4xf32>
    %c0_23 = arith.constant 0 : index
    %c17_24 = arith.constant 17 : index
    %c0_25 = arith.constant 0 : index
    %10 = vector.load %arg4[%c0_23, %c17_24, %c0_25] : memref<18x18x4xf32, #tpu.memory_space<vmem>>, vector<18x1x4xf32>
    tpu.vector_store %arg4[%c0_23, %c17_24, %c0_25], %9 {strides = array<i32>} : memref<18x18x4xf32, #tpu.memory_space<vmem>>, vector<18x1x4xf32>,
    %c0_26 = arith.constant 0 : index
    %c0_27 = arith.constant 0 : index
    %c0_28 = arith.constant 0 : index
    %11 = vector.load %arg2[%c0_26, %c0_27, %c0_28] : memref<2x36x4xf32, #tpu.memory_space<vmem>>, vector<1x36x4xf32>
    %12 = vector.shape_cast %11 : vector<1x36x4xf32> to vector<36x4xf32>
    %cst = arith.constant 0.000000e+00 : f32
    %13 = vector.broadcast %cst : f32 to vector<1x4xf32>
    %c0_29 = arith.constant 0 : index
    %c0_30 = arith.constant 0 : index
    %c0_31 = arith.constant 0 : index
    %14 = vector.load %arg4[%c0_29, %c0_30, %c0_31] : memref<18x18x4xf32, #tpu.memory_space<vmem>>, vector<16x16x4xf32>
    %15 = vector.shape_cast %14 : vector<16x16x4xf32> to vector<256x4xf32>
    %c0_32 = arith.constant 0 : index
    %c1_33 = arith.constant 1 : index
    %c0_34 = arith.constant 0 : index
    %16 = vector.load %arg4[%c0_32, %c1_33, %c0_34] : memref<18x18x4xf32, #tpu.memory_space<vmem>>, vector<16x16x4xf32>
    %17 = vector.shape_cast %16 : vector<16x16x4xf32> to vector<256x4xf32>
    %c0_35 = arith.constant 0 : index
    %c2_36 = arith.constant 2 : index
    %c0_37 = arith.constant 0 : index
    %18 = vector.load %arg4[%c0_35, %c2_36, %c0_37] : memref<18x18x4xf32, #tpu.memory_space<vmem>>, vector<16x16x4xf32>
    %19 = vector.shape_cast %18 : vector<16x16x4xf32> to vector<256x4xf32>
    %c1_38 = arith.constant 1 : index
    %c0_39 = arith.constant 0 : index
    %c0_40 = arith.constant 0 : index
    %20 = vector.load %arg4[%c1_38, %c0_39, %c0_40] : memref<18x18x4xf32, #tpu.memory_space<vmem>>, vector<16x16x4xf32>
    %21 = vector.shape_cast %20 : vector<16x16x4xf32> to vector<256x4xf32>
    %c1_41 = arith.constant 1 : index
    %c1_42 = arith.constant 1 : index
    %c0_43 = arith.constant 0 : index
    %22 = vector.load %arg4[%c1_41, %c1_42, %c0_43] : memref<18x18x4xf32, #tpu.memory_space<vmem>>, vector<16x16x4xf32>
    %23 = vector.shape_cast %22 : vector<16x16x4xf32> to vector<256x4xf32>
    %c1_44 = arith.constant 1 : index
    %c2_45 = arith.constant 2 : index
    %c0_46 = arith.constant 0 : index
    %24 = vector.load %arg4[%c1_44, %c2_45, %c0_46] : memref<18x18x4xf32, #tpu.memory_space<vmem>>, vector<16x16x4xf32>
    %25 = vector.shape_cast %24 : vector<16x16x4xf32> to vector<256x4xf32>
    %c2_47 = arith.constant 2 : index
    %c0_48 = arith.constant 0 : index
    %c0_49 = arith.constant 0 : index
    %26 = vector.load %arg4[%c2_47, %c0_48, %c0_49] : memref<18x18x4xf32, #tpu.memory_space<vmem>>, vector<16x16x4xf32>
    %27 = vector.shape_cast %26 : vector<16x16x4xf32> to vector<256x4xf32>
    %c2_50 = arith.constant 2 : index
    %c1_51 = arith.constant 1 : index
    %c0_52 = arith.constant 0 : index
    %28 = vector.load %arg4[%c2_50, %c1_51, %c0_52] : memref<18x18x4xf32, #tpu.memory_space<vmem>>, vector<16x16x4xf32>
    %29 = vector.shape_cast %28 : vector<16x16x4xf32> to vector<256x4xf32>
    %c2_53 = arith.constant 2 : index
    %c2_54 = arith.constant 2 : index
    %c0_55 = arith.constant 0 : index
    %30 = vector.load %arg4[%c2_53, %c2_54, %c0_55] : memref<18x18x4xf32, #tpu.memory_space<vmem>>, vector<16x16x4xf32>
    %31 = vector.shape_cast %30 : vector<16x16x4xf32> to vector<256x4xf32>
    %32 = tpu.concatenate %15, %17, %19, %21, %23, %25, %27, %29, %31 in 1 : vector<256x4xf32>, vector<256x4xf32>, vector<256x4xf32>, vector<256x4xf32>, vector<256x4xf32>, vector<256x4xf32>, vector<256x4xf32>, vector<256x4xf32>, vector<256x4xf32> -> vector<256x36xf32>
    %cst_56 = arith.constant dense<0.000000e+00> : vector<256x4xf32>
    %33 = tpu.matmul %32, %12, %cst_56 {dimension_numbers = #tpu.dot_dimension_numbers<[1], [0], [0], [1], [0, 0, 1, 1], [], []>} : vector<256x36xf32>, vector<36x4xf32>, vector<256x4xf32> -> vector<256x4xf32>
    %c0_57 = arith.constant 0 : index
    %c0_58 = arith.constant 0 : index
    %34 = vector.load %arg5[%c0_57, %c0_58] : memref<256x4xf32, #tpu.memory_space<vmem>>, vector<256x4xf32>
    tpu.vector_store %arg5[%c0_57, %c0_58], %33 {strides = array<i32>} : memref<256x4xf32, #tpu.memory_space<vmem>>, vector<256x4xf32>,
    %cst_59 = arith.constant dense<0.000000e+00> : vector<4xf32>
    %35 = vector.multi_reduction <add>, %33, %cst_59 [0] : vector<256x4xf32> to vector<4xf32>
    %36 = vector.shape_cast %35 : vector<4xf32> to vector<1x4xf32>
    %37 = arith.addf %13, %36 : vector<1x4xf32>
    %38 = arith.mulf %33, %33 : vector<256x4xf32>
    %cst_60 = arith.constant dense<0.000000e+00> : vector<4xf32>
    %39 = vector.multi_reduction <add>, %38, %cst_60 [0] : vector<256x4xf32> to vector<4xf32>
    %40 = vector.shape_cast %39 : vector<4xf32> to vector<1x4xf32>
    %41 = arith.addf %13, %40 : vector<1x4xf32>
    %cst_61 = arith.constant 3.906250e-03 : f32
    %42 = vector.broadcast %cst_61 : f32 to vector<1x4xf32>
    %43 = arith.mulf %37, %42 : vector<1x4xf32>
    %cst_62 = arith.constant 3.906250e-03 : f32
    %44 = vector.broadcast %cst_62 : f32 to vector<1x4xf32>
    %45 = arith.mulf %41, %44 : vector<1x4xf32>
    %46 = arith.mulf %43, %43 : vector<1x4xf32>
    %47 = arith.subf %45, %46 : vector<1x4xf32>
    %cst_63 = arith.constant 0.000000e+00 : f32
    %48 = vector.broadcast %cst_63 : f32 to vector<1x4xf32>
    %49 = arith.maximumf %47, %48 : vector<1x4xf32>
    %cst_64 = arith.constant 9.99999974E-6 : f32
    %50 = vector.broadcast %cst_64 : f32 to vector<1x4xf32>
    %51 = arith.addf %49, %50 : vector<1x4xf32>
    %52 = math.rsqrt %51 : vector<1x4xf32>
    %c0_65 = arith.constant 0 : index
    %c0_66 = arith.constant 0 : index
    %53 = vector.load %arg5[%c0_65, %c0_66] : memref<256x4xf32, #tpu.memory_space<vmem>>, vector<256x4xf32>
    %54 = vector.shape_cast %53 : vector<256x4xf32> to vector<16x16x4xf32>
    %55 = vector.shape_cast %43 : vector<1x4xf32> to vector<1x1x4xf32>
    %56 = vector.broadcast %55 : vector<1x1x4xf32> to vector<16x16x4xf32>
    %57 = arith.subf %54, %56 : vector<16x16x4xf32>
    %58 = vector.shape_cast %52 : vector<1x4xf32> to vector<1x1x4xf32>
    %59 = vector.broadcast %58 : vector<1x1x4xf32> to vector<16x16x4xf32>
    %60 = arith.mulf %57, %59 : vector<16x16x4xf32>
    %cst_67 = arith.constant 0.000000e+00 : f32
    %61 = vector.broadcast %cst_67 : f32 to vector<16x16x4xf32>
    %62 = arith.maximumf %60, %61 : vector<16x16x4xf32>
    %c1_68 = arith.constant 1 : index
    %c1_69 = arith.constant 1 : index
    %c0_70 = arith.constant 0 : index
    %63 = vector.load %arg4[%c1_68, %c1_69, %c0_70] : memref<18x18x4xf32, #tpu.memory_space<vmem>>, vector<16x16x4xf32>
    tpu.vector_store %arg4[%c1_68, %c1_69, %c0_70], %62 {strides = array<i32>} : memref<18x18x4xf32, #tpu.memory_space<vmem>>, vector<16x16x4xf32>,
    %c2_71 = arith.constant 2 : index
    %c1_72 = arith.constant 1 : index
    %c0_73 = arith.constant 0 : index
    %64 = vector.load %arg4[%c2_71, %c1_72, %c0_73] : memref<18x18x4xf32, #tpu.memory_space<vmem>>, vector<1x16x4xf32>
    %c0_74 = arith.constant 0 : index
    %c1_75 = arith.constant 1 : index
    %c0_76 = arith.constant 0 : index
    %65 = vector.load %arg4[%c0_74, %c1_75, %c0_76] : memref<18x18x4xf32, #tpu.memory_space<vmem>>, vector<1x16x4xf32>
    tpu.vector_store %arg4[%c0_74, %c1_75, %c0_76], %64 {strides = array<i32>} : memref<18x18x4xf32, #tpu.memory_space<vmem>>, vector<1x16x4xf32>,
    %c15_77 = arith.constant 15 : index
    %c1_78 = arith.constant 1 : index
    %c0_79 = arith.constant 0 : index
    %66 = vector.load %arg4[%c15_77, %c1_78, %c0_79] : memref<18x18x4xf32, #tpu.memory_space<vmem>>, vector<1x16x4xf32>
    %c17_80 = arith.constant 17 : index
    %c1_81 = arith.constant 1 : index
    %c0_82 = arith.constant 0 : index
    %67 = vector.load %arg4[%c17_80, %c1_81, %c0_82] : memref<18x18x4xf32, #tpu.memory_space<vmem>>, vector<1x16x4xf32>
    tpu.vector_store %arg4[%c17_80, %c1_81, %c0_82], %66 {strides = array<i32>} : memref<18x18x4xf32, #tpu.memory_space<vmem>>, vector<1x16x4xf32>,
    %c0_83 = arith.constant 0 : index
    %c2_84 = arith.constant 2 : index
    %c0_85 = arith.constant 0 : index
    %68 = vector.load %arg4[%c0_83, %c2_84, %c0_85] : memref<18x18x4xf32, #tpu.memory_space<vmem>>, vector<18x1x4xf32>
    %c0_86 = arith.constant 0 : index
    %c0_87 = arith.constant 0 : index
    %c0_88 = arith.constant 0 : index
    %69 = vector.load %arg4[%c0_86, %c0_87, %c0_88] : memref<18x18x4xf32, #tpu.memory_space<vmem>>, vector<18x1x4xf32>
    tpu.vector_store %arg4[%c0_86, %c0_87, %c0_88], %68 {strides = array<i32>} : memref<18x18x4xf32, #tpu.memory_space<vmem>>, vector<18x1x4xf32>,
    %c0_89 = arith.constant 0 : index
    %c15_90 = arith.constant 15 : index
    %c0_91 = arith.constant 0 : index
    %70 = vector.load %arg4[%c0_89, %c15_90, %c0_91] : memref<18x18x4xf32, #tpu.memory_space<vmem>>, vector<18x1x4xf32>
    %c0_92 = arith.constant 0 : index
    %c17_93 = arith.constant 17 : index
    %c0_94 = arith.constant 0 : index
    %71 = vector.load %arg4[%c0_92, %c17_93, %c0_94] : memref<18x18x4xf32, #tpu.memory_space<vmem>>, vector<18x1x4xf32>
    tpu.vector_store %arg4[%c0_92, %c17_93, %c0_94], %70 {strides = array<i32>} : memref<18x18x4xf32, #tpu.memory_space<vmem>>, vector<18x1x4xf32>,
    %c1_95 = arith.constant 1 : index
    %c0_96 = arith.constant 0 : index
    %c0_97 = arith.constant 0 : index
    %72 = vector.load %arg2[%c1_95, %c0_96, %c0_97] : memref<2x36x4xf32, #tpu.memory_space<vmem>>, vector<1x36x4xf32>
    %73 = vector.shape_cast %72 : vector<1x36x4xf32> to vector<36x4xf32>
    %cst_98 = arith.constant 0.000000e+00 : f32
    %74 = vector.broadcast %cst_98 : f32 to vector<1x4xf32>
    %c0_99 = arith.constant 0 : index
    %c0_100 = arith.constant 0 : index
    %c0_101 = arith.constant 0 : index
    %75 = vector.load %arg4[%c0_99, %c0_100, %c0_101] : memref<18x18x4xf32, #tpu.memory_space<vmem>>, vector<16x16x4xf32>
    %76 = vector.shape_cast %75 : vector<16x16x4xf32> to vector<256x4xf32>
    %c0_102 = arith.constant 0 : index
    %c1_103 = arith.constant 1 : index
    %c0_104 = arith.constant 0 : index
    %77 = vector.load %arg4[%c0_102, %c1_103, %c0_104] : memref<18x18x4xf32, #tpu.memory_space<vmem>>, vector<16x16x4xf32>
    %78 = vector.shape_cast %77 : vector<16x16x4xf32> to vector<256x4xf32>
    %c0_105 = arith.constant 0 : index
    %c2_106 = arith.constant 2 : index
    %c0_107 = arith.constant 0 : index
    %79 = vector.load %arg4[%c0_105, %c2_106, %c0_107] : memref<18x18x4xf32, #tpu.memory_space<vmem>>, vector<16x16x4xf32>
    %80 = vector.shape_cast %79 : vector<16x16x4xf32> to vector<256x4xf32>
    %c1_108 = arith.constant 1 : index
    %c0_109 = arith.constant 0 : index
    %c0_110 = arith.constant 0 : index
    %81 = vector.load %arg4[%c1_108, %c0_109, %c0_110] : memref<18x18x4xf32, #tpu.memory_space<vmem>>, vector<16x16x4xf32>
    %82 = vector.shape_cast %81 : vector<16x16x4xf32> to vector<256x4xf32>
    %c1_111 = arith.constant 1 : index
    %c1_112 = arith.constant 1 : index
    %c0_113 = arith.constant 0 : index
    %83 = vector.load %arg4[%c1_111, %c1_112, %c0_113] : memref<18x18x4xf32, #tpu.memory_space<vmem>>, vector<16x16x4xf32>
    %84 = vector.shape_cast %83 : vector<16x16x4xf32> to vector<256x4xf32>
    %c1_114 = arith.constant 1 : index
    %c2_115 = arith.constant 2 : index
    %c0_116 = arith.constant 0 : index
    %85 = vector.load %arg4[%c1_114, %c2_115, %c0_116] : memref<18x18x4xf32, #tpu.memory_space<vmem>>, vector<16x16x4xf32>
    %86 = vector.shape_cast %85 : vector<16x16x4xf32> to vector<256x4xf32>
    %c2_117 = arith.constant 2 : index
    %c0_118 = arith.constant 0 : index
    %c0_119 = arith.constant 0 : index
    %87 = vector.load %arg4[%c2_117, %c0_118, %c0_119] : memref<18x18x4xf32, #tpu.memory_space<vmem>>, vector<16x16x4xf32>
    %88 = vector.shape_cast %87 : vector<16x16x4xf32> to vector<256x4xf32>
    %c2_120 = arith.constant 2 : index
    %c1_121 = arith.constant 1 : index
    %c0_122 = arith.constant 0 : index
    %89 = vector.load %arg4[%c2_120, %c1_121, %c0_122] : memref<18x18x4xf32, #tpu.memory_space<vmem>>, vector<16x16x4xf32>
    %90 = vector.shape_cast %89 : vector<16x16x4xf32> to vector<256x4xf32>
    %c2_123 = arith.constant 2 : index
    %c2_124 = arith.constant 2 : index
    %c0_125 = arith.constant 0 : index
    %91 = vector.load %arg4[%c2_123, %c2_124, %c0_125] : memref<18x18x4xf32, #tpu.memory_space<vmem>>, vector<16x16x4xf32>
    %92 = vector.shape_cast %91 : vector<16x16x4xf32> to vector<256x4xf32>
    %93 = tpu.concatenate %76, %78, %80, %82, %84, %86, %88, %90, %92 in 1 : vector<256x4xf32>, vector<256x4xf32>, vector<256x4xf32>, vector<256x4xf32>, vector<256x4xf32>, vector<256x4xf32>, vector<256x4xf32>, vector<256x4xf32>, vector<256x4xf32> -> vector<256x36xf32>
    %cst_126 = arith.constant dense<0.000000e+00> : vector<256x4xf32>
    %94 = tpu.matmul %93, %73, %cst_126 {dimension_numbers = #tpu.dot_dimension_numbers<[1], [0], [0], [1], [0, 0, 1, 1], [], []>} : vector<256x36xf32>, vector<36x4xf32>, vector<256x4xf32> -> vector<256x4xf32>
    %c0_127 = arith.constant 0 : index
    %c0_128 = arith.constant 0 : index
    %95 = vector.load %arg5[%c0_127, %c0_128] : memref<256x4xf32, #tpu.memory_space<vmem>>, vector<256x4xf32>
    tpu.vector_store %arg5[%c0_127, %c0_128], %94 {strides = array<i32>} : memref<256x4xf32, #tpu.memory_space<vmem>>, vector<256x4xf32>,
    %cst_129 = arith.constant dense<0.000000e+00> : vector<4xf32>
    %96 = vector.multi_reduction <add>, %94, %cst_129 [0] : vector<256x4xf32> to vector<4xf32>
    %97 = vector.shape_cast %96 : vector<4xf32> to vector<1x4xf32>
    %98 = arith.addf %74, %97 : vector<1x4xf32>
    %99 = arith.mulf %94, %94 : vector<256x4xf32>
    %cst_130 = arith.constant dense<0.000000e+00> : vector<4xf32>
    %100 = vector.multi_reduction <add>, %99, %cst_130 [0] : vector<256x4xf32> to vector<4xf32>
    %101 = vector.shape_cast %100 : vector<4xf32> to vector<1x4xf32>
    %102 = arith.addf %74, %101 : vector<1x4xf32>
    %cst_131 = arith.constant 3.906250e-03 : f32
    %103 = vector.broadcast %cst_131 : f32 to vector<1x4xf32>
    %104 = arith.mulf %98, %103 : vector<1x4xf32>
    %cst_132 = arith.constant 3.906250e-03 : f32
    %105 = vector.broadcast %cst_132 : f32 to vector<1x4xf32>
    %106 = arith.mulf %102, %105 : vector<1x4xf32>
    %107 = arith.mulf %104, %104 : vector<1x4xf32>
    %108 = arith.subf %106, %107 : vector<1x4xf32>
    %cst_133 = arith.constant 0.000000e+00 : f32
    %109 = vector.broadcast %cst_133 : f32 to vector<1x4xf32>
    %110 = arith.maximumf %108, %109 : vector<1x4xf32>
    %cst_134 = arith.constant 9.99999974E-6 : f32
    %111 = vector.broadcast %cst_134 : f32 to vector<1x4xf32>
    %112 = arith.addf %110, %111 : vector<1x4xf32>
    %113 = math.rsqrt %112 : vector<1x4xf32>
    %c0_135 = arith.constant 0 : index
    %c0_136 = arith.constant 0 : index
    %114 = vector.load %arg5[%c0_135, %c0_136] : memref<256x4xf32, #tpu.memory_space<vmem>>, vector<256x4xf32>
    %115 = vector.shape_cast %114 : vector<256x4xf32> to vector<16x16x4xf32>
    %116 = vector.shape_cast %104 : vector<1x4xf32> to vector<1x1x4xf32>
    %117 = vector.broadcast %116 : vector<1x1x4xf32> to vector<16x16x4xf32>
    %118 = arith.subf %115, %117 : vector<16x16x4xf32>
    %119 = vector.shape_cast %113 : vector<1x4xf32> to vector<1x1x4xf32>
    %120 = vector.broadcast %119 : vector<1x1x4xf32> to vector<16x16x4xf32>
    %121 = arith.mulf %118, %120 : vector<16x16x4xf32>
    %c0_137 = arith.constant 0 : index
    %c0_138 = arith.constant 0 : index
    %c0_139 = arith.constant 0 : index
    %c0_140 = arith.constant 0 : index
    %122 = vector.load %arg1[%c0_137, %c0_138, %c0_139, %c0_140] : memref<1x16x16x4xf32, #tpu.memory_space<vmem>>, vector<1x16x16x4xf32>
    %123 = vector.shape_cast %122 : vector<1x16x16x4xf32> to vector<16x16x4xf32>
    %124 = arith.addf %121, %123 : vector<16x16x4xf32>
    %c0_141 = arith.constant 0 : index
    %c0_142 = arith.constant 0 : index
    %c0_143 = arith.constant 0 : index
    %c0_144 = arith.constant 0 : index
    %125 = vector.load %arg3[%c0_141, %c0_142, %c0_143, %c0_144] : memref<1x16x16x4xf32, #tpu.memory_space<vmem>>, vector<1x16x16x4xf32>
    %126 = vector.shape_cast %125 : vector<1x16x16x4xf32> to vector<16x16x4xf32>
    %127 = vector.shape_cast %124 : vector<16x16x4xf32> to vector<1x16x16x4xf32>
    tpu.vector_store %arg3[%c0_141, %c0_142, %c0_143, %c0_144], %127 {strides = array<i32>} : memref<1x16x16x4xf32, #tpu.memory_space<vmem>>, vector<1x16x16x4xf32>,
    return
  }
  func.func @transform_0(%arg0: i32) -> (i32, i32, i32, i32) {
    %c0_i32 = arith.constant 0 : i32
    %c0_i32_0 = arith.constant 0 : i32
    %c0_i32_1 = arith.constant 0 : i32
    %c0_i32_2 = arith.constant 0 : i32
    return %arg0, %c0_i32, %c0_i32_0, %c0_i32_1 : i32, i32, i32, i32
  }
  func.func @transform_1(%arg0: i32) -> (i32, i32, i32) {
    %c0_i32 = arith.constant 0 : i32
    %c0_i32_0 = arith.constant 0 : i32
    %c0_i32_1 = arith.constant 0 : i32
    %c0_i32_2 = arith.constant 0 : i32
    return %c0_i32, %c0_i32_0, %c0_i32_1 : i32, i32, i32
  }
  func.func @transform_2(%arg0: i32) -> (i32, i32, i32, i32) {
    %c0_i32 = arith.constant 0 : i32
    %c0_i32_0 = arith.constant 0 : i32
    %c0_i32_1 = arith.constant 0 : i32
    %c0_i32_2 = arith.constant 0 : i32
    return %arg0, %c0_i32, %c0_i32_0, %c0_i32_1 : i32, i32, i32, i32
  }
}

</mosaic_0001>

<bundles_post_ra>
// kernel: residual_block.1
= control target key start
LH: loop header
LB: loop body
LE: loop exit
PB: predicated region body
PF: predicated region fallthrough
CT: control target
= control target key end

     0   :  { %s4992_s9 = smov 0   ;;  %s8829_s0 = inlined_call_operand.vmem [shape: f32[2,16,16,4], index: 0, kind: input, shape index: {}]   ;;  %s8830_s1 = inlined_call_operand.vmem [shape: f32[2,36,4], index: 1, kind: input, shape index: {}]   ;;  %s8831_s2 = inlined_call_operand.vmem [shape: f32[2,16,16,4], index: 2, kind: output, shape index: {}]  }
   0x1 LB: > { %s4801_s10 = sadd.s32 4294967295, %s4967_s9   ;;  %p4805_p0 = scmp.ge.s32.totalorder %s4967_s9, 1  ;;  %s4967_s9 = sphi %s4992_s9, %s12_s9  }
   0x2   : > { %p112_p1 = scmp.lt.s32.totalorder %s4967_s9, 3 }
   0x4   : > { %p113_p2 = pnand %p4805_p0, %p112_p1 }
   0x6   : > { %116 = sbr.rel (%p113_p2) target bundleno = 2117 (0x845), region = 28 }
   0xb   : > { %p134_p3 = scmp.lt.s32.totalorder %s4801_s10, 1  ;;  %vm177_vm0 = vcmask 31744   ;;  %s4969_s15 = smov 4   ;;  %vm239_vm1 = vcmask 24576   ;;  %vm1971_vm2 = vcmask 1043456   ;;  %vm1643_vm3 = vcmask 64512  }
   0xc   : > { %s4970_s16 = smov 8   ;;  %s4971_s17 = smov 12   ;;  %vm1676_vm4 = vcmask 97280   ;;  %vm1742_vm5 = vcmask 162816   ;;  %vm1709_vm6 = vcmask 130048   ;;  %vm1775_vm7 = vcmask 195584  }
   0xd   : > { %s9437_s10 = smov (!%p134_p3, %s4801_s10), 1  ;;  %s4972_s18 = smov 16   ;;  %vm1841_vm8 = vcmask 261120   ;;  %vm1808_vm9 = vcmask 228352   ;;  %vm1874_vm10 = vcmask 293888  }
   0xe   : > { %s4883_s11 = sshll.u32 %s9437_s10, 8  ;;  %s4973_s19 = smov 20  }
   0xf   : > { %s5008_s14 = scalar_lea.vmem %s8829_s0, %s4883_s11  ;;  %s4974_s20 = smov 24  }
  0x10   : > { %v148_v0 = vld [vmem:[%s5008_s14 + $0x20] sm:$0xff]  ;;  %v146_v1 = vld [vmem:[%s5008_s14 + $0x10] sm:$0xff]  ;;  %v147_v3 = vld [vmem:[%s5008_s14 + $0x18] sm:$0xff]  ;;  %s4975_s21 = smov 28   ;;  %s4976_s22 = smov 32  }
  0x11   : > { %v144_v2 = vld [vmem:[%s5008_s14] sm:$0xff]  ;;  %182 = vst.msk [vmem:[#allocation2 + $0x49] sm:$0xff] %vm177_vm0, %v148_v0  ;;  %v145_v4 = vld [vmem:[%s5008_s14 + $0x8] sm:$0xff]  ;;  %v150_v5 = vld [vmem:[%s5008_s14 + $0x30] sm:$0xff] }
  0x12   : > { %180 = vst.msk [vmem:[#allocation2 + $0x31] sm:$0xff] %vm177_vm0, %v146_v1  ;;  %v149_v6 = vld [vmem:[%s5008_s14 + $0x28] sm:$0xff]  ;;  %v151_v8 = vld [vmem:[%s5008_s14 + $0x38] sm:$0xff]  ;;  %v152_v10 = vld [vmem:[%s5008_s14 + $0x40] sm:$0xff] }
  0x13   : > { %178 = vst.msk [vmem:[#allocation2 + $0x19] sm:$0xff] %vm177_vm0, %v144_v2  ;;  %v153_v7 = vld [vmem:[%s5008_s14 + $0x48] sm:$0xff]  ;;  %v156_v13 = vld [vmem:[%s5008_s14 + $0x60] sm:$0xff]  ;;  %v154_v15 = vld [vmem:[%s5008_s14 + $0x50] sm:$0xff] }
  0x14   : > { %181 = vst.msk [vmem:[#allocation2 + $0x39] sm:$0xff] %vm177_vm0, %v147_v3  ;;  %v155_v16 = vld [vmem:[%s5008_s14 + $0x58] sm:$0xff]  ;;  %v157_v18 = vld [vmem:[%s5008_s14 + $0x68] sm:$0xff]  ;;  %v158_v19 = vld [vmem:[%s5008_s14 + $0x70] sm:$0xff] }
  0x15   : > { %179 = vst.msk [vmem:[#allocation2 + $0x21] sm:$0xff] %vm177_vm0, %v145_v4  ;;  %v159_v17 = vld [vmem:[%s5008_s14 + $0x78] sm:$0xff]  ;;  %v162_v22 = vld [vmem:[%s5008_s14 + $0x90] sm:$0xff]  ;;  %v160_v23 = vld [vmem:[%s5008_s14 + $0x80] sm:$0xff] }
  0x16   : > { %184 = vst.msk [vmem:[#allocation2 + $0x61] sm:$0xff] %vm177_vm0, %v150_v5  ;;  %v161_v24 = vld [vmem:[%s5008_s14 + $0x88] sm:$0xff]  ;;  %v163_v29 = vld [vmem:[%s5008_s14 + $0x98] sm:$0xff]  ;;  %v164_v30 = vld [vmem:[%s5008_s14 + $0xa0] sm:$0xff] }
  0x17   : > { %183 = vst.msk [vmem:[#allocation2 + $0x51] sm:$0xff] %vm177_vm0, %v149_v6  ;;  %v165_v28 = vld [vmem:[%s5008_s14 + $0xa8] sm:$0xff]  ;;  %v168_v34 = vld [vmem:[%s5008_s14 + $0xc0] sm:$0xff]  ;;  %v166_v35 = vld [vmem:[%s5008_s14 + $0xb0] sm:$0xff] }
  0x18   : > { %v5026_v9 = vld [vmem:[#allocation2 + $0x49] sm:$0xff]  ;;  %187 = vst.msk [vmem:[#allocation2 + $0x81] sm:$0xff] %vm177_vm0, %v153_v7  ;;  %v167_v36 = vld [vmem:[%s5008_s14 + $0xb8] sm:$0xff]  ;;  %v172_v46 = vld [vmem:[%s5008_s14 + $0xe0] sm:$0xff] }
  0x19   : > { %631 = vrot.lane.b32.xlu0 %v5026_v9, %s4969_s15  ;;  %v5032_v11 = vld [vmem:[#allocation2 + $0x31] sm:$0xff]  ;;  %185 = vst.msk [vmem:[#allocation2 + $0x69] sm:$0xff] %vm177_vm0, %v151_v8  ;;  %v169_v41 = vld [vmem:[%s5008_s14 + $0xc8] sm:$0xff] }
  0x1a   : > { %627 = vrot.lane.b32.xlu2 %v5032_v11, %s4969_s15  ;;  %v5037_v12 = vld [vmem:[#allocation2 + $0x19] sm:$0xff]  ;;  %213 = vst.msk [vmem:[#allocation2 + $0x1] sm:$0xff] %vm177_vm0, %v5032_v11  ;;  %v170_v42 = vld [vmem:[%s5008_s14 + $0xd0] sm:$0xff]  ;;  %v173_v47 = vld [vmem:[%s5008_s14 + $0xe8] sm:$0xff] }
  0x1b   : > { %623 = vrot.lane.b32.xlu1 %v5037_v12, %s4969_s15  ;;  %v5044_v14 = vld [vmem:[#allocation2 + $0x39] sm:$0xff]  ;;  %186 = vst.msk [vmem:[#allocation2 + $0x79] sm:$0xff] %vm177_vm0, %v152_v10  ;;  %v223_v57 = vld [vmem:[#allocation2 + $0x32] sm:$0x1]  ;;  %v224_v4 = vld [vmem:[#allocation2 + $0x4a] sm:$0x1] }
  0x1c   : > { %214 = vst.msk [vmem:[#allocation2 + $0x9] sm:$0xff] %vm177_vm0, %v5044_v14  ;;  %v5057_v20 = vld [vmem:[#allocation2 + $0x21] sm:$0xff]  ;;  %v171_v40 = vld [vmem:[%s5008_s14 + $0xd8] sm:$0xff] }
  0x1d   : > { %190 = vst.msk [vmem:[#allocation2 + $0xa9] sm:$0xff] %vm177_vm0, %v156_v13  ;;  %v5073_v25 = vld [vmem:[#allocation2 + $0x61] sm:$0xff]  ;;  %v260_v56 = vld [vmem:[#allocation2 + $0x3f] sm:$0x1]  ;;  %v222_v13 = vld [vmem:[#allocation2 + $0x1a] sm:$0x1] }
  0x1e   : > { %188 = vst.msk [vmem:[#allocation2 + $0x91] sm:$0xff] %vm177_vm0, %v154_v15  ;;  %v5075_v27 = vld [vmem:[#allocation2 + $0x51] sm:$0xff]  ;;  %v259_v52 = vld [vmem:[#allocation2 + $0x27] sm:$0x1]  ;;  %v225_v3 = vld [vmem:[#allocation2 + $0x62] sm:$0x1] }
  0x1f   : > { %189 = vst.msk [vmem:[#allocation2 + $0x99] sm:$0xff] %vm177_vm0, %v155_v16  ;;  %v5088_v31 = vld [vmem:[#allocation2 + $0x81] sm:$0xff]  ;;  %v261_v61 = vld [vmem:[#allocation2 + $0x57] sm:$0x1] }
  0x20   : > { %193 = vst.msk [vmem:[#allocation2 + $0xc9] sm:$0xff] %vm177_vm0, %v159_v17  ;;  %v5090_v32 = vld [vmem:[#allocation2 + $0x69] sm:$0xff]  ;;  %v263_v2 = vld [vmem:[#allocation2 + $0x87] sm:$0x1] }
  0x21   : > { %v331_v21 = vld [vmem:[#allocation2 + $0x1] sm:$0xff]  ;;  %191 = vst.msk [vmem:[#allocation2 + $0xb1] sm:$0xff] %vm177_vm0, %v157_v18  ;;  %v262_v62 = vld [vmem:[#allocation2 + $0x6f] sm:$0x1] }
  0x22   : > { %629 = vrot.lane.b32.xlu2 %v5044_v14, %s4969_s15  ;;  %619 = vrot.lane.b32.xlu0 %v331_v21, %s4969_s15  ;;  %192 = vst.msk [vmem:[#allocation2 + $0xc1] sm:$0xff] %vm177_vm0, %v158_v19  ;;  %v5092_v33 = vld [vmem:[#allocation2 + $0x79] sm:$0xff]  ;;  %v221_v15 = vld [vmem:[#allocation2 + $0x2] sm:$0x1] }
  0x23   : > { %625 = vrot.lane.b32.xlu1 %v5057_v20, %s4969_s15  ;;  %196 = vst.msk [vmem:[#allocation2 + $0xf1] sm:$0xff] %vm177_vm0, %v162_v22  ;;  %v332_v26 = vld [vmem:[#allocation2 + $0x9] sm:$0xff]  ;;  %v5212_v18 = vld [vmem:[#allocation2 + $0x1a] sm:$0xff] }
  0x24   : > { %194 = vst.msk [vmem:[#allocation2 + $0xd9] sm:$0xff] %vm177_vm0, %v160_v23  ;;  %v5106_v37 = vld [vmem:[#allocation2 + $0xa9] sm:$0xff]  ;;  %v5223_v23 = vld [vmem:[#allocation2 + $0x32] sm:$0xff] }
  0x25   : > { %195 = vst.msk [vmem:[#allocation2 + $0xe1] sm:$0xff] %vm177_vm0, %v161_v24  ;;  %v5108_v38 = vld [vmem:[#allocation2 + $0x91] sm:$0xff]  ;;  %v258_v51 = vld [vmem:[#allocation2 + $0xf] sm:$0x1]  ;;  %v363_v5 = vld [vmem:[#allocation2 + $0x2] sm:$0xff] }
  0x26   : > { %199 = vst.msk [vmem:[#allocation2 + $0x111] sm:$0xff] %vm177_vm0, %v165_v28  ;;  %v5110_v39 = vld [vmem:[#allocation2 + $0x99] sm:$0xff]  ;;  %v228_v21 = vld [vmem:[#allocation2 + $0xaa] sm:$0x1] }
  0x27   : > { %197 = vst.msk [vmem:[#allocation2 + $0xf9] sm:$0xff] %vm177_vm0, %v163_v29  ;;  %v5124_v43 = vld [vmem:[#allocation2 + $0xc9] sm:$0xff]  ;;  %v264_v8 = vld [vmem:[#allocation2 + $0x9f] sm:$0x1] }
  0x28   : > { %198 = vst.msk [vmem:[#allocation2 + $0x109] sm:$0xff] %vm177_vm0, %v164_v30  ;;  %v5126_v44 = vld [vmem:[#allocation2 + $0xb1] sm:$0xff]  ;;  %v266_v19 = vld [vmem:[#allocation2 + $0xcf] sm:$0x1] }
  0x29   : > { %202 = vst.msk [vmem:[#allocation2 + $0x139] sm:$0xff] %vm177_vm0, %v168_v34  ;;  %v5128_v45 = vld [vmem:[#allocation2 + $0xc1] sm:$0xff]  ;;  %v265_v10 = vld [vmem:[#allocation2 + $0xb7] sm:$0x1]  ;;  %v5225_v24 = vld [vmem:[#allocation2 + $0x4a] sm:$0xff] }
  0x2a   : > { %635 = vrot.lane.b32.xlu2 %v5073_v25, %s4969_s15  ;;  %621 = vrot.lane.b32.xlu0 %v332_v26, %s4969_s15  ;;  %200 = vst.msk [vmem:[#allocation2 + $0x121] sm:$0xff] %vm177_vm0, %v166_v35  ;;  %v5140_v48 = vld [vmem:[#allocation2 + $0xf1] sm:$0xff] }
  0x2b   : > { %633 = vrot.lane.b32.xlu1 %v5075_v27, %s4969_s15  ;;  %201 = vst.msk [vmem:[#allocation2 + $0x129] sm:$0xff] %vm177_vm0, %v167_v36  ;;  %v5142_v49 = vld [vmem:[#allocation2 + $0xd9] sm:$0xff]  ;;  %v5243_v36 = vld [vmem:[#allocation2 + $0x62] sm:$0xff] }
  0x2c   : > { %205 = vst.msk [vmem:[#allocation2 + $0x159] sm:$0xff] %vm177_vm0, %v171_v40  ;;  %v5144_v50 = vld [vmem:[#allocation2 + $0xe1] sm:$0xff] }
  0x2d   : > { %203 = vst.msk [vmem:[#allocation2 + $0x141] sm:$0xff] %vm177_vm0, %v169_v41  ;;  %v5154_v53 = vld [vmem:[#allocation2 + $0x111] sm:$0xff]  ;;  %v267_v28 = vld [vmem:[#allocation2 + $0xe7] sm:$0x1] }
  0x2e   : > { %204 = vst.msk [vmem:[#allocation2 + $0x151] sm:$0xff] %vm177_vm0, %v170_v42  ;;  %v5156_v54 = vld [vmem:[#allocation2 + $0xf9] sm:$0xff]  ;;  %v269_v40 = vld [vmem:[#allocation2 + $0x117] sm:$0x1]  ;;  %v231_v41 = vld [vmem:[#allocation2 + $0xf2] sm:$0x1] }
  0x2f   : > { %206 = vst.msk [vmem:[#allocation2 + $0x169] sm:$0xff] %vm177_vm0, %v172_v46  ;;  %v5158_v55 = vld [vmem:[#allocation2 + $0x109] sm:$0xff]  ;;  %v268_v29 = vld [vmem:[#allocation2 + $0xff] sm:$0x1]  ;;  %v226_v46 = vld [vmem:[#allocation2 + $0x7a] sm:$0x1] }
  0x30   : > { %207 = vst.msk [vmem:[#allocation2 + $0x171] sm:$0xff] %vm177_vm0, %v173_v47  ;;  %v5168_v58 = vld [vmem:[#allocation2 + $0x139] sm:$0xff]  ;;  %v227_v47 = vld [vmem:[#allocation2 + $0x92] sm:$0x1] }
  0x31   : > { %276 = vst.msk [vmem:[#allocation2 + $0x11] sm:$0x1] %vm239_vm1, %v258_v51  ;;  %v5170_v59 = vld [vmem:[#allocation2 + $0x121] sm:$0xff] }
  0x32   : > { %641 = vrot.lane.b32.xlu2 %v5088_v31, %s4969_s15  ;;  %637 = vrot.lane.b32.xlu0 %v5090_v32, %s4969_s15  ;;  %277 = vst.msk [vmem:[#allocation2 + $0x29] sm:$0x1] %vm239_vm1, %v259_v52  ;;  %v5172_v60 = vld [vmem:[#allocation2 + $0x129] sm:$0xff]  ;;  %v5256_v51 = vld [vmem:[#allocation2 + $0x7a] sm:$0xff]  ;;  %v5258_v52 = vld [vmem:[#allocation2 + $0x92] sm:$0xff] }
  0x33   : > { %639 = vrot.lane.b32.xlu1 %v5092_v33, %s4969_s15  ;;  %278 = vst.msk [vmem:[#allocation2 + $0x41] sm:$0x1] %vm239_vm1, %v260_v56  ;;  %v5182_v63 = vld [vmem:[#allocation2 + $0x159] sm:$0xff] }
  0x34   : > { %242 = vst.msk [vmem:[#allocation2 + $0x30] sm:$0x1] %vm239_vm1, %v223_v57  ;;  %v5184_v0 = vld [vmem:[#allocation2 + $0x141] sm:$0xff]  ;;  %v270_v57 = vld [vmem:[#allocation2 + $0x12f] sm:$0x1] }
  0x35   : > { %279 = vst.msk [vmem:[#allocation2 + $0x59] sm:$0x1] %vm239_vm1, %v261_v61  ;;  %v5186_v1 = vld [vmem:[#allocation2 + $0x151] sm:$0xff] }
  0x36   : > { %280 = vst.msk [vmem:[#allocation2 + $0x71] sm:$0x1] %vm239_vm1, %v262_v62  ;;  %v5197_v6 = vld [vmem:[#allocation2 + $0x169] sm:$0xff]  ;;  %v271_v62 = vld [vmem:[#allocation2 + $0x147] sm:$0x1] }
  0x37   : > { %281 = vst.msk [vmem:[#allocation2 + $0x89] sm:$0x1] %vm239_vm1, %v263_v2  ;;  %v5199_v7 = vld [vmem:[#allocation2 + $0x171] sm:$0xff] }
  0x38   : > { %244 = vst.msk [vmem:[#allocation2 + $0x60] sm:$0x1] %vm239_vm1, %v225_v3  ;;  %v364_v16 = vld [vmem:[#allocation2 + $0xa] sm:$0xff] }
  0x39   : > { %243 = vst.msk [vmem:[#allocation2 + $0x48] sm:$0x1] %vm239_vm1, %v224_v4  ;;  %v5209_v17 = vld [vmem:[#allocation2 + $0x22] sm:$0xff] }
  0x3a   : > { %647 = vrot.lane.b32.xlu2 %v5106_v37, %s4969_s15  ;;  %643 = vrot.lane.b32.xlu0 %v5108_v38, %s4969_s15  ;;  %282 = vst.msk [vmem:[#allocation2 + $0xa1] sm:$0x1] %vm239_vm1, %v264_v8  ;;  %v5227_v26 = vld [vmem:[#allocation2 + $0x3a] sm:$0xff]  ;;  %v5281_v8 = vld [vmem:[#allocation2 + $0xaa] sm:$0xff] }
  0x3b   : > { %645 = vrot.lane.b32.xlu1 %v5110_v39, %s4969_s15  ;;  %283 = vst.msk [vmem:[#allocation2 + $0xb9] sm:$0x1] %vm239_vm1, %v265_v10  ;;  %v272_v10 = vld [vmem:[#allocation2 + $0x15f] sm:$0x1] }
  0x3c   : > { %241 = vst.msk [vmem:[#allocation2 + $0x18] sm:$0x1] %vm239_vm1, %v222_v13  ;;  %v5239_v34 = vld [vmem:[#allocation2 + $0x52] sm:$0xff]  ;;  %v234_v13 = vld [vmem:[#allocation2 + $0x13a] sm:$0x1] }
  0x3d   : > { %240 = vst.msk [vmem:[#allocation2] sm:$0x1] %vm239_vm1, %v221_v15  ;;  %v5241_v35 = vld [vmem:[#allocation2 + $0x6a] sm:$0xff] }
  0x3e   : > { %284 = vst.msk [vmem:[#allocation2 + $0xd1] sm:$0x1] %vm239_vm1, %v266_v19  ;;  %v5261_v56 = vld [vmem:[#allocation2 + $0x82] sm:$0xff] }
  0x3f   : > { %247 = vst.msk [vmem:[#allocation2 + $0xa8] sm:$0x1] %vm239_vm1, %v228_v21  ;;  %v229_v21 = vld [vmem:[#allocation2 + $0xc2] sm:$0x1] }
  0x40   : > { %285 = vst.msk [vmem:[#allocation2 + $0xe9] sm:$0x1] %vm239_vm1, %v267_v28  ;;  %v230_v28 = vld [vmem:[#allocation2 + $0xda] sm:$0x1] }
  0x41   : > { %286 = vst.msk [vmem:[#allocation2 + $0x101] sm:$0x1] %vm239_vm1, %v268_v29  ;;  %v5277_v4 = vld [vmem:[#allocation2 + $0x9a] sm:$0xff]  ;;  %v5298_v29 = vld [vmem:[#allocation2 + $0xc2] sm:$0xff] }
  0x42   : > { %653 = vrot.lane.b32.xlu2 %v5124_v43, %s4969_s15  ;;  %649 = vrot.lane.b32.xlu0 %v5126_v44, %s4969_s15  ;;  %287 = vst.msk [vmem:[#allocation2 + $0x119] sm:$0x1] %vm239_vm1, %v269_v40  ;;  %v5300_v40 = vld [vmem:[#allocation2 + $0xda] sm:$0xff] }
  0x43   : > { %651 = vrot.lane.b32.xlu1 %v5128_v45, %s4969_s15  ;;  %250 = vst.msk [vmem:[#allocation2 + $0xf0] sm:$0x1] %vm239_vm1, %v231_v41 }
  0x44   : > { %245 = vst.msk [vmem:[#allocation2 + $0x78] sm:$0x1] %vm239_vm1, %v226_v46  ;;  %v273_v46 = vld [vmem:[#allocation2 + $0x177] sm:$0x1] }
  0x45   : > { %246 = vst.msk [vmem:[#allocation2 + $0x90] sm:$0x1] %vm239_vm1, %v227_v47  ;;  %v5303_v41 = vld [vmem:[#allocation2 + $0xca] sm:$0xff] }
  0x46   : > { %288 = vst.msk [vmem:[#allocation2 + $0x131] sm:$0x1] %vm239_vm1, %v270_v57 }
  0x47   : > { %289 = vst.msk [vmem:[#allocation2 + $0x149] sm:$0x1] %vm239_vm1, %v271_v62 }
  0x48   : > { %290 = vst.msk [vmem:[#allocation2 + $0x161] sm:$0x1] %vm239_vm1, %v272_v10  ;;  %v5318_v10 = vld [vmem:[#allocation2 + $0xe2] sm:$0xff] }
  0x49   : > { %253 = vst.msk [vmem:[#allocation2 + $0x138] sm:$0x1] %vm239_vm1, %v234_v13  ;;  %v5320_v13 = vld [vmem:[#allocation2 + $0xfa] sm:$0xff] }
  0x4a   : > { %659 = vrot.lane.b32.xlu2 %v5140_v48, %s4969_s15  ;;  %655 = vrot.lane.b32.xlu0 %v5142_v49, %s4969_s15  ;;  %248 = vst.msk [vmem:[#allocation2 + $0xc0] sm:$0x1] %vm239_vm1, %v229_v21  ;;  %v5322_v21 = vld [vmem:[#allocation2 + $0xf2] sm:$0xff] }
  0x4b   : > { %657 = vrot.lane.b32.xlu1 %v5144_v50, %s4969_s15  ;;  %249 = vst.msk [vmem:[#allocation2 + $0xd8] sm:$0x1] %vm239_vm1, %v230_v28 }
  0x4c   : > { %291 = vst.msk [vmem:[#allocation2 + $0x179] sm:$0x1] %vm239_vm1, %v273_v46 }
  0x52   : > { %665 = vrot.lane.b32.xlu2 %v5154_v53, %s4969_s15  ;;  %661 = vrot.lane.b32.xlu0 %v5156_v54, %s4969_s15 }
  0x53   : > { %663 = vrot.lane.b32.xlu1 %v5158_v55, %s4969_s15 }
  0x5a   : > { %671 = vrot.lane.b32.xlu2 %v5168_v58, %s4969_s15  ;;  %667 = vrot.lane.b32.xlu0 %v5170_v59, %s4969_s15 }
  0x5b   : > { %669 = vrot.lane.b32.xlu1 %v5172_v60, %s4969_s15 }
  0x62   : > { %677 = vrot.lane.b32.xlu2 %v5182_v63, %s4969_s15  ;;  %673 = vrot.lane.b32.xlu0 %v5184_v0, %s4969_s15 }
  0x63   : > { %675 = vrot.lane.b32.xlu1 %v5186_v1, %s4969_s15 }
  0x6a   : > { %747 = vrot.lane.b32.xlu2 %v363_v5, %s4970_s16  ;;  %679 = vrot.lane.b32.xlu0 %v5197_v6, %s4969_s15  ;;  %v5279_v5 = vld [vmem:[#allocation2 + $0xb2] sm:$0xff] }
  0x6b   : > { %681 = vrot.lane.b32.xlu1 %v5199_v7, %s4969_s15 }
  0x72   : > { %749 = vrot.lane.b32.xlu0 %v364_v16, %s4970_s16  ;;  %753 = vrot.lane.b32.xlu2 %v5209_v17, %s4970_s16 }
  0x73   : > { %751 = vrot.lane.b32.xlu1 %v5212_v18, %s4970_s16 }
  0x74   : > { %v5220_v22 = vpop.permute.xlu2 %627 }
  0x75   : > { %8866 = vst [vmem:[#allocation4_spill] sm:$0xff] %v5220_v22  ;;  %v235_v22 = vld [vmem:[#allocation2 + $0x152] sm:$0x1] }
  0x76   : > { %254 = vst.msk [vmem:[#allocation2 + $0x150] sm:$0x1] %vm239_vm1, %v235_v22 }
  0x7a   : > { %755 = vrot.lane.b32.xlu0 %v5223_v23, %s4970_s16  ;;  %759 = vrot.lane.b32.xlu2 %v5225_v24, %s4970_s16 }
  0x7b   : > { %757 = vrot.lane.b32.xlu1 %v5227_v26, %s4970_s16 }
  0x7c   : > { %v5236_v30 = vpop.permute.xlu2 %629 }
  0x7d   : > { %8867 = vst [vmem:[#allocation5_spill] sm:$0xff] %v5236_v30  ;;  %v5360_v30 = vld [vmem:[#allocation2 + $0x13a] sm:$0xff] }
  0x82   : > { %761 = vrot.lane.b32.xlu0 %v5239_v34, %s4970_s16  ;;  %765 = vrot.lane.b32.xlu2 %v5241_v35, %s4970_s16 }
  0x83   : > { %763 = vrot.lane.b32.xlu1 %v5243_v36, %s4970_s16 }
  0x84   : > { %v5252_v42 = vpop.permute.xlu2 %635 }
  0x85   : > { %8868 = vst [vmem:[#allocation6_spill] sm:$0xff] %v5252_v42  ;;  %v233_v42 = vld [vmem:[#allocation2 + $0x122] sm:$0x1] }
  0x86   : > { %252 = vst.msk [vmem:[#allocation2 + $0x120] sm:$0x1] %vm239_vm1, %v233_v42  ;;  %v5358_v42 = vld [vmem:[#allocation2 + $0x142] sm:$0xff] }
  0x87   : > { %8885 = vst [vmem:[#allocation23_spill] sm:$0xff] %v5358_v42 }
  0x8a   : > { %767 = vrot.lane.b32.xlu0 %v5256_v51, %s4970_s16  ;;  %771 = vrot.lane.b32.xlu2 %v5258_v52, %s4970_s16 }
  0x8b   : > { %769 = vrot.lane.b32.xlu1 %v5261_v56, %s4970_s16  ;;  %v5269_v61 = vpop.permute.xlu0 %631 }
  0x8c   : > { %8869 = vst [vmem:[#allocation7_spill] sm:$0xff] %v5269_v61  ;;  %v5272_v2 = vpop.permute.xlu2 %641  ;;  %v5342_v61 = vld [vmem:[#allocation2 + $0x112] sm:$0xff] }
  0x8d   : > { %8870 = vst [vmem:[#allocation8_spill] sm:$0xff] %v5272_v2  ;;  %v5275_v3 = vpop.permute.xlu1 %623  ;;  %v232_v2 = vld [vmem:[#allocation2 + $0x10a] sm:$0x1] }
  0x8e   : > { %8871 = vst [vmem:[#allocation9_spill] sm:$0xff] %v5275_v3  ;;  %v5375_v3 = vld [vmem:[#allocation2 + $0x152] sm:$0xff] }
  0x8f   : > { %251 = vst.msk [vmem:[#allocation2 + $0x108] sm:$0x1] %vm239_vm1, %v232_v2 }
  0x90   : > { %8889 = vst [vmem:[#allocation27_spill] sm:$0xff] %v5375_v3 }
  0x92   : > { %773 = vrot.lane.b32.xlu0 %v5277_v4, %s4970_s16  ;;  %777 = vrot.lane.b32.xlu2 %v5279_v5, %s4970_s16 }
  0x93   : > { %775 = vrot.lane.b32.xlu1 %v5281_v8, %s4970_s16 }
  0x94   : > { %v5290_v15 = vpop.permute.xlu2 %647  ;;  %v5292_v16 = vpop.permute.xlu0 %619 }
  0x95   : > { %8872 = vst [vmem:[#allocation10_spill] sm:$0xff] %v5290_v15  ;;  %v5295_v19 = vpop.permute.xlu1 %625 }
  0x96   : > { %8873 = vst [vmem:[#allocation11_spill] sm:$0xff] %v5292_v16  ;;  %v5380_v16 = vld [vmem:[#allocation2 + $0x15a] sm:$0xff] }
  0x97   : > { %8874 = vst [vmem:[#allocation12_spill] sm:$0xff] %v5295_v19  ;;  %v236_v19 = vld [vmem:[#allocation2 + $0x16a] sm:$0x1] }
  0x98   : > { %255 = vst.msk [vmem:[#allocation2 + $0x168] sm:$0x1] %vm239_vm1, %v236_v19  ;;  %v302_v19 = vld [vmem:[#allocation2 + $0x20] sm:$0xff] }
  0x99   : > { %8891 = vst [vmem:[#allocation29_spill] sm:$0xff] %v5380_v16 }
  0x9a   : > { %779 = vrot.lane.b32.xlu0 %v5298_v29, %s4970_s16  ;;  %783 = vrot.lane.b32.xlu2 %v5300_v40, %s4970_s16 }
  0x9b   : > { %781 = vrot.lane.b32.xlu1 %v5303_v41, %s4970_s16 }
  0x9c   : > { %v5312_v47 = vpop.permute.xlu2 %653  ;;  %v5314_v57 = vpop.permute.xlu0 %621 }
  0x9d   : > { %8875 = vst [vmem:[#allocation13_spill] sm:$0xff] %v5312_v47  ;;  %v5316_v62 = vpop.permute.xlu1 %633  ;;  %v5339_v47 = vld [vmem:[#allocation2 + $0x122] sm:$0xff] }
  0x9e   : > { %8876 = vst [vmem:[#allocation14_spill] sm:$0xff] %v5314_v57  ;;  %v5377_v57 = vld [vmem:[#allocation2 + $0x16a] sm:$0xff] }
  0x9f   : > { %8877 = vst [vmem:[#allocation15_spill] sm:$0xff] %v5316_v62  ;;  %v5337_v62 = vld [vmem:[#allocation2 + $0x10a] sm:$0xff] }
  0xa0   : > { %8890 = vst [vmem:[#allocation28_spill] sm:$0xff] %v5377_v57 }
  0xa2   : > { %785 = vrot.lane.b32.xlu0 %v5318_v10, %s4970_s16  ;;  %789 = vrot.lane.b32.xlu2 %v5320_v13, %s4970_s16 }
  0xa3   : > { %787 = vrot.lane.b32.xlu1 %v5322_v21, %s4970_s16 }
  0xa4   : > { %v5330_v28 = vpop.permute.xlu2 %659  ;;  %v5332_v46 = vpop.permute.xlu0 %637 }
  0xa5   : > { %8878 = vst [vmem:[#allocation16_spill] sm:$0xff] %v5330_v28  ;;  %v5334_v15 = vpop.permute.xlu1 %639 }
  0xa6   : > { %8879 = vst [vmem:[#allocation17_spill] sm:$0xff] %v5332_v46  ;;  %v5356_v46 = vld [vmem:[#allocation2 + $0x12a] sm:$0xff] }
  0xa7   : > { %8880 = vst [vmem:[#allocation18_spill] sm:$0xff] %v5334_v15 }
  0xa8   : > { %8884 = vst [vmem:[#allocation22_spill] sm:$0xff] %v5356_v46 }
  0xaa   : > { %791 = vrot.lane.b32.xlu0 %v5337_v62, %s4970_s16  ;;  %795 = vrot.lane.b32.xlu2 %v5339_v47, %s4970_s16 }
  0xab   : > { %793 = vrot.lane.b32.xlu1 %v5342_v61, %s4970_s16 }
  0xac   : > { %v5350_v15 = vpop.permute.xlu2 %665  ;;  %v5352_v2 = vpop.permute.xlu0 %643 }
  0xad   : > { %8881 = vst [vmem:[#allocation19_spill] sm:$0xff] %v5350_v15  ;;  %v5354_v28 = vpop.permute.xlu1 %645 }
  0xae   : > { %8882 = vst [vmem:[#allocation20_spill] sm:$0xff] %v5352_v2 }
  0xaf   : > { %8883 = vst [vmem:[#allocation21_spill] sm:$0xff] %v5354_v28 }
  0xb2   : > { %797 = vrot.lane.b32.xlu0 %v5356_v46, %s4970_s16  ;;  %801 = vrot.lane.b32.xlu2 %v5358_v42, %s4970_s16  ;;  %v301_v42 = vld [vmem:[#allocation2 + $0x18] sm:$0xff]  ;;  %v5415_v46 = vld [vmem:[#allocation2 + $0x68] sm:$0xff] }
  0xb3   : > { %799 = vrot.lane.b32.xlu1 %v5360_v30, %s4970_s16  ;;  %8902 = vst [vmem:[#allocation40_spill] sm:$0xff] %v5415_v46 }
  0xb4   : > { %v5368_v15 = vpop.permute.xlu2 %671  ;;  %v5370_v2 = vpop.permute.xlu0 %649 }
  0xb5   : > { %8886 = vst [vmem:[#allocation24_spill] sm:$0xff] %v5368_v15  ;;  %v5372_v28 = vpop.permute.xlu1 %651 }
  0xb6   : > { %8887 = vst [vmem:[#allocation25_spill] sm:$0xff] %v5370_v2 }
  0xb7   : > { %8888 = vst [vmem:[#allocation26_spill] sm:$0xff] %v5372_v28  ;;  %v5394_v28 = vld [vmem:[#allocation2 + $0x172] sm:$0xff] }
  0xb8   : > { %8895 = vst [vmem:[#allocation33_spill] sm:$0xff] %v5394_v28 }
  0xba   : > { %803 = vrot.lane.b32.xlu0 %v5375_v3, %s4970_s16  ;;  %807 = vrot.lane.b32.xlu2 %v5377_v57, %s4970_s16 }
  0xbb   : > { %805 = vrot.lane.b32.xlu1 %v5380_v16, %s4970_s16  ;;  %v304_v16 = vld [vmem:[#allocation2 + $0x38] sm:$0xff] }
  0xbc   : > { %v5388_v15 = vpop.permute.xlu2 %677  ;;  %v5390_v22 = vpop.permute.xlu0 %655 }
  0xbd   : > { %8892 = vst [vmem:[#allocation30_spill] sm:$0xff] %v5388_v15  ;;  %v5392_v2 = vpop.permute.xlu1 %657 }
  0xbe   : > { %8893 = vst [vmem:[#allocation31_spill] sm:$0xff] %v5390_v22  ;;  %v303_v22 = vld [vmem:[#allocation2 + $0x30] sm:$0xff] }
  0xbf   : > { %8894 = vst [vmem:[#allocation32_spill] sm:$0xff] %v5392_v2  ;;  %v305_v2 = vld [vmem:[#allocation2 + $0x48] sm:$0xff] }
  0xc2   : > { %809 = vrot.lane.b32.xlu0 %v5394_v28, %s4970_s16  ;;  %877 = vrot.lane.b32.xlu2 %v302_v19, %s4971_s17 }
  0xc3   : > { %875 = vrot.lane.b32.xlu1 %v301_v42, %s4971_s17 }
  0xc4   : > { %v5400_v57 = vpop.permute.xlu2 %747  ;;  %v5402_v3 = vpop.permute.xlu0 %661 }
  0xc5   : > { %8896 = vst [vmem:[#allocation34_spill] sm:$0xff] %v5400_v57  ;;  %v5404_v15 = vpop.permute.xlu1 %663  ;;  %v306_v57 = vld [vmem:[#allocation2 + $0x50] sm:$0xff] }
  0xc6   : > { %8897 = vst [vmem:[#allocation35_spill] sm:$0xff] %v5402_v3  ;;  %v307_v3 = vld [vmem:[#allocation2 + $0x60] sm:$0xff] }
  0xc7   : > { %8898 = vst [vmem:[#allocation36_spill] sm:$0xff] %v5404_v15  ;;  %v310_v15 = vld [vmem:[#allocation2 + $0x80] sm:$0xff] }
  0xca   : > { %879 = vrot.lane.b32.xlu0 %v303_v22, %s4971_s17  ;;  %883 = vrot.lane.b32.xlu2 %v305_v2, %s4971_s17 }
  0xcb   : > { %881 = vrot.lane.b32.xlu1 %v304_v16, %s4971_s17 }
  0xcc   : > { %v5409_v28 = vpop.permute.xlu0 %667  ;;  %v5411_v19 = vpop.permute.xlu2 %753 }
  0xcd   : > { %8899 = vst [vmem:[#allocation37_spill] sm:$0xff] %v5409_v28  ;;  %v5413_v42 = vpop.permute.xlu1 %669  ;;  %v5427_v28 = vld [vmem:[#allocation2 + $0x78] sm:$0xff] }
  0xce   : > { %8900 = vst [vmem:[#allocation38_spill] sm:$0xff] %v5411_v19  ;;  %v313_v19 = vld [vmem:[#allocation2 + $0xa8] sm:$0xff] }
  0xcf   : > { %8901 = vst [vmem:[#allocation39_spill] sm:$0xff] %v5413_v42  ;;  %v5429_v42 = vld [vmem:[#allocation2 + $0x90] sm:$0xff] }
  0xd0   : > { %8906 = vst [vmem:[#allocation44_spill] sm:$0xff] %v5427_v28 }
  0xd1   : > { %8907 = vst [vmem:[#allocation45_spill] sm:$0xff] %v5429_v42 }
  0xd2   : > { %885 = vrot.lane.b32.xlu0 %v306_v57, %s4971_s17  ;;  %889 = vrot.lane.b32.xlu2 %v5415_v46, %s4971_s17  ;;  %v316_v46 = vld [vmem:[#allocation2 + $0xc8] sm:$0xff] }
  0xd3   : > { %887 = vrot.lane.b32.xlu1 %v307_v3, %s4971_s17 }
  0xd4   : > { %v5421_v2 = vpop.permute.xlu0 %673  ;;  %v5423_v16 = vpop.permute.xlu2 %759 }
  0xd5   : > { %8903 = vst [vmem:[#allocation41_spill] sm:$0xff] %v5421_v2  ;;  %v5425_v22 = vpop.permute.xlu1 %675 }
  0xd6   : > { %8904 = vst [vmem:[#allocation42_spill] sm:$0xff] %v5423_v16  ;;  %v5444_v16 = vld [vmem:[#allocation2 + $0xb0] sm:$0xff] }
  0xd7   : > { %8905 = vst [vmem:[#allocation43_spill] sm:$0xff] %v5425_v22  ;;  %v5442_v22 = vld [vmem:[#allocation2 + $0x98] sm:$0xff] }
  0xd8   : > { %8911 = vst [vmem:[#allocation49_spill] sm:$0xff] %v5442_v22 }
  0xd9   : > { %8912 = vst [vmem:[#allocation50_spill] sm:$0xff] %v5444_v16 }
  0xda   : > { %891 = vrot.lane.b32.xlu0 %v5427_v28, %s4971_s17  ;;  %895 = vrot.lane.b32.xlu2 %v5429_v42, %s4971_s17  ;;  %v174_v42 = vld [vmem:[%s5008_s14 + $0xf0] sm:$0xff]  ;;  %v5461_v28 = vld [vmem:[#allocation2 + $0xd8] sm:$0xff] }
  0xdb   : > { %893 = vrot.lane.b32.xlu1 %v310_v15, %s4971_s17  ;;  %208 = vst.msk [vmem:[#allocation2 + $0x181] sm:$0xff] %vm177_vm0, %v174_v42 }
  0xdc   : > { %v5436_v3 = vpop.permute.xlu0 %679  ;;  %v5438_v57 = vpop.permute.xlu2 %765 }
  0xdd   : > { %8908 = vst [vmem:[#allocation46_spill] sm:$0xff] %v5436_v3  ;;  %v5440_v2 = vpop.permute.xlu1 %681 }
  0xde   : > { %8909 = vst [vmem:[#allocation47_spill] sm:$0xff] %v5438_v57  ;;  %v5459_v57 = vld [vmem:[#allocation2 + $0xc0] sm:$0xff] }
  0xdf   : > { %8910 = vst [vmem:[#allocation48_spill] sm:$0xff] %v5440_v2 }
  0xe0   : > { %8916 = vst [vmem:[#allocation54_spill] sm:$0xff] %v5459_v57 }
  0xe2   : > { %897 = vrot.lane.b32.xlu0 %v5442_v22, %s4971_s17  ;;  %901 = vrot.lane.b32.xlu2 %v5444_v16, %s4971_s17  ;;  %v237_v16 = vld [vmem:[#allocation2 + $0x182] sm:$0x1]  ;;  %v319_v22 = vld [vmem:[#allocation2 + $0xf0] sm:$0xff] }
  0xe3   : > { %899 = vrot.lane.b32.xlu1 %v313_v19, %s4971_s17  ;;  %v175_v19 = vld [vmem:[%s5008_s14 + $0xf8] sm:$0xff]  ;;  %256 = vst.msk [vmem:[#allocation2 + $0x180] sm:$0x1] %vm239_vm1, %v237_v16 }
  0xe4   : > { %v5453_v15 = vpop.permute.xlu0 %749  ;;  %v5455_v2 = vpop.permute.xlu2 %771  ;;  %209 = vst.msk [vmem:[#allocation2 + $0x189] sm:$0xff] %vm177_vm0, %v175_v19 }
  0xe5   : > { %8913 = vst [vmem:[#allocation51_spill] sm:$0xff] %v5453_v15  ;;  %v5457_v3 = vpop.permute.xlu1 %751  ;;  %v5477_v15 = vld [vmem:[#allocation2 + $0xe0] sm:$0xff] }
  0xe6   : > { %8914 = vst [vmem:[#allocation52_spill] sm:$0xff] %v5455_v2 }
  0xe7   : > { %8915 = vst [vmem:[#allocation53_spill] sm:$0xff] %v5457_v3 }
  0xe8   : > { %8920 = vst [vmem:[#allocation58_spill] sm:$0xff] %v5477_v15 }
  0xea   : > { %903 = vrot.lane.b32.xlu0 %v5459_v57, %s4971_s17  ;;  %907 = vrot.lane.b32.xlu2 %v5461_v28, %s4971_s17  ;;  %v5479_v57 = vld [vmem:[#allocation2 + $0xf8] sm:$0xff] }
  0xeb   : > { %905 = vrot.lane.b32.xlu1 %v316_v46, %s4971_s17  ;;  %8921 = vst [vmem:[#allocation59_spill] sm:$0xff] %v5479_v57 }
  0xec   : > { %v5470_v42 = vpop.permute.xlu0 %755  ;;  %v5472_v2 = vpop.permute.xlu2 %777 }
  0xed   : > { %8917 = vst [vmem:[#allocation55_spill] sm:$0xff] %v5470_v42  ;;  %v5475_v3 = vpop.permute.xlu1 %757  ;;  %v322_v42 = vld [vmem:[#allocation2 + $0x110] sm:$0xff] }
  0xee   : > { %8918 = vst [vmem:[#allocation56_spill] sm:$0xff] %v5472_v2  ;;  %v5492_v2 = vld [vmem:[#allocation2 + $0x108] sm:$0xff] }
  0xef   : > { %8919 = vst [vmem:[#allocation57_spill] sm:$0xff] %v5475_v3  ;;  %v5494_v3 = vld [vmem:[#allocation2 + $0x120] sm:$0xff] }
  0xf0   : > { %8925 = vst [vmem:[#allocation63_spill] sm:$0xff] %v5492_v2 }
  0xf1   : > { %8926 = vst [vmem:[#allocation64_spill] sm:$0xff] %v5494_v3 }
  0xf2   : > { %909 = vrot.lane.b32.xlu0 %v5477_v15, %s4971_s17  ;;  %913 = vrot.lane.b32.xlu2 %v5479_v57, %s4971_s17  ;;  %v5509_v57 = vld [vmem:[#allocation2 + $0x140] sm:$0xff]  ;;  %v325_v15 = vld [vmem:[#allocation2 + $0x138] sm:$0xff] }
  0xf3   : > { %911 = vrot.lane.b32.xlu1 %v319_v22, %s4971_s17  ;;  %8931 = vst [vmem:[#allocation69_spill] sm:$0xff] %v5509_v57 }
  0xf4   : > { %v5486_v46 = vpop.permute.xlu0 %761  ;;  %v5488_v19 = vpop.permute.xlu2 %783 }
  0xf5   : > { %8922 = vst [vmem:[#allocation60_spill] sm:$0xff] %v5486_v46  ;;  %v5490_v16 = vpop.permute.xlu1 %763 }
  0xf6   : > { %8923 = vst [vmem:[#allocation61_spill] sm:$0xff] %v5488_v19 }
  0xf7   : > { %8924 = vst [vmem:[#allocation62_spill] sm:$0xff] %v5490_v16  ;;  %v5507_v16 = vld [vmem:[#allocation2 + $0x128] sm:$0xff] }
  0xf8   : > { %8930 = vst [vmem:[#allocation68_spill] sm:$0xff] %v5507_v16 }
  0xfa   : > { %915 = vrot.lane.b32.xlu0 %v5492_v2, %s4971_s17  ;;  %919 = vrot.lane.b32.xlu2 %v5494_v3, %s4971_s17  ;;  %v5524_v3 = vld [vmem:[#allocation2 + $0x168] sm:$0xff]  ;;  %v328_v2 = vld [vmem:[#allocation2 + $0x158] sm:$0xff] }
  0xfb   : > { %917 = vrot.lane.b32.xlu1 %v322_v42, %s4971_s17 }
  0xfc   : > { %v5501_v22 = vpop.permute.xlu0 %767  ;;  %v5503_v46 = vpop.permute.xlu2 %789 }
  0xfd   : > { %8927 = vst [vmem:[#allocation65_spill] sm:$0xff] %v5501_v22  ;;  %v5505_v19 = vpop.permute.xlu1 %769 }
  0xfe   : > { %8928 = vst [vmem:[#allocation66_spill] sm:$0xff] %v5503_v46 }
  0xff   : > { %8929 = vst [vmem:[#allocation67_spill] sm:$0xff] %v5505_v19  ;;  %v5522_v19 = vld [vmem:[#allocation2 + $0x150] sm:$0xff] }
 0x102   : > { %921 = vrot.lane.b32.xlu0 %v5507_v16, %s4971_s17  ;;  %925 = vrot.lane.b32.xlu2 %v5509_v57, %s4971_s17  ;;  %v5539_v57 = vld [vmem:[#allocation2 + $0x180] sm:$0xff]  ;;  %v5541_v16 = vld [vmem:[#allocation2 + $0x170] sm:$0xff] }
 0x103   : > { %923 = vrot.lane.b32.xlu1 %v325_v15, %s4971_s17  ;;  %8939 = vst [vmem:[#allocation77_spill] sm:$0xff] %v5541_v16 }
 0x104   : > { %v5516_v42 = vpop.permute.xlu0 %773  ;;  %v5518_v22 = vpop.permute.xlu2 %795 }
 0x105   : > { %8932 = vst [vmem:[#allocation70_spill] sm:$0xff] %v5516_v42  ;;  %v5520_v46 = vpop.permute.xlu1 %775 }
 0x106   : > { %8933 = vst [vmem:[#allocation71_spill] sm:$0xff] %v5518_v22 }
 0x107   : > { %8934 = vst [vmem:[#allocation72_spill] sm:$0xff] %v5520_v46  ;;  %v5537_v46 = vld [vmem:[#allocation2 + $0x188] sm:$0xff] }
 0x108   : > { %8938 = vst [vmem:[#allocation76_spill] sm:$0xff] %v5537_v46 }
 0x10a   : > { %927 = vrot.lane.b32.xlu0 %v5522_v19, %s4971_s17  ;;  %931 = vrot.lane.b32.xlu2 %v5524_v3, %s4971_s17 }
 0x10b   : > { %929 = vrot.lane.b32.xlu1 %v328_v2, %s4971_s17 }
 0x10c   : > { %v5531_v15 = vpop.permute.xlu0 %779  ;;  %v5533_v42 = vpop.permute.xlu2 %801 }
 0x10d   : > { %8935 = vst [vmem:[#allocation73_spill] sm:$0xff] %v5531_v15  ;;  %v5535_v22 = vpop.permute.xlu1 %781 }
 0x10e   : > { %8936 = vst [vmem:[#allocation74_spill] sm:$0xff] %v5533_v42 }
 0x10f   : > { %8937 = vst [vmem:[#allocation75_spill] sm:$0xff] %v5535_v22 }
 0x112   : > { %933 = vrot.lane.b32.xlu0 %v5541_v16, %s4971_s17  ;;  %937 = vrot.lane.b32.xlu2 %v5537_v46, %s4971_s17 }
 0x113   : > { %935 = vrot.lane.b32.xlu1 %v5539_v57, %s4971_s17 }
 0x114   : > { %v5549_v2 = vpop.permute.xlu0 %785  ;;  %v5551_v42 = vpop.permute.xlu2 %807 }
 0x115   : > { %8940 = vst [vmem:[#allocation78_spill] sm:$0xff] %v5549_v2  ;;  %v5553_v22 = vpop.permute.xlu1 %787  ;;  %v573_v2 = vld [vmem:[#allocation2 + $0x10a] sm:$0xff] }
 0x116   : > { %8941 = vst [vmem:[#allocation79_spill] sm:$0xff] %v5551_v42  ;;  %v5677_v42 = vld [vmem:[#allocation2 + $0x189] sm:$0xff] }
 0x117   : > { %8942 = vst [vmem:[#allocation80_spill] sm:$0xff] %v5553_v22  ;;  %v543_v22 = vld [vmem:[#allocation2 + $0x121] sm:$0xff] }
 0x11a   : > { %1003 = vrot.lane.b32.xlu0 %v5037_v12, %s4972_s18  ;;  %1007 = vrot.lane.b32.xlu2 %v5032_v11, %s4972_s18 }
 0x11b   : > { %1005 = vrot.lane.b32.xlu1 %v5057_v20, %s4972_s18 }
 0x11c   : > { %v5561_v15 = vpop.permute.xlu0 %791  ;;  %v5563_v46 = vpop.permute.xlu2 %877 }
 0x11d   : > { %8943 = vst [vmem:[#allocation81_spill] sm:$0xff] %v5561_v15  ;;  %v5565_v16 = vpop.permute.xlu1 %793  ;;  %v9012_v15 = vld [vmem:[#allocation68_spill] sm:$0xff] }
 0x11e   : > { %8944 = vst [vmem:[#allocation82_spill] sm:$0xff] %v5565_v16 }
 0x122   : > { %1009 = vrot.lane.b32.xlu0 %v5044_v14, %s4972_s18  ;;  %1013 = vrot.lane.b32.xlu2 %v5075_v27, %s4972_s18 }
 0x123   : > { %1011 = vrot.lane.b32.xlu1 %v5026_v9, %s4972_s18 }
 0x124   : > { %v5573_v12 = vpop.permute.xlu0 %797  ;;  %v5575_v11 = vpop.permute.xlu2 %883 }
 0x125   : > { %8945 = vst [vmem:[#allocation83_spill] sm:$0xff] %v5573_v12  ;;  %v5577_v20 = vpop.permute.xlu1 %799  ;;  %v495_v12 = vld [vmem:[#allocation2 + $0x60] sm:$0xff] }
 0x126   : > { %8946 = vst [vmem:[#allocation84_spill] sm:$0xff] %v5577_v20 }
 0x12a   : > { %1015 = vrot.lane.b32.xlu0 %v5073_v25, %s4972_s18  ;;  %1019 = vrot.lane.b32.xlu2 %v5092_v33, %s4972_s18 }
 0x12b   : > { %1017 = vrot.lane.b32.xlu1 %v5090_v32, %s4972_s18 }
 0x12c   : > { %v5585_v14 = vpop.permute.xlu0 %803  ;;  %v5587_v27 = vpop.permute.xlu2 %889 }
 0x12d   : > { %8947 = vst [vmem:[#allocation85_spill] sm:$0xff] %v5585_v14  ;;  %v5589_v9 = vpop.permute.xlu1 %805 }
 0x12e   : > { %8948 = vst [vmem:[#allocation86_spill] sm:$0xff] %v5589_v9 }
 0x132   : > { %1021 = vrot.lane.b32.xlu0 %v5088_v31, %s4972_s18  ;;  %1025 = vrot.lane.b32.xlu2 %v5110_v39, %s4972_s18 }
 0x133   : > { %1023 = vrot.lane.b32.xlu1 %v5108_v38, %s4972_s18 }
 0x134   : > { %v5597_v25 = vpop.permute.xlu0 %809  ;;  %v5599_v33 = vpop.permute.xlu2 %895 }
 0x135   : > { %8949 = vst [vmem:[#allocation87_spill] sm:$0xff] %v5597_v25  ;;  %v5601_v32 = vpop.permute.xlu1 %875  ;;  %v5675_v25 = vld [vmem:[#allocation2 + $0x181] sm:$0xff] }
 0x136   : > { %8950 = vst [vmem:[#allocation88_spill] sm:$0xff] %v5599_v33  ;;  %v541_v33 = vld [vmem:[#allocation2 + $0x109] sm:$0xff] }
 0x13a   : > { %1027 = vrot.lane.b32.xlu0 %v5106_v37, %s4972_s18  ;;  %1031 = vrot.lane.b32.xlu2 %v5128_v45, %s4972_s18 }
 0x13b   : > { %1029 = vrot.lane.b32.xlu1 %v5126_v44, %s4972_s18 }
 0x13c   : > { %v5609_v31 = vpop.permute.xlu0 %879  ;;  %v5611_v39 = vpop.permute.xlu2 %901 }
 0x13d   : > { %8951 = vst [vmem:[#allocation89_spill] sm:$0xff] %v5611_v39  ;;  %v5613_v38 = vpop.permute.xlu1 %881  ;;  %v9002_v39 = vld [vmem:[#allocation50_spill] sm:$0xff] }
 0x142   : > { %1033 = vrot.lane.b32.xlu0 %v5124_v43, %s4972_s18  ;;  %1037 = vrot.lane.b32.xlu2 %v5144_v50, %s4972_s18 }
 0x143   : > { %1035 = vrot.lane.b32.xlu1 %v5142_v49, %s4972_s18 }
 0x144   : > { %v5621_v37 = vpop.permute.xlu0 %885  ;;  %v5623_v45 = vpop.permute.xlu2 %907 }
 0x145   : > { %v5625_v44 = vpop.permute.xlu1 %887 }
 0x14a   : > { %1039 = vrot.lane.b32.xlu0 %v5140_v48, %s4972_s18  ;;  %1043 = vrot.lane.b32.xlu2 %v5158_v55, %s4972_s18 }
 0x14b   : > { %1041 = vrot.lane.b32.xlu1 %v5156_v54, %s4972_s18 }
 0x14c   : > { %v5633_v43 = vpop.permute.xlu0 %891  ;;  %v5635_v50 = vpop.permute.xlu2 %913 }
 0x14d   : > { %8952 = vst [vmem:[#allocation90_spill] sm:$0xff] %v5635_v50  ;;  %v5637_v49 = vpop.permute.xlu1 %893  ;;  %v569_v50 = vld [vmem:[#allocation2 + $0xda] sm:$0xff] }
 0x14e   : > { %8953 = vst [vmem:[#allocation91_spill] sm:$0xff] %v5637_v49  ;;  %v548_v49 = vld [vmem:[#allocation2 + $0x159] sm:$0xff] }
 0x152   : > { %1045 = vrot.lane.b32.xlu0 %v5154_v53, %s4972_s18  ;;  %1049 = vrot.lane.b32.xlu2 %v5172_v60, %s4972_s18 }
 0x153   : > { %1047 = vrot.lane.b32.xlu1 %v5170_v59, %s4972_s18 }
 0x154   : > { %v5645_v48 = vpop.permute.xlu0 %897  ;;  %v5647_v55 = vpop.permute.xlu2 %919 }
 0x155   : > { %8954 = vst [vmem:[#allocation92_spill] sm:$0xff] %v5645_v48  ;;  %v5649_v54 = vpop.permute.xlu1 %899  ;;  %v526_v48 = vld [vmem:[#allocation2 + $0x51] sm:$0xff] }
 0x156   : > { %8955 = vst [vmem:[#allocation93_spill] sm:$0xff] %v5647_v55 }
 0x157   : > { %8956 = vst [vmem:[#allocation94_spill] sm:$0xff] %v5649_v54 }
 0x15a   : > { %1051 = vrot.lane.b32.xlu0 %v5168_v58, %s4972_s18  ;;  %1055 = vrot.lane.b32.xlu2 %v5186_v1, %s4972_s18 }
 0x15b   : > { %1053 = vrot.lane.b32.xlu1 %v5184_v0, %s4972_s18 }
 0x15c   : > { %v5657_v53 = vpop.permute.xlu0 %903  ;;  %v5659_v60 = vpop.permute.xlu2 %925 }
 0x15d   : > { %8957 = vst [vmem:[#allocation95_spill] sm:$0xff] %v5657_v53  ;;  %v5661_v59 = vpop.permute.xlu1 %905  ;;  %v498_v53 = vld [vmem:[#allocation2 + $0x80] sm:$0xff] }
 0x15e   : > { %8958 = vst [vmem:[#allocation96_spill] sm:$0xff] %v5659_v60 }
 0x15f   : > { %8959 = vst [vmem:[#allocation97_spill] sm:$0xff] %v5661_v59  ;;  %v491_v59 = vld [vmem:[#allocation2 + $0x30] sm:$0xff] }
 0x162   : > { %1057 = vrot.lane.b32.xlu0 %v5182_v63, %s4972_s18  ;;  %1061 = vrot.lane.b32.xlu2 %v5199_v7, %s4972_s18 }
 0x163   : > { %1059 = vrot.lane.b32.xlu1 %v5197_v6, %s4972_s18 }
 0x164   : > { %v5669_v58 = vpop.permute.xlu0 %909  ;;  %v5671_v1 = vpop.permute.xlu2 %931 }
 0x165   : > { %8960 = vst [vmem:[#allocation98_spill] sm:$0xff] %v5671_v1  ;;  %v5673_v0 = vpop.permute.xlu1 %911 }
 0x16a   : > { %1063 = vrot.lane.b32.xlu0 %v5675_v25, %s4972_s18  ;;  %1131 = vrot.lane.b32.xlu2 %v5212_v18, %s4973_s19 }
 0x16b   : > { %1065 = vrot.lane.b32.xlu1 %v5677_v42, %s4972_s18 }
 0x16c   : > { %v5685_v63 = vpop.permute.xlu0 %915  ;;  %v5687_v6 = vpop.permute.xlu2 %937 }
 0x16d   : > { %8961 = vst [vmem:[#allocation99_spill] sm:$0xff] %v5685_v63  ;;  %v5689_v7 = vpop.permute.xlu1 %917  ;;  %v536_v63 = vld [vmem:[#allocation2 + $0xc9] sm:$0xff] }
 0x16e   : > { %8962 = vst [vmem:[#allocation100_spill] sm:$0xff] %v5687_v6  ;;  %v274_v6 = vld [vmem:[#allocation2 + $0x18f] sm:$0x1] }
 0x16f   : > { %8963 = vst [vmem:[#allocation101_spill] sm:$0xff] %v5689_v7  ;;  %v525_v7 = vld [vmem:[#allocation2 + $0x49] sm:$0xff] }
 0x170   : > { %292 = vst.msk [vmem:[#allocation2 + $0x191] sm:$0x1] %vm239_vm1, %v274_v6 }
 0x172   : > { %1133 = vrot.lane.b32.xlu0 %v5209_v17, %s4973_s19  ;;  %1137 = vrot.lane.b32.xlu2 %v5227_v26, %s4973_s19 }
 0x173   : > { %1135 = vrot.lane.b32.xlu1 %v5223_v23, %s4973_s19 }
 0x174   : > { %v5697_v9 = vpop.permute.xlu0 %921  ;;  %v5699_v18 = vpop.permute.xlu2 %1007 }
 0x175   : > { %8964 = vst [vmem:[#allocation102_spill] sm:$0xff] %v5697_v9  ;;  %v5701_v1 = vpop.permute.xlu1 %923  ;;  %v8997_v9 = vld [vmem:[#allocation45_spill] sm:$0xff] }
 0x176   : > { %8965 = vst [vmem:[#allocation103_spill] sm:$0xff] %v5701_v1 }
 0x17a   : > { %1139 = vrot.lane.b32.xlu0 %v5225_v24, %s4973_s19  ;;  %1143 = vrot.lane.b32.xlu2 %v5243_v36, %s4973_s19 }
 0x17b   : > { %1141 = vrot.lane.b32.xlu1 %v5239_v34, %s4973_s19 }
 0x17c   : > { %v5709_v17 = vpop.permute.xlu0 %927  ;;  %v5711_v26 = vpop.permute.xlu2 %1013 }
 0x17d   : > { %8966 = vst [vmem:[#allocation104_spill] sm:$0xff] %v5709_v17  ;;  %v5713_v23 = vpop.permute.xlu1 %929  ;;  %v8984_v17 = vld [vmem:[#allocation28_spill] sm:$0xff] }
 0x17e   : > { %8967 = vst [vmem:[#allocation105_spill] sm:$0xff] %v5713_v23  ;;  %v5800_v23 = vld [vmem:[#allocation2 + $0x182] sm:$0xff] }
 0x182   : > { %1145 = vrot.lane.b32.xlu0 %v5241_v35, %s4973_s19  ;;  %1149 = vrot.lane.b32.xlu2 %v5261_v56, %s4973_s19 }
 0x183   : > { %1147 = vrot.lane.b32.xlu1 %v5256_v51, %s4973_s19 }
 0x184   : > { %v5721_v24 = vpop.permute.xlu0 %933  ;;  %v5723_v36 = vpop.permute.xlu2 %1019 }
 0x185   : > { %8968 = vst [vmem:[#allocation106_spill] sm:$0xff] %v5721_v24  ;;  %v5725_v34 = vpop.permute.xlu1 %935  ;;  %v8980_v24 = vld [vmem:[#allocation29_spill] sm:$0xff] }
 0x186   : > { %8969 = vst [vmem:[#allocation107_spill] sm:$0xff] %v5725_v34  ;;  %v8979_v34 = vld [vmem:[#allocation23_spill] sm:$0xff] }
 0x18a   : > { %1151 = vrot.lane.b32.xlu0 %v5258_v52, %s4973_s19  ;;  %1155 = vrot.lane.b32.xlu2 %v5281_v8, %s4973_s19 }
 0x18b   : > { %1153 = vrot.lane.b32.xlu1 %v5277_v4, %s4973_s19 }
 0x18c   : > { %v5733_v35 = vpop.permute.xlu0 %1003  ;;  %v5735_v56 = vpop.permute.xlu2 %1025 }
 0x18d   : > { %8970 = vst [vmem:[#allocation108_spill] sm:$0xff] %v5735_v56  ;;  %v5737_v51 = vpop.permute.xlu1 %1005  ;;  %v9016_v56 = vld [vmem:[#allocation69_spill] sm:$0xff] }
 0x192   : > { %1157 = vrot.lane.b32.xlu0 %v5279_v5, %s4973_s19  ;;  %1161 = vrot.lane.b32.xlu2 %v5303_v41, %s4973_s19 }
 0x193   : > { %1159 = vrot.lane.b32.xlu1 %v5298_v29, %s4973_s19 }
 0x194   : > { %v5745_v52 = vpop.permute.xlu0 %1009  ;;  %v5747_v8 = vpop.permute.xlu2 %1031 }
 0x195   : > { %8971 = vst [vmem:[#allocation109_spill] sm:$0xff] %v5747_v8  ;;  %v5749_v4 = vpop.permute.xlu1 %1011  ;;  %v494_v8 = vld [vmem:[#allocation2 + $0x50] sm:$0xff] }
 0x19a   : > { %1163 = vrot.lane.b32.xlu0 %v5300_v40, %s4973_s19  ;;  %1167 = vrot.lane.b32.xlu2 %v5322_v21, %s4973_s19 }
 0x19b   : > { %1165 = vrot.lane.b32.xlu1 %v5318_v10, %s4973_s19 }
 0x19c   : > { %v5758_v5 = vpop.permute.xlu0 %1015  ;;  %v5760_v29 = vpop.permute.xlu2 %1037 }
 0x19d   : > { %v5762_v41 = vpop.permute.xlu1 %1017 }
 0x1a2   : > { %1169 = vrot.lane.b32.xlu0 %v5320_v13, %s4973_s19  ;;  %1173 = vrot.lane.b32.xlu2 %v5342_v61, %s4973_s19  ;;  %v8975_v13 = vld [vmem:[#allocation22_spill] sm:$0xff] }
 0x1a3   : > { %1171 = vrot.lane.b32.xlu1 %v5337_v62, %s4973_s19 }
 0x1a4   : > { %v5770_v40 = vpop.permute.xlu0 %1021  ;;  %v5772_v10 = vpop.permute.xlu2 %1043 }
 0x1a5   : > { %8972 = vst [vmem:[#allocation110_spill] sm:$0xff] %v5770_v40  ;;  %v5774_v21 = vpop.permute.xlu1 %1023  ;;  %v547_v40 = vld [vmem:[#allocation2 + $0x151] sm:$0xff] }
 0x1a6   : > { %8973 = vst [vmem:[#allocation111_spill] sm:$0xff] %v5772_v10  ;;  %v533_v10 = vld [vmem:[#allocation2 + $0xa9] sm:$0xff] }
 0x1a7   : > { %8974 = vst [vmem:[#allocation112_spill] sm:$0xff] %v5774_v21  ;;  %v530_v21 = vld [vmem:[#allocation2 + $0x81] sm:$0xff] }
 0x1aa   : > { %1175 = vrot.lane.b32.xlu0 %v5339_v47, %s4973_s19  ;;  %1179 = vrot.lane.b32.xlu2 %v5360_v30, %s4973_s19  ;;  %v8981_v47 = vld [vmem:[#allocation27_spill] sm:$0xff] }
 0x1ab   : > { %1177 = vrot.lane.b32.xlu1 %v8975_v13, %s4973_s19 }
 0x1ac   : > { %v5782_v6 = vpop.permute.xlu0 %1027  ;;  %v5784_v61 = vpop.permute.xlu2 %1049 }
 0x1ad   : > { %8976 = vst [vmem:[#allocation22_spill] sm:$0xff] %v5782_v6  ;;  %v5786_v62 = vpop.permute.xlu1 %1029  ;;  %v9008_v6 = vld [vmem:[#allocation63_spill] sm:$0xff] }
 0x1ae   : > { %8977 = vst [vmem:[#allocation113_spill] sm:$0xff] %v5784_v61  ;;  %v8994_v61 = vld [vmem:[#allocation44_spill] sm:$0xff] }
 0x1af   : > { %8978 = vst [vmem:[#allocation114_spill] sm:$0xff] %v5786_v62  ;;  %v8993_v62 = vld [vmem:[#allocation40_spill] sm:$0xff] }
 0x1b2   : > { %1181 = vrot.lane.b32.xlu0 %v8979_v34, %s4973_s19  ;;  %1185 = vrot.lane.b32.xlu2 %v8980_v24, %s4973_s19  ;;  %v8985_v34 = vld [vmem:[#allocation33_spill] sm:$0xff] }
 0x1b3   : > { %1183 = vrot.lane.b32.xlu1 %v8981_v47, %s4973_s19 }
 0x1b4   : > { %v5794_v14 = vpop.permute.xlu0 %1033  ;;  %v5796_v30 = vpop.permute.xlu2 %1055 }
 0x1b5   : > { %8982 = vst [vmem:[#allocation23_spill] sm:$0xff] %v5794_v14  ;;  %v5798_v13 = vpop.permute.xlu1 %1035  ;;  %v492_v14 = vld [vmem:[#allocation2 + $0x38] sm:$0xff] }
 0x1b6   : > { %8983 = vst [vmem:[#allocation29_spill] sm:$0xff] %v5796_v30  ;;  %v5814_v30 = vld [vmem:[#allocation2 + $0x18a] sm:$0xff] }
 0x1ba   : > { %1187 = vrot.lane.b32.xlu0 %v8984_v17, %s4973_s19  ;;  %1191 = vrot.lane.b32.xlu2 %v5800_v23, %s4973_s19 }
 0x1bb   : > { %1189 = vrot.lane.b32.xlu1 %v8985_v34, %s4973_s19 }
 0x1bc   : > { %v5808_v24 = vpop.permute.xlu0 %1039  ;;  %v5810_v47 = vpop.permute.xlu2 %1061 }
 0x1bd   : > { %8986 = vst [vmem:[#allocation27_spill] sm:$0xff] %v5808_v24  ;;  %v5812_v20 = vpop.permute.xlu1 %1041  ;;  %v578_v24 = vld [vmem:[#allocation2 + $0x142] sm:$0xff] }
 0x1be   : > { %8987 = vst [vmem:[#allocation28_spill] sm:$0xff] %v5810_v47  ;;  %v493_v47 = vld [vmem:[#allocation2 + $0x48] sm:$0xff] }
 0x1bf   : > { %8988 = vst [vmem:[#allocation33_spill] sm:$0xff] %v5812_v20  ;;  %v545_v20 = vld [vmem:[#allocation2 + $0x139] sm:$0xff] }
 0x1c2   : > { %1193 = vrot.lane.b32.xlu0 %v5814_v30, %s4973_s19  ;;  %1261 = vrot.lane.b32.xlu2 %v492_v14, %s4974_s20 }
 0x1c3   : > { %1259 = vrot.lane.b32.xlu1 %v491_v59, %s4974_s20 }
 0x1c4   : > { %v5820_v17 = vpop.permute.xlu0 %1045  ;;  %v5822_v34 = vpop.permute.xlu2 %1131 }
 0x1c5   : > { %8989 = vst [vmem:[#allocation115_spill] sm:$0xff] %v5820_v17  ;;  %v5824_v60 = vpop.permute.xlu1 %1047  ;;  %v516_v17 = vld [vmem:[#allocation2 + $0x158] sm:$0xff] }
 0x1c6   : > { %8990 = vst [vmem:[#allocation116_spill] sm:$0xff] %v5824_v60 }
 0x1ca   : > { %1263 = vrot.lane.b32.xlu0 %v493_v47, %s4974_s20  ;;  %1267 = vrot.lane.b32.xlu2 %v495_v12, %s4974_s20 }
 0x1cb   : > { %1265 = vrot.lane.b32.xlu1 %v494_v8, %s4974_s20 }
 0x1cc   : > { %v5829_v1 = vpop.permute.xlu0 %1051  ;;  %v5831_v14 = vpop.permute.xlu2 %1137 }
 0x1cd   : > { %8991 = vst [vmem:[#allocation117_spill] sm:$0xff] %v5829_v1  ;;  %v5833_v59 = vpop.permute.xlu1 %1053  ;;  %v501_v1 = vld [vmem:[#allocation2 + $0xa8] sm:$0xff] }
 0x1ce   : > { %8992 = vst [vmem:[#allocation118_spill] sm:$0xff] %v5833_v59  ;;  %v8998_v59 = vld [vmem:[#allocation49_spill] sm:$0xff] }
 0x1d2   : > { %1269 = vrot.lane.b32.xlu0 %v8993_v62, %s4974_s20  ;;  %1273 = vrot.lane.b32.xlu2 %v498_v53, %s4974_s20 }
 0x1d3   : > { %1271 = vrot.lane.b32.xlu1 %v8994_v61, %s4974_s20 }
 0x1d4   : > { %v5840_v47 = vpop.permute.xlu0 %1057  ;;  %v5842_v12 = vpop.permute.xlu2 %1143 }
 0x1d5   : > { %8995 = vst [vmem:[#allocation40_spill] sm:$0xff] %v5840_v47  ;;  %v5844_v8 = vpop.permute.xlu1 %1059  ;;  %v504_v47 = vld [vmem:[#allocation2 + $0xc8] sm:$0xff] }
 0x1d6   : > { %8996 = vst [vmem:[#allocation44_spill] sm:$0xff] %v5844_v8  ;;  %v5860_v8 = vld [vmem:[#allocation2 + $0x169] sm:$0xff] }
 0x1d7   : > { %219 = vst.msk [vmem:[#allocation2 + $0x199] sm:$0xff] %vm177_vm0, %v5860_v8 }
 0x1da   : > { %1275 = vrot.lane.b32.xlu0 %v8997_v9, %s4974_s20  ;;  %1279 = vrot.lane.b32.xlu2 %v501_v1, %s4974_s20  ;;  %v9003_v9 = vld [vmem:[#allocation54_spill] sm:$0xff] }
 0x1db   : > { %1277 = vrot.lane.b32.xlu1 %v8998_v59, %s4974_s20 }
 0x1dc   : > { %v5851_v62 = vpop.permute.xlu0 %1063  ;;  %v5853_v53 = vpop.permute.xlu2 %1149 }
 0x1dd   : > { %8999 = vst [vmem:[#allocation45_spill] sm:$0xff] %v5851_v62  ;;  %v5855_v61 = vpop.permute.xlu1 %1065 }
 0x1de   : > { %9000 = vst [vmem:[#allocation49_spill] sm:$0xff] %v5853_v53  ;;  %v546_v53 = vld [vmem:[#allocation2 + $0x141] sm:$0xff] }
 0x1df   : > { %9001 = vst [vmem:[#allocation119_spill] sm:$0xff] %v5855_v61  ;;  %v507_v61 = vld [vmem:[#allocation2 + $0xf0] sm:$0xff] }
 0x1e2   : > { %1281 = vrot.lane.b32.xlu0 %v9002_v39, %s4974_s20  ;;  %1285 = vrot.lane.b32.xlu2 %v504_v47, %s4974_s20  ;;  %v5875_v39 = vld [vmem:[#allocation2 + $0x171] sm:$0xff]  ;;  %v238_v47 = vld [vmem:[#allocation2 + $0x19a] sm:$0x1] }
 0x1e3   : > { %1283 = vrot.lane.b32.xlu1 %v9003_v9, %s4974_s20  ;;  %v9005_v9 = vld [vmem:[#allocation58_spill] sm:$0xff]  ;;  %220 = vst.msk [vmem:[#allocation2 + $0x1a1] sm:$0xff] %vm177_vm0, %v5875_v39 }
 0x1e4   : > { %v5866_v1 = vpop.permute.xlu0 %1133  ;;  %v5868_v59 = vpop.permute.xlu2 %1155  ;;  %257 = vst.msk [vmem:[#allocation2 + $0x198] sm:$0x1] %vm239_vm1, %v238_v47  ;;  %v9011_v47 = vld [vmem:[#allocation64_spill] sm:$0xff] }
 0x1e5   : > { %9004 = vst [vmem:[#allocation50_spill] sm:$0xff] %v5868_v59  ;;  %v5870_v62 = vpop.permute.xlu1 %1135 }
 0x1ea   : > { %1287 = vrot.lane.b32.xlu0 %v5461_v28, %s4974_s20  ;;  %1291 = vrot.lane.b32.xlu2 %v507_v61, %s4974_s20  ;;  %v510_v28 = vld [vmem:[#allocation2 + $0x110] sm:$0xff]  ;;  %v9007_v61 = vld [vmem:[#allocation59_spill] sm:$0xff] }
 0x1eb   : > { %1289 = vrot.lane.b32.xlu1 %v9005_v9, %s4974_s20 }
 0x1ec   : > { %v5881_v16 = vpop.permute.xlu0 %1139  ;;  %v5883_v59 = vpop.permute.xlu2 %1161 }
 0x1ed   : > { %9006 = vst [vmem:[#allocation54_spill] sm:$0xff] %v5883_v59  ;;  %v5886_v60 = vpop.permute.xlu1 %1141  ;;  %v513_v59 = vld [vmem:[#allocation2 + $0x138] sm:$0xff] }
 0x1f2   : > { %1293 = vrot.lane.b32.xlu0 %v9007_v61, %s4974_s20  ;;  %1297 = vrot.lane.b32.xlu2 %v510_v28, %s4974_s20 }
 0x1f3   : > { %1295 = vrot.lane.b32.xlu1 %v9008_v6, %s4974_s20 }
 0x1f4   : > { %v5893_v9 = vpop.permute.xlu0 %1145  ;;  %v5895_v54 = vpop.permute.xlu2 %1167 }
 0x1f5   : > { %9009 = vst [vmem:[#allocation58_spill] sm:$0xff] %v5895_v54  ;;  %v5897_v55 = vpop.permute.xlu1 %1147 }
 0x1f6   : > { %9010 = vst [vmem:[#allocation59_spill] sm:$0xff] %v5897_v55 }
 0x1fa   : > { %1299 = vrot.lane.b32.xlu0 %v9011_v47, %s4974_s20  ;;  %1303 = vrot.lane.b32.xlu2 %v513_v59, %s4974_s20 }
 0x1fb   : > { %1301 = vrot.lane.b32.xlu1 %v9012_v15, %s4974_s20 }
 0x1fc   : > { %v5904_v61 = vpop.permute.xlu0 %1151  ;;  %v5906_v28 = vpop.permute.xlu2 %1173 }
 0x1fd   : > { %9013 = vst [vmem:[#allocation63_spill] sm:$0xff] %v5904_v61  ;;  %v5908_v6 = vpop.permute.xlu1 %1153  ;;  %v527_v61 = vld [vmem:[#allocation2 + $0x61] sm:$0xff] }
 0x1fe   : > { %9014 = vst [vmem:[#allocation64_spill] sm:$0xff] %v5906_v28  ;;  %v521_v28 = vld [vmem:[#allocation2 + $0x198] sm:$0xff] }
 0x1ff   : > { %9015 = vst [vmem:[#allocation68_spill] sm:$0xff] %v5908_v6  ;;  %v9020_v6 = vld [vmem:[#allocation77_spill] sm:$0xff] }
 0x202   : > { %1305 = vrot.lane.b32.xlu0 %v9016_v56, %s4974_s20  ;;  %1309 = vrot.lane.b32.xlu2 %v516_v17, %s4974_s20 }
 0x203   : > { %1307 = vrot.lane.b32.xlu1 %v5522_v19, %s4974_s20 }
 0x204   : > { %v5915_v47 = vpop.permute.xlu0 %1157  ;;  %v5917_v59 = vpop.permute.xlu2 %1179 }
 0x205   : > { %9017 = vst [vmem:[#allocation69_spill] sm:$0xff] %v5915_v47  ;;  %v5919_v15 = vpop.permute.xlu1 %1159  ;;  %v522_v47 = vld [vmem:[#allocation2 + $0x1a0] sm:$0xff] }
 0x206   : > { %9018 = vst [vmem:[#allocation120_spill] sm:$0xff] %v5917_v59  ;;  %v9022_v59 = vld [vmem:[#allocation76_spill] sm:$0xff] }
 0x207   : > { %9019 = vst [vmem:[#allocation121_spill] sm:$0xff] %v5919_v15  ;;  %v523_v15 = vld [vmem:[#allocation2 + $0x31] sm:$0xff] }
 0x20a   : > { %1311 = vrot.lane.b32.xlu0 %v5524_v3, %s4974_s20  ;;  %1315 = vrot.lane.b32.xlu2 %v5539_v57, %s4974_s20 }
 0x20b   : > { %1313 = vrot.lane.b32.xlu1 %v9020_v6, %s4974_s20 }
 0x20c   : > { %v5927_v56 = vpop.permute.xlu0 %1163  ;;  %v5929_v17 = vpop.permute.xlu2 %1185 }
 0x20d   : > { %9021 = vst [vmem:[#allocation77_spill] sm:$0xff] %v5929_v17  ;;  %v5931_v19 = vpop.permute.xlu1 %1165  ;;  %v524_v17 = vld [vmem:[#allocation2 + $0x39] sm:$0xff] }
 0x212   : > { %1317 = vrot.lane.b32.xlu0 %v9022_v59, %s4974_s20  ;;  %1321 = vrot.lane.b32.xlu2 %v522_v47, %s4974_s20 }
 0x213   : > { %1319 = vrot.lane.b32.xlu1 %v521_v28, %s4974_s20 }
 0x214   : > { %v5937_v3 = vpop.permute.xlu0 %1169  ;;  %v5939_v57 = vpop.permute.xlu2 %1191 }
 0x215   : > { %9023 = vst [vmem:[#allocation76_spill] sm:$0xff] %v5937_v3  ;;  %v5941_v6 = vpop.permute.xlu1 %1171  ;;  %v544_v3 = vld [vmem:[#allocation2 + $0x129] sm:$0xff] }
 0x216   : > { %9024 = vst [vmem:[#allocation122_spill] sm:$0xff] %v5939_v57  ;;  %v528_v57 = vld [vmem:[#allocation2 + $0x69] sm:$0xff] }
 0x217   : > { %9025 = vst [vmem:[#allocation123_spill] sm:$0xff] %v5941_v6  ;;  %v531_v6 = vld [vmem:[#allocation2 + $0x91] sm:$0xff] }
 0x21a   : > { %1387 = vrot.lane.b32.xlu0 %v523_v15, %s4975_s21  ;;  %1391 = vrot.lane.b32.xlu2 %v525_v7, %s4975_s21 }
 0x21b   : > { %1389 = vrot.lane.b32.xlu1 %v524_v17, %s4975_s21 }
 0x21c   : > { %v5946_v59 = vpop.permute.xlu0 %1175  ;;  %v5948_v47 = vpop.permute.xlu2 %1261 }
 0x21d   : > { %9026 = vst [vmem:[#allocation124_spill] sm:$0xff] %v5946_v59  ;;  %v5950_v28 = vpop.permute.xlu1 %1177  ;;  %v529_v59 = vld [vmem:[#allocation2 + $0x79] sm:$0xff] }
 0x21e   : > { %9027 = vst [vmem:[#allocation125_spill] sm:$0xff] %v5950_v28  ;;  %v534_v28 = vld [vmem:[#allocation2 + $0xb1] sm:$0xff] }
 0x222   : > { %1393 = vrot.lane.b32.xlu0 %v526_v48, %s4975_s21  ;;  %1397 = vrot.lane.b32.xlu2 %v528_v57, %s4975_s21 }
 0x223   : > { %1395 = vrot.lane.b32.xlu1 %v527_v61, %s4975_s21 }
 0x224   : > { %v5955_v15 = vpop.permute.xlu0 %1181  ;;  %v5957_v7 = vpop.permute.xlu2 %1267 }
 0x225   : > { %9028 = vst [vmem:[#allocation126_spill] sm:$0xff] %v5955_v15  ;;  %v5959_v17 = vpop.permute.xlu1 %1183  ;;  %v532_v15 = vld [vmem:[#allocation2 + $0x99] sm:$0xff] }
 0x226   : > { %9029 = vst [vmem:[#allocation127_spill] sm:$0xff] %v5959_v17  ;;  %v537_v17 = vld [vmem:[#allocation2 + $0xd9] sm:$0xff] }
 0x22a   : > { %1399 = vrot.lane.b32.xlu0 %v529_v59, %s4975_s21  ;;  %1403 = vrot.lane.b32.xlu2 %v531_v6, %s4975_s21 }
 0x22b   : > { %1401 = vrot.lane.b32.xlu1 %v530_v21, %s4975_s21 }
 0x22c   : > { %v5964_v48 = vpop.permute.xlu0 %1187  ;;  %v5966_v57 = vpop.permute.xlu2 %1273 }
 0x22d   : > { %9030 = vst [vmem:[#allocation128_spill] sm:$0xff] %v5964_v48  ;;  %v5968_v61 = vpop.permute.xlu1 %1189  ;;  %v535_v48 = vld [vmem:[#allocation2 + $0xc1] sm:$0xff] }
 0x22e   : > { %9031 = vst [vmem:[#allocation129_spill] sm:$0xff] %v5968_v61  ;;  %v540_v61 = vld [vmem:[#allocation2 + $0xf9] sm:$0xff] }
 0x232   : > { %1405 = vrot.lane.b32.xlu0 %v532_v15, %s4975_s21  ;;  %1409 = vrot.lane.b32.xlu2 %v534_v28, %s4975_s21 }
 0x233   : > { %1407 = vrot.lane.b32.xlu1 %v533_v10, %s4975_s21 }
 0x234   : > { %v5973_v59 = vpop.permute.xlu0 %1193  ;;  %v5975_v6 = vpop.permute.xlu2 %1279 }
 0x235   : > { %9032 = vst [vmem:[#allocation130_spill] sm:$0xff] %v5973_v59  ;;  %v5977_v21 = vpop.permute.xlu1 %1259  ;;  %v538_v59 = vld [vmem:[#allocation2 + $0xe1] sm:$0xff] }
 0x236   : > { %9033 = vst [vmem:[#allocation131_spill] sm:$0xff] %v5975_v6  ;;  %v539_v6 = vld [vmem:[#allocation2 + $0xf1] sm:$0xff] }
 0x23a   : > { %1411 = vrot.lane.b32.xlu0 %v535_v48, %s4975_s21  ;;  %1415 = vrot.lane.b32.xlu2 %v537_v17, %s4975_s21 }
 0x23b   : > { %1413 = vrot.lane.b32.xlu1 %v536_v63, %s4975_s21 }
 0x23c   : > { %v5982_v15 = vpop.permute.xlu0 %1263  ;;  %v5984_v28 = vpop.permute.xlu2 %1285 }
 0x23d   : > { %9034 = vst [vmem:[#allocation132_spill] sm:$0xff] %v5984_v28  ;;  %v5986_v10 = vpop.permute.xlu1 %1265  ;;  %v542_v28 = vld [vmem:[#allocation2 + $0x111] sm:$0xff] }
 0x242   : > { %1417 = vrot.lane.b32.xlu0 %v538_v59, %s4975_s21  ;;  %1421 = vrot.lane.b32.xlu2 %v540_v61, %s4975_s21 }
 0x243   : > { %1419 = vrot.lane.b32.xlu1 %v539_v6, %s4975_s21 }
 0x244   : > { %v5991_v48 = vpop.permute.xlu0 %1269  ;;  %v5993_v17 = vpop.permute.xlu2 %1291 }
 0x245   : > { %v5995_v63 = vpop.permute.xlu1 %1271 }
 0x24a   : > { %1423 = vrot.lane.b32.xlu0 %v541_v33, %s4975_s21  ;;  %1427 = vrot.lane.b32.xlu2 %v543_v22, %s4975_s21 }
 0x24b   : > { %1425 = vrot.lane.b32.xlu1 %v542_v28, %s4975_s21 }
 0x24c   : > { %v6000_v59 = vpop.permute.xlu0 %1275  ;;  %v6002_v61 = vpop.permute.xlu2 %1297 }
 0x24d   : > { %9035 = vst [vmem:[#allocation133_spill] sm:$0xff] %v6000_v59  ;;  %v6004_v6 = vpop.permute.xlu1 %1277  ;;  %v295_v59 = vld [vmem:[%s8830_s1 + $0x8] sm:$0xff] }
 0x24e   : > { %9036 = vst [vmem:[#allocation134_spill] sm:$0xff] %v6002_v61  ;;  %v566_v61 = vld [vmem:[#allocation2 + $0xb2] sm:$0xff] }
 0x24f   : > { %9037 = vst [vmem:[#allocation135_spill] sm:$0xff] %v6004_v6  ;;  %v563_v6 = vld [vmem:[#allocation2 + $0x92] sm:$0xff] }
 0x252   : > { %1429 = vrot.lane.b32.xlu0 %v544_v3, %s4975_s21  ;;  %1433 = vrot.lane.b32.xlu2 %v546_v53, %s4975_s21 }
 0x253   : > { %1431 = vrot.lane.b32.xlu1 %v545_v20, %s4975_s21 }
 0x254   : > { %v6009_v33 = vpop.permute.xlu0 %1281  ;;  %v6011_v22 = vpop.permute.xlu2 %1303 }
 0x255   : > { %9038 = vst [vmem:[#allocation136_spill] sm:$0xff] %v6009_v33  ;;  %v6013_v28 = vpop.permute.xlu1 %1283  ;;  %v559_v33 = vld [vmem:[#allocation2 + $0x62] sm:$0xff] }
 0x256   : > { %9039 = vst [vmem:[#allocation137_spill] sm:$0xff] %v6011_v22  ;;  %v557_v22 = vld [vmem:[#allocation2 + $0x4a] sm:$0xff] }
 0x257   : > { %9040 = vst [vmem:[#allocation138_spill] sm:$0xff] %v6013_v28  ;;  %v555_v28 = vld [vmem:[#allocation2 + $0x32] sm:$0xff] }
 0x25a   : > { %1435 = vrot.lane.b32.xlu0 %v547_v40, %s4975_s21  ;;  %1439 = vrot.lane.b32.xlu2 %v5860_v8, %s4975_s21 }
 0x25b   : > { %1437 = vrot.lane.b32.xlu1 %v548_v49, %s4975_s21 }
 0x25c   : > { %v6019_v3 = vpop.permute.xlu0 %1287  ;;  %v6021_v53 = vpop.permute.xlu2 %1309 }
 0x25d   : > { %9041 = vst [vmem:[#allocation139_spill] sm:$0xff] %v6019_v3  ;;  %v6023_v20 = vpop.permute.xlu1 %1289  ;;  %v553_v3 = vld [vmem:[#allocation2 + $0x199] sm:$0xff] }
 0x25e   : > { %9042 = vst [vmem:[#allocation140_spill] sm:$0xff] %v6021_v53  ;;  %v554_v53 = vld [vmem:[#allocation2 + $0x1a1] sm:$0xff] }
 0x25f   : > { %9043 = vst [vmem:[#allocation141_spill] sm:$0xff] %v6023_v20  ;;  %v556_v20 = vld [vmem:[#allocation2 + $0x3a] sm:$0xff] }
 0x262   : > { %1441 = vrot.lane.b32.xlu0 %v5875_v39, %s4975_s21  ;;  %1445 = vrot.lane.b32.xlu2 %v5677_v42, %s4975_s21 }
 0x263   : > { %1443 = vrot.lane.b32.xlu1 %v5675_v25, %s4975_s21 }
 0x264   : > { %v6031_v40 = vpop.permute.xlu0 %1293  ;;  %v6033_v8 = vpop.permute.xlu2 %1315 }
 0x265   : > { %9044 = vst [vmem:[#allocation142_spill] sm:$0xff] %v6033_v8  ;;  %v6035_v49 = vpop.permute.xlu1 %1295  ;;  %v558_v8 = vld [vmem:[#allocation2 + $0x52] sm:$0xff] }
 0x266   : > { %9045 = vst [vmem:[#allocation143_spill] sm:$0xff] %v6035_v49  ;;  %v296_v49 = vld [vmem:[%s8830_s1 + $0x10] sm:$0xff] }
 0x26a   : > { %1447 = vrot.lane.b32.xlu0 %v553_v3, %s4975_s21  ;;  %1515 = vrot.lane.b32.xlu2 %v555_v28, %s4976_s22 }
 0x26b   : > { %1449 = vrot.lane.b32.xlu1 %v554_v53, %s4975_s21 }
 0x26c   : > { %v6040_v42 = vpop.permute.xlu0 %1299  ;;  %v6042_v39 = vpop.permute.xlu2 %1321 }
 0x26d   : > { %9046 = vst [vmem:[#allocation144_spill] sm:$0xff] %v6040_v42  ;;  %v6044_v25 = vpop.permute.xlu1 %1301  ;;  %v561_v42 = vld [vmem:[#allocation2 + $0x7a] sm:$0xff] }
 0x26e   : > { %9047 = vst [vmem:[#allocation145_spill] sm:$0xff] %v6042_v39  ;;  %v560_v39 = vld [vmem:[#allocation2 + $0x6a] sm:$0xff] }
 0x26f   : > { %9048 = vst [vmem:[#allocation146_spill] sm:$0xff] %v6044_v25  ;;  %v564_v25 = vld [vmem:[#allocation2 + $0x9a] sm:$0xff] }
 0x272   : > { %1517 = vrot.lane.b32.xlu0 %v556_v20, %s4976_s22  ;;  %1521 = vrot.lane.b32.xlu2 %v558_v8, %s4976_s22 }
 0x273   : > { %1519 = vrot.lane.b32.xlu1 %v557_v22, %s4976_s22 }
 0x274   : > { %v6049_v3 = vpop.permute.xlu0 %1305  ;;  %v6051_v28 = vpop.permute.xlu2 %1391 }
 0x275   : > { %9049 = vst [vmem:[#allocation147_spill] sm:$0xff] %v6049_v3  ;;  %v6053_v53 = vpop.permute.xlu1 %1307  ;;  %v562_v3 = vld [vmem:[#allocation2 + $0x82] sm:$0xff] }
 0x276   : > { %9050 = vst [vmem:[#allocation148_spill] sm:$0xff] %v6053_v53  ;;  %v567_v53 = vld [vmem:[#allocation2 + $0xc2] sm:$0xff] }
 0x27a   : > { %1523 = vrot.lane.b32.xlu0 %v559_v33, %s4976_s22  ;;  %1527 = vrot.lane.b32.xlu2 %v561_v42, %s4976_s22 }
 0x27b   : > { %1525 = vrot.lane.b32.xlu1 %v560_v39, %s4976_s22 }
 0x27c   : > { %v6058_v20 = vpop.permute.xlu0 %1311  ;;  %v6060_v8 = vpop.permute.xlu2 %1397 }
 0x27d   : > { %9051 = vst [vmem:[#allocation149_spill] sm:$0xff] %v6058_v20  ;;  %v6062_v22 = vpop.permute.xlu1 %1313  ;;  %v565_v20 = vld [vmem:[#allocation2 + $0xaa] sm:$0xff] }
 0x27e   : > { %9052 = vst [vmem:[#allocation150_spill] sm:$0xff] %v6062_v22  ;;  %v570_v22 = vld [vmem:[#allocation2 + $0xe2] sm:$0xff] }
 0x282   : > { %1529 = vrot.lane.b32.xlu0 %v562_v3, %s4976_s22  ;;  %1533 = vrot.lane.b32.xlu2 %v564_v25, %s4976_s22 }
 0x283   : > { %1531 = vrot.lane.b32.xlu1 %v563_v6, %s4976_s22 }
 0x284   : > { %v6067_v33 = vpop.permute.xlu0 %1317  ;;  %v6069_v42 = vpop.permute.xlu2 %1403 }
 0x285   : > { %9053 = vst [vmem:[#allocation151_spill] sm:$0xff] %v6067_v33  ;;  %v6071_v39 = vpop.permute.xlu1 %1319  ;;  %v568_v33 = vld [vmem:[#allocation2 + $0xca] sm:$0xff] }
 0x286   : > { %9054 = vst [vmem:[#allocation152_spill] sm:$0xff] %v6069_v42  ;;  %v275_v42 = vld [vmem:[#allocation2 + $0x1a7] sm:$0x1] }
 0x287   : > { %9055 = vst [vmem:[#allocation153_spill] sm:$0xff] %v6071_v39  ;;  %v571_v39 = vld [vmem:[#allocation2 + $0xf2] sm:$0xff] }
 0x288   : > { %293 = vst.msk [vmem:[#allocation2 + $0x1a9] sm:$0x1] %vm239_vm1, %v275_v42  ;;  %v574_v42 = vld [vmem:[#allocation2 + $0x112] sm:$0xff] }
 0x28a   : > { %1535 = vrot.lane.b32.xlu0 %v565_v20, %s4976_s22  ;;  %1539 = vrot.lane.b32.xlu2 %v567_v53, %s4976_s22 }
 0x28b   : > { %1537 = vrot.lane.b32.xlu1 %v566_v61, %s4976_s22 }
 0x28c   : > { %v6076_v3 = vpop.permute.xlu0 %1387  ;;  %v6078_v25 = vpop.permute.xlu2 %1409 }
 0x28d   : > { %9056 = vst [vmem:[#allocation154_spill] sm:$0xff] %v6078_v25  ;;  %v6080_v6 = vpop.permute.xlu1 %1389  ;;  %v572_v25 = vld [vmem:[#allocation2 + $0xfa] sm:$0xff] }
 0x292   : > { %1541 = vrot.lane.b32.xlu0 %v568_v33, %s4976_s22  ;;  %1545 = vrot.lane.b32.xlu2 %v570_v22, %s4976_s22 }
 0x293   : > { %1543 = vrot.lane.b32.xlu1 %v569_v50, %s4976_s22 }
 0x294   : > { %v6085_v20 = vpop.permute.xlu0 %1393  ;;  %v6087_v53 = vpop.permute.xlu2 %1415 }
 0x295   : > { %9057 = vst [vmem:[#allocation155_spill] sm:$0xff] %v6087_v53  ;;  %v6089_v61 = vpop.permute.xlu1 %1395  ;;  %v298_v53 = vld [vmem:[%s8830_s1 + $0x20] sm:$0xf] }
 0x296   : > { %4810 = vmatpush.msk.msra.mxu0 %vm1971_vm2, %v298_v53  ;;  %4885 = vmatpush.msk.msra.mxu2 %vm1971_vm2, %v298_v53 }
 0x29a   : > { %1547 = vrot.lane.b32.xlu0 %v571_v39, %s4976_s22  ;;  %1551 = vrot.lane.b32.xlu2 %v573_v2, %s4976_s22  ;;  %v297_v2 = vld [vmem:[%s8830_s1 + $0x18] sm:$0xff]  ;;  %v576_v39 = vld [vmem:[#allocation2 + $0x12a] sm:$0xff] }
 0x29b   : > { %1549 = vrot.lane.b32.xlu1 %v572_v25, %s4976_s22  ;;  %v575_v25 = vld [vmem:[#allocation2 + $0x122] sm:$0xff]  ;;  %1987 = vmatpush.msra.mxu0 %v297_v2 }
 0x29c   : > { %v6095_v22 = vpop.permute.xlu0 %1399  ;;  %v6097_v50 = vpop.permute.xlu2 %1421  ;;  %4886 = vmatpush.msra.mxu2 %v297_v2  ;;  %v294_v2 = vld [vmem:[%s8830_s1] sm:$0xff] }
 0x29d   : > { %v6099_v33 = vpop.permute.xlu1 %1401  ;;  %1988 = vmatpush.msra.mxu0 %v296_v49 }
 0x29e   : > { %4887 = vmatpush.msra.mxu2 %v296_v49 }
 0x29f   : > { %1989 = vmatpush.msra.mxu0 %v295_v59 }
 0x2a0   : > { %4888 = vmatpush.msra.mxu2 %v295_v59  ;;  %v581_v59 = vld [vmem:[#allocation2 + $0x16a] sm:$0xff] }
 0x2a1   : > { %1990 = vmatpush.msra.mxu0 %v294_v2 }
 0x2a2   : > { %1553 = vrot.lane.b32.xlu0 %v574_v42, %s4976_s22  ;;  %1557 = vrot.lane.b32.xlu2 %v576_v39, %s4976_s22  ;;  %v577_v42 = vld [vmem:[#allocation2 + $0x13a] sm:$0xff]  ;;  %v579_v39 = vld [vmem:[#allocation2 + $0x152] sm:$0xff] }
 0x2a3   : > { %1555 = vrot.lane.b32.xlu1 %v575_v25, %s4976_s22  ;;  %4889 = vmatpush.msra.mxu2 %v294_v2 }
 0x2a4   : > { %v6118_v53 = vpop.permute.xlu0 %1405  ;;  %v6120_v55 = vpop.permute.xlu2 %1427 }
 0x2a5   : > { %9058 = vst [vmem:[#allocation156_spill] sm:$0xff] %v6118_v53  ;;  %v6122_v54 = vpop.permute.xlu1 %1407  ;;  %v582_v53 = vld [vmem:[#allocation2 + $0x172] sm:$0xff] }
 0x2a6   : > { %9059 = vst [vmem:[#allocation157_spill] sm:$0xff] %v6120_v55  ;;  %v580_v55 = vld [vmem:[#allocation2 + $0x15a] sm:$0xff] }
 0x2a7   : > { %9060 = vst [vmem:[#allocation158_spill] sm:$0xff] %v6122_v54 }
 0x2aa   : > { %1559 = vrot.lane.b32.xlu0 %v577_v42, %s4976_s22  ;;  %1563 = vrot.lane.b32.xlu2 %v579_v39, %s4976_s22  ;;  %v585_v39 = vld [vmem:[#allocation2 + $0x19a] sm:$0xff] }
 0x2ab   : > { %1561 = vrot.lane.b32.xlu1 %v578_v24, %s4976_s22 }
 0x2ac   : > { %v6130_v49 = vpop.permute.xlu0 %1411  ;;  %v6132_v25 = vpop.permute.xlu2 %1433 }
 0x2ad   : > { %9061 = vst [vmem:[#allocation159_spill] sm:$0xff] %v6130_v49  ;;  %v6134_v54 = vpop.permute.xlu1 %1413 }
 0x2ae   : > { %9062 = vst [vmem:[#allocation160_spill] sm:$0xff] %v6132_v25  ;;  %v9068_v25 = vld [vmem:[#allocation34_spill] sm:$0xff] }
 0x2af   : > { %9063 = vst [vmem:[#allocation161_spill] sm:$0xff] %v6134_v54  ;;  %v299_v54 = vld [vmem:[#allocation2] sm:$0xff] }
 0x2b2   : > { %1565 = vrot.lane.b32.xlu0 %v580_v55, %s4976_s22  ;;  %1569 = vrot.lane.b32.xlu2 %v582_v53, %s4976_s22 }
 0x2b3   : > { %1567 = vrot.lane.b32.xlu1 %v581_v59, %s4976_s22 }
 0x2b4   : > { %v6139_v2 = vpop.permute.xlu0 %1417  ;;  %v6141_v42 = vpop.permute.xlu2 %1439 }
 0x2b5   : > { %9064 = vst [vmem:[#allocation162_spill] sm:$0xff] %v6139_v2  ;;  %v6143_v24 = vpop.permute.xlu1 %1419 }
 0x2b6   : > { %9065 = vst [vmem:[#allocation163_spill] sm:$0xff] %v6141_v42  ;;  %v9067_v42 = vld [vmem:[#allocation11_spill] sm:$0xff] }
 0x2b7   : > { %v1611_v2 = vsel %vm177_vm0, %v299_v54, %v9067_v42 }
 0x2b8   : > { %v1644_v49 = vsel %vm1643_vm3, %v1611_v2, %v9068_v25 }
 0x2ba   : > { %1571 = vrot.lane.b32.xlu0 %v5800_v23, %s4976_s22  ;;  %1575 = vrot.lane.b32.xlu2 %v585_v39, %s4976_s22  ;;  %v586_v23 = vld [vmem:[#allocation2 + $0x1a2] sm:$0xff]  ;;  %v1677_v39 = vsel %vm1676_vm4, %v1644_v49, %v5601_v32 }
 0x2bb   : > { %1573 = vrot.lane.b32.xlu1 %v5814_v30, %s4976_s22  ;;  %v1710_v30 = vsel %vm1709_vm6, %v1677_v39, %v5733_v35 }
 0x2bc   : > { %v6150_v55 = vpop.permute.xlu0 %1423  ;;  %v6152_v53 = vpop.permute.xlu2 %1445 }
 0x2bd   : > { %9066 = vst [vmem:[#allocation164_spill] sm:$0xff] %v6152_v53  ;;  %v6154_v59 = vpop.permute.xlu1 %1425  ;;  %v1743_v53 = vsel %vm1742_vm5, %v1710_v30, %v5822_v34  ;;  %v9074_v30 = vld [vmem:[#allocation14_spill] sm:$0xff] }
 0x2be   : > { %v1776_v54 = vsel %vm1775_vm7, %v1743_v53, %v5977_v21  ;;  %v300_v53 = vld [vmem:[#allocation2 + $0x8] sm:$0xff] }
 0x2bf   : > { %v1809_v25 = vsel %vm1808_vm9, %v1776_v54, %v6076_v3  ;;  %v1612_v54 = vsel %vm177_vm0, %v300_v53, %v9074_v30 }
 0x2c2   : > { %1577 = vrot.lane.b32.xlu0 %v586_v23, %s4976_s22 }
 0x2c4   : > { %v6171_v32 = vpop.permute.xlu0 %1429  ;;  %v1516_v49 = vpop.permute.xlu2 %1515 }
 0x2c5   : > { %v6173_v2 = vpop.permute.xlu1 %1431  ;;  %v1842_v35 = vsel %vm1841_vm8, %v1809_v25, %v1516_v49 }
 0x2c6   : > { %9069 = vst [vmem:[#allocation11_spill] sm:$0xff] %v6173_v2  ;;  %4811 = vmatmul.msk.f32.vlgmr.msra.gmra.mxu0 %vm1874_vm10, %v1842_v35  ;;  %v9075_v2 = vld [vmem:[#allocation51_spill] sm:$0xff] }
 0x2c7   : > { %v1645_v25 = vsel %vm1643_vm3, %v1612_v54, %v9075_v2  ;;  %v4915_v2 = vld [vmem:[#allocation2 + $0x18] sm:$0xff] }
 0x2c8   : > { %v1678_v49 = vsel %vm1676_vm4, %v1645_v25, %v5563_v46  ;;  %v9076_v54 = vld [vmem:[#allocation9_spill] sm:$0xff] }
 0x2c9   : > { %v1711_v35 = vsel %vm1709_vm6, %v1678_v49, %v5737_v51  ;;  %v1613_v46 = vsel %vm177_vm0, %v4915_v2, %v9076_v54  ;;  %v9077_v51 = vld [vmem:[#allocation53_spill] sm:$0xff]  ;;  %v9078_v2 = vld [vmem:[#allocation12_spill] sm:$0xff] }
 0x2ca   : > { %v1646_v25 = vsel %vm1643_vm3, %v1613_v46, %v9077_v51 }
 0x2cc   : > { %v6177_v34 = vpop.permute.xlu0 %1435 }
 0x2cd   : > { %v6179_v42 = vpop.permute.xlu1 %1437 }
 0x2d4   : > { %v6181_v23 = vpop.permute.xlu0 %1441 }
 0x2d5   : > { %9070 = vst [vmem:[#allocation34_spill] sm:$0xff] %v6181_v23  ;;  %v6183_v21 = vpop.permute.xlu1 %1443 }
 0x2d6   : > { %9071 = vst [vmem:[#allocation165_spill] sm:$0xff] %v6183_v21  ;;  %v1744_v21 = vsel %vm1742_vm5, %v1711_v35, %v5866_v1  ;;  %v1679_v1 = vsel %vm1676_vm4, %v1646_v25, %v5609_v31 }
 0x2dc   : > { %v6185_v39 = vpop.permute.xlu0 %1447 }
 0x2dd   : > { %9072 = vst [vmem:[#allocation166_spill] sm:$0xff] %v6185_v39  ;;  %v6187_v3 = vpop.permute.xlu1 %1449  ;;  %v1777_v39 = vsel %vm1775_vm7, %v1744_v21, %v5948_v47  ;;  %v1522_v47 = vpop.permute.xlu2 %1521 }
 0x2de   : > { %9073 = vst [vmem:[#allocation167_spill] sm:$0xff] %v6187_v3  ;;  %v1810_v3 = vsel %vm1808_vm9, %v1777_v39, %v6080_v6  ;;  %v1712_v6 = vsel %vm1709_vm6, %v1679_v1, %v5699_v18  ;;  %v9079_v18 = vld [vmem:[#allocation38_spill] sm:$0xff] }
 0x2df   : > { %v1745_v21 = vsel %vm1742_vm5, %v1712_v6, %v5870_v62 }
 0x2e4   : > { %v1518_v23 = vpop.permute.xlu0 %1517 }
 0x2e5   : > { %v1520_v53 = vpop.permute.xlu1 %1519  ;;  %v1843_v30 = vsel %vm1841_vm8, %v1810_v3, %v1518_v23  ;;  %v1778_v23 = vsel %vm1775_vm7, %v1745_v21, %v5982_v15  ;;  %v1528_v46 = vpop.permute.xlu2 %1527  ;;  %v9080_v21 = vld [vmem:[#allocation4_spill] sm:$0xff] }
 0x2e6   : > { %4812 = vmatmul.msk.f32.gmra.mxu0 %vm1874_vm10, %v1843_v30  ;;  %v1811_v39 = vsel %vm1808_vm9, %v1778_v23, %v6051_v28  ;;  %v4916_v30 = vld [vmem:[#allocation2 + $0x20] sm:$0xff] }
 0x2e7   : > { %v1844_v35 = vsel %vm1841_vm8, %v1811_v39, %v1520_v53  ;;  %v1614_v31 = vsel %vm177_vm0, %v4916_v30, %v9078_v2 }
 0x2e8   : > { %v1647_v54 = vsel %vm1643_vm3, %v1614_v31, %v9079_v18  ;;  %v4918_v18 = vld [vmem:[#allocation2 + $0x38] sm:$0xff] }
 0x2e9   : > { %v1680_v62 = vsel %vm1676_vm4, %v1647_v54, %v5613_v38  ;;  %v4917_v38 = vld [vmem:[#allocation2 + $0x30] sm:$0xff] }
 0x2ea   : > { %v1713_v15 = vsel %vm1709_vm6, %v1680_v62, %v5745_v52  ;;  %v1615_v52 = vsel %vm177_vm0, %v4917_v38, %v9080_v21  ;;  %v9084_v38 = vld [vmem:[#allocation7_spill] sm:$0xff]  ;;  %v4920_v21 = vld [vmem:[#allocation2 + $0xc0] sm:$0xff] }
 0x2eb   : > { %v1746_v28 = vsel %vm1742_vm5, %v1713_v15, %v5831_v14  ;;  %v9081_v14 = vld [vmem:[#allocation55_spill] sm:$0xff] }
 0x2ec   : > { %v1524_v3 = vpop.permute.xlu0 %1523  ;;  %v1779_v53 = vsel %vm1775_vm7, %v1746_v28, %v5986_v10  ;;  %v1648_v23 = vsel %vm1643_vm3, %v1615_v52, %v9081_v14  ;;  %v9085_v52 = vld [vmem:[#allocation26_spill] sm:$0xff] }
 0x2ed   : > { %v1526_v49 = vpop.permute.xlu1 %1525  ;;  %v1812_v51 = vsel %vm1808_vm9, %v1779_v53, %v6085_v20  ;;  %v1681_v10 = vsel %vm1676_vm4, %v1648_v23, %v5575_v11  ;;  %v6255_v30 = vpop.permute.xlu2 %1533  ;;  %v9082_v11 = vld [vmem:[#allocation5_spill] sm:$0xff] }
 0x2ee   : > { %4813 = vmatmul.msk.f32.gmra.mxu0 %vm1874_vm10, %v1844_v35  ;;  %v1845_v6 = vsel %vm1841_vm8, %v1812_v51, %v1522_v47  ;;  %v1714_v20 = vsel %vm1709_vm6, %v1681_v10, %v5749_v4  ;;  %v1616_v54 = vsel %vm177_vm0, %v4918_v18, %v9082_v11 }
 0x2ef   : > { %v1747_v39 = vsel %vm1742_vm5, %v1714_v20, %v5881_v16  ;;  %v9083_v16 = vld [vmem:[#allocation57_spill] sm:$0xff] }
 0x2f0   : > { %v1780_v47 = vsel %vm1775_vm7, %v1747_v39, %v5957_v7  ;;  %v1649_v7 = vsel %vm1643_vm3, %v1616_v54, %v9083_v16  ;;  %v4921_v54 = vld [vmem:[#allocation2 + $0xc8] sm:$0xff]  ;;  %v9088_v16 = vld [vmem:[#allocation13_spill] sm:$0xff] }
 0x2f1   : > { %v1813_v35 = vsel %vm1808_vm9, %v1780_v47, %v6089_v61  ;;  %v1682_v61 = vsel %vm1676_vm4, %v1649_v7, %v5621_v37  ;;  %v4922_v7 = vld [vmem:[#allocation2 + $0x50] sm:$0xff] }
 0x2f2   : > { %v1846_v31 = vsel %vm1841_vm8, %v1813_v35, %v1524_v3  ;;  %v1715_v62 = vsel %vm1709_vm6, %v1682_v61, %v5711_v26  ;;  %v1627_v26 = vsel %vm177_vm0, %v4920_v21, %v9085_v52  ;;  %v4923_v52 = vld [vmem:[#allocation2 + $0x60] sm:$0xff] }
 0x2f3   : > { %v1748_v3 = vsel %vm1742_vm5, %v1715_v62, %v5886_v60  ;;  %v9086_v60 = vld [vmem:[#allocation42_spill] sm:$0xff] }
 0x2f4   : > { %v6235_v25 = vpop.permute.xlu0 %1529  ;;  %v1781_v15 = vsel %vm1775_vm7, %v1748_v3, %v5991_v48 }
 0x2f5   : > { %v6237_v1 = vpop.permute.xlu1 %1531  ;;  %v1814_v28 = vsel %vm1808_vm9, %v1781_v15, %v6060_v8  ;;  %v6284_v14 = vpop.permute.xlu2 %1539  ;;  %v9087_v8 = vld [vmem:[#allocation73_spill] sm:$0xff] }
 0x2f6   : > { %4814 = vmatmul.msk.f32.gmra.mxu0 %vm1874_vm10, %v1845_v6  ;;  %v1847_v51 = vsel %vm1841_vm8, %v1814_v28, %v1526_v49  ;;  %v4919_v6 = vld [vmem:[#allocation2 + $0x48] sm:$0xff]  ;;  %v1660_v23 = vsel %vm1643_vm3, %v1627_v26, %v9087_v8 }
 0x2f7   : > { %v1617_v37 = vsel %vm177_vm0, %v4919_v6, %v9084_v38  ;;  %v1693_v49 = vsel %vm1676_vm4, %v1660_v23, %v5623_v45 }
 0x2f8   : > { %v1650_v48 = vsel %vm1643_vm3, %v1617_v37, %v9086_v60  ;;  %v1726_v47 = vsel %vm1709_vm6, %v1693_v49, %v5798_v13  ;;  %v4924_v60 = vld [vmem:[#allocation2 + $0xd8] sm:$0xff] }
 0x2f9   : > { %v1683_v10 = vsel %vm1676_vm4, %v1650_v48, %v5625_v44 }
 0x2fa   : > { %v1716_v39 = vsel %vm1709_vm6, %v1683_v10, %v5758_v5  ;;  %v9096_v10 = vld [vmem:[#allocation27_spill] sm:$0xff] }
 0x2fb   : > { %v1749_v35 = vsel %vm1742_vm5, %v1716_v39, %v5842_v12 }
 0x2fc   : > { %v6257_v2 = vpop.permute.xlu0 %1535  ;;  %v1782_v44 = vsel %vm1775_vm7, %v1749_v35, %v5995_v63  ;;  %v9090_v63 = vld [vmem:[#allocation60_spill] sm:$0xff] }
 0x2fd   : > { %v6262_v4 = vpop.permute.xlu1 %1537  ;;  %v1815_v18 = vsel %vm1808_vm9, %v1782_v44, %v6095_v22  ;;  %v6329_v15 = vpop.permute.xlu2 %1545 }
 0x2fe   : > { %4815 = vmatmul.msk.f32.gmra.mxu0 %vm1874_vm10, %v1846_v31  ;;  %v1759_v31 = vsel %vm1742_vm5, %v1726_v47, %v5927_v56  ;;  %v1848_v13 = vsel %vm1841_vm8, %v1815_v18, %v1528_v46  ;;  %v1628_v56 = vsel %vm177_vm0, %v4921_v54, %v9088_v16  ;;  %v9097_v47 = vld [vmem:[#allocation58_spill] sm:$0xff]  ;;  %v9099_v18 = vld [vmem:[#allocation133_spill] sm:$0xff]  ;;  %v4925_v16 = vld [vmem:[#allocation2 + $0x68] sm:$0xff] }
 0x2ff   : > { %v1792_v45 = vsel %vm1775_vm7, %v1759_v31, %v5993_v17  ;;  %v9089_v17 = vld [vmem:[#allocation15_spill] sm:$0xff] }
 0x300   : > { %v1825_v5 = vsel %vm1808_vm9, %v1792_v45, %v6143_v24  ;;  %v1618_v61 = vsel %vm177_vm0, %v4922_v7, %v9089_v17  ;;  %v9091_v24 = vld [vmem:[#allocation75_spill] sm:$0xff]  ;;  %v4926_v17 = vld [vmem:[#allocation2 + $0xe0] sm:$0xff] }
 0x301   : > { %v1651_v22 = vsel %vm1643_vm3, %v1618_v61, %v9090_v63  ;;  %v1661_v46 = vsel %vm1643_vm3, %v1628_v56, %v9091_v24  ;;  %v9098_v31 = vld [vmem:[#allocation59_spill] sm:$0xff]  ;;  %v9102_v56 = vld [vmem:[#allocation17_spill] sm:$0xff]  ;;  %v9103_v61 = vld [vmem:[#allocation32_spill] sm:$0xff] }
 0x302   : > { %v1684_v62 = vsel %vm1676_vm4, %v1651_v22, %v5587_v27  ;;  %v1694_v3 = vsel %vm1676_vm4, %v1661_v46, %v5669_v58  ;;  %v1620_v7 = vsel %vm177_vm0, %v4925_v16, %v9102_v56  ;;  %v1630_v63 = vsel %vm177_vm0, %v4926_v17, %v9103_v61  ;;  %v9104_v22 = vld [vmem:[#allocation47_spill] sm:$0xff]  ;;  %v9105_v24 = vld [vmem:[#allocation78_spill] sm:$0xff]  ;;  %v9127_v61 = vld [vmem:[#allocation157_spill] sm:$0xff] }
 0x303   : > { %v1727_v28 = vsel %vm1709_vm6, %v1694_v3, %v5760_v29  ;;  %v9106_v46 = vld [vmem:[#allocation90_spill] sm:$0xff]  ;;  %v9107_v3 = vld [vmem:[#allocation91_spill] sm:$0xff] }
 0x304   : > { %v6277_v53 = vpop.permute.xlu0 %1541  ;;  %v1760_v38 = vsel %vm1742_vm5, %v1727_v28, %v5931_v19  ;;  %v9092_v19 = vld [vmem:[#allocation6_spill] sm:$0xff]  ;;  %v9125_v16 = vld [vmem:[#allocation131_spill] sm:$0xff] }
 0x305   : > { %v6295_v20 = vpop.permute.xlu1 %1543  ;;  %v1793_v58 = vsel %vm1775_vm7, %v1760_v38, %v6031_v40  ;;  %v1619_v26 = vsel %vm177_vm0, %v4923_v52, %v9092_v19  ;;  %v9094_v40 = vld [vmem:[#allocation61_spill] sm:$0xff]  ;;  %v1552_v44 = vpop.permute.xlu2 %1551  ;;  %v9113_v19 = vld [vmem:[#allocation135_spill] sm:$0xff] }
 0x306   : > { %4816 = vmatmul.msk.f32.gmra.mxu0 %vm1874_vm10, %v1847_v51  ;;  %v1717_v51 = vsel %vm1709_vm6, %v1684_v62, %v5762_v41  ;;  %v1826_v21 = vsel %vm1808_vm9, %v1793_v58, %v6097_v50  ;;  %v9109_v38 = vld [vmem:[#allocation33_spill] sm:$0xff] }
 0x307   : > { %v1750_v6 = vsel %vm1742_vm5, %v1717_v51, %v5893_v9  ;;  %v9108_v51 = vld [vmem:[#allocation110_spill] sm:$0xff] }
 0x308   : > { %v1783_v27 = vsel %vm1775_vm7, %v1750_v6, %v5966_v57  ;;  %v9093_v57 = vld [vmem:[#allocation31_spill] sm:$0xff] }
 0x309   : > { %v1816_v29 = vsel %vm1808_vm9, %v1783_v27, %v6099_v33  ;;  %v1629_v48 = vsel %vm177_vm0, %v4924_v60, %v9093_v57  ;;  %v9095_v33 = vld [vmem:[#allocation62_spill] sm:$0xff]  ;;  %v9110_v27 = vld [vmem:[#allocation49_spill] sm:$0xff]  ;;  %v9114_v60 = vld [vmem:[#allocation156_spill] sm:$0xff] }
 0x30a   : > { %v1849_v41 = vsel %vm1841_vm8, %v1816_v29, %v6235_v25  ;;  %v1662_v50 = vsel %vm1643_vm3, %v1629_v48, %v9094_v40  ;;  %v1652_v25 = vsel %vm1643_vm3, %v1619_v26, %v9095_v33  ;;  %v4927_v33 = vld [vmem:[#allocation2 + $0xf0] sm:$0xff] }
 0x30b   : > { %v1685_v8 = vsel %vm1676_vm4, %v1652_v25, %v5633_v43  ;;  %v1695_v23 = vsel %vm1676_vm4, %v1662_v50, %v5673_v0  ;;  %v9100_v43 = vld [vmem:[#allocation143_spill] sm:$0xff]  ;;  %v9101_v0 = vld [vmem:[#allocation152_spill] sm:$0xff] }
 0x30c   : > { %v1548_v11 = vpop.permute.xlu0 %1547  ;;  %v1718_v49 = vsel %vm1709_vm6, %v1685_v8, %v5723_v36  ;;  %v1728_v39 = vsel %vm1709_vm6, %v1695_v23, %v9096_v10  ;;  %v9115_v25 = vld [vmem:[#allocation16_spill] sm:$0xff]  ;;  %v4928_v23 = vld [vmem:[#allocation2 + $0x78] sm:$0xff] }
 0x30d   : > { %v1858_v12 = vsel %vm1841_vm8, %v1825_v5, %v1548_v11  ;;  %v1550_v37 = vpop.permute.xlu1 %1549  ;;  %v1761_v35 = vsel %vm1742_vm5, %v1728_v39, %v9097_v47  ;;  %v1751_v45 = vsel %vm1742_vm5, %v1718_v49, %v9098_v31  ;;  %v1631_v8 = vsel %vm177_vm0, %v4927_v33, %v9115_v25  ;;  %v9116_v49 = vld [vmem:[#allocation18_spill] sm:$0xff]  ;;  %v9117_v39 = vld [vmem:[#allocation65_spill] sm:$0xff]  ;;  %v9118_v47 = vld [vmem:[#allocation80_spill] sm:$0xff] }
 0x30e   : > { %4817 = vmatmul.msk.f32.gmra.mxu0 %vm1874_vm10, %v1848_v13  ;;  %4827 = vmatmul.msk.f32.vlgmr.msra.gmra.mxu2 %vm1874_vm10, %v1858_v12  ;;  %v1859_v9 = vsel %vm1841_vm8, %v1826_v21, %v1550_v37  ;;  %v1784_v5 = vsel %vm1775_vm7, %v1751_v45, %v9099_v18  ;;  %v1794_v11 = vsel %vm1775_vm7, %v1761_v35, %v9100_v43  ;;  %v9111_v21 = vld [vmem:[#allocation76_spill] sm:$0xff]  ;;  %v9120_v45 = vld [vmem:[#allocation99_spill] sm:$0xff] }
 0x30f   : > { %v1817_v13 = vsel %vm1808_vm9, %v1784_v5, %v9101_v0  ;;  %v1827_v36 = vsel %vm1808_vm9, %v1794_v11, %v6150_v55  ;;  %v1653_v55 = vsel %vm1643_vm3, %v1620_v7, %v9104_v22  ;;  %v1621_v10 = vsel %vm177_vm0, %v4928_v23, %v9116_v49  ;;  %v9119_v35 = vld [vmem:[#allocation88_spill] sm:$0xff]  ;;  %v9121_v18 = vld [vmem:[#allocation111_spill] sm:$0xff]  ;;  %v9128_v22 = vld [vmem:[#allocation158_spill] sm:$0xff] }
 0x310   : > { %v1850_v12 = vsel %vm1841_vm8, %v1817_v13, %v6237_v1  ;;  %v1860_v54 = vsel %vm1841_vm8, %v1827_v36, %v1552_v44  ;;  %v1663_v1 = vsel %vm1643_vm3, %v1630_v63, %v9105_v24  ;;  %v1686_v28 = vsel %vm1676_vm4, %v1653_v55, %v9107_v3  ;;  %v9122_v43 = vld [vmem:[#allocation112_spill] sm:$0xff]  ;;  %v9123_v0 = vld [vmem:[#allocation63_spill] sm:$0xff]  ;;  %v9141_v49 = vld [vmem:[#allocation154_spill] sm:$0xff] }
 0x311   : > { %v1696_v62 = vsel %vm1676_vm4, %v1663_v1, %v9106_v46  ;;  %v1719_v6 = vsel %vm1709_vm6, %v1686_v28, %v9108_v51  ;;  %v9124_v36 = vld [vmem:[#allocation123_spill] sm:$0xff]  ;;  %v9126_v7 = vld [vmem:[#allocation144_spill] sm:$0xff]  ;;  %v4929_v46 = vld [vmem:[#allocation2 + $0x80] sm:$0xff] }
 0x312   : > { %v1729_v37 = vsel %vm1709_vm6, %v1696_v62, %v9109_v38  ;;  %v1752_v58 = vsel %vm1742_vm5, %v1719_v6, %v9110_v27  ;;  %v9129_v62 = vld [vmem:[#allocation8_spill] sm:$0xff]  ;;  %v4930_v28 = vld [vmem:[#allocation2 + $0xf8] sm:$0xff]  ;;  %v9130_v51 = vld [vmem:[#allocation35_spill] sm:$0xff] }
 0x313   : > { %v1762_v29 = vsel %vm1742_vm5, %v1729_v37, %v9111_v21  ;;  %v1785_v26 = vsel %vm1775_vm7, %v1752_v58, %v9113_v19  ;;  %v1622_v3 = vsel %vm177_vm0, %v4929_v46, %v9129_v62  ;;  %v1632_v6 = vsel %vm177_vm0, %v4930_v28, %v9130_v51  ;;  %v9131_v38 = vld [vmem:[#allocation66_spill] sm:$0xff]  ;;  %v9132_v27 = vld [vmem:[#allocation67_spill] sm:$0xff]  ;;  %v9133_v58 = vld [vmem:[#allocation92_spill] sm:$0xff] }
 0x314   : > { %v1818_v57 = vsel %vm1808_vm9, %v1785_v26, %v9114_v60  ;;  %v1665_v37 = vsel %vm1643_vm3, %v1632_v6, %v9131_v38  ;;  %v9136_v19 = vld [vmem:[#allocation115_spill] sm:$0xff]  ;;  %v9137_v60 = vld [vmem:[#allocation64_spill] sm:$0xff] }
 0x315   : > { %v1851_v40 = vsel %vm1841_vm8, %v1818_v57, %v6255_v30  ;;  %v1664_v30 = vsel %vm1643_vm3, %v1631_v8, %v9118_v47  ;;  %v9139_v33 = vld [vmem:[#allocation136_spill] sm:$0xff]  ;;  %v9140_v8 = vld [vmem:[#allocation146_spill] sm:$0xff]  ;;  %v9154_v62 = vld [vmem:[#allocation159_spill] sm:$0xff] }
 0x316   : > { %4818 = vmatmul.msk.f32.gmra.mxu0 %vm1874_vm10, %v1849_v41  ;;  %4828 = vmatmul.msk.f32.gmra.mxu2 %vm1874_vm10, %v1859_v9  ;;  %v1554_v41 = vpop.permute.xlu0 %1553  ;;  %v9112_v9 = vld [vmem:[#allocation134_spill] sm:$0xff]  ;;  %v1697_v44 = vsel %vm1676_vm4, %v1664_v30, %v9120_v45  ;;  %v4931_v30 = vld [vmem:[#allocation2 + $0x90] sm:$0xff]  ;;  %v4932_v45 = vld [vmem:[#allocation2 + $0x108] sm:$0xff] }
 0x317   : > { %v1795_v52 = vsel %vm1775_vm7, %v1762_v29, %v9112_v9  ;;  %v1730_v5 = vsel %vm1709_vm6, %v1697_v44, %v9121_v18  ;;  %v9134_v29 = vld [vmem:[#allocation101_spill] sm:$0xff]  ;;  %v9135_v9 = vld [vmem:[#allocation108_spill] sm:$0xff]  ;;  %v9155_v28 = vld [vmem:[#allocation11_spill] sm:$0xff] }
 0x318   : > { %v1828_v48 = vsel %vm1808_vm9, %v1795_v52, %v6154_v59  ;;  %v1654_v59 = vsel %vm1643_vm3, %v1621_v10, %v9117_v39  ;;  %v9143_v44 = vld [vmem:[#allocation36_spill] sm:$0xff] }
 0x319   : > { %v1861_v50 = vsel %vm1841_vm8, %v1828_v48, %v1554_v41  ;;  %v1687_v31 = vsel %vm1676_vm4, %v1654_v59, %v9119_v35  ;;  %v1698_v41 = vsel %vm1676_vm4, %v1665_v37, %v9134_v29  ;;  %v9138_v48 = vld [vmem:[#allocation68_spill] sm:$0xff]  ;;  %v1633_v18 = vsel %vm177_vm0, %v4932_v45, %v9143_v44  ;;  %v9169_v44 = vld [vmem:[#allocation161_spill] sm:$0xff] }
 0x31a   : > { %v1720_v11 = vsel %vm1709_vm6, %v1687_v31, %v9122_v43  ;;  %v1731_v26 = vsel %vm1709_vm6, %v1698_v41, %v9136_v19  ;;  %v9142_v35 = vld [vmem:[#allocation20_spill] sm:$0xff]  ;;  %v9145_v43 = vld [vmem:[#allocation81_spill] sm:$0xff]  ;;  %v9158_v41 = vld [vmem:[#allocation70_spill] sm:$0xff] }
 0x31b   : > { %v1753_v13 = vsel %vm1742_vm5, %v1720_v11, %v9123_v0  ;;  %v1764_v57 = vsel %vm1742_vm5, %v1731_v26, %v9137_v60  ;;  %v1623_v31 = vsel %vm177_vm0, %v4931_v30, %v9142_v35  ;;  %v9146_v11 = vld [vmem:[#allocation93_spill] sm:$0xff]  ;;  %v4933_v37 = vld [vmem:[#allocation2 + $0x110] sm:$0xff]  ;;  %v9161_v60 = vld [vmem:[#allocation102_spill] sm:$0xff] }
 0x31c   : > { %v1786_v56 = vsel %vm1775_vm7, %v1753_v13, %v9125_v16  ;;  %v1797_v23 = vsel %vm1775_vm7, %v1764_v57, %v9140_v8  ;;  %v9147_v13 = vld [vmem:[#allocation94_spill] sm:$0xff]  ;;  %v9149_v16 = vld [vmem:[#allocation116_spill] sm:$0xff]  ;;  %v9160_v19 = vld [vmem:[#allocation89_spill] sm:$0xff] }
 0x31d   : > { %v1819_v55 = vsel %vm1808_vm9, %v1786_v56, %v9128_v22  ;;  %v1830_v39 = vsel %vm1808_vm9, %v1797_v23, %v6171_v32  ;;  %v9165_v23 = vld [vmem:[#allocation125_spill] sm:$0xff] }
 0x31e   : > { %4819 = vmatmul.msk.f32.gmra.mxu0 %vm1874_vm10, %v1850_v12  ;;  %4829 = vmatmul.msk.f32.gmra.mxu2 %vm1874_vm10, %v1860_v54  ;;  %v1763_v12 = vsel %vm1742_vm5, %v1730_v5, %v9124_v36  ;;  %v1556_v54 = vpop.permute.xlu1 %1555  ;;  %v1852_v24 = vsel %vm1841_vm8, %v1819_v55, %v6257_v2  ;;  %v1655_v2 = vsel %vm1643_vm3, %v1622_v3, %v9132_v27  ;;  %v9144_v5 = vld [vmem:[#allocation52_spill] sm:$0xff]  ;;  %v1560_v22 = vpop.permute.xlu0 %1559  ;;  %v9152_v55 = vld [vmem:[#allocation137_spill] sm:$0xff]  ;;  %v9156_v27 = vld [vmem:[#allocation19_spill] sm:$0xff] }
 0x31f   : > { %v1796_v17 = vsel %vm1775_vm7, %v1763_v12, %v9126_v7  ;;  %v1688_v21 = vsel %vm1676_vm4, %v1655_v2, %v9133_v58  ;;  %v1656_v32 = vsel %vm1643_vm3, %v1623_v31, %v9144_v5  ;;  %v9148_v12 = vld [vmem:[#allocation22_spill] sm:$0xff]  ;;  %v1634_v2 = vsel %vm177_vm0, %v4933_v37, %v9156_v27  ;;  %v4934_v58 = vld [vmem:[#allocation2 + $0x98] sm:$0xff]  ;;  %v9168_v31 = vld [vmem:[#allocation160_spill] sm:$0xff] }
 0x320   : > { %v1829_v63 = vsel %vm1808_vm9, %v1796_v17, %v9127_v61  ;;  %v1721_v52 = vsel %vm1709_vm6, %v1688_v21, %v9135_v9  ;;  %v1689_v36 = vsel %vm1676_vm4, %v1656_v32, %v9147_v13  ;;  %v9150_v7 = vld [vmem:[#allocation50_spill] sm:$0xff]  ;;  %v9151_v61 = vld [vmem:[#allocation124_spill] sm:$0xff]  ;;  %v9157_v21 = vld [vmem:[#allocation21_spill] sm:$0xff] }
 0x321   : > { %v1862_v1 = vsel %vm1841_vm8, %v1829_v63, %v1556_v54  ;;  %v1722_v54 = vsel %vm1709_vm6, %v1689_v36, %v9148_v12  ;;  %v1624_v29 = vsel %vm177_vm0, %v4934_v58, %v9157_v21  ;;  %v9171_v13 = vld [vmem:[#allocation37_spill] sm:$0xff]  ;;  %v9172_v12 = vld [vmem:[#allocation71_spill] sm:$0xff] }
 0x322   : > { %v1755_v17 = vsel %vm1742_vm5, %v1722_v54, %v9150_v7  ;;  %v1657_v9 = vsel %vm1643_vm3, %v1624_v29, %v9158_v41  ;;  %v9182_v27 = vld [vmem:[#allocation155_spill] sm:$0xff]  ;;  %v4937_v41 = vld [vmem:[#allocation2 + $0xb0] sm:$0xff] }
 0x323   : > { %v1690_v26 = vsel %vm1676_vm4, %v1657_v9, %v9160_v19  ;;  %v9183_v9 = vld [vmem:[#allocation25_spill] sm:$0xff]  ;;  %v9184_v19 = vld [vmem:[#allocation39_spill] sm:$0xff] }
 0x326   : > { %4820 = vmatmul.msk.f32.gmra.mxu0 %vm1874_vm10, %v1851_v40  ;;  %4830 = vmatmul.msk.f32.gmra.mxu2 %vm1874_vm10, %v1861_v50  ;;  %v1754_v40 = vsel %vm1742_vm5, %v1721_v52, %v9138_v48  ;;  %v1558_v50 = vpop.permute.xlu2 %1557  ;;  %v9159_v52 = vld [vmem:[#allocation82_spill] sm:$0xff]  ;;  %v9162_v48 = vld [vmem:[#allocation113_spill] sm:$0xff] }
 0x327   : > { %v1787_v25 = vsel %vm1775_vm7, %v1754_v40, %v9139_v33  ;;  %v1863_v47 = vsel %vm1841_vm8, %v1830_v39, %v1558_v50  ;;  %v9163_v50 = vld [vmem:[#allocation114_spill] sm:$0xff]  ;;  %v9166_v39 = vld [vmem:[#allocation132_spill] sm:$0xff] }
 0x328   : > { %v1820_v10 = vsel %vm1808_vm9, %v1787_v25, %v9141_v49  ;;  %v1723_v33 = vsel %vm1709_vm6, %v1690_v26, %v9163_v50  ;;  %v9164_v25 = vld [vmem:[#allocation69_spill] sm:$0xff] }
 0x329   : > { %v1853_v59 = vsel %vm1841_vm8, %v1820_v10, %v6262_v4  ;;  %v1666_v4 = vsel %vm1643_vm3, %v1633_v18, %v9145_v43  ;;  %v1756_v8 = vsel %vm1742_vm5, %v1723_v33, %v9164_v25  ;;  %v1562_v10 = vpop.permute.xlu1 %1561  ;;  %v4935_v43 = vld [vmem:[#allocation2 + $0xa8] sm:$0xff]  ;;  %v9188_v50 = vld [vmem:[#allocation97_spill] sm:$0xff] }
 0x32a   : > { %v1699_v0 = vsel %vm1676_vm4, %v1666_v4, %v9146_v11  ;;  %v9170_v4 = vld [vmem:[#allocation10_spill] sm:$0xff]  ;;  %v9189_v25 = vld [vmem:[#allocation23_spill] sm:$0xff] }
 0x32b   : > { %v1732_v56 = vsel %vm1709_vm6, %v1699_v0, %v9149_v16  ;;  %v1625_v11 = vsel %vm177_vm0, %v4935_v43, %v9170_v4  ;;  %v4936_v0 = vld [vmem:[#allocation2 + $0x120] sm:$0xff]  ;;  %v9173_v16 = vld [vmem:[#allocation72_spill] sm:$0xff] }
 0x32c   : > { %v1765_v63 = vsel %vm1742_vm5, %v1732_v56, %v9151_v61  ;;  %v1635_v36 = vsel %vm177_vm0, %v4936_v0, %v9171_v13  ;;  %v9174_v56 = vld [vmem:[#allocation95_spill] sm:$0xff]  ;;  %v4939_v0 = vld [vmem:[#allocation2 + $0x138] sm:$0xff]  ;;  %v9196_v13 = vld [vmem:[#allocation24_spill] sm:$0xff] }
 0x32d   : > { %v1668_v54 = vsel %vm1643_vm3, %v1635_v36, %v9172_v12  ;;  %v1637_v36 = vsel %vm177_vm0, %v4939_v0, %v9196_v13  ;;  %v9197_v12 = vld [vmem:[#allocation84_spill] sm:$0xff]  ;;  %v4942_v0 = vld [vmem:[#allocation2 + $0x158] sm:$0xff]  ;;  %v9217_v13 = vld [vmem:[#allocation30_spill] sm:$0xff] }
 0x32e   : > { %4821 = vmatmul.msk.f32.gmra.mxu0 %vm1874_vm10, %v1852_v24  ;;  %4831 = vmatmul.msk.f32.gmra.mxu2 %vm1874_vm10, %v1862_v1  ;;  %v1798_v24 = vsel %vm1775_vm7, %v1765_v63, %v9152_v55  ;;  %v9153_v1 = vld [vmem:[#allocation138_spill] sm:$0xff]  ;;  %v9176_v63 = vld [vmem:[#allocation109_spill] sm:$0xff] }
 0x32f   : > { %v1788_v46 = vsel %vm1775_vm7, %v1755_v17, %v9153_v1  ;;  %v1831_v51 = vsel %vm1808_vm9, %v1798_v24, %v9155_v28  ;;  %v9175_v17 = vld [vmem:[#allocation103_spill] sm:$0xff]  ;;  %v9177_v55 = vld [vmem:[#allocation117_spill] sm:$0xff]  ;;  %v9178_v1 = vld [vmem:[#allocation120_spill] sm:$0xff]  ;;  %v1564_v28 = vpop.permute.xlu2 %1563 }
 0x330   : > { %v1821_v3 = vsel %vm1808_vm9, %v1788_v46, %v9154_v62  ;;  %v1864_v38 = vsel %vm1841_vm8, %v1831_v51, %v1560_v22  ;;  %v1701_v61 = vsel %vm1676_vm4, %v1668_v54, %v9175_v17  ;;  %v9179_v62 = vld [vmem:[#allocation121_spill] sm:$0xff]  ;;  %v9180_v51 = vld [vmem:[#allocation139_spill] sm:$0xff]  ;;  %v1670_v54 = vsel %vm1643_vm3, %v1637_v36, %v9197_v12 }
 0x331   : > { %v1854_v6 = vsel %vm1841_vm8, %v1821_v3, %v6284_v14  ;;  %v1667_v14 = vsel %vm1643_vm3, %v1634_v2, %v9159_v52  ;;  %v1734_v24 = vsel %vm1709_vm6, %v1701_v61, %v9177_v55  ;;  %v1626_v52 = vsel %vm177_vm0, %v4937_v41, %v9183_v9  ;;  %v1568_v17 = vpop.permute.xlu1 %1567  ;;  %v9201_v61 = vld [vmem:[#allocation149_spill] sm:$0xff] }
 0x332   : > { %v1700_v57 = vsel %vm1676_vm4, %v1667_v14, %v9161_v60  ;;  %v1767_v46 = vsel %vm1742_vm5, %v1734_v24, %v9178_v1  ;;  %v4938_v14 = vld [vmem:[#allocation2 + $0x128] sm:$0xff]  ;;  %v9185_v60 = vld [vmem:[#allocation56_spill] sm:$0xff]  ;;  %v4940_v1 = vld [vmem:[#allocation2 + $0x140] sm:$0xff]  ;;  %v1640_v36 = vsel %vm177_vm0, %v4942_v0, %v9217_v13 }
 0x333   : > { %v1733_v40 = vsel %vm1709_vm6, %v1700_v57, %v9162_v48  ;;  %v1636_v26 = vsel %vm177_vm0, %v4938_v14, %v9184_v19  ;;  %v9186_v57 = vld [vmem:[#allocation83_spill] sm:$0xff]  ;;  %v9187_v48 = vld [vmem:[#allocation96_spill] sm:$0xff] }
 0x334   : > { %v1766_v49 = vsel %vm1742_vm5, %v1733_v40, %v9165_v23  ;;  %v9190_v23 = vld [vmem:[#allocation118_spill] sm:$0xff] }
 0x336   : > { %4822 = vmatmul.msk.f32.gmra.mxu0 %vm1874_vm10, %v1853_v59  ;;  %4832 = vmatmul.msk.f32.gmra.mxu2 %vm1874_vm10, %v1863_v47  ;;  %v1789_v59 = vsel %vm1775_vm7, %v1756_v8, %v9166_v39  ;;  %v9167_v47 = vld [vmem:[#allocation147_spill] sm:$0xff] }
 0x337   : > { %v1799_v30 = vsel %vm1775_vm7, %v1766_v49, %v9167_v47  ;;  %v1822_v18 = vsel %vm1808_vm9, %v1789_v59, %v9169_v44  ;;  %v9192_v59 = vld [vmem:[#allocation126_spill] sm:$0xff]  ;;  %v9194_v44 = vld [vmem:[#allocation141_spill] sm:$0xff] }
 0x338   : > { %v1832_v45 = vsel %vm1808_vm9, %v1799_v30, %v9168_v31  ;;  %v1855_v5 = vsel %vm1841_vm8, %v1822_v18, %v6277_v53  ;;  %v1658_v53 = vsel %vm1643_vm3, %v1625_v11, %v9173_v16  ;;  %v1566_v30 = vpop.permute.xlu0 %1565  ;;  %v9193_v31 = vld [vmem:[#allocation140_spill] sm:$0xff] }
 0x339   : > { %v1865_v32 = vsel %vm1841_vm8, %v1832_v45, %v1562_v10  ;;  %v1691_v7 = vsel %vm1676_vm4, %v1658_v53, %v9174_v56  ;;  %v9191_v10 = vld [vmem:[#allocation54_spill] sm:$0xff]  ;;  %v9198_v16 = vld [vmem:[#allocation104_spill] sm:$0xff] }
 0x33a   : > { %v1724_v22 = vsel %vm1709_vm6, %v1691_v7, %v9176_v63  ;;  %v1703_v53 = vsel %vm1676_vm4, %v1670_v54, %v9198_v16  ;;  %v9218_v54 = vld [vmem:[#allocation86_spill] sm:$0xff] }
 0x33b   : > { %v1757_v3 = vsel %vm1742_vm5, %v1724_v22, %v9179_v62  ;;  %v9202_v22 = vld [vmem:[#allocation163_spill] sm:$0xff]  ;;  %v1673_v16 = vsel %vm1643_vm3, %v1640_v36, %v9218_v54 }
 0x33e   : > { %4823 = vmatmul.msk.f32.gmra.mxu0 %vm1874_vm10, %v1854_v6  ;;  %4833 = vmatmul.msk.f32.gmra.mxu2 %vm1874_vm10, %v1864_v38  ;;  %v1790_v6 = vsel %vm1775_vm7, %v1757_v3, %v9180_v51  ;;  %v9181_v38 = vld [vmem:[#allocation148_spill] sm:$0xff]  ;;  %v9204_v3 = vld [vmem:[#allocation74_spill] sm:$0xff]  ;;  %v9205_v51 = vld [vmem:[#allocation105_spill] sm:$0xff] }
 0x33f   : > { %v1800_v37 = vsel %vm1775_vm7, %v1767_v46, %v9181_v38  ;;  %v1823_v2 = vsel %vm1808_vm9, %v1790_v6, %v9182_v27  ;;  %v9203_v46 = vld [vmem:[#allocation41_spill] sm:$0xff]  ;;  %v9206_v38 = vld [vmem:[#allocation40_spill] sm:$0xff] }
 0x340   : > { %v1833_v58 = vsel %vm1808_vm9, %v1800_v37, %v6177_v34  ;;  %v1856_v21 = vsel %vm1841_vm8, %v1823_v2, %v6295_v20  ;;  %v1659_v34 = vsel %vm1643_vm3, %v1626_v52, %v9185_v60  ;;  %v1669_v20 = vsel %vm1643_vm3, %v1636_v26, %v9186_v57  ;;  %v9207_v27 = vld [vmem:[#allocation77_spill] sm:$0xff]  ;;  %v9209_v52 = vld [vmem:[#allocation34_spill] sm:$0xff] }
 0x341   : > { %v1866_v29 = vsel %vm1841_vm8, %v1833_v58, %v1564_v28  ;;  %v1702_v40 = vsel %vm1676_vm4, %v1669_v20, %v9187_v48  ;;  %v1692_v33 = vsel %vm1676_vm4, %v1659_v34, %v9188_v50  ;;  %v1638_v62 = vsel %vm177_vm0, %v4940_v1, %v9203_v46  ;;  %v1570_v58 = vpop.permute.xlu2 %1569  ;;  %v4941_v20 = vld [vmem:[#allocation2 + $0x150] sm:$0xff]  ;;  %v9210_v48 = vld [vmem:[#allocation43_spill] sm:$0xff] }
 0x342   : > { %v1725_v8 = vsel %vm1709_vm6, %v1692_v33, %v9189_v25  ;;  %v1735_v49 = vsel %vm1709_vm6, %v1702_v40, %v9190_v23  ;;  %v1671_v28 = vsel %vm1643_vm3, %v1638_v62, %v9204_v3  ;;  %v1639_v40 = vsel %vm177_vm0, %v4941_v20, %v9210_v48  ;;  %v9211_v25 = vld [vmem:[#allocation85_spill] sm:$0xff]  ;;  %v9212_v23 = vld [vmem:[#allocation98_spill] sm:$0xff]  ;;  %v9223_v1 = vld [vmem:[#allocation164_spill] sm:$0xff] }
 0x343   : > { %v6541_v35 = vpop.f32.mrf.mxu0  ;;  %v1758_v39 = vsel %vm1742_vm5, %v1725_v8, %v9191_v10  ;;  %v1768_v47 = vsel %vm1742_vm5, %v1735_v49, %v9192_v59  ;;  %v1704_v6 = vsel %vm1676_vm4, %v1671_v28, %v9205_v51  ;;  %v9213_v10 = vld [vmem:[#allocation44_spill] sm:$0xff]  ;;  %v9230_v20 = vld [vmem:[#allocation166_spill] sm:$0xff] }
 0x344   : > { %2088 = vst.msk [vmem:[#allocation3] sm:$0xff] %vm177_vm0, %v6541_v35  ;;  %v1801_v45 = vsel %vm1775_vm7, %v1768_v47, %v9193_v31  ;;  %v1791_v18 = vsel %vm1775_vm7, %v1758_v39, %v9194_v44  ;;  %v1737_v37 = vsel %vm1709_vm6, %v1704_v6, %v9206_v38  ;;  %v2120_v19 = vsel %vm177_vm0, %v6541_v35, 0.0  ;;  %v9214_v59 = vld [vmem:[#allocation128_spill] sm:$0xff]  ;;  %v9215_v31 = vld [vmem:[#allocation142_spill] sm:$0xff]  ;;  %v4943_v6 = vld [vmem:[#allocation2 + $0x168] sm:$0xff] }
 0x345   : > { %v1834_v43 = vsel %vm1808_vm9, %v1801_v45, %v6179_v42  ;;  %v9199_v42 = vld [vmem:[#allocation29_spill] sm:$0xff]  ;;  %v1770_v2 = vsel %vm1742_vm5, %v1737_v37, %v9207_v27  ;;  %v9224_v38 = vld [vmem:[#allocation46_spill] sm:$0xff] }
 0x346   : > { %4824 = vmatmul.msk.f32.gmra.mxu0 %vm1874_vm10, %v1855_v5  ;;  %4834 = vmatmul.msk.f32.gmra.mxu2 %vm1874_vm10, %v1865_v32  ;;  %v9195_v5 = vld [vmem:[#allocation162_spill] sm:$0xff]  ;;  %v1867_v11 = vsel %vm1841_vm8, %v1834_v43, %v1566_v30  ;;  %v1736_v56 = vsel %vm1709_vm6, %v1703_v53, %v9199_v42  ;;  %v1572_v30 = vpop.permute.xlu0 %1571  ;;  %v1641_v37 = vsel %vm177_vm0, %v4943_v6, %v9224_v38 }
 0x347   : > { %v1824_v32 = vsel %vm1808_vm9, %v1791_v18, %v9195_v5  ;;  %v9216_v18 = vld [vmem:[#allocation165_spill] sm:$0xff]  ;;  %v9219_v42 = vld [vmem:[#allocation106_spill] sm:$0xff] }
 0x348   : > { %v1857_v4 = vsel %vm1841_vm8, %v1824_v32, %v6329_v15  ;;  %v9200_v15 = vld [vmem:[#allocation127_spill] sm:$0xff] }
 0x349   : > { %v1769_v7 = vsel %vm1742_vm5, %v1736_v56, %v9200_v15  ;;  %v1706_v56 = vsel %vm1676_vm4, %v1673_v16, %v9219_v42  ;;  %v9220_v15 = vld [vmem:[#allocation28_spill] sm:$0xff] }
 0x34a   : > { %v1802_v63 = vsel %vm1775_vm7, %v1769_v7, %v9201_v61  ;;  %v1739_v7 = vsel %vm1709_vm6, %v1706_v56, %v9220_v15 }
 0x34b   : > { %v1835_v55 = vsel %vm1808_vm9, %v1802_v63, %v9202_v22  ;;  %v1574_v63 = vpop.permute.xlu1 %1573  ;;  %v9222_v22 = vld [vmem:[#allocation151_spill] sm:$0xff] }
 0x34c   : > { %v1868_v24 = vsel %vm1841_vm8, %v1835_v55, %v1568_v17  ;;  %v9221_v17 = vld [vmem:[#allocation129_spill] sm:$0xff] }
 0x34d   : > { %v1772_v61 = vsel %vm1742_vm5, %v1739_v7, %v9221_v17 }
 0x34e   : > { %4825 = vmatmul.msk.f32.gmra.mxu0 %vm1874_vm10, %v1856_v21  ;;  %4835 = vmatmul.msk.f32.gmra.mxu2 %vm1874_vm10, %v1866_v29  ;;  %v2190_v21 = vmul.f32 %v6541_v35, %v6541_v35  ;;  %v9208_v29 = vld [vmem:[#allocation150_spill] sm:$0xff]  ;;  %v1672_v35 = vsel %vm1643_vm3, %v1639_v40, %v9211_v25  ;;  %v1805_v55 = vsel %vm1775_vm7, %v1772_v61, %v9222_v22 }
 0x34f   : > { %v1803_v41 = vsel %vm1775_vm7, %v1770_v2, %v9208_v29  ;;  %v1705_v49 = vsel %vm1676_vm4, %v1672_v35, %v9212_v23  ;;  %v1838_v46 = vsel %vm1808_vm9, %v1805_v55, %v9223_v1  ;;  %v9225_v2 = vld [vmem:[#allocation79_spill] sm:$0xff]  ;;  %v4944_v35 = vld [vmem:[#allocation2 + $0x170] sm:$0xff] }
 0x350   : > { %v1836_v14 = vsel %vm1808_vm9, %v1803_v41, %v9209_v52  ;;  %v2222_v50 = vsel %vm177_vm0, %v2190_v21, 0.0  ;;  %v1738_v39 = vsel %vm1709_vm6, %v1705_v49, %v9213_v10  ;;  %v1871_v51 = vsel %vm1841_vm8, %v1838_v46, %v1574_v63  ;;  %v9226_v29 = vld [vmem:[#allocation107_spill] sm:$0xff] }
 0x351   : > { %v1869_v57 = vsel %vm1841_vm8, %v1836_v14, %v1570_v58  ;;  %v1771_v47 = vsel %vm1742_vm5, %v1738_v39, %v9214_v59  ;;  %v1674_v58 = vsel %vm1643_vm3, %v1641_v37, %v9225_v2  ;;  %v9228_v14 = vld [vmem:[#allocation122_spill] sm:$0xff]  ;;  %v9232_v10 = vld [vmem:[#allocation87_spill] sm:$0xff] }
 0x352   : > { %v1804_v45 = vsel %vm1775_vm7, %v1771_v47, %v9215_v31  ;;  %v1707_v41 = vsel %vm1676_vm4, %v1674_v58, %v9226_v29  ;;  %v9233_v47 = vld [vmem:[#allocation100_spill] sm:$0xff]  ;;  %v9234_v31 = vld [vmem:[#allocation119_spill] sm:$0xff] }
 0x353   : > { %v1837_v5 = vsel %vm1808_vm9, %v1804_v45, %v9216_v18 }
 0x356   : > { %4826 = vmatmul.msk.f32.gmra.mxu0 %vm1874_vm10, %v1857_v4  ;;  %4836 = vmatmul.msk.f32.gmra.mxu2 %vm1874_vm10, %v1867_v11  ;;  %v1870_v11 = vsel %vm1841_vm8, %v1837_v5, %v1572_v30  ;;  %v1578_v5 = vpop.permute.xlu0 %1577 }
 0x35e   : > { %4837 = vmatmul.msk.f32.gmra.mxu2 %vm1874_vm10, %v1868_v24 }
 0x363   : > { %v1995_v9 = vpop.f32.mrf.mxu0 }
 0x364   : > { %2089 = vst.msk [vmem:[#allocation3 + $0x8] sm:$0xff] %vm177_vm0, %v1995_v9  ;;  %v2121_v26 = vsel %vm177_vm0, %v1995_v9, 0.0  ;;  %v2191_v60 = vmul.f32 %v1995_v9, %v1995_v9  ;;  %v9227_v9 = vld [vmem:[#allocation45_spill] sm:$0xff] }
 0x365   : > { %v2122_v34 = vadd.f32 %v2121_v26, %v2120_v19  ;;  %v1740_v52 = vsel %vm1709_vm6, %v1707_v41, %v9227_v9  ;;  %v1576_v26 = vpop.permute.xlu2 %1575 }
 0x366   : > { %v2223_v33 = vsel %vm177_vm0, %v2191_v60, 0.0  ;;  %4838 = vmatmul.msk.f32.gmra.mxu2 %vm1874_vm10, %v1869_v57  ;;  %v1773_v19 = vsel %vm1742_vm5, %v1740_v52, %v9228_v14  ;;  %v9229_v60 = vld [vmem:[#allocation153_spill] sm:$0xff] }
 0x367   : > { %v2224_v8 = vadd.f32 %v2223_v33, %v2222_v50 }
 0x36b   : > { %v1998_v44 = vpop.f32.mrf.mxu0 }
 0x36c   : > { %2090 = vst.msk [vmem:[#allocation3 + $0x10] sm:$0xff] %vm177_vm0, %v1998_v44  ;;  %v2123_v32 = vsel %vm177_vm0, %v1998_v44, 0.0  ;;  %v2192_v43 = vmul.f32 %v1998_v44, %v1998_v44  ;;  %v9235_v44 = vld [vmem:[#allocation130_spill] sm:$0xff] }
 0x36d   : > { %v2124_v4 = vadd.f32 %v2123_v32, %v2122_v34  ;;  %v1806_v34 = vsel %vm1775_vm7, %v1773_v19, %v9229_v60  ;;  %v9236_v32 = vld [vmem:[#allocation145_spill] sm:$0xff] }
 0x36e   : > { %v2225_v12 = vsel %vm177_vm0, %v2192_v43, 0.0  ;;  %4839 = vmatmul.msk.f32.gmra.mxu2 %vm1874_vm10, %v1870_v11  ;;  %v1839_v48 = vsel %vm1808_vm9, %v1806_v34, %v9230_v20  ;;  %v9237_v11 = vld [vmem:[#allocation167_spill] sm:$0xff] }
 0x36f   : > { %v2226_v53 = vadd.f32 %v2225_v12, %v2224_v8  ;;  %v1872_v25 = vsel %vm1841_vm8, %v1839_v48, %v1576_v26  ;;  %v9231_v8 = vld [vmem:[#allocation48_spill] sm:$0xff] }
 0x370   : > { %v1642_v23 = vsel %vm177_vm0, %v4944_v35, %v9231_v8 }
 0x371   : > { %v1675_v39 = vsel %vm1643_vm3, %v1642_v23, %v9232_v10 }
 0x372   : > { %v1708_v30 = vsel %vm1676_vm4, %v1675_v39, %v9233_v47 }
 0x373   : > { %v2001_v24 = vpop.f32.mrf.mxu0  ;;  %v1741_v45 = vsel %vm1709_vm6, %v1708_v30, %v9234_v31 }
 0x374   : > { %2091 = vst.msk [vmem:[#allocation3 + $0x18] sm:$0xff] %vm177_vm0, %v2001_v24  ;;  %v2125_v62 = vsel %vm177_vm0, %v2001_v24, 0.0  ;;  %v2193_v3 = vmul.f32 %v2001_v24, %v2001_v24  ;;  %v1774_v18 = vsel %vm1742_vm5, %v1741_v45, %v9235_v44 }
 0x375   : > { %v2126_v28 = vadd.f32 %v2125_v62, %v2124_v4  ;;  %v1807_v43 = vsel %vm1775_vm7, %v1774_v18, %v9236_v32 }
 0x376   : > { %v2227_v27 = vsel %vm177_vm0, %v2193_v3, 0.0  ;;  %4840 = vmatmul.msk.f32.gmra.mxu2 %vm1874_vm10, %v1871_v51  ;;  %v1840_v0 = vsel %vm1808_vm9, %v1807_v43, %v9237_v11 }
 0x377   : > { %v2228_v21 = vadd.f32 %v2227_v27, %v2226_v53  ;;  %v1873_v54 = vsel %vm1841_vm8, %v1840_v0, %v1578_v5 }
 0x37b   : > { %v2004_v57 = vpop.f32.mrf.mxu0 }
 0x37c   : > { %2092 = vst.msk [vmem:[#allocation3 + $0x20] sm:$0xff] %vm177_vm0, %v2004_v57  ;;  %v2127_v40 = vsel %vm177_vm0, %v2004_v57, 0.0  ;;  %v2194_v50 = vmul.f32 %v2004_v57, %v2004_v57 }
 0x37d   : > { %v2128_v33 = vadd.f32 %v2127_v40, %v2126_v28 }
 0x37e   : > { %v2229_v49 = vsel %vm177_vm0, %v2194_v50, 0.0  ;;  %4841 = vmatmul.msk.f32.gmra.mxu2 %vm1874_vm10, %v1872_v25 }
 0x37f   : > { %v2230_v59 = vadd.f32 %v2229_v49, %v2228_v21 }
 0x383   : > { %v2007_v4 = vpop.f32.mrf.mxu0 }
 0x384   : > { %2093 = vst.msk [vmem:[#allocation3 + $0x28] sm:$0xff] %vm177_vm0, %v2007_v4  ;;  %v2129_v13 = vsel %vm177_vm0, %v2007_v4, 0.0  ;;  %v2195_v36 = vmul.f32 %v2007_v4, %v2007_v4 }
 0x385   : > { %v2130_v12 = vadd.f32 %v2129_v13, %v2128_v33 }
 0x386   : > { %v2231_v16 = vsel %vm177_vm0, %v2195_v36, 0.0  ;;  %4842 = vmatmul.msk.f32.gmra.mxu2 %vm1874_vm10, %v1873_v54 }
 0x387   : > { %v2232_v53 = vadd.f32 %v2231_v16, %v2230_v59 }
 0x38b   : > { %v2010_v42 = vpop.f32.mrf.mxu0 }
 0x38c   : > { %2094 = vst.msk [vmem:[#allocation3 + $0x30] sm:$0xff] %vm177_vm0, %v2010_v42  ;;  %v2131_v56 = vsel %vm177_vm0, %v2010_v42, 0.0  ;;  %v2196_v15 = vmul.f32 %v2010_v42, %v2010_v42 }
 0x38d   : > { %v2132_v7 = vadd.f32 %v2131_v56, %v2130_v12 }
 0x38e   : > { %v2233_v17 = vsel %vm177_vm0, %v2196_v15, 0.0 }
 0x38f   : > { %v2234_v61 = vadd.f32 %v2233_v17, %v2232_v53 }
 0x391   : > { %v6739_v63 = vpop.f32.mrf.mxu2 }
 0x392   : > { %2104 = vst.msk [vmem:[#allocation3 + $0x80] sm:$0xff] %vm177_vm0, %v6739_v63  ;;  %v2206_v53 = vmul.f32 %v6739_v63, %v6739_v63  ;;  %v2151_v17 = vsel %vm177_vm0, %v6739_v63, 0.0 }
 0x393   : > { %v2013_v22 = vpop.f32.mrf.mxu0 }
 0x394   : > { %2095 = vst.msk [vmem:[#allocation3 + $0x38] sm:$0xff] %vm177_vm0, %v2013_v22  ;;  %v2133_v55 = vsel %vm177_vm0, %v2013_v22, 0.0  ;;  %v2197_v24 = vmul.f32 %v2013_v22, %v2013_v22 }
 0x395   : > { %v2134_v1 = vadd.f32 %v2133_v55, %v2132_v7 }
 0x396   : > { %v2235_v46 = vsel %vm177_vm0, %v2197_v24, 0.0 }
 0x397   : > { %v2236_v62 = vadd.f32 %v2235_v46, %v2234_v61 }
 0x399   : > { %v6746_v3 = vpop.f32.mrf.mxu2 }
 0x39a   : > { %2105 = vst.msk [vmem:[#allocation3 + $0x88] sm:$0xff] %vm177_vm0, %v6746_v3  ;;  %v2207_v61 = vmul.f32 %v6746_v3, %v6746_v3  ;;  %v2153_v46 = vsel %vm177_vm0, %v6746_v3, 0.0 }
 0x39b   : > { %v2016_v28 = vpop.f32.mrf.mxu0 }
 0x39c   : > { %2096 = vst.msk [vmem:[#allocation3 + $0x40] sm:$0xff] %vm177_vm0, %v2016_v28  ;;  %v2135_v51 = vsel %vm177_vm0, %v2016_v28, 0.0  ;;  %v2198_v6 = vmul.f32 %v2016_v28, %v2016_v28  ;;  %v2255_v63 = vsel %vm177_vm0, %v2207_v61, 0.0 }
 0x39d   : > { %v2136_v38 = vadd.f32 %v2135_v51, %v2134_v1  ;;  %v2253_v1 = vsel %vm177_vm0, %v2206_v53, 0.0 }
 0x39e   : > { %v2237_v37 = vsel %vm177_vm0, %v2198_v6, 0.0 }
 0x39f   : > { %v2238_v27 = vadd.f32 %v2237_v37, %v2236_v62 }
 0x3a1   : > { %v6753_v2 = vpop.f32.mrf.mxu2 }
 0x3a2   : > { %2106 = vst.msk [vmem:[#allocation3 + $0x90] sm:$0xff] %vm177_vm0, %v6753_v2  ;;  %v2208_v62 = vmul.f32 %v6753_v2, %v6753_v2 }
 0x3a3   : > { %v2019_v58 = vpop.f32.mrf.mxu0 }
 0x3a4   : > { %2097 = vst.msk [vmem:[#allocation3 + $0x48] sm:$0xff] %vm177_vm0, %v2019_v58  ;;  %v2199_v60 = vmul.f32 %v2019_v58, %v2019_v58  ;;  %v2137_v34 = vsel %vm177_vm0, %v2019_v58, 0.0  ;;  %v2257_v3 = vsel %vm177_vm0, %v2208_v62, 0.0 }
 0x3a5   : > { %v2138_v50 = vadd.f32 %v2137_v34, %v2136_v38  ;;  %v2155_v38 = vsel %vm177_vm0, %v6753_v2, 0.0 }
 0x3a6   : > { %v2239_v20 = vsel %vm177_vm0, %v2199_v60, 0.0 }
 0x3a7   : > { %v2240_v23 = vadd.f32 %v2239_v20, %v2238_v27 }
 0x3a9   : > { %v6758_v21 = vpop.f32.mrf.mxu2 }
 0x3aa   : > { %2107 = vst.msk [vmem:[#allocation3 + $0x98] sm:$0xff] %vm177_vm0, %v6758_v21  ;;  %v2209_v37 = vmul.f32 %v6758_v21, %v6758_v21 }
 0x3ab   : > { %v2022_v29 = vpop.f32.mrf.mxu0 }
 0x3ac   : > { %2098 = vst.msk [vmem:[#allocation3 + $0x50] sm:$0xff] %vm177_vm0, %v2022_v29  ;;  %v2200_v57 = vmul.f32 %v2022_v29, %v2022_v29  ;;  %v2139_v48 = vsel %vm177_vm0, %v2022_v29, 0.0  ;;  %v2157_v29 = vsel %vm177_vm0, %v6758_v21, 0.0  ;;  %v2259_v60 = vsel %vm177_vm0, %v2209_v37, 0.0 }
 0x3ad   : > { %v2140_v49 = vadd.f32 %v2139_v48, %v2138_v50 }
 0x3ae   : > { %v2241_v25 = vsel %vm177_vm0, %v2200_v57, 0.0 }
 0x3af   : > { %v2242_v30 = vadd.f32 %v2241_v25, %v2240_v23 }
 0x3b1   : > { %v6763_v41 = vpop.f32.mrf.mxu2 }
 0x3b2   : > { %2108 = vst.msk [vmem:[#allocation3 + $0xa0] sm:$0xff] %vm177_vm0, %v6763_v41  ;;  %v2159_v2 = vsel %vm177_vm0, %v6763_v41, 0.0 }
 0x3b3   : > { %v2025_v9 = vpop.f32.mrf.mxu0 }
 0x3b4   : > { %2099 = vst.msk [vmem:[#allocation3 + $0x58] sm:$0xff] %vm177_vm0, %v2025_v9  ;;  %v2201_v40 = vmul.f32 %v2025_v9, %v2025_v9  ;;  %v2141_v35 = vsel %vm177_vm0, %v2025_v9, 0.0  ;;  %v2210_v9 = vmul.f32 %v6763_v41, %v6763_v41 }
 0x3b5   : > { %v2142_v31 = vadd.f32 %v2141_v35, %v2140_v49 }
 0x3b6   : > { %v2243_v39 = vsel %vm177_vm0, %v2201_v40, 0.0  ;;  %v2261_v20 = vsel %vm177_vm0, %v2210_v9, 0.0 }
 0x3b7   : > { %v2244_v5 = vadd.f32 %v2243_v39, %v2242_v30 }
 0x3b9   : > { %v6768_v52 = vpop.f32.mrf.mxu2 }
 0x3ba   : > { %2109 = vst.msk [vmem:[#allocation3 + $0xa8] sm:$0xff] %vm177_vm0, %v6768_v52  ;;  %v2211_v21 = vmul.f32 %v6768_v52, %v6768_v52  ;;  %v2161_v25 = vsel %vm177_vm0, %v6768_v52, 0.0 }
 0x3bb   : > { %v2028_v14 = vpop.f32.mrf.mxu0 }
 0x3bc   : > { %2100 = vst.msk [vmem:[#allocation3 + $0x60] sm:$0xff] %vm177_vm0, %v2028_v14  ;;  %v2202_v8 = vmul.f32 %v2028_v14, %v2028_v14  ;;  %v2143_v59 = vsel %vm177_vm0, %v2028_v14, 0.0  ;;  %v2263_v41 = vsel %vm177_vm0, %v2211_v21, 0.0 }
 0x3bd   : > { %v2144_v32 = vadd.f32 %v2143_v59, %v2142_v31 }
 0x3be   : > { %v2245_v45 = vsel %vm177_vm0, %v2202_v8, 0.0 }
 0x3bf   : > { %v2246_v11 = vadd.f32 %v2245_v45, %v2244_v5 }
 0x3c1   : > { %v6773_v19 = vpop.f32.mrf.mxu2 }
 0x3c2   : > { %2110 = vst.msk [vmem:[#allocation3 + $0xb0] sm:$0xff] %vm177_vm0, %v6773_v19  ;;  %v2212_v8 = vmul.f32 %v6773_v19, %v6773_v19  ;;  %v2163_v49 = vsel %vm177_vm0, %v6773_v19, 0.0 }
 0x3c3   : > { %v2031_v26 = vpop.f32.mrf.mxu0 }
 0x3c4   : > { %2101 = vst.msk [vmem:[#allocation3 + $0x68] sm:$0xff] %vm177_vm0, %v2031_v26  ;;  %v2203_v47 = vmul.f32 %v2031_v26, %v2031_v26  ;;  %v2145_v44 = vsel %vm177_vm0, %v2031_v26, 0.0  ;;  %v2265_v39 = vsel %vm177_vm0, %v2212_v8, 0.0 }
 0x3c5   : > { %v2146_v0 = vadd.f32 %v2145_v44, %v2144_v32 }
 0x3c6   : > { %v2247_v43 = vsel %vm177_vm0, %v2203_v47, 0.0 }
 0x3c7   : > { %v2248_v12 = vadd.f32 %v2247_v43, %v2246_v11 }
 0x3c9   : > { %v6781_v33 = vpop.f32.mrf.mxu2 }
 0x3ca   : > { %2111 = vst.msk [vmem:[#allocation3 + $0xb8] sm:$0xff] %vm177_vm0, %v6781_v33  ;;  %v2213_v59 = vmul.f32 %v6781_v33, %v6781_v33  ;;  %v2165_v30 = vsel %vm177_vm0, %v6781_v33, 0.0 }
 0x3cb   : > { %v2034_v10 = vpop.f32.mrf.mxu0 }
 0x3cc   : > { %2102 = vst.msk [vmem:[#allocation3 + $0x70] sm:$0xff] %vm177_vm0, %v2034_v10  ;;  %v2204_v18 = vmul.f32 %v2034_v10, %v2034_v10  ;;  %v2147_v4 = vsel %vm177_vm0, %v2034_v10, 0.0  ;;  %v2267_v45 = vsel %vm177_vm0, %v2213_v59, 0.0 }
 0x3cd   : > { %v2148_v54 = vadd.f32 %v2147_v4, %v2146_v0 }
 0x3ce   : > { %v2249_v36 = vsel %vm177_vm0, %v2204_v18, 0.0 }
 0x3cf   : > { %v2250_v15 = vadd.f32 %v2249_v36, %v2248_v12 }
 0x3d1   : > { %v2064_v13 = vpop.f32.mrf.mxu2 }
 0x3d2   : > { %2112 = vst.msk [vmem:[#allocation3 + $0xc0] sm:$0xff] %vm177_vm0, %v2064_v13  ;;  %v2214_v44 = vmul.f32 %v2064_v13, %v2064_v13  ;;  %v2167_v19 = vsel %vm177_vm0, %v2064_v13, 0.0 }
 0x3d3   : > { %v2037_v16 = vpop.f32.mrf.mxu0 }
 0x3d4   : > { %2103 = vst.msk [vmem:[#allocation3 + $0x78] sm:$0xff] %vm177_vm0, %v2037_v16  ;;  %v2149_v42 = vsel %vm177_vm0, %v2037_v16, 0.0  ;;  %v2205_v56 = vmul.f32 %v2037_v16, %v2037_v16  ;;  %v2269_v32 = vsel %vm177_vm0, %v2214_v44, 0.0  ;;  %v6873_v44 = vld [vmem:[#allocation3 + $0x8] sm:$0xff] }
 0x3d5   : > { %v2150_v7 = vadd.f32 %v2149_v42, %v2148_v54 }
 0x3d6   : > { %v2251_v22 = vsel %vm177_vm0, %v2205_v56, 0.0 }
 0x3d7   : > { %v2152_v55 = vadd.f32 %v2151_v17, %v2150_v7  ;;  %v2252_v24 = vadd.f32 %v2251_v22, %v2250_v15 }
 0x3d9   : > { %v2154_v28 = vadd.f32 %v2153_v46, %v2152_v55  ;;  %v2254_v51 = vadd.f32 %v2253_v1, %v2252_v24  ;;  %v2067_v6 = vpop.f32.mrf.mxu2 }
 0x3da   : > { %2113 = vst.msk [vmem:[#allocation3 + $0xc8] sm:$0xff] %vm177_vm0, %v2067_v6  ;;  %v2215_v43 = vmul.f32 %v2067_v6, %v2067_v6  ;;  %v2169_v0 = vsel %vm177_vm0, %v2067_v6, 0.0 }
 0x3db   : > { %v2156_v27 = vadd.f32 %v2155_v38, %v2154_v28  ;;  %v2256_v58 = vadd.f32 %v2255_v63, %v2254_v51 }
 0x3dc   : > { %v2271_v36 = vsel %vm177_vm0, %v2215_v43, 0.0  ;;  %v6883_v43 = vld [vmem:[#allocation3 + $0x20] sm:$0xff] }
 0x3dd   : > { %v2158_v14 = vadd.f32 %v2157_v29, %v2156_v27  ;;  %v2258_v26 = vadd.f32 %v2257_v3, %v2256_v58 }
 0x3df   : > { %v2160_v34 = vadd.f32 %v2159_v2, %v2158_v14  ;;  %v2260_v57 = vadd.f32 %v2259_v60, %v2258_v26 }
 0x3e1   : > { %v2262_v48 = vadd.f32 %v2261_v20, %v2260_v57  ;;  %v2070_v40 = vpop.f32.mrf.mxu2  ;;  %v2162_v35 = vadd.f32 %v2161_v25, %v2160_v34 }
 0x3e2   : > { %2114 = vst.msk [vmem:[#allocation3 + $0xd0] sm:$0xff] %vm177_vm0, %v2070_v40  ;;  %v2216_v12 = vmul.f32 %v2070_v40, %v2070_v40  ;;  %v2171_v16 = vsel %vm177_vm0, %v2070_v40, 0.0 }
 0x3e3   : > { %v2264_v23 = vadd.f32 %v2263_v41, %v2262_v48  ;;  %v2164_v10 = vadd.f32 %v2163_v49, %v2162_v35 }
 0x3e4   : > { %v2273_v13 = vsel %vm177_vm0, %v2216_v12, 0.0  ;;  %v6895_v12 = vld [vmem:[#allocation3 + $0x38] sm:$0xff] }
 0x3e5   : > { %v2266_v47 = vadd.f32 %v2265_v39, %v2264_v23  ;;  %v2166_v31 = vadd.f32 %v2165_v30, %v2164_v10 }
 0x3e7   : > { %v2268_v18 = vadd.f32 %v2267_v45, %v2266_v47  ;;  %v2168_v5 = vadd.f32 %v2167_v19, %v2166_v31  ;;  %v6871_v45 = vld [vmem:[#allocation3] sm:$0xff]  ;;  %v6877_v19 = vld [vmem:[#allocation3 + $0x18] sm:$0xff] }
 0x3e9   : > { %v2073_v50 = vpop.f32.mrf.mxu2  ;;  %v2270_v4 = vadd.f32 %v2269_v32, %v2268_v18  ;;  %v2170_v33 = vadd.f32 %v2169_v0, %v2168_v5  ;;  %v6875_v18 = vld [vmem:[#allocation3 + $0x10] sm:$0xff] }
 0x3ea   : > { %2115 = vst.msk [vmem:[#allocation3 + $0xd8] sm:$0xff] %vm177_vm0, %v2073_v50  ;;  %v2217_v42 = vmul.f32 %v2073_v50, %v2073_v50  ;;  %v2173_v17 = vsel %vm177_vm0, %v2073_v50, 0.0 }
 0x3eb   : > { %v2272_v54 = vadd.f32 %v2271_v36, %v2270_v4  ;;  %v2172_v53 = vadd.f32 %v2171_v16, %v2170_v33  ;;  %v6885_v4 = vld [vmem:[#allocation3 + $0x28] sm:$0xff] }
 0x3ec   : > { %v2275_v24 = vsel %vm177_vm0, %v2217_v42, 0.0  ;;  %v6899_v16 = vld [vmem:[#allocation3 + $0x48] sm:$0xff] }
 0x3ed   : > { %v2274_v15 = vadd.f32 %v2273_v13, %v2272_v54  ;;  %v2174_v55 = vadd.f32 %v2173_v17, %v2172_v53  ;;  %v6897_v54 = vld [vmem:[#allocation3 + $0x40] sm:$0xff]  ;;  %v6912_v17 = vld [vmem:[#allocation3 + $0x58] sm:$0xff] }
 0x3ef   : > { %v2276_v28 = vadd.f32 %v2275_v24, %v2274_v15  ;;  %v6908_v15 = vld [vmem:[#allocation3 + $0x80] sm:$0xff] }
 0x3f1   : > { %v2076_v52 = vpop.f32.mrf.mxu2 }
 0x3f2   : > { %2116 = vst.msk [vmem:[#allocation3 + $0xe0] sm:$0xff] %vm177_vm0, %v2076_v52  ;;  %v2218_v56 = vmul.f32 %v2076_v52, %v2076_v52  ;;  %v2175_v61 = vsel %vm177_vm0, %v2076_v52, 0.0 }
 0x3f3   : > { %v2176_v51 = vadd.f32 %v2175_v61, %v2174_v55  ;;  %v6914_v61 = vld [vmem:[#allocation3 + $0x60] sm:$0xff] }
 0x3f4   : > { %v2277_v1 = vsel %vm177_vm0, %v2218_v56, 0.0 }
 0x3f5   : > { %v2278_v38 = vadd.f32 %v2277_v1, %v2276_v28  ;;  %v6928_v28 = vld [vmem:[#allocation3 + $0x78] sm:$0xff] }
 0x3f9   : > { %v2079_v11 = vpop.f32.mrf.mxu2 }
 0x3fa   : > { %2117 = vst.msk [vmem:[#allocation3 + $0xe8] sm:$0xff] %vm177_vm0, %v2079_v11  ;;  %v2219_v22 = vmul.f32 %v2079_v11, %v2079_v11  ;;  %v2177_v46 = vsel %vm177_vm0, %v2079_v11, 0.0  ;;  %v6887_v11 = vld [vmem:[#allocation3 + $0x30] sm:$0xff] }
 0x3fb   : > { %v2178_v37 = vadd.f32 %v2177_v46, %v2176_v51  ;;  %v6924_v46 = vld [vmem:[#allocation3 + $0x68] sm:$0xff] }
 0x3fc   : > { %v2279_v6 = vsel %vm177_vm0, %v2219_v22, 0.0 }
 0x3fd   : > { %v2280_v58 = vadd.f32 %v2279_v6, %v2278_v38 }
 0x401   : > { %v2082_v7 = vpop.f32.mrf.mxu2 }
 0x402   : > { %2118 = vst.msk [vmem:[#allocation3 + $0xf0] sm:$0xff] %vm177_vm0, %v2082_v7  ;;  %v2220_v62 = vmul.f32 %v2082_v7, %v2082_v7  ;;  %v2179_v63 = vsel %vm177_vm0, %v2082_v7, 0.0  ;;  %v6910_v7 = vld [vmem:[#allocation3 + $0x50] sm:$0xff] }
 0x403   : > { %v2180_v3 = vadd.f32 %v2179_v63, %v2178_v37  ;;  %v2325_v37 = vld [vmem:[#allocation3 + $0x88] sm:$0xff] }
 0x404   : > { %v2281_v27 = vsel %vm177_vm0, %v2220_v62, 0.0  ;;  %v6926_v62 = vld [vmem:[#allocation3 + $0x70] sm:$0xff] }
 0x405   : > { %v2282_v26 = vadd.f32 %v2281_v27, %v2280_v58  ;;  %v2326_v27 = vld [vmem:[#allocation3 + $0x90] sm:$0xff]  ;;  %v2327_v58 = vld [vmem:[#allocation3 + $0x98] sm:$0xff] }
 0x409   : > { %v2085_v29 = vpop.f32.mrf.mxu2 }
 0x40a   : > { %2119 = vst.msk [vmem:[#allocation3 + $0xf8] sm:$0xff] %vm177_vm0, %v2085_v29  ;;  %v2181_v9 = vsel %vm177_vm0, %v2085_v29, 0.0  ;;  %v2221_v14 = vmul.f32 %v2085_v29, %v2085_v29 }
 0x40b   : > { %v2182_v60 = vadd.f32 %v2181_v9, %v2180_v3 }
 0x40c   : > { %v2283_v2 = vsel %vm177_vm0, %v2221_v14, 0.0 }
 0x40d   : > { %v2183_v34 = vrot.slane %v2182_v60, 4  ;;  %v2284_v57 = vadd.f32 %v2283_v2, %v2282_v26  ;;  %v2328_v26 = vld [vmem:[#allocation3 + $0xa0] sm:$0xff]  ;;  %v2330_v2 = vld [vmem:[#allocation3 + $0xb0] sm:$0xff] }
 0x40f   : > { %v2184_v20 = vadd.f32 %v2183_v34, %v2182_v60  ;;  %v2285_v48 = vrot.slane %v2284_v57, 4  ;;  %v2329_v60 = vld [vmem:[#allocation3 + $0xa8] sm:$0xff] }
 0x411   : > { %v2185_v40 = vrot.slane %v2184_v20, 2  ;;  %v2286_v21 = vadd.f32 %v2285_v48, %v2284_v57  ;;  %v6881_v32 = vld [vmem:[#allocation3 + $0xf8] sm:$0xff] }
 0x412   : > { %v2331_v48 = vld [vmem:[#allocation3 + $0xb8] sm:$0xff] }
 0x413   : > { %v2186_v50 = vadd.f32 %v2185_v40, %v2184_v20  ;;  %v2287_v25 = vrot.slane %v2286_v21, 2  ;;  %v2332_v40 = vld [vmem:[#allocation3 + $0xc0] sm:$0xff] }
 0x415   : > { %v2187_v35 = vrot.slane %v2186_v50, 1  ;;  %v2288_v41 = vadd.f32 %v2287_v25, %v2286_v21  ;;  %v2333_v21 = vld [vmem:[#allocation3 + $0xc8] sm:$0xff] }
 0x417   : > { %v2188_v8 = vadd.f32 %v2187_v35, %v2186_v50  ;;  %v2289_v23 = vrot.slane %v2288_v41, 1 }
 0x419   : > { %v2290_v49 = vadd.f32 %v2289_v23, %v2288_v41  ;;  %v6862_v10 = vmul.f32 0.00390625, %v2188_v8  ;;  %v2334_v8 = vld [vmem:[#allocation3 + $0xd0] sm:$0xff]  ;;  %v2335_v23 = vld [vmem:[#allocation3 + $0xd8] sm:$0xff] }
 0x41b   : > { %v2293_v39 = vmul.f32 0.00390625, %v2290_v49  ;;  %v2294_v59 = vmul.f32 %v6862_v10, %v6862_v10  ;;  %v2371_v0 = vsub.f32 %v6881_v32, %v6862_v10  ;;  %v2340_v33 = vsub.f32 %v6871_v45, %v6862_v10  ;;  %v2336_v49 = vld [vmem:[#allocation3 + $0xe0] sm:$0xff] }
 0x41c   : > { %v2341_v36 = vsub.f32 %v6873_v44, %v6862_v10  ;;  %v2342_v13 = vsub.f32 %v6875_v18, %v6862_v10  ;;  %v2343_v42 = vsub.f32 %v6877_v19, %v6862_v10  ;;  %v2344_v56 = vsub.f32 %v6883_v43, %v6862_v10  ;;  %v2338_v18 = vld [vmem:[#allocation3 + $0xf0] sm:$0xff] }
 0x41d   : > { %v2295_v47 = vsub.f32 %v2293_v39, %v2294_v59  ;;  %v2345_v22 = vsub.f32 %v6885_v4, %v6862_v10  ;;  %v2346_v55 = vsub.f32 %v6887_v11, %v6862_v10  ;;  %v2347_v24 = vsub.f32 %v6895_v12, %v6862_v10 }
 0x41e   : > { %v2348_v1 = vsub.f32 %v6897_v54, %v6862_v10  ;;  %v2349_v6 = vsub.f32 %v6899_v16, %v6862_v10  ;;  %v2350_v63 = vsub.f32 %v6910_v7, %v6862_v10  ;;  %v2351_v38 = vsub.f32 %v6912_v17, %v6862_v10 }
 0x41f   : > { %v2296_v52 = vmax.f32 %v2295_v47, 0.0  ;;  %v2352_v3 = vsub.f32 %v6914_v61, %v6862_v10  ;;  %v2353_v29 = vsub.f32 %v6924_v46, %v6862_v10  ;;  %v2354_v9 = vsub.f32 %v6926_v62, %v6862_v10 }
 0x420   : > { %v2355_v14 = vsub.f32 %v6928_v28, %v6862_v10  ;;  %v2356_v57 = vsub.f32 %v6908_v15, %v6862_v10  ;;  %v2357_v20 = vsub.f32 %v2325_v37, %v6862_v10  ;;  %v2358_v50 = vsub.f32 %v2326_v27, %v6862_v10 }
 0x421   : > { %v6866_v30 = vadd.f32 1e-05, %v2296_v52  ;;  %v2359_v25 = vsub.f32 %v2327_v58, %v6862_v10  ;;  %v2360_v35 = vsub.f32 %v2328_v26, %v6862_v10  ;;  %v2361_v41 = vsub.f32 %v2329_v60, %v6862_v10  ;;  %v2337_v52 = vld [vmem:[#allocation3 + $0xe8] sm:$0xff] }
 0x422   : > { %v2362_v59 = vsub.f32 %v2330_v2, %v6862_v10  ;;  %v2363_v47 = vsub.f32 %v2331_v48, %v6862_v10  ;;  %v2364_v19 = vsub.f32 %v2332_v40, %v6862_v10  ;;  %v2366_v43 = vsub.f32 %v2334_v8, %v6862_v10 }
 0x423   : > { %4911 = vrsqrt.f32 %v6866_v30  ;;  %vm2304_vm12 = vweird.f32 %v6866_v30  ;;  %v2367_v4 = vsub.f32 %v2335_v23, %v6862_v10  ;;  %v2369_v12 = vsub.f32 %v2337_v52, %v6862_v10 }
 0x424   : > { %v2370_v54 = vsub.f32 %v2338_v18, %v6862_v10 }
 0x429   : > { %v6869_v31 = vpop.eup %4911 }
 0x42a   : > { %v2299_v5 = vmul.f32 %v6869_v31, %v6866_v30  ;;  %vm2305_vm11 = vweird.f32 %v6869_v31  ;;  %v2368_v30 = vsub.f32 %v2336_v49, %v6862_v10 }
 0x42b   : > { %vm2306_vm13 = vmor %vm2304_vm12, %vm2305_vm11 }
 0x42c   : > { %v2300_v53 = vmul.f32 %v6869_v31, %v2299_v5  ;;  %v2365_v5 = vsub.f32 %v2333_v21, %v6862_v10 }
 0x42e   : > { %v2301_v51 = vmul.f32 0.5, %v2300_v53 }
 0x430   : > { %v2302_v34 = vsub.f32 1.5, %v2301_v51 }
 0x432   : > { %v2303_v39 = vmul.f32 %v6869_v31, %v2302_v34 }
 0x434   : > { %v2307_v11 = vsel %vm2306_vm13, %v6869_v31, %v2303_v39 }
 0x435   : > { %v2403_v16 = vmul.f32 %v2371_v0, %v2307_v11  ;;  %v2372_v53 = vmul.f32 %v2340_v33, %v2307_v11  ;;  %v2373_v15 = vmul.f32 %v2341_v36, %v2307_v11  ;;  %v2374_v7 = vmul.f32 %v2342_v13, %v2307_v11 }
 0x436   : > { %v2375_v31 = vmul.f32 %v2343_v42, %v2307_v11  ;;  %v2376_v17 = vmul.f32 %v2344_v56, %v2307_v11  ;;  %v2377_v61 = vmul.f32 %v2345_v22, %v2307_v11  ;;  %v2378_v46 = vmul.f32 %v2346_v55, %v2307_v11 }
 0x437   : > { %v2435_v62 = vmax.f32 %v2403_v16, 0.0  ;;  %v2404_v28 = vmax.f32 %v2372_v53, 0.0  ;;  %v2379_v51 = vmul.f32 %v2347_v24, %v2307_v11  ;;  %v2380_v37 = vmul.f32 %v2348_v1, %v2307_v11 }
 0x438   : > { %v2381_v27 = vmul.f32 %v2349_v6, %v2307_v11  ;;  %v2382_v32 = vmul.f32 %v2350_v63, %v2307_v11  ;;  %v2383_v0 = vmul.f32 %v2351_v38, %v2307_v11  ;;  %v2384_v58 = vmul.f32 %v2352_v3, %v2307_v11 }
 0x439   : > { %2467 = vst.msk [vmem:[#allocation2 + $0x189] sm:$0xff] %vm177_vm0, %v2435_v62  ;;  %v2385_v45 = vmul.f32 %v2353_v29, %v2307_v11  ;;  %v2386_v33 = vmul.f32 %v2354_v9, %v2307_v11  ;;  %v2387_v26 = vmul.f32 %v2355_v14, %v2307_v11  ;;  %v6976_v10 = vmul.f32 %v2356_v57, %v2307_v11 }
 0x43a   : > { %2436 = vst.msk [vmem:[#allocation2 + $0x19] sm:$0xff] %vm177_vm0, %v2404_v28  ;;  %v6979_v44 = vmul.f32 %v2357_v20, %v2307_v11  ;;  %v6981_v36 = vmul.f32 %v2358_v50, %v2307_v11  ;;  %v6983_v13 = vmul.f32 %v2359_v25, %v2307_v11  ;;  %v6985_v42 = vmul.f32 %v2360_v35, %v2307_v11 }
 0x43b   : > { %v6987_v56 = vmul.f32 %v2361_v41, %v2307_v11  ;;  %v6989_v22 = vmul.f32 %v2362_v59, %v2307_v11  ;;  %v6991_v55 = vmul.f32 %v2363_v47, %v2307_v11  ;;  %v6993_v24 = vmul.f32 %v2364_v19, %v2307_v11 }
 0x43c   : > { %v6995_v1 = vmul.f32 %v2365_v5, %v2307_v11  ;;  %v6997_v6 = vmul.f32 %v2366_v43, %v2307_v11  ;;  %v6999_v63 = vmul.f32 %v2367_v4, %v2307_v11  ;;  %v7001_v38 = vmul.f32 %v2368_v30, %v2307_v11 }
 0x43d   : > { %v7003_v3 = vmul.f32 %v2369_v12, %v2307_v11  ;;  %v7005_v29 = vmul.f32 %v2370_v54, %v2307_v11  ;;  %v2407_v9 = vmax.f32 %v2375_v31, 0.0  ;;  %v2405_v14 = vmax.f32 %v2373_v15, 0.0 }
 0x43e   : > { %v2406_v60 = vmax.f32 %v2374_v7, 0.0  ;;  %v2408_v2 = vmax.f32 %v2376_v17, 0.0  ;;  %v2409_v34 = vmax.f32 %v2377_v61, 0.0  ;;  %v2410_v57 = vmax.f32 %v2378_v46, 0.0 }
 0x43f   : > { %2439 = vst.msk [vmem:[#allocation2 + $0x39] sm:$0xff] %vm177_vm0, %v2407_v9  ;;  %v2411_v48 = vmax.f32 %v2379_v51, 0.0  ;;  %v2412_v40 = vmax.f32 %v2380_v37, 0.0  ;;  %v2413_v21 = vmax.f32 %v2381_v27, 0.0  ;;  %v2414_v25 = vmax.f32 %v2382_v32, 0.0 }
 0x440   : > { %2438 = vst.msk [vmem:[#allocation2 + $0x31] sm:$0xff] %vm177_vm0, %v2406_v60  ;;  %v2415_v35 = vmax.f32 %v2383_v0, 0.0  ;;  %v2416_v8 = vmax.f32 %v2384_v58, 0.0  ;;  %v2417_v23 = vmax.f32 %v2385_v45, 0.0  ;;  %v2418_v49 = vmax.f32 %v2386_v33, 0.0 }
 0x441   : > { %v7009_v20 = vld [vmem:[#allocation2 + $0x19] sm:$0xff]  ;;  %2437 = vst.msk [vmem:[#allocation2 + $0x21] sm:$0xff] %vm177_vm0, %v2405_v14  ;;  %v2419_v39 = vmax.f32 %v2387_v26, 0.0  ;;  %v2420_v59 = vmax.f32 %v6976_v10, 0.0  ;;  %v2421_v47 = vmax.f32 %v6979_v44, 0.0  ;;  %v2422_v18 = vmax.f32 %v6981_v36, 0.0 }
 0x442   : > { %2878 = vrot.lane.b32.xlu0 %v7009_v20, %s4969_s15  ;;  %2440 = vst.msk [vmem:[#allocation2 + $0x49] sm:$0xff] %vm177_vm0, %v2408_v2  ;;  %v2423_v19 = vmax.f32 %v6983_v13, 0.0  ;;  %v2424_v43 = vmax.f32 %v6985_v42, 0.0  ;;  %v2425_v4 = vmax.f32 %v6987_v56, 0.0  ;;  %v2426_v30 = vmax.f32 %v6989_v22, 0.0 }
 0x443   : > { %2441 = vst.msk [vmem:[#allocation2 + $0x51] sm:$0xff] %vm177_vm0, %v2409_v34  ;;  %v2427_v12 = vmax.f32 %v6991_v55, 0.0  ;;  %v2428_v54 = vmax.f32 %v6993_v24, 0.0  ;;  %v2429_v16 = vmax.f32 %v6995_v1, 0.0  ;;  %v2430_v53 = vmax.f32 %v6997_v6, 0.0 }
 0x444   : > { %2442 = vst.msk [vmem:[#allocation2 + $0x61] sm:$0xff] %vm177_vm0, %v2410_v57  ;;  %v2431_v15 = vmax.f32 %v6999_v63, 0.0  ;;  %v2432_v31 = vmax.f32 %v7001_v38, 0.0  ;;  %v2433_v17 = vmax.f32 %v7003_v3, 0.0  ;;  %v2434_v46 = vmax.f32 %v7005_v29, 0.0 }
 0x445   : > { %2443 = vst.msk [vmem:[#allocation2 + $0x69] sm:$0xff] %vm177_vm0, %v2411_v48  ;;  %v2477_v33 = vld [vmem:[#allocation2 + $0x1a] sm:$0x1] }
 0x446   : > { %v7018_v50 = vld [vmem:[#allocation2 + $0x39] sm:$0xff]  ;;  %2444 = vst.msk [vmem:[#allocation2 + $0x79] sm:$0xff] %vm177_vm0, %v2412_v40 }
 0x447   : > { %2471 = vst.msk [vmem:[#allocation2 + $0x9] sm:$0xff] %vm177_vm0, %v7018_v50  ;;  %v7023_v41 = vld [vmem:[#allocation2 + $0x31] sm:$0xff]  ;;  %v2514_v37 = vld [vmem:[#allocation2 + $0x3f] sm:$0x1] }
 0x448   : > { %2470 = vst.msk [vmem:[#allocation2 + $0x1] sm:$0xff] %vm177_vm0, %v7023_v41  ;;  %v7064_v7 = vld [vmem:[#allocation2 + $0x21] sm:$0xff]  ;;  %v2478_v0 = vld [vmem:[#allocation2 + $0x32] sm:$0x1] }
 0x449   : > { %2445 = vst.msk [vmem:[#allocation2 + $0x81] sm:$0xff] %vm177_vm0, %v2413_v21  ;;  %v2513_v62 = vld [vmem:[#allocation2 + $0x27] sm:$0x1]  ;;  %v7086_v27 = vld [vmem:[#allocation2 + $0x49] sm:$0xff] }
 0x44a   : > { %2446 = vst.msk [vmem:[#allocation2 + $0x91] sm:$0xff] %vm177_vm0, %v2414_v25  ;;  %2884 = vrot.lane.b32.xlu0 %v7018_v50, %s4969_s15  ;;  %v7082_v51 = vld [vmem:[#allocation2 + $0x51] sm:$0xff]  ;;  %v2479_v63 = vld [vmem:[#allocation2 + $0x4a] sm:$0x1] }
 0x44b   : > { %2447 = vst.msk [vmem:[#allocation2 + $0x99] sm:$0xff] %vm177_vm0, %v2415_v35  ;;  %v7046_v11 = vld [vmem:[#allocation2 + $0x61] sm:$0xff]  ;;  %v2515_v45 = vld [vmem:[#allocation2 + $0x57] sm:$0x1] }
 0x44c   : > { %2448 = vst.msk [vmem:[#allocation2 + $0xa9] sm:$0xff] %vm177_vm0, %v2416_v8  ;;  %v2516_v32 = vld [vmem:[#allocation2 + $0x6f] sm:$0x1]  ;;  %v2480_v22 = vld [vmem:[#allocation2 + $0x62] sm:$0x1] }
 0x44d   : > { %2449 = vst.msk [vmem:[#allocation2 + $0xb1] sm:$0xff] %vm177_vm0, %v2417_v23  ;;  %v2481_v44 = vld [vmem:[#allocation2 + $0x7a] sm:$0x1]  ;;  %v7106_v42 = vld [vmem:[#allocation2 + $0x69] sm:$0xff] }
 0x44e   : > { %v2587_v52 = vld [vmem:[#allocation2 + $0x9] sm:$0xff]  ;;  %2450 = vst.msk [vmem:[#allocation2 + $0xc1] sm:$0xff] %vm177_vm0, %v2418_v49  ;;  %v7101_v36 = vld [vmem:[#allocation2 + $0x79] sm:$0xff] }
 0x44f   : > { %2876 = vrot.lane.b32.xlu2 %v2587_v52, %s4969_s15  ;;  %v2586_v5 = vld [vmem:[#allocation2 + $0x1] sm:$0xff]  ;;  %2451 = vst.msk [vmem:[#allocation2 + $0xc9] sm:$0xff] %vm177_vm0, %v2419_v39  ;;  %v2512_v28 = vld [vmem:[#allocation2 + $0xf] sm:$0x1] }
 0x450   : > { %2874 = vrot.lane.b32.xlu1 %v2586_v5, %s4969_s15  ;;  %2452 = vst.msk [vmem:[#allocation2 + $0xd9] sm:$0xff] %vm177_vm0, %v2420_v59  ;;  %v7072_v61 = vld [vmem:[#allocation2 + $0x81] sm:$0xff] }
 0x451   : > { %2453 = vst.msk [vmem:[#allocation2 + $0xe1] sm:$0xff] %vm177_vm0, %v2421_v47  ;;  %v2517_v26 = vld [vmem:[#allocation2 + $0x87] sm:$0x1]  ;;  %v2476_v13 = vld [vmem:[#allocation2 + $0x2] sm:$0x1]  ;;  %v7126_v9 = vld [vmem:[#allocation2 + $0x91] sm:$0xff] }
 0x452   : > { %2454 = vst.msk [vmem:[#allocation2 + $0xf1] sm:$0xff] %vm177_vm0, %v2422_v18  ;;  %2890 = vrot.lane.b32.xlu0 %v7046_v11, %s4969_s15  ;;  %v2518_v56 = vld [vmem:[#allocation2 + $0x9f] sm:$0x1]  ;;  %v2482_v57 = vld [vmem:[#allocation2 + $0x92] sm:$0x1] }
 0x453   : > { %2455 = vst.msk [vmem:[#allocation2 + $0xf9] sm:$0xff] %vm177_vm0, %v2423_v19  ;;  %v7092_v58 = vld [vmem:[#allocation2 + $0xa9] sm:$0xff]  ;;  %v7121_v3 = vld [vmem:[#allocation2 + $0x99] sm:$0xff] }
 0x454   : > { %2456 = vst.msk [vmem:[#allocation2 + $0x109] sm:$0xff] %vm177_vm0, %v2424_v43  ;;  %v2519_v10 = vld [vmem:[#allocation2 + $0xb7] sm:$0x1]  ;;  %v2483_v29 = vld [vmem:[#allocation2 + $0xaa] sm:$0x1] }
 0x455   : > { %2457 = vst.msk [vmem:[#allocation2 + $0x111] sm:$0xff] %vm177_vm0, %v2425_v4  ;;  %v2484_v6 = vld [vmem:[#allocation2 + $0xc2] sm:$0x1]  ;;  %v7146_v8 = vld [vmem:[#allocation2 + $0xb1] sm:$0xff] }
 0x456   : > { %2458 = vst.msk [vmem:[#allocation2 + $0x121] sm:$0xff] %vm177_vm0, %v2426_v30  ;;  %v7112_v55 = vld [vmem:[#allocation2 + $0xc9] sm:$0xff]  ;;  %v7141_v25 = vld [vmem:[#allocation2 + $0xc1] sm:$0xff] }
 0x457   : > { %2459 = vst.msk [vmem:[#allocation2 + $0x129] sm:$0xff] %vm177_vm0, %v2427_v12  ;;  %2882 = vrot.lane.b32.xlu2 %v7023_v41, %s4969_s15  ;;  %v2520_v1 = vld [vmem:[#allocation2 + $0xcf] sm:$0x1]  ;;  %v2485_v23 = vld [vmem:[#allocation2 + $0xda] sm:$0x1] }
 0x458   : > { %2460 = vst.msk [vmem:[#allocation2 + $0x139] sm:$0xff] %vm177_vm0, %v2428_v54  ;;  %2880 = vrot.lane.b32.xlu1 %v7064_v7, %s4969_s15  ;;  %v2521_v38 = vld [vmem:[#allocation2 + $0xe7] sm:$0x1]  ;;  %v7166_v5 = vld [vmem:[#allocation2 + $0xd9] sm:$0xff] }
 0x459   : > { %2461 = vst.msk [vmem:[#allocation2 + $0x141] sm:$0xff] %vm177_vm0, %v2429_v16  ;;  %v7132_v2 = vld [vmem:[#allocation2 + $0xf1] sm:$0xff]  ;;  %v7161_v19 = vld [vmem:[#allocation2 + $0xe1] sm:$0xff] }
 0x45a   : > { %2462 = vst.msk [vmem:[#allocation2 + $0x151] sm:$0xff] %vm177_vm0, %v2430_v53  ;;  %2896 = vrot.lane.b32.xlu0 %v7072_v61, %s4969_s15  ;;  %v2522_v24 = vld [vmem:[#allocation2 + $0xff] sm:$0x1]  ;;  %v2486_v40 = vld [vmem:[#allocation2 + $0xf2] sm:$0x1] }
 0x45b   : > { %2463 = vst.msk [vmem:[#allocation2 + $0x159] sm:$0xff] %vm177_vm0, %v2431_v15  ;;  %v2487_v34 = vld [vmem:[#allocation2 + $0x10a] sm:$0x1]  ;;  %v7181_v12 = vld [vmem:[#allocation2 + $0xf9] sm:$0xff]  ;;  %v2528_v53 = vld [vmem:[#allocation2 + $0x18f] sm:$0x1] }
 0x45c   : > { %2464 = vst.msk [vmem:[#allocation2 + $0x169] sm:$0xff] %vm177_vm0, %v2432_v31  ;;  %v2523_v60 = vld [vmem:[#allocation2 + $0x117] sm:$0x1]  ;;  %v7175_v4 = vld [vmem:[#allocation2 + $0x109] sm:$0xff] }
 0x45d   : > { %2465 = vst.msk [vmem:[#allocation2 + $0x171] sm:$0xff] %vm177_vm0, %v2433_v17  ;;  %v7152_v39 = vld [vmem:[#allocation2 + $0x111] sm:$0xff]  ;;  %v2488_v47 = vld [vmem:[#allocation2 + $0x122] sm:$0x1] }
 0x45e   : > { %2466 = vst.msk [vmem:[#allocation2 + $0x181] sm:$0xff] %vm177_vm0, %v2434_v46  ;;  %v2524_v48 = vld [vmem:[#allocation2 + $0x12f] sm:$0x1]  ;;  %v7200_v17 = vld [vmem:[#allocation2 + $0x121] sm:$0xff] }
 0x45f   : > { %2888 = vrot.lane.b32.xlu2 %v7082_v51, %s4969_s15  ;;  %2531 = vst.msk [vmem:[#allocation2 + $0x29] sm:$0x1] %vm239_vm1, %v2513_v62  ;;  %v2489_v59 = vld [vmem:[#allocation2 + $0x13a] sm:$0x1]  ;;  %v7196_v15 = vld [vmem:[#allocation2 + $0x129] sm:$0xff] }
 0x460   : > { %2886 = vrot.lane.b32.xlu1 %v7086_v27, %s4969_s15  ;;  %2530 = vst.msk [vmem:[#allocation2 + $0x11] sm:$0x1] %vm239_vm1, %v2512_v28  ;;  %v2525_v14 = vld [vmem:[#allocation2 + $0x147] sm:$0x1]  ;;  %v7171_v43 = vld [vmem:[#allocation2 + $0x139] sm:$0xff] }
 0x461   : > { %2532 = vst.msk [vmem:[#allocation2 + $0x41] sm:$0x1] %vm239_vm1, %v2514_v37  ;;  %v2490_v35 = vld [vmem:[#allocation2 + $0x152] sm:$0x1]  ;;  %v2618_v46 = vld [vmem:[#allocation2 + $0x2] sm:$0xff] }
 0x462   : > { %2902 = vrot.lane.b32.xlu0 %v7092_v58, %s4969_s15  ;;  %2534 = vst.msk [vmem:[#allocation2 + $0x71] sm:$0x1] %vm239_vm1, %v2516_v32  ;;  %v2526_v21 = vld [vmem:[#allocation2 + $0x15f] sm:$0x1]  ;;  %v7207_v28 = vld [vmem:[#allocation2 + $0x151] sm:$0xff]  ;;  %v7211_v37 = vld [vmem:[#allocation2 + $0x141] sm:$0xff] }
 0x463   : > { %2496 = vst.msk [vmem:[#allocation2 + $0x30] sm:$0x1] %vm239_vm1, %v2478_v0  ;;  %v2491_v52 = vld [vmem:[#allocation2 + $0x16a] sm:$0x1]  ;;  %v7189_v16 = vld [vmem:[#allocation2 + $0x159] sm:$0xff] }
 0x464   : > { %2533 = vst.msk [vmem:[#allocation2 + $0x59] sm:$0x1] %vm239_vm1, %v2515_v45  ;;  %v2527_v49 = vld [vmem:[#allocation2 + $0x177] sm:$0x1]  ;;  %v7177_v30 = vld [vmem:[#allocation2 + $0x169] sm:$0xff] }
 0x465   : > { %2495 = vst.msk [vmem:[#allocation2 + $0x18] sm:$0x1] %vm239_vm1, %v2477_v33  ;;  %v2492_v18 = vld [vmem:[#allocation2 + $0x182] sm:$0x1]  ;;  %v7187_v54 = vld [vmem:[#allocation2 + $0x171] sm:$0xff]  ;;  %v7223_v45 = vld [vmem:[#allocation2 + $0x169] sm:$0xff] }
 0x466   : > { %2535 = vst.msk [vmem:[#allocation2 + $0x89] sm:$0x1] %vm239_vm1, %v2517_v26  ;;  %v7215_v32 = vld [vmem:[#allocation2 + $0x22] sm:$0xff]  ;;  %v7219_v0 = vld [vmem:[#allocation2 + $0x171] sm:$0xff]  ;;  %v7231_v26 = vld [vmem:[#allocation2 + $0x1a] sm:$0xff] }
 0x467   : > { %2894 = vrot.lane.b32.xlu2 %v7101_v36, %s4969_s15  ;;  %2537 = vst.msk [vmem:[#allocation2 + $0xb9] sm:$0x1] %vm239_vm1, %v2519_v10  ;;  %v7227_v33 = vld [vmem:[#allocation2 + $0x4a] sm:$0xff] }
 0x468   : > { %2892 = vrot.lane.b32.xlu1 %v7106_v42, %s4969_s15  ;;  %2499 = vst.msk [vmem:[#allocation2 + $0x78] sm:$0x1] %vm239_vm1, %v2481_v44  ;;  %v2619_v10 = vld [vmem:[#allocation2 + $0xa] sm:$0xff] }
 0x469   : > { %2494 = vst.msk [vmem:[#allocation2] sm:$0x1] %vm239_vm1, %v2476_v13  ;;  %v2627_v13 = vld [vmem:[#allocation2 + $0x6a] sm:$0xff] }
 0x46a   : > { %2908 = vrot.lane.b32.xlu0 %v7112_v55, %s4969_s15  ;;  %2536 = vst.msk [vmem:[#allocation2 + $0xa1] sm:$0x1] %vm239_vm1, %v2518_v56  ;;  %v7239_v56 = vld [vmem:[#allocation2 + $0x3a] sm:$0xff] }
 0x46b   : > { %2498 = vst.msk [vmem:[#allocation2 + $0x60] sm:$0x1] %vm239_vm1, %v2480_v22  ;;  %v7241_v22 = vld [vmem:[#allocation2 + $0x32] sm:$0xff] }
 0x46c   : > { %2540 = vst.msk [vmem:[#allocation2 + $0x101] sm:$0x1] %vm239_vm1, %v2522_v24 }
 0x46d   : > { %2538 = vst.msk [vmem:[#allocation2 + $0xd1] sm:$0x1] %vm239_vm1, %v2520_v1  ;;  %v2630_v1 = vld [vmem:[#allocation2 + $0x92] sm:$0xff] }
 0x46e   : > { %2502 = vst.msk [vmem:[#allocation2 + $0xc0] sm:$0x1] %vm239_vm1, %v2484_v6 }
 0x46f   : > { %2900 = vrot.lane.b32.xlu2 %v7121_v3, %s4969_s15  ;;  %2497 = vst.msk [vmem:[#allocation2 + $0x48] sm:$0x1] %vm239_vm1, %v2479_v63  ;;  %v2626_v63 = vld [vmem:[#allocation2 + $0x62] sm:$0xff] }
 0x470   : > { %2898 = vrot.lane.b32.xlu1 %v7126_v9, %s4969_s15  ;;  %2539 = vst.msk [vmem:[#allocation2 + $0xe9] sm:$0x1] %vm239_vm1, %v2521_v38  ;;  %v7252_v38 = vld [vmem:[#allocation2 + $0x52] sm:$0xff] }
 0x471   : > { %2501 = vst.msk [vmem:[#allocation2 + $0xa8] sm:$0x1] %vm239_vm1, %v2483_v29 }
 0x472   : > { %2914 = vrot.lane.b32.xlu0 %v7132_v2, %s4969_s15  ;;  %2543 = vst.msk [vmem:[#allocation2 + $0x149] sm:$0x1] %vm239_vm1, %v2525_v14  ;;  %v2633_v14 = vld [vmem:[#allocation2 + $0xb2] sm:$0xff] }
 0x473   : > { %2541 = vst.msk [vmem:[#allocation2 + $0x119] sm:$0x1] %vm239_vm1, %v2523_v60 }
 0x474   : > { %2505 = vst.msk [vmem:[#allocation2 + $0x108] sm:$0x1] %vm239_vm1, %v2487_v34  ;;  %v2629_v34 = vld [vmem:[#allocation2 + $0x82] sm:$0xff] }
 0x475   : > { %2500 = vst.msk [vmem:[#allocation2 + $0x90] sm:$0x1] %vm239_vm1, %v2482_v57  ;;  %v2628_v57 = vld [vmem:[#allocation2 + $0x7a] sm:$0xff] }
 0x476   : > { %2542 = vst.msk [vmem:[#allocation2 + $0x131] sm:$0x1] %vm239_vm1, %v2524_v48 }
 0x477   : > { %2906 = vrot.lane.b32.xlu2 %v7141_v25, %s4969_s15  ;;  %2504 = vst.msk [vmem:[#allocation2 + $0xf0] sm:$0x1] %vm239_vm1, %v2486_v40  ;;  %v7266_v40 = vld [vmem:[#allocation2 + $0xda] sm:$0xff] }
 0x478   : > { %2904 = vrot.lane.b32.xlu1 %v7146_v8, %s4969_s15  ;;  %2544 = vst.msk [vmem:[#allocation2 + $0x161] sm:$0x1] %vm239_vm1, %v2526_v21 }
 0x479   : > { %2508 = vst.msk [vmem:[#allocation2 + $0x150] sm:$0x1] %vm239_vm1, %v2490_v35 }
 0x47a   : > { %2920 = vrot.lane.b32.xlu0 %v7152_v39, %s4969_s15  ;;  %2503 = vst.msk [vmem:[#allocation2 + $0xd8] sm:$0x1] %vm239_vm1, %v2485_v23  ;;  %v2632_v23 = vld [vmem:[#allocation2 + $0xaa] sm:$0xff] }
 0x47b   : > { %2545 = vst.msk [vmem:[#allocation2 + $0x179] sm:$0x1] %vm239_vm1, %v2527_v49  ;;  %v2631_v49 = vld [vmem:[#allocation2 + $0x9a] sm:$0xff] }
 0x47c   : > { %2507 = vst.msk [vmem:[#allocation2 + $0x138] sm:$0x1] %vm239_vm1, %v2489_v59 }
 0x47d   : > { %2506 = vst.msk [vmem:[#allocation2 + $0x120] sm:$0x1] %vm239_vm1, %v2488_v47  ;;  %v7278_v47 = vld [vmem:[#allocation2 + $0xfa] sm:$0xff] }
 0x47e   : > { %2509 = vst.msk [vmem:[#allocation2 + $0x168] sm:$0x1] %vm239_vm1, %v2491_v52 }
 0x47f   : > { %2912 = vrot.lane.b32.xlu2 %v7161_v19, %s4969_s15  ;;  %2510 = vst.msk [vmem:[#allocation2 + $0x180] sm:$0x1] %vm239_vm1, %v2492_v18 }
 0x480   : > { %2910 = vrot.lane.b32.xlu1 %v7166_v5, %s4969_s15  ;;  %9238 = vst [vmem:[#allocation14_spill] sm:$0xff] %v7177_v30 }
 0x481   : > { %2474 = vst.msk [vmem:[#allocation2 + $0x199] sm:$0xff] %vm177_vm0, %v7177_v30 }
 0x482   : > { %2926 = vrot.lane.b32.xlu0 %v7171_v43, %s4969_s15  ;;  %9239 = vst [vmem:[#allocation51_spill] sm:$0xff] %v7187_v54 }
 0x483   : > { %2475 = vst.msk [vmem:[#allocation2 + $0x1a1] sm:$0xff] %vm177_vm0, %v7187_v54 }
 0x484   : > { %2546 = vst.msk [vmem:[#allocation2 + $0x191] sm:$0x1] %vm239_vm1, %v2528_v53  ;;  %v2635_v53 = vld [vmem:[#allocation2 + $0xca] sm:$0xff] }
 0x487   : > { %2918 = vrot.lane.b32.xlu2 %v7175_v4, %s4969_s15 }
 0x488   : > { %2916 = vrot.lane.b32.xlu1 %v7181_v12, %s4969_s15  ;;  %v2493_v31 = vld [vmem:[#allocation2 + $0x19a] sm:$0x1] }
 0x489   : > { %2511 = vst.msk [vmem:[#allocation2 + $0x198] sm:$0x1] %vm239_vm1, %v2493_v31  ;;  %v2634_v31 = vld [vmem:[#allocation2 + $0xc2] sm:$0xff] }
 0x48a   : > { %2932 = vrot.lane.b32.xlu0 %v7189_v16, %s4969_s15  ;;  %v2529_v62 = vld [vmem:[#allocation2 + $0x1a7] sm:$0x1] }
 0x48b   : > { %2547 = vst.msk [vmem:[#allocation2 + $0x1a9] sm:$0x1] %vm239_vm1, %v2529_v62  ;;  %v2642_v62 = vld [vmem:[#allocation2 + $0x122] sm:$0xff] }
 0x48f   : > { %2924 = vrot.lane.b32.xlu2 %v7196_v15, %s4969_s15 }
 0x490   : > { %2922 = vrot.lane.b32.xlu1 %v7200_v17, %s4969_s15 }
 0x492   : > { %3002 = vrot.lane.b32.xlu0 %v2618_v46, %s4970_s16 }
 0x497   : > { %2930 = vrot.lane.b32.xlu2 %v7207_v28, %s4969_s15 }
 0x498   : > { %2928 = vrot.lane.b32.xlu1 %v7211_v37, %s4969_s15 }
 0x49a   : > { %3008 = vrot.lane.b32.xlu0 %v7215_v32, %s4970_s16 }
 0x49f   : > { %2936 = vrot.lane.b32.xlu2 %v7219_v0, %s4969_s15 }
 0x4a0   : > { %2934 = vrot.lane.b32.xlu1 %v7223_v45, %s4969_s15 }
 0x4a2   : > { %3014 = vrot.lane.b32.xlu0 %v7227_v33, %s4970_s16 }
 0x4a7   : > { %3006 = vrot.lane.b32.xlu2 %v7231_v26, %s4970_s16 }
 0x4a8   : > { %3004 = vrot.lane.b32.xlu1 %v2619_v10, %s4970_s16 }
 0x4a9   : > { %v7236_v44 = vpop.permute.xlu2 %2876 }
 0x4aa   : > { %9240 = vst [vmem:[#allocation9_spill] sm:$0xff] %v7236_v44  ;;  %3020 = vrot.lane.b32.xlu0 %v2627_v13, %s4970_s16  ;;  %v7421_v44 = vld [vmem:[#allocation2 + $0xc8] sm:$0xff] }
 0x4ab   : > { %9283 = vst [vmem:[#allocation88_spill] sm:$0xff] %v7421_v44 }
 0x4af   : > { %3012 = vrot.lane.b32.xlu2 %v7239_v56, %s4970_s16 }
 0x4b0   : > { %3010 = vrot.lane.b32.xlu1 %v7241_v22, %s4970_s16 }
 0x4b1   : > { %v7247_v24 = vpop.permute.xlu2 %2882 }
 0x4b2   : > { %9241 = vst [vmem:[#allocation53_spill] sm:$0xff] %v7247_v24  ;;  %3026 = vrot.lane.b32.xlu0 %v2630_v1, %s4970_s16  ;;  %v7295_v1 = vld [vmem:[#allocation2 + $0xf2] sm:$0xff] }
 0x4b4   : > { %v7250_v6 = vpop.permute.xlu0 %2878 }
 0x4b5   : > { %9242 = vst [vmem:[#allocation12_spill] sm:$0xff] %v7250_v6  ;;  %v2567_v6 = vld [vmem:[#allocation2 + $0x98] sm:$0xff] }
 0x4b7   : > { %3018 = vrot.lane.b32.xlu2 %v2626_v63, %s4970_s16  ;;  %v7297_v63 = vld [vmem:[#allocation2 + $0xe2] sm:$0xff] }
 0x4b8   : > { %3016 = vrot.lane.b32.xlu1 %v7252_v38, %s4970_s16 }
 0x4b9   : > { %v7257_v29 = vpop.permute.xlu2 %2888 }
 0x4ba   : > { %9243 = vst [vmem:[#allocation38_spill] sm:$0xff] %v7257_v29  ;;  %3032 = vrot.lane.b32.xlu0 %v2633_v14, %s4970_s16 }
 0x4bc   : > { %v7260_v60 = vpop.permute.xlu0 %2884 }
 0x4bd   : > { %9244 = vst [vmem:[#allocation4_spill] sm:$0xff] %v7260_v60  ;;  %v7387_v60 = vld [vmem:[#allocation2 + $0xb0] sm:$0xff] }
 0x4bf   : > { %3024 = vrot.lane.b32.xlu2 %v2629_v34, %s4970_s16  ;;  %v2645_v34 = vld [vmem:[#allocation2 + $0x142] sm:$0xff] }
 0x4c0   : > { %3022 = vrot.lane.b32.xlu1 %v2628_v57, %s4970_s16 }
 0x4c1   : > { %v7264_v48 = vpop.permute.xlu2 %2894 }
 0x4c2   : > { %9245 = vst [vmem:[#allocation55_spill] sm:$0xff] %v7264_v48  ;;  %v7268_v21 = vpop.permute.xlu1 %2874  ;;  %3038 = vrot.lane.b32.xlu0 %v7266_v40, %s4970_s16  ;;  %v7327_v48 = vld [vmem:[#allocation2 + $0x20] sm:$0xff] }
 0x4c3   : > { %9246 = vst [vmem:[#allocation5_spill] sm:$0xff] %v7268_v21  ;;  %v7459_v21 = vld [vmem:[#allocation2 + $0x108] sm:$0xff] }
 0x4c4   : > { %v7272_v35 = vpop.permute.xlu0 %2890  ;;  %9262 = vst [vmem:[#allocation59_spill] sm:$0xff] %v7327_v48 }
 0x4c5   : > { %9247 = vst [vmem:[#allocation57_spill] sm:$0xff] %v7272_v35  ;;  %v7349_v35 = vld [vmem:[#allocation2 + $0x18] sm:$0xff] }
 0x4c6   : > { %9267 = vst [vmem:[#allocation32_spill] sm:$0xff] %v7349_v35 }
 0x4c7   : > { %3030 = vrot.lane.b32.xlu2 %v2632_v23, %s4970_s16 }
 0x4c8   : > { %3028 = vrot.lane.b32.xlu1 %v2631_v49, %s4970_s16  ;;  %v7310_v49 = vld [vmem:[#allocation2 + $0x112] sm:$0xff] }
 0x4c9   : > { %v7276_v59 = vpop.permute.xlu2 %2900  ;;  %9257 = vst [vmem:[#allocation31_spill] sm:$0xff] %v7310_v49 }
 0x4ca   : > { %9248 = vst [vmem:[#allocation7_spill] sm:$0xff] %v7276_v59  ;;  %v7280_v52 = vpop.permute.xlu1 %2880  ;;  %3044 = vrot.lane.b32.xlu0 %v7278_v47, %s4970_s16  ;;  %v2644_v59 = vld [vmem:[#allocation2 + $0x13a] sm:$0xff] }
 0x4cb   : > { %9249 = vst [vmem:[#allocation26_spill] sm:$0xff] %v7280_v52  ;;  %v7399_v52 = vld [vmem:[#allocation2 + $0xd8] sm:$0xff] }
 0x4cc   : > { %v7284_v18 = vpop.permute.xlu0 %2896 }
 0x4cd   : > { %9250 = vst [vmem:[#allocation42_spill] sm:$0xff] %v7284_v18  ;;  %v2643_v18 = vld [vmem:[#allocation2 + $0x12a] sm:$0xff] }
 0x4cf   : > { %3036 = vrot.lane.b32.xlu2 %v2635_v53, %s4970_s16  ;;  %v7312_v53 = vld [vmem:[#allocation2 + $0x10a] sm:$0xff] }
 0x4d0   : > { %3034 = vrot.lane.b32.xlu1 %v2634_v31, %s4970_s16  ;;  %9258 = vst [vmem:[#allocation61_spill] sm:$0xff] %v7312_v53 }
 0x4d1   : > { %v7288_v46 = vpop.permute.xlu2 %2906 }
 0x4d2   : > { %9251 = vst [vmem:[#allocation73_spill] sm:$0xff] %v7288_v46  ;;  %v7290_v10 = vpop.permute.xlu1 %2886  ;;  %3050 = vrot.lane.b32.xlu0 %v2642_v62, %s4970_s16  ;;  %v2648_v62 = vld [vmem:[#allocation2 + $0x16a] sm:$0xff] }
 0x4d3   : > { %9252 = vst [vmem:[#allocation13_spill] sm:$0xff] %v7290_v10  ;;  %v7381_v10 = vld [vmem:[#allocation2 + $0x50] sm:$0xff] }
 0x4d4   : > { %v7293_v13 = vpop.permute.xlu0 %2902 }
 0x4d5   : > { %9253 = vst [vmem:[#allocation15_spill] sm:$0xff] %v7293_v13 }
 0x4d7   : > { %3042 = vrot.lane.b32.xlu2 %v7295_v1, %s4970_s16 }
 0x4d8   : > { %3040 = vrot.lane.b32.xlu1 %v7297_v63, %s4970_s16 }
 0x4d9   : > { %v7303_v14 = vpop.permute.xlu2 %2912 }
 0x4da   : > { %9254 = vst [vmem:[#allocation60_spill] sm:$0xff] %v7303_v14  ;;  %v7305_v57 = vpop.permute.xlu1 %2892  ;;  %3056 = vrot.lane.b32.xlu0 %v2645_v34, %s4970_s16 }
 0x4db   : > { %9255 = vst [vmem:[#allocation75_spill] sm:$0xff] %v7305_v57 }
 0x4dc   : > { %v7308_v23 = vpop.permute.xlu0 %2908 }
 0x4dd   : > { %9256 = vst [vmem:[#allocation6_spill] sm:$0xff] %v7308_v23 }
 0x4df   : > { %3048 = vrot.lane.b32.xlu2 %v7310_v49, %s4970_s16 }
 0x4e0   : > { %3046 = vrot.lane.b32.xlu1 %v7312_v53, %s4970_s16  ;;  %v2582_v53 = vld [vmem:[#allocation2 + $0x150] sm:$0xff] }
 0x4e1   : > { %v7318_v31 = vpop.permute.xlu2 %2918 }
 0x4e2   : > { %9259 = vst [vmem:[#allocation62_spill] sm:$0xff] %v7318_v31  ;;  %v7320_v13 = vpop.permute.xlu1 %2898  ;;  %3062 = vrot.lane.b32.xlu0 %v2648_v62, %s4970_s16  ;;  %v2647_v62 = vld [vmem:[#allocation2 + $0x15a] sm:$0xff]  ;;  %v2646_v31 = vld [vmem:[#allocation2 + $0x152] sm:$0xff] }
 0x4e3   : > { %9260 = vst [vmem:[#allocation27_spill] sm:$0xff] %v7320_v13 }
 0x4e4   : > { %v7323_v34 = vpop.permute.xlu0 %2914 }
 0x4e5   : > { %9261 = vst [vmem:[#allocation58_spill] sm:$0xff] %v7323_v34  ;;  %v7366_v34 = vld [vmem:[#allocation2 + $0x30] sm:$0xff] }
 0x4e7   : > { %3054 = vrot.lane.b32.xlu2 %v2644_v59, %s4970_s16  ;;  %v7339_v59 = vld [vmem:[#allocation2 + $0x48] sm:$0xff] }
 0x4e8   : > { %3052 = vrot.lane.b32.xlu1 %v2643_v18, %s4970_s16 }
 0x4e9   : > { %v7329_v54 = vpop.permute.xlu2 %2924 }
 0x4ea   : > { %9263 = vst [vmem:[#allocation133_spill] sm:$0xff] %v7329_v54  ;;  %v7331_v57 = vpop.permute.xlu1 %2904  ;;  %3132 = vrot.lane.b32.xlu0 %v7327_v48, %s4971_s17  ;;  %v2564_v48 = vld [vmem:[#allocation2 + $0x78] sm:$0xff] }
 0x4ec   : > { %v7335_v13 = vpop.permute.xlu0 %2920 }
 0x4ed   : > { %9264 = vst [vmem:[#allocation143_spill] sm:$0xff] %v7335_v13  ;;  %v2649_v13 = vld [vmem:[#allocation2 + $0x172] sm:$0xff] }
 0x4ef   : > { %3060 = vrot.lane.b32.xlu2 %v2647_v62, %s4970_s16 }
 0x4f0   : > { %3058 = vrot.lane.b32.xlu1 %v2646_v31, %s4970_s16  ;;  %v7354_v31 = vld [vmem:[#allocation2 + $0x68] sm:$0xff] }
 0x4f1   : > { %v7341_v18 = vpop.permute.xlu2 %2930 }
 0x4f2   : > { %9265 = vst [vmem:[#allocation152_spill] sm:$0xff] %v7341_v18  ;;  %v7343_v30 = vpop.permute.xlu1 %2910  ;;  %3138 = vrot.lane.b32.xlu0 %v7339_v59, %s4971_s17 }
 0x4f4   : > { %v7347_v54 = vpop.permute.xlu0 %2926 }
 0x4f5   : > { %9266 = vst [vmem:[#allocation17_spill] sm:$0xff] %v7347_v54  ;;  %v7364_v54 = vld [vmem:[#allocation2 + $0x38] sm:$0xff] }
 0x4f7   : > { %3130 = vrot.lane.b32.xlu2 %v7349_v35, %s4971_s17  ;;  %v2568_v35 = vld [vmem:[#allocation2 + $0xa8] sm:$0xff] }
 0x4f8   : > { %3064 = vrot.lane.b32.xlu1 %v2649_v13, %s4970_s16  ;;  %v2566_v13 = vld [vmem:[#allocation2 + $0x90] sm:$0xff] }
 0x4f9   : > { %v7356_v62 = vpop.permute.xlu2 %2936 }
 0x4fa   : > { %9268 = vst [vmem:[#allocation47_spill] sm:$0xff] %v7356_v62  ;;  %v7358_v18 = vpop.permute.xlu1 %2916  ;;  %3144 = vrot.lane.b32.xlu0 %v7354_v31, %s4971_s17 }
 0x4fb   : > { %9269 = vst [vmem:[#allocation78_spill] sm:$0xff] %v7358_v18 }
 0x4fc   : > { %v7362_v29 = vpop.permute.xlu0 %2932 }
 0x4fd   : > { %9270 = vst [vmem:[#allocation90_spill] sm:$0xff] %v7362_v29  ;;  %v7379_v29 = vld [vmem:[#allocation2 + $0x60] sm:$0xff] }
 0x4ff   : > { %3136 = vrot.lane.b32.xlu2 %v7364_v54, %s4971_s17 }
 0x500   : > { %3134 = vrot.lane.b32.xlu1 %v7366_v34, %s4971_s17 }
 0x501   : > { %v7372_v14 = vpop.permute.xlu2 %3006 }
 0x502   : > { %9271 = vst [vmem:[#allocation91_spill] sm:$0xff] %v7372_v14  ;;  %v7374_v62 = vpop.permute.xlu1 %2922  ;;  %3150 = vrot.lane.b32.xlu0 %v2566_v13, %s4971_s17 }
 0x503   : > { %9272 = vst [vmem:[#allocation110_spill] sm:$0xff] %v7374_v62  ;;  %v2565_v62 = vld [vmem:[#allocation2 + $0x80] sm:$0xff] }
 0x504   : > { %v7377_v18 = vpop.permute.xlu0 %3002 }
 0x505   : > { %9273 = vst [vmem:[#allocation33_spill] sm:$0xff] %v7377_v18  ;;  %v7441_v18 = vld [vmem:[#allocation2 + $0xe0] sm:$0xff] }
 0x506   : > { %9289 = vst [vmem:[#allocation131_spill] sm:$0xff] %v7441_v18 }
 0x507   : > { %3142 = vrot.lane.b32.xlu2 %v7379_v29, %s4971_s17 }
 0x508   : > { %3140 = vrot.lane.b32.xlu1 %v7381_v10, %s4971_s17 }
 0x509   : > { %v7389_v23 = vpop.permute.xlu2 %3012 }
 0x50a   : > { %9274 = vst [vmem:[#allocation49_spill] sm:$0xff] %v7389_v23  ;;  %v7391_v24 = vpop.permute.xlu1 %2928  ;;  %3156 = vrot.lane.b32.xlu0 %v7387_v60, %s4971_s17 }
 0x50b   : > { %9275 = vst [vmem:[#allocation76_spill] sm:$0xff] %v7391_v24 }
 0x50c   : > { %v7395_v13 = vpop.permute.xlu0 %3008 }
 0x50d   : > { %9276 = vst [vmem:[#allocation134_spill] sm:$0xff] %v7395_v13 }
 0x50f   : > { %3148 = vrot.lane.b32.xlu2 %v2565_v62, %s4971_s17  ;;  %v7411_v62 = vld [vmem:[#allocation2 + $0xf8] sm:$0xff] }
 0x510   : > { %3146 = vrot.lane.b32.xlu1 %v2564_v48, %s4971_s17 }
 0x511   : > { %v7401_v46 = vpop.permute.xlu2 %3018 }
 0x512   : > { %9277 = vst [vmem:[#allocation135_spill] sm:$0xff] %v7401_v46  ;;  %v7403_v14 = vpop.permute.xlu1 %2934  ;;  %3162 = vrot.lane.b32.xlu0 %v7399_v52, %s4971_s17 }
 0x513   : > { %9278 = vst [vmem:[#allocation156_spill] sm:$0xff] %v7403_v14  ;;  %v2579_v14 = vld [vmem:[#allocation2 + $0x128] sm:$0xff] }
 0x514   : > { %v7407_v23 = vpop.permute.xlu0 %3014 }
 0x515   : > { %9279 = vst [vmem:[#allocation16_spill] sm:$0xff] %v7407_v23  ;;  %v7423_v23 = vld [vmem:[#allocation2 + $0xc0] sm:$0xff] }
 0x516   : > { %9284 = vst [vmem:[#allocation99_spill] sm:$0xff] %v7423_v23 }
 0x517   : > { %3154 = vrot.lane.b32.xlu2 %v2568_v35, %s4971_s17 }
 0x518   : > { %3152 = vrot.lane.b32.xlu1 %v2567_v6, %s4971_s17  ;;  %v7429_v6 = vld [vmem:[#allocation2 + $0x120] sm:$0xff] }
 0x519   : > { %v7413_v48 = vpop.permute.xlu2 %3024  ;;  %9285 = vst [vmem:[#allocation111_spill] sm:$0xff] %v7429_v6 }
 0x51a   : > { %9280 = vst [vmem:[#allocation18_spill] sm:$0xff] %v7413_v48  ;;  %v7415_v13 = vpop.permute.xlu1 %3004  ;;  %3168 = vrot.lane.b32.xlu0 %v7411_v62, %s4971_s17 }
 0x51b   : > { %9281 = vst [vmem:[#allocation65_spill] sm:$0xff] %v7415_v13  ;;  %v7439_v13 = vld [vmem:[#allocation2 + $0xf0] sm:$0xff] }
 0x51c   : > { %v7419_v46 = vpop.permute.xlu0 %3020 }
 0x51d   : > { %9282 = vst [vmem:[#allocation80_spill] sm:$0xff] %v7419_v46 }
 0x51f   : > { %3160 = vrot.lane.b32.xlu2 %v7421_v44, %s4971_s17  ;;  %v7447_v44 = vld [vmem:[#allocation2 + $0x140] sm:$0xff] }
 0x520   : > { %3158 = vrot.lane.b32.xlu1 %v7423_v23, %s4971_s17  ;;  %9290 = vst [vmem:[#allocation144_spill] sm:$0xff] %v7447_v44  ;;  %v7457_v23 = vld [vmem:[#allocation2 + $0x110] sm:$0xff] }
 0x521   : > { %v7431_v35 = vpop.permute.xlu2 %3030  ;;  %9293 = vst [vmem:[#allocation8_spill] sm:$0xff] %v7457_v23 }
 0x522   : > { %9286 = vst [vmem:[#allocation112_spill] sm:$0xff] %v7431_v35  ;;  %v7433_v48 = vpop.permute.xlu1 %3010  ;;  %3174 = vrot.lane.b32.xlu0 %v7429_v6, %s4971_s17  ;;  %v2580_v6 = vld [vmem:[#allocation2 + $0x138] sm:$0xff] }
 0x523   : > { %9287 = vst [vmem:[#allocation63_spill] sm:$0xff] %v7433_v48 }
 0x524   : > { %v7437_v46 = vpop.permute.xlu0 %3026 }
 0x525   : > { %9288 = vst [vmem:[#allocation123_spill] sm:$0xff] %v7437_v46 }
 0x527   : > { %3166 = vrot.lane.b32.xlu2 %v7439_v13, %s4971_s17 }
 0x528   : > { %3164 = vrot.lane.b32.xlu1 %v7441_v18, %s4971_s17  ;;  %v7465_v18 = vld [vmem:[#allocation2 + $0x168] sm:$0xff] }
 0x529   : > { %v7449_v35 = vpop.permute.xlu2 %3036  ;;  %9294 = vst [vmem:[#allocation35_spill] sm:$0xff] %v7465_v18 }
 0x52a   : > { %9291 = vst [vmem:[#allocation157_spill] sm:$0xff] %v7449_v35  ;;  %v7451_v48 = vpop.permute.xlu1 %3016  ;;  %3180 = vrot.lane.b32.xlu0 %v7447_v44, %s4971_s17  ;;  %v2681_v44 = vld [vmem:[#allocation2 + $0x188] sm:$0xff] }
 0x52b   : > { %9292 = vst [vmem:[#allocation158_spill] sm:$0xff] %v7451_v48 }
 0x52c   : > { %v7455_v46 = vpop.permute.xlu0 %3032 }
 0x52f   : > { %3172 = vrot.lane.b32.xlu2 %v7457_v23, %s4971_s17 }
 0x530   : > { %3170 = vrot.lane.b32.xlu1 %v7459_v21, %s4971_s17 }
 0x531   : > { %v7467_v35 = vpop.permute.xlu2 %3042 }
 0x532   : > { %9295 = vst [vmem:[#allocation66_spill] sm:$0xff] %v7467_v35  ;;  %v7469_v48 = vpop.permute.xlu1 %3022  ;;  %3186 = vrot.lane.b32.xlu0 %v7465_v18, %s4971_s17 }
 0x533   : > { %9296 = vst [vmem:[#allocation67_spill] sm:$0xff] %v7469_v48  ;;  %v2583_v48 = vld [vmem:[#allocation2 + $0x158] sm:$0xff] }
 0x534   : > { %v7473_v49 = vpop.permute.xlu0 %3038 }
 0x537   : > { %3178 = vrot.lane.b32.xlu2 %v2580_v6, %s4971_s17 }
 0x538   : > { %3176 = vrot.lane.b32.xlu1 %v2579_v14, %s4971_s17 }
 0x539   : > { %v7477_v23 = vpop.permute.xlu2 %3048 }
 0x53a   : > { %9297 = vst [vmem:[#allocation92_spill] sm:$0xff] %v7477_v23  ;;  %v7479_v24 = vpop.permute.xlu1 %3028  ;;  %3192 = vrot.lane.b32.xlu0 %v2681_v44, %s4971_s17  ;;  %v2585_v23 = vld [vmem:[#allocation2 + $0x170] sm:$0xff] }
 0x53b   : > { %9298 = vst [vmem:[#allocation101_spill] sm:$0xff] %v7479_v24  ;;  %v2680_v24 = vld [vmem:[#allocation2 + $0x180] sm:$0xff] }
 0x53c   : > { %v7482_v35 = vpop.permute.xlu0 %3044 }
 0x53f   : > { %3184 = vrot.lane.b32.xlu2 %v2583_v48, %s4971_s17 }
 0x540   : > { %3182 = vrot.lane.b32.xlu1 %v2582_v53, %s4971_s17 }
 0x541   : > { %v7486_v18 = vpop.permute.xlu2 %3054 }
 0x542   : > { %9299 = vst [vmem:[#allocation108_spill] sm:$0xff] %v7486_v18  ;;  %v7488_v6 = vpop.permute.xlu1 %3034  ;;  %3262 = vrot.lane.b32.xlu0 %v7023_v41, %s4972_s18  ;;  %v2778_v18 = vld [vmem:[#allocation2 + $0x31] sm:$0xff] }
 0x544   : > { %v7492_v14 = vpop.permute.xlu0 %3050 }
 0x545   : > { %9300 = vst [vmem:[#allocation115_spill] sm:$0xff] %v7492_v14 }
 0x547   : > { %3190 = vrot.lane.b32.xlu2 %v2680_v24, %s4971_s17 }
 0x548   : > { %3188 = vrot.lane.b32.xlu1 %v2585_v23, %s4971_s17 }
 0x549   : > { %v7496_v44 = vpop.permute.xlu2 %3060 }
 0x54a   : > { %9301 = vst [vmem:[#allocation64_spill] sm:$0xff] %v7496_v44  ;;  %v7498_v48 = vpop.permute.xlu1 %3040  ;;  %3268 = vrot.lane.b32.xlu0 %v7082_v51, %s4972_s18  ;;  %v7624_v44 = vld [vmem:[#allocation2 + $0x181] sm:$0xff] }
 0x54b   : > { %9314 = vst [vmem:[#allocation50_spill] sm:$0xff] %v7624_v44 }
 0x54c   : > { %v7502_v53 = vpop.permute.xlu0 %3056 }
 0x54f   : > { %3260 = vrot.lane.b32.xlu2 %v7064_v7, %s4972_s18 }
 0x550   : > { %3258 = vrot.lane.b32.xlu1 %v7009_v20, %s4972_s18 }
 0x551   : > { %v7508_v41 = vpop.permute.xlu2 %3130 }
 0x552   : > { %v7510_v24 = vpop.permute.xlu1 %3046  ;;  %3274 = vrot.lane.b32.xlu0 %v7101_v36, %s4972_s18 }
 0x553   : > { %9302 = vst [vmem:[#allocation68_spill] sm:$0xff] %v7510_v24  ;;  %v2817_v24 = vld [vmem:[#allocation2 + $0x82] sm:$0xff] }
 0x554   : > { %v7514_v23 = vpop.permute.xlu0 %3062 }
 0x557   : > { %3266 = vrot.lane.b32.xlu2 %v7086_v27, %s4972_s18 }
 0x558   : > { %3264 = vrot.lane.b32.xlu1 %v7018_v50, %s4972_s18 }
 0x559   : > { %v7520_v51 = vpop.permute.xlu2 %3136 }
 0x55a   : > { %v7522_v7 = vpop.permute.xlu1 %3052  ;;  %3280 = vrot.lane.b32.xlu0 %v7121_v3, %s4972_s18 }
 0x55b   : > { %9303 = vst [vmem:[#allocation136_spill] sm:$0xff] %v7522_v7  ;;  %v2780_v7 = vld [vmem:[#allocation2 + $0x49] sm:$0xff] }
 0x55c   : > { %v7526_v20 = vpop.permute.xlu0 %3132 }
 0x55f   : > { %3272 = vrot.lane.b32.xlu2 %v7106_v42, %s4972_s18 }
 0x560   : > { %3270 = vrot.lane.b32.xlu1 %v7046_v11, %s4972_s18 }
 0x561   : > { %v7532_v36 = vpop.permute.xlu2 %3142 }
 0x562   : > { %v7534_v27 = vpop.permute.xlu1 %3058  ;;  %3286 = vrot.lane.b32.xlu0 %v7141_v25, %s4972_s18 }
 0x563   : > { %9304 = vst [vmem:[#allocation146_spill] sm:$0xff] %v7534_v27 }
 0x564   : > { %v7538_v50 = vpop.permute.xlu0 %3138 }
 0x567   : > { %3278 = vrot.lane.b32.xlu2 %v7126_v9, %s4972_s18 }
 0x568   : > { %3276 = vrot.lane.b32.xlu1 %v7072_v61, %s4972_s18 }
 0x569   : > { %v7544_v3 = vpop.permute.xlu2 %3148 }
 0x56a   : > { %v7546_v42 = vpop.permute.xlu1 %3064  ;;  %3292 = vrot.lane.b32.xlu0 %v7161_v19, %s4972_s18 }
 0x56b   : > { %9305 = vst [vmem:[#allocation154_spill] sm:$0xff] %v7546_v42  ;;  %v2713_v42 = vld [vmem:[#allocation2 + $0x189] sm:$0xff] }
 0x56c   : > { %v7550_v11 = vpop.permute.xlu0 %3144 }
 0x56f   : > { %3284 = vrot.lane.b32.xlu2 %v7146_v8, %s4972_s18 }
 0x570   : > { %3282 = vrot.lane.b32.xlu1 %v7092_v58, %s4972_s18 }
 0x571   : > { %v7556_v25 = vpop.permute.xlu2 %3154 }
 0x572   : > { %9306 = vst [vmem:[#allocation20_spill] sm:$0xff] %v7556_v25  ;;  %v7558_v9 = vpop.permute.xlu1 %3134  ;;  %3298 = vrot.lane.b32.xlu0 %v7175_v4, %s4972_s18 }
 0x574   : > { %v7562_v61 = vpop.permute.xlu0 %3150 }
 0x575   : > { %9307 = vst [vmem:[#allocation36_spill] sm:$0xff] %v7562_v61 }
 0x577   : > { %3290 = vrot.lane.b32.xlu2 %v7166_v5, %s4972_s18 }
 0x578   : > { %3288 = vrot.lane.b32.xlu1 %v7112_v55, %s4972_s18 }
 0x579   : > { %v7568_v19 = vpop.permute.xlu2 %3160 }
 0x57a   : > { %v7570_v8 = vpop.permute.xlu1 %3140  ;;  %3304 = vrot.lane.b32.xlu0 %v7196_v15, %s4972_s18 }
 0x57c   : > { %v7574_v58 = vpop.permute.xlu0 %3156 }
 0x57d   : > { %9308 = vst [vmem:[#allocation52_spill] sm:$0xff] %v7574_v58 }
 0x57f   : > { %3296 = vrot.lane.b32.xlu2 %v7181_v12, %s4972_s18 }
 0x580   : > { %3294 = vrot.lane.b32.xlu1 %v7132_v2, %s4972_s18 }
 0x581   : > { %v7580_v4 = vpop.permute.xlu2 %3166 }
 0x582   : > { %v7582_v5 = vpop.permute.xlu1 %3146  ;;  %3310 = vrot.lane.b32.xlu0 %v7207_v28, %s4972_s18 }
 0x584   : > { %v7586_v55 = vpop.permute.xlu0 %3162 }
 0x587   : > { %3302 = vrot.lane.b32.xlu2 %v7200_v17, %s4972_s18 }
 0x588   : > { %3300 = vrot.lane.b32.xlu1 %v7152_v39, %s4972_s18 }
 0x589   : > { %v7592_v15 = vpop.permute.xlu2 %3172 }
 0x58a   : > { %v7594_v12 = vpop.permute.xlu1 %3152  ;;  %3316 = vrot.lane.b32.xlu0 %v7219_v0, %s4972_s18 }
 0x58b   : > { %9309 = vst [vmem:[#allocation81_spill] sm:$0xff] %v7594_v12 }
 0x58c   : > { %v7598_v2 = vpop.permute.xlu0 %3168 }
 0x58f   : > { %3308 = vrot.lane.b32.xlu2 %v7211_v37, %s4972_s18 }
 0x590   : > { %3306 = vrot.lane.b32.xlu1 %v7171_v43, %s4972_s18 }
 0x591   : > { %v7604_v28 = vpop.permute.xlu2 %3178 }
 0x592   : > { %9310 = vst [vmem:[#allocation93_spill] sm:$0xff] %v7604_v28  ;;  %v7606_v17 = vpop.permute.xlu1 %3158  ;;  %3386 = vrot.lane.b32.xlu0 %v7231_v26, %s4973_s19  ;;  %v2781_v28 = vld [vmem:[#allocation2 + $0x51] sm:$0xff] }
 0x593   : > { %9311 = vst [vmem:[#allocation94_spill] sm:$0xff] %v7606_v17 }
 0x594   : > { %v7610_v39 = vpop.permute.xlu0 %3174 }
 0x595   : > { %9312 = vst [vmem:[#allocation22_spill] sm:$0xff] %v7610_v39  ;;  %v2798_v39 = vld [vmem:[#allocation2 + $0x121] sm:$0xff] }
 0x597   : > { %3314 = vrot.lane.b32.xlu2 %v7223_v45, %s4972_s18 }
 0x598   : > { %3312 = vrot.lane.b32.xlu1 %v7189_v16, %s4972_s18 }
 0x599   : > { %v7616_v0 = vpop.permute.xlu2 %3184 }
 0x59a   : > { %v7618_v37 = vpop.permute.xlu1 %3164  ;;  %3392 = vrot.lane.b32.xlu0 %v7239_v56, %s4973_s19 }
 0x59c   : > { %v7622_v43 = vpop.permute.xlu0 %3180 }
 0x59d   : > { %9313 = vst [vmem:[#allocation116_spill] sm:$0xff] %v7622_v43 }
 0x59f   : > { %3320 = vrot.lane.b32.xlu2 %v2713_v42, %s4972_s18 }
 0x5a0   : > { %3318 = vrot.lane.b32.xlu1 %v7624_v44, %s4972_s18 }
 0x5a1   : > { %v7629_v45 = vpop.permute.xlu2 %3190 }
 0x5a2   : > { %v7631_v16 = vpop.permute.xlu1 %3170  ;;  %3514 = vrot.lane.b32.xlu0 %v7366_v34, %s4974_s20 }
 0x5a4   : > { %v7635_v26 = vpop.permute.xlu0 %3186 }
 0x5a5   : > { %9315 = vst [vmem:[#allocation124_spill] sm:$0xff] %v7635_v26 }
 0x5a7   : > { %3390 = vrot.lane.b32.xlu2 %v7241_v22, %s4973_s19 }
 0x5a8   : > { %3388 = vrot.lane.b32.xlu1 %v7215_v32, %s4973_s19 }
 0x5a9   : > { %v7641_v27 = vpop.permute.xlu2 %3260 }
 0x5aa   : > { %v7643_v42 = vpop.permute.xlu1 %3176  ;;  %3516 = vrot.lane.b32.xlu0 %v7364_v54, %s4974_s20 }
 0x5ab   : > { %9316 = vst [vmem:[#allocation137_spill] sm:$0xff] %v7643_v42 }
 0x5ac   : > { %v7647_v17 = vpop.permute.xlu0 %3192 }
 0x5ad   : > { %9317 = vst [vmem:[#allocation138_spill] sm:$0xff] %v7647_v17 }
 0x5af   : > { %3396 = vrot.lane.b32.xlu2 %v7252_v38, %s4973_s19 }
 0x5b0   : > { %3394 = vrot.lane.b32.xlu1 %v7227_v33, %s4973_s19 }
 0x5b1   : > { %v7653_v26 = vpop.permute.xlu2 %3266 }
 0x5b2   : > { %v7655_v58 = vpop.permute.xlu1 %3182  ;;  %3518 = vrot.lane.b32.xlu0 %v7339_v59, %s4974_s20 }
 0x5b3   : > { %9318 = vst [vmem:[#allocation159_spill] sm:$0xff] %v7655_v58  ;;  %v2779_v58 = vld [vmem:[#allocation2 + $0x39] sm:$0xff] }
 0x5b4   : > { %v7659_v32 = vpop.permute.xlu0 %3262 }
 0x5b7   : > { %3770 = vrot.lane.b32.xlu2 %v7241_v22, %s4976_s22 }
 0x5b8   : > { %3642 = vrot.lane.b32.xlu1 %v2778_v18, %s4975_s21 }
 0x5b9   : > { %v7664_v17 = vpop.permute.xlu2 %3272 }
 0x5ba   : > { %v7666_v38 = vpop.permute.xlu1 %3188  ;;  %3520 = vrot.lane.b32.xlu0 %v7381_v10, %s4974_s20 }
 0x5bb   : > { %9319 = vst [vmem:[#allocation11_spill] sm:$0xff] %v7666_v38  ;;  %v2812_v38 = vld [vmem:[#allocation2 + $0x4a] sm:$0xff] }
 0x5bc   : > { %v7670_v33 = vpop.permute.xlu0 %3268 }
 0x5bf   : > { %3772 = vrot.lane.b32.xlu2 %v7239_v56, %s4976_s22 }
 0x5c0   : > { %3644 = vrot.lane.b32.xlu1 %v2779_v58, %s4975_s21 }
 0x5c1   : > { %v7675_v43 = vpop.permute.xlu2 %3278 }
 0x5c2   : > { %9320 = vst [vmem:[#allocation19_spill] sm:$0xff] %v7675_v43  ;;  %v7677_v22 = vpop.permute.xlu1 %3258  ;;  %3546 = vrot.lane.b32.xlu0 %v7439_v13, %s4974_s20  ;;  %v2813_v43 = vld [vmem:[#allocation2 + $0x52] sm:$0xff] }
 0x5c4   : > { %v7681_v18 = vpop.permute.xlu0 %3274 }
 0x5c7   : > { %3774 = vrot.lane.b32.xlu2 %v2812_v38, %s4976_s22  ;;  %v2782_v38 = vld [vmem:[#allocation2 + $0x61] sm:$0xff] }
 0x5c8   : > { %3646 = vrot.lane.b32.xlu1 %v2780_v7, %s4975_s21 }
 0x5c9   : > { %v7685_v25 = vpop.permute.xlu2 %3284 }
 0x5ca   : > { %9321 = vst [vmem:[#allocation21_spill] sm:$0xff] %v7685_v25  ;;  %v7687_v56 = vpop.permute.xlu1 %3264  ;;  %3802 = vrot.lane.b32.xlu0 %v7295_v1, %s4976_s22  ;;  %v2794_v25 = vld [vmem:[#allocation2 + $0xf1] sm:$0xff] }
 0x5cc   : > { %v7691_v58 = vpop.permute.xlu0 %3280 }
 0x5cd   : > { %9322 = vst [vmem:[#allocation70_spill] sm:$0xff] %v7691_v58 }
 0x5cf   : > { %3648 = vrot.lane.b32.xlu2 %v2781_v28, %s4975_s21  ;;  %v2795_v28 = vld [vmem:[#allocation2 + $0xf9] sm:$0xff] }
 0x5d0   : > { %3418 = vrot.lane.b32.xlu1 %v7266_v40, %s4973_s19 }
 0x5d1   : > { %v7696_v14 = vpop.permute.xlu2 %3290 }
 0x5d2   : > { %v7698_v12 = vpop.permute.xlu1 %3270  ;;  %3650 = vrot.lane.b32.xlu0 %v2782_v38, %s4975_s21 }
 0x5d4   : > { %v7701_v7 = vpop.permute.xlu0 %3286 }
 0x5d5   : > { %9323 = vst [vmem:[#allocation82_spill] sm:$0xff] %v7701_v7  ;;  %v2814_v7 = vld [vmem:[#allocation2 + $0x62] sm:$0xff] }
 0x5d7   : > { %3674 = vrot.lane.b32.xlu2 %v2794_v25, %s4975_s21 }
 0x5d8   : > { %3776 = vrot.lane.b32.xlu1 %v2813_v43, %s4976_s22 }
 0x5d9   : > { %v7705_v58 = vpop.permute.xlu2 %3296 }
 0x5da   : > { %v7707_v61 = vpop.permute.xlu1 %3276  ;;  %3676 = vrot.lane.b32.xlu0 %v2795_v28, %s4975_s21  ;;  %v3881_v28 = vsel %vm177_vm0, %v7387_v60, %v7331_v57 }
 0x5db   : > { %9324 = vst [vmem:[#allocation89_spill] sm:$0xff] %v7707_v61  ;;  %v2754_v61 = vld [vmem:[#allocation2 + $0x90] sm:$0xff] }
 0x5dc   : > { %v7710_v40 = vpop.permute.xlu0 %3292 }
 0x5df   : > { %3420 = vrot.lane.b32.xlu2 %v7297_v63, %s4973_s19 }
 0x5e0   : > { %3522 = vrot.lane.b32.xlu1 %v7379_v29, %s4974_s20  ;;  %v3913_v29 = vsel %vm1643_vm3, %v3881_v28, %v7455_v46  ;;  %v3884_v46 = vsel %vm177_vm0, %v7399_v52, %v7343_v30  ;;  %v2783_v30 = vld [vmem:[#allocation2 + $0x69] sm:$0xff]  ;;  %v2784_v52 = vld [vmem:[#allocation2 + $0x79] sm:$0xff] }
 0x5e1   : > { %v7716_v38 = vpop.permute.xlu2 %3302  ;;  %v3916_v57 = vsel %vm1643_vm3, %v3884_v46, %v7473_v49 }
 0x5e2   : > { %9325 = vst [vmem:[#allocation102_spill] sm:$0xff] %v7716_v38  ;;  %v7718_v25 = vpop.permute.xlu1 %3282  ;;  %3422 = vrot.lane.b32.xlu0 %v7295_v1, %s4973_s19  ;;  %v3945_v1 = vsel %vm1676_vm4, %v3913_v29, %v7568_v19  ;;  %v3948_v19 = vsel %vm1676_vm4, %v3916_v57, %v7580_v4  ;;  %v9334_v29 = vld [vmem:[#allocation61_spill] sm:$0xff]  ;;  %v4847_v57 = vld [vmem:[%s8830_s1 + $0x48] sm:$0xf] }
 0x5e3   : > { %9326 = vst [vmem:[#allocation113_spill] sm:$0xff] %v7718_v25  ;;  %v7734_v25 = vld [vmem:[#allocation2 + $0x6a] sm:$0xff]  ;;  %4848 = vmatpush.msk.msra.mxu1 %vm1971_vm2, %v4847_v57  ;;  %4890 = vmatpush.msk.msra.mxu3 %vm1971_vm2, %v4847_v57 }
 0x5e4   : > { %v7722_v43 = vpop.permute.xlu0 %3298  ;;  %v4844_v57 = vld [vmem:[%s8830_s1 + $0x30] sm:$0xff] }
 0x5e7   : > { %3778 = vrot.lane.b32.xlu2 %v2814_v7, %s4976_s22 }
 0x5e8   : > { %3548 = vrot.lane.b32.xlu1 %v7411_v62, %s4974_s20 }
 0x5e9   : > { %v7732_v63 = vpop.permute.xlu2 %3308 }
 0x5ea   : > { %9327 = vst [vmem:[#allocation114_spill] sm:$0xff] %v7732_v63  ;;  %v3289_v42 = vpop.permute.xlu1 %3288  ;;  %3780 = vrot.lane.b32.xlu0 %v7734_v25, %s4976_s22 }
 0x5eb   : > { %v7741_v38 = vsel %vm1709_vm6, %v3945_v1, %v3289_v42 }
 0x5ec   : > { %9328 = vst [vmem:[#allocation69_spill] sm:$0xff] %v7741_v38  ;;  %v7743_v60 = vpop.permute.xlu0 %3304 }
 0x5ed   : > { %9329 = vst [vmem:[#allocation125_spill] sm:$0xff] %v7743_v60 }
 0x5ef   : > { %3524 = vrot.lane.b32.xlu2 %v7354_v31, %s4974_s20 }
 0x5f0   : > { %3804 = vrot.lane.b32.xlu1 %v7278_v47, %s4976_s22 }
 0x5f1   : > { %v7754_v62 = vpop.permute.xlu2 %3314 }
 0x5f2   : > { %9330 = vst [vmem:[#allocation132_spill] sm:$0xff] %v7754_v62  ;;  %v3295_v42 = vpop.permute.xlu1 %3294  ;;  %3398 = vrot.lane.b32.xlu0 %v2814_v7, %s4973_s19  ;;  %v2796_v7 = vld [vmem:[#allocation2 + $0x109] sm:$0xff] }
 0x5f3   : > { %v7760_v31 = vsel %vm1709_vm6, %v3948_v19, %v3295_v42  ;;  %v4846_v19 = vld [vmem:[%s8830_s1 + $0x40] sm:$0xff] }
 0x5f4   : > { %v7762_v28 = vpop.permute.xlu0 %3310  ;;  %4233 = vmatpush.msra.mxu1 %v4846_v19  ;;  %4891 = vmatpush.msra.mxu3 %v4846_v19  ;;  %v2753_v19 = vld [vmem:[#allocation2 + $0x80] sm:$0xff] }
 0x5f5   : > { %9331 = vst [vmem:[#allocation147_spill] sm:$0xff] %v7762_v28 }
 0x5f7   : > { %3550 = vrot.lane.b32.xlu2 %v7459_v21, %s4974_s20  ;;  %v2797_v21 = vld [vmem:[#allocation2 + $0x111] sm:$0xff] }
 0x5f8   : > { %3652 = vrot.lane.b32.xlu1 %v2783_v30, %s4975_s21  ;;  %v4845_v30 = vld [vmem:[%s8830_s1 + $0x38] sm:$0xff] }
 0x5f9   : > { %v7767_v47 = vpop.permute.xlu2 %3320  ;;  %4234 = vmatpush.msra.mxu1 %v4845_v30  ;;  %4892 = vmatpush.msra.mxu3 %v4845_v30 }
 0x5fa   : > { %9332 = vst [vmem:[#allocation160_spill] sm:$0xff] %v7767_v47  ;;  %v7769_v49 = vpop.permute.xlu1 %3300  ;;  %3654 = vrot.lane.b32.xlu0 %v2784_v52, %s4975_s21  ;;  %v2733_v52 = vld [vmem:[#allocation2 + $0xfa] sm:$0xff] }
 0x5fb   : > { %4235 = vmatpush.msra.mxu1 %v4844_v57  ;;  %4893 = vmatpush.msra.mxu3 %v4844_v57 }
 0x5fc   : > { %v7772_v4 = vpop.permute.xlu0 %3316 }
 0x5fd   : > { %9333 = vst [vmem:[#allocation161_spill] sm:$0xff] %v7772_v4 }
 0x5ff   : > { %3806 = vrot.lane.b32.xlu2 %v9334_v29, %s4976_s22  ;;  %v9336_v29 = vld [vmem:[#allocation76_spill] sm:$0xff] }
 0x600   : > { %3678 = vrot.lane.b32.xlu1 %v2796_v7, %s4975_s21  ;;  %v2752_v7 = vld [vmem:[#allocation2 + $0x78] sm:$0xff] }
 0x601   : > { %v7777_v1 = vpop.permute.xlu2 %3390 }
 0x602   : > { %v7779_v46 = vpop.permute.xlu1 %3306  ;;  %3680 = vrot.lane.b32.xlu0 %v2797_v21, %s4975_s21  ;;  %v9337_v21 = vld [vmem:[#allocation144_spill] sm:$0xff] }
 0x603   : > { %9335 = vst [vmem:[#allocation10_spill] sm:$0xff] %v7779_v46  ;;  %v3893_v47 = vsel %vm177_vm0, %v9337_v21, %v9336_v29  ;;  %v4843_v29 = vld [vmem:[%s8830_s1 + $0x28] sm:$0xff]  ;;  %v9341_v21 = vld [vmem:[#allocation8_spill] sm:$0xff]  ;;  %v9346_v46 = vld [vmem:[#allocation33_spill] sm:$0xff] }
 0x604   : > { %v7788_v42 = vpop.permute.xlu0 %3386  ;;  %v3925_v4 = vsel %vm1643_vm3, %v3893_v47, %v7502_v53  ;;  %4236 = vmatpush.msra.mxu1 %v4843_v29  ;;  %4894 = vmatpush.msra.mxu3 %v4843_v29  ;;  %v2816_v47 = vld [vmem:[#allocation2 + $0x7a] sm:$0xff]  ;;  %v9342_v29 = vld [vmem:[#allocation111_spill] sm:$0xff] }
 0x607   : > { %3424 = vrot.lane.b32.xlu2 %v2733_v52, %s4973_s19  ;;  %v3957_v52 = vsel %vm1676_vm4, %v3925_v4, %v7616_v0  ;;  %v9339_v0 = vld [vmem:[#allocation156_spill] sm:$0xff]  ;;  %v9340_v4 = vld [vmem:[#allocation35_spill] sm:$0xff] }
 0x608   : > { %3526 = vrot.lane.b32.xlu1 %v2752_v7, %s4974_s20  ;;  %v3896_v30 = vsel %vm177_vm0, %v9340_v4, %v9339_v0  ;;  %v9344_v0 = vld [vmem:[#allocation31_spill] sm:$0xff] }
 0x609   : > { %v7805_v62 = vpop.permute.xlu2 %3396 }
 0x60a   : > { %v3313_v38 = vpop.permute.xlu1 %3312  ;;  %3528 = vrot.lane.b32.xlu0 %v2753_v19, %s4974_s20 }
 0x60b   : > { %v7811_v7 = vsel %vm1709_vm6, %v3957_v52, %v3313_v38  ;;  %v3928_v38 = vsel %vm1643_vm3, %v3896_v30, %v7514_v23  ;;  %v7837_v23 = vld [vmem:[#allocation2 + $0x122] sm:$0xff] }
 0x60c   : > { %9338 = vst [vmem:[#allocation37_spill] sm:$0xff] %v7811_v7  ;;  %v7816_v53 = vpop.permute.xlu0 %3392  ;;  %v3960_v57 = vsel %vm1676_vm4, %v3928_v38, %v7629_v45  ;;  %v2734_v38 = vld [vmem:[#allocation2 + $0x10a] sm:$0xff] }
 0x60f   : > { %3782 = vrot.lane.b32.xlu2 %v2816_v47, %s4976_s22 }
 0x610   : > { %3552 = vrot.lane.b32.xlu1 %v9341_v21, %s4974_s20  ;;  %v2785_v21 = vld [vmem:[#allocation2 + $0x81] sm:$0xff] }
 0x611   : > { %v3771_v19 = vpop.permute.xlu2 %3770 }
 0x612   : > { %v3319_v52 = vpop.permute.xlu1 %3318  ;;  %3554 = vrot.lane.b32.xlu0 %v9342_v29, %s4974_s20  ;;  %v2554_v29 = vld [vmem:[#allocation2] sm:$0xff] }
 0x613   : > { %v7831_v7 = vsel %vm1709_vm6, %v3960_v57, %v3319_v52  ;;  %v2735_v52 = vld [vmem:[#allocation2 + $0x112] sm:$0xff] }
 0x614   : > { %9343 = vst [vmem:[#allocation71_spill] sm:$0xff] %v7831_v7  ;;  %v3515_v28 = vpop.permute.xlu0 %3514  ;;  %v9345_v7 = vld [vmem:[#allocation5_spill] sm:$0xff] }
 0x615   : > { %v3866_v63 = vsel %vm177_vm0, %v2554_v29, %v9345_v7  ;;  %v7860_v7 = vld [vmem:[#allocation2 + $0x92] sm:$0xff] }
 0x616   : > { %v3898_v60 = vsel %vm1643_vm3, %v3866_v63, %v9346_v46  ;;  %v9347_v29 = vld [vmem:[#allocation9_spill] sm:$0xff] }
 0x617   : > { %3400 = vrot.lane.b32.xlu2 %v7734_v25, %s4973_s19 }
 0x618   : > { %3808 = vrot.lane.b32.xlu1 %v9344_v0, %s4976_s22 }
 0x619   : > { %v3773_v4 = vpop.permute.xlu2 %3772 }
 0x61a   : > { %v3389_v30 = vpop.permute.xlu1 %3388  ;;  %3810 = vrot.lane.b32.xlu0 %v7837_v23, %s4976_s22 }
 0x61c   : > { %v3517_v45 = vpop.permute.xlu0 %3516 }
 0x61f   : > { %3656 = vrot.lane.b32.xlu2 %v2785_v21, %s4975_s21  ;;  %v3930_v21 = vsel %vm1676_vm4, %v3898_v60, %v7508_v41 }
 0x620   : > { %3426 = vrot.lane.b32.xlu1 %v2734_v38, %s4973_s19  ;;  %v3962_v38 = vsel %vm1709_vm6, %v3930_v21, %v7677_v22 }
 0x621   : > { %v3775_v57 = vpop.permute.xlu2 %3774 }
 0x622   : > { %v7843_v25 = vpop.permute.xlu1 %3394  ;;  %3428 = vrot.lane.b32.xlu0 %v2735_v52, %s4973_s19  ;;  %v3994_v52 = vsel %vm1742_vm5, %v3962_v38, %v7788_v42  ;;  %v9348_v42 = vld [vmem:[#allocation65_spill] sm:$0xff] }
 0x623   : > { %v4026_v63 = vsel %vm1775_vm7, %v3994_v52, %v3515_v28 }
 0x624   : > { %v3519_v0 = vpop.permute.xlu0 %3518 }
 0x627   : > { %3682 = vrot.lane.b32.xlu2 %v2798_v39, %s4975_s21  ;;  %v2555_v39 = vld [vmem:[#allocation2 + $0x8] sm:$0xff] }
 0x628   : > { %3784 = vrot.lane.b32.xlu1 %v2817_v24, %s4976_s22  ;;  %v3867_v21 = vsel %vm177_vm0, %v2555_v39, %v9347_v29  ;;  %v9349_v29 = vld [vmem:[#allocation12_spill] sm:$0xff] }
 0x629   : > { %v7858_v44 = vpop.permute.xlu2 %3648  ;;  %v3899_v38 = vsel %vm1643_vm3, %v3867_v21, %v9348_v42  ;;  %v2786_v42 = vld [vmem:[#allocation2 + $0x91] sm:$0xff] }
 0x62a   : > { %v3643_v46 = vpop.permute.xlu1 %3642  ;;  %3786 = vrot.lane.b32.xlu0 %v7860_v7, %s4976_s22  ;;  %v3931_v28 = vsel %vm1676_vm4, %v3899_v38, %v7526_v20 }
 0x62b   : > { %v4058_v41 = vsel %vm1808_vm9, %v4026_v63, %v3643_v46  ;;  %v3963_v52 = vsel %vm1709_vm6, %v3931_v28, %v7641_v27  ;;  %v9351_v27 = vld [vmem:[#allocation91_spill] sm:$0xff]  ;;  %v2787_v28 = vld [vmem:[#allocation2 + $0x99] sm:$0xff] }
 0x62c   : > { %v4090_v22 = vsel %vm1841_vm8, %v4058_v41, %v3771_v19  ;;  %v3521_v60 = vpop.permute.xlu0 %3520  ;;  %v3995_v19 = vsel %vm1742_vm5, %v3963_v52, %v3389_v30  ;;  %v2767_v30 = vld [vmem:[#allocation2 + $0x128] sm:$0xff] }
 0x62d   : > { %4849 = vmatmul.msk.f32.vlgmr.msra.gmra.mxu1 %vm1874_vm10, %v4090_v22  ;;  %v4027_v46 = vsel %vm1775_vm7, %v3995_v19, %v3517_v45 }
 0x62f   : > { %3530 = vrot.lane.b32.xlu2 %v2754_v61, %s4974_s20  ;;  %v9350_v61 = vld [vmem:[#allocation32_spill] sm:$0xff] }
 0x630   : > { %3402 = vrot.lane.b32.xlu1 %v2816_v47, %s4973_s19  ;;  %v3868_v21 = vsel %vm177_vm0, %v9350_v61, %v9349_v29  ;;  %v2799_v29 = vld [vmem:[#allocation2 + $0x129] sm:$0xff] }
 0x631   : > { %v3675_v63 = vpop.permute.xlu2 %3674  ;;  %v3900_v47 = vsel %vm1643_vm3, %v3868_v21, %v9351_v27  ;;  %v2800_v21 = vld [vmem:[#allocation2 + $0x139] sm:$0xff] }
 0x632   : > { %v3645_v41 = vpop.permute.xlu1 %3644  ;;  %3404 = vrot.lane.b32.xlu0 %v2817_v24, %s4973_s19  ;;  %v3932_v45 = vsel %vm1676_vm4, %v3900_v47, %v7558_v9  ;;  %v9354_v27 = vld [vmem:[#allocation26_spill] sm:$0xff]  ;;  %v9355_v47 = vld [vmem:[#allocation59_spill] sm:$0xff] }
 0x633   : > { %v4059_v39 = vsel %vm1808_vm9, %v4027_v46, %v3645_v41  ;;  %v3964_v24 = vsel %vm1709_vm6, %v3932_v45, %v7659_v32  ;;  %v7904_v32 = vld [vmem:[#allocation2 + $0x12a] sm:$0xff] }
 0x634   : > { %v4091_v22 = vsel %vm1841_vm8, %v4059_v39, %v3773_v4  ;;  %v3547_v20 = vpop.permute.xlu0 %3546  ;;  %v3996_v4 = vsel %vm1742_vm5, %v3964_v24, %v7777_v1  ;;  %v9352_v39 = vld [vmem:[#allocation73_spill] sm:$0xff]  ;;  %v9356_v24 = vld [vmem:[#allocation134_spill] sm:$0xff] }
 0x635   : > { %4850 = vmatmul.msk.f32.gmra.mxu1 %vm1874_vm10, %v4091_v22  ;;  %v4028_v52 = vsel %vm1775_vm7, %v3996_v4, %v3519_v0  ;;  %v9353_v22 = vld [vmem:[#allocation99_spill] sm:$0xff] }
 0x636   : > { %v3882_v1 = vsel %vm177_vm0, %v9353_v22, %v9352_v39  ;;  %v2755_v22 = vld [vmem:[#allocation2 + $0x98] sm:$0xff] }
 0x637   : > { %3556 = vrot.lane.b32.xlu2 %v2767_v30, %s4974_s20  ;;  %v3914_v0 = vsel %vm1643_vm3, %v3882_v1, %v7488_v6  ;;  %v3869_v30 = vsel %vm177_vm0, %v9355_v47, %v9354_v27  ;;  %v2769_v47 = vld [vmem:[#allocation2 + $0x140] sm:$0xff] }
 0x638   : > { %3658 = vrot.lane.b32.xlu1 %v2786_v42, %s4975_s21  ;;  %v3901_v6 = vsel %vm1643_vm3, %v3869_v30, %v9356_v24 }
 0x639   : > { %v7897_v38 = vpop.permute.xlu2 %3420 }
 0x63a   : > { %v3647_v19 = vpop.permute.xlu1 %3646  ;;  %3660 = vrot.lane.b32.xlu0 %v2787_v28, %s4975_s21 }
 0x63b   : > { %v4060_v9 = vsel %vm1808_vm9, %v4028_v52, %v3647_v19 }
 0x63c   : > { %v4092_v46 = vsel %vm1841_vm8, %v4060_v9, %v3775_v57  ;;  %v3803_v41 = vpop.permute.xlu0 %3802  ;;  %v3946_v57 = vsel %vm1676_vm4, %v3914_v0, %v7586_v55  ;;  %v3933_v55 = vsel %vm1676_vm4, %v3901_v6, %v7520_v51  ;;  %v2832_v6 = vld [vmem:[#allocation2 + $0x13a] sm:$0xff] }
 0x63d   : > { %4851 = vmatmul.msk.f32.gmra.mxu1 %vm1874_vm10, %v4092_v46  ;;  %v3978_v45 = vsel %vm1709_vm6, %v3946_v57, %v7696_v14  ;;  %v3965_v19 = vsel %vm1709_vm6, %v3933_v55, %v7687_v56  ;;  %v2768_v57 = vld [vmem:[#allocation2 + $0x138] sm:$0xff]  ;;  %v9360_v55 = vld [vmem:[#allocation88_spill] sm:$0xff] }
 0x63e   : > { %v3997_v14 = vsel %vm1742_vm5, %v3965_v19, %v7816_v53 }
 0x63f   : > { %3812 = vrot.lane.b32.xlu2 %v7904_v32, %s4976_s22  ;;  %v4029_v39 = vsel %vm1775_vm7, %v3997_v14, %v3521_v60 }
 0x640   : > { %3684 = vrot.lane.b32.xlu1 %v2799_v29, %s4975_s21  ;;  %v9358_v29 = vld [vmem:[#allocation63_spill] sm:$0xff] }
 0x641   : > { %v3779_v61 = vpop.permute.xlu2 %3778 }
 0x642   : > { %v3419_v42 = vpop.permute.xlu1 %3418  ;;  %3686 = vrot.lane.b32.xlu0 %v2800_v21, %s4975_s21 }
 0x643   : > { %v4010_v4 = vsel %vm1742_vm5, %v3978_v45, %v3419_v42 }
 0x644   : > { %v4042_v28 = vsel %vm1775_vm7, %v4010_v4, %v3547_v20  ;;  %v3651_v52 = vpop.permute.xlu0 %3650  ;;  %v2756_v20 = vld [vmem:[#allocation2 + $0xa8] sm:$0xff]  ;;  %v9359_v4 = vld [vmem:[#allocation6_spill] sm:$0xff] }
 0x645   : > { %v4074_v9 = vsel %vm1808_vm9, %v4042_v28, %v3675_v63  ;;  %v4061_v63 = vsel %vm1808_vm9, %v4029_v39, %v7858_v44  ;;  %v3883_v28 = vsel %vm177_vm0, %v9360_v55, %v9359_v4  ;;  %v2788_v39 = vld [vmem:[#allocation2 + $0xa9] sm:$0xff]  ;;  %v9364_v55 = vld [vmem:[#allocation13_spill] sm:$0xff] }
 0x646   : > { %v4106_v46 = vsel %vm1841_vm8, %v4074_v9, %v3803_v41  ;;  %v9357_v41 = vld [vmem:[#allocation53_spill] sm:$0xff] }
 0x647   : > { %4865 = vmatmul.msk.f32.vlgmr.msra.gmra.mxu3 %vm1874_vm10, %v4106_v46  ;;  %3430 = vrot.lane.b32.xlu2 %v7837_v23, %s4973_s19  ;;  %v3870_v1 = vsel %vm177_vm0, %v7366_v34, %v9357_v41  ;;  %v2819_v23 = vld [vmem:[#allocation2 + $0x9a] sm:$0xff] }
 0x648   : > { %3532 = vrot.lane.b32.xlu1 %v2755_v22, %s4974_s20  ;;  %v3902_v0 = vsel %vm1643_vm3, %v3870_v1, %v9358_v29  ;;  %v9363_v41 = vld [vmem:[#allocation49_spill] sm:$0xff] }
 0x649   : > { %v3525_v51 = vpop.permute.xlu2 %3524  ;;  %v3934_v44 = vsel %vm1676_vm4, %v3902_v0, %v7538_v50  ;;  %v2820_v0 = vld [vmem:[#allocation2 + $0xaa] sm:$0xff] }
 0x64a   : > { %v3777_v56 = vpop.permute.xlu1 %3776  ;;  %3534 = vrot.lane.b32.xlu0 %v2756_v20, %s4974_s20  ;;  %v3966_v21 = vsel %vm1709_vm6, %v3934_v44, %v7653_v26 }
 0x64b   : > { %v4093_v53 = vsel %vm1841_vm8, %v4061_v63, %v3777_v56  ;;  %v3998_v34 = vsel %vm1742_vm5, %v3966_v21, %v7843_v25  ;;  %v7965_v25 = vld [vmem:[#allocation2 + $0x142] sm:$0xff]  ;;  %v9362_v63 = vld [vmem:[#allocation4_spill] sm:$0xff] }
 0x64c   : > { %4852 = vmatmul.msk.f32.gmra.mxu1 %vm1874_vm10, %v4093_v53  ;;  %v3677_v60 = vpop.permute.xlu0 %3676  ;;  %v3871_v53 = vsel %vm177_vm0, %v7364_v54, %v9362_v63  ;;  %v8003_v54 = vld [vmem:[#allocation2 + $0xb2] sm:$0xff] }
 0x64d   : > { %v3903_v1 = vsel %vm1643_vm3, %v3871_v53, %v9363_v41 }
 0x64e   : > { %v3935_v29 = vsel %vm1676_vm4, %v3903_v1, %v7570_v8 }
 0x64f   : > { %3788 = vrot.lane.b32.xlu2 %v2819_v23, %s4976_s22 }
 0x650   : > { %3558 = vrot.lane.b32.xlu1 %v2768_v57, %s4974_s20 }
 0x651   : > { %v3551_v27 = vpop.permute.xlu2 %3550 }
 0x652   : > { %v3523_v30 = vpop.permute.xlu1 %3522  ;;  %3560 = vrot.lane.b32.xlu0 %v2769_v47, %s4974_s20 }
 0x653   : > { %v4030_v45 = vsel %vm1775_vm7, %v3998_v34, %v3523_v30 }
 0x654   : > { %v4062_v42 = vsel %vm1808_vm9, %v4030_v45, %v3651_v52  ;;  %v3423_v24 = vpop.permute.xlu0 %3422 }
 0x655   : > { %v4094_v50 = vsel %vm1841_vm8, %v4062_v42, %v3779_v61  ;;  %v9361_v61 = vld [vmem:[#allocation157_spill] sm:$0xff] }
 0x656   : > { %4853 = vmatmul.msk.f32.gmra.mxu1 %vm1874_vm10, %v4094_v50  ;;  %v3915_v52 = vsel %vm1643_vm3, %v3883_v28, %v9361_v61 }
 0x657   : > { %3406 = vrot.lane.b32.xlu2 %v7860_v7, %s4973_s19  ;;  %v3947_v9 = vsel %vm1676_vm4, %v3915_v52, %v7618_v37  ;;  %v2790_v52 = vld [vmem:[#allocation2 + $0xc1] sm:$0xff] }
 0x658   : > { %3814 = vrot.lane.b32.xlu1 %v2832_v6, %s4976_s22  ;;  %v3979_v14 = vsel %vm1709_vm6, %v3947_v9, %v7710_v40 }
 0x659   : > { %v3807_v26 = vpop.permute.xlu2 %3806  ;;  %v4011_v46 = vsel %vm1742_vm5, %v3979_v14, %v7897_v38 }
 0x65a   : > { %v3549_v19 = vpop.permute.xlu1 %3548  ;;  %3816 = vrot.lane.b32.xlu0 %v7965_v25, %s4976_s22 }
 0x65b   : > { %v4043_v22 = vsel %vm1775_vm7, %v4011_v46, %v3549_v19  ;;  %v2789_v19 = vld [vmem:[#allocation2 + $0xb1] sm:$0xff] }
 0x65c   : > { %v3781_v7 = vpop.permute.xlu0 %3780  ;;  %v4075_v37 = vsel %vm1808_vm9, %v4043_v22, %v3677_v60  ;;  %v3967_v60 = vsel %vm1709_vm6, %v3935_v29, %v7670_v33  ;;  %v2757_v33 = vld [vmem:[#allocation2 + $0xb0] sm:$0xff] }
 0x65d   : > { %v3999_v57 = vsel %vm1742_vm5, %v3967_v60, %v7805_v62  ;;  %v4012_v62 = vsel %vm1742_vm5, %v7760_v31, %v3423_v24  ;;  %v3872_v31 = vsel %vm177_vm0, %v7339_v59, %v9364_v55  ;;  %v2770_v24 = vld [vmem:[#allocation2 + $0x150] sm:$0xff]  ;;  %v2758_v60 = vld [vmem:[#allocation2 + $0xc0] sm:$0xff] }
 0x65e   : > { %v4031_v21 = vsel %vm1775_vm7, %v3999_v57, %v3525_v51  ;;  %v4044_v42 = vsel %vm1775_vm7, %v4012_v62, %v3551_v27  ;;  %v2802_v22 = vld [vmem:[#allocation2 + $0x151] sm:$0xff] }
 0x65f   : > { %3662 = vrot.lane.b32.xlu2 %v2788_v39, %s4975_s21  ;;  %v2834_v39 = vld [vmem:[#allocation2 + $0x152] sm:$0xff] }
 0x660   : > { %3432 = vrot.lane.b32.xlu1 %v7904_v32, %s4973_s19  ;;  %v2801_v32 = vld [vmem:[#allocation2 + $0x141] sm:$0xff] }
 0x661   : > { %v7984_v20 = vpop.permute.xlu2 %3424 }
 0x662   : > { %v3805_v56 = vpop.permute.xlu1 %3804  ;;  %3434 = vrot.lane.b32.xlu0 %v2832_v6, %s4973_s19 }
 0x663   : > { %v4107_v40 = vsel %vm1841_vm8, %v4075_v37, %v3805_v56  ;;  %v2803_v56 = vld [vmem:[#allocation2 + $0x159] sm:$0xff]  ;;  %v9366_v37 = vld [vmem:[#allocation60_spill] sm:$0xff] }
 0x664   : > { %4866 = vmatmul.msk.f32.gmra.mxu3 %vm1874_vm10, %v4107_v40  ;;  %v3399_v38 = vpop.permute.xlu0 %3398  ;;  %v9367_v40 = vld [vmem:[#allocation131_spill] sm:$0xff] }
 0x667   : > { %3688 = vrot.lane.b32.xlu2 %v2801_v32, %s4975_s21 }
 0x668   : > { %3790 = vrot.lane.b32.xlu1 %v2820_v0, %s4976_s22 }
 0x669   : > { %v3783_v44 = vpop.permute.xlu2 %3782 }
 0x66a   : > { %v3653_v47 = vpop.permute.xlu1 %3652  ;;  %3792 = vrot.lane.b32.xlu0 %v8003_v54, %s4976_s22 }
 0x66b   : > { %v4063_v8 = vsel %vm1808_vm9, %v4031_v21, %v3653_v47  ;;  %v8065_v21 = vld [vmem:[#allocation2 + $0xc2] sm:$0xff] }
 0x66c   : > { %v4095_v34 = vsel %vm1841_vm8, %v4063_v8, %v3781_v7  ;;  %v3655_v30 = vpop.permute.xlu0 %3654  ;;  %v9368_v47 = vld [vmem:[#allocation58_spill] sm:$0xff]  ;;  %v2771_v8 = vld [vmem:[#allocation2 + $0x158] sm:$0xff] }
 0x66d   : > { %4854 = vmatmul.msk.f32.gmra.mxu1 %vm1874_vm10, %v4095_v34  ;;  %v9369_v34 = vld [vmem:[#allocation66_spill] sm:$0xff] }
 0x66f   : > { %3536 = vrot.lane.b32.xlu2 %v2757_v33, %s4974_s20 }
 0x670   : > { %3408 = vrot.lane.b32.xlu1 %v2819_v23, %s4973_s19  ;;  %v9365_v23 = vld [vmem:[#allocation16_spill] sm:$0xff] }
 0x671   : > { %v8015_v51 = vpop.permute.xlu2 %3400  ;;  %v3904_v28 = vsel %vm1643_vm3, %v3872_v31, %v9365_v23 }
 0x672   : > { %v3679_v45 = vpop.permute.xlu1 %3678  ;;  %3410 = vrot.lane.b32.xlu0 %v2820_v0, %s4973_s19  ;;  %v3936_v27 = vsel %vm1676_vm4, %v3904_v28, %v7532_v36 }
 0x673   : > { %v4076_v50 = vsel %vm1808_vm9, %v4044_v42, %v3679_v45  ;;  %v2772_v45 = vld [vmem:[#allocation2 + $0x168] sm:$0xff]  ;;  %v9370_v42 = vld [vmem:[#allocation38_spill] sm:$0xff] }
 0x674   : > { %v4108_v6 = vsel %vm1841_vm8, %v4076_v50, %v3807_v26  ;;  %v3681_v4 = vpop.permute.xlu0 %3680  ;;  %v3968_v26 = vsel %vm1709_vm6, %v3936_v27, %v7698_v12  ;;  %v3873_v50 = vsel %vm177_vm0, %v7381_v10, %v9370_v42 }
 0x675   : > { %4867 = vmatmul.msk.f32.gmra.mxu3 %vm1874_vm10, %v4108_v6  ;;  %v4000_v59 = vsel %vm1742_vm5, %v3968_v26, %v3399_v38  ;;  %v3885_v38 = vsel %vm177_vm0, %v9367_v40, %v9366_v37  ;;  %v2835_v26 = vld [vmem:[#allocation2 + $0x15a] sm:$0xff] }
 0x676   : > { %v3917_v53 = vsel %vm1643_vm3, %v3885_v38, %v7498_v48  ;;  %v2759_v48 = vld [vmem:[#allocation2 + $0xc8] sm:$0xff] }
 0x677   : > { %3562 = vrot.lane.b32.xlu2 %v2770_v24, %s4974_s20  ;;  %v3949_v41 = vsel %vm1676_vm4, %v3917_v53, %v7598_v2  ;;  %v2823_v38 = vld [vmem:[#allocation2 + $0xca] sm:$0xff] }
 0x678   : > { %3664 = vrot.lane.b32.xlu1 %v2789_v19, %s4975_s21  ;;  %v3981_v32 = vsel %vm1709_vm6, %v3949_v41, %v7705_v58  ;;  %v2824_v41 = vld [vmem:[#allocation2 + $0xda] sm:$0xff] }
 0x679   : > { %v8033_v61 = vpop.permute.xlu2 %3656  ;;  %v4013_v29 = vsel %vm1742_vm5, %v3981_v32, %v7984_v20 }
 0x67a   : > { %v3527_v9 = vpop.permute.xlu1 %3526  ;;  %3666 = vrot.lane.b32.xlu0 %v2790_v52, %s4975_s21  ;;  %v8102_v52 = vld [vmem:[#allocation2 + $0x16a] sm:$0xff] }
 0x67b   : > { %v4032_v7 = vsel %vm1775_vm7, %v4000_v59, %v3527_v9 }
 0x67c   : > { %v4064_v14 = vsel %vm1808_vm9, %v4032_v7, %v3655_v30  ;;  %v3529_v46 = vpop.permute.xlu0 %3528  ;;  %v2791_v7 = vld [vmem:[#allocation2 + $0xc9] sm:$0xff] }
 0x67d   : > { %v4096_v36 = vsel %vm1841_vm8, %v4064_v14, %v3783_v44 }
 0x67e   : > { %4855 = vmatmul.msk.f32.gmra.mxu1 %vm1874_vm10, %v4096_v36 }
 0x67f   : > { %3818 = vrot.lane.b32.xlu2 %v2834_v39, %s4976_s22 }
 0x680   : > { %3690 = vrot.lane.b32.xlu1 %v2802_v22, %s4975_s21  ;;  %v9373_v22 = vld [vmem:[#allocation135_spill] sm:$0xff] }
 0x681   : > { %v3683_v12 = vpop.permute.xlu2 %3682 }
 0x682   : > { %v3553_v63 = vpop.permute.xlu1 %3552  ;;  %3692 = vrot.lane.b32.xlu0 %v2803_v56, %s4975_s21 }
 0x683   : > { %v4045_v0 = vsel %vm1775_vm7, %v4013_v29, %v3553_v63  ;;  %v9374_v63 = vld [vmem:[#allocation14_spill] sm:$0xff] }
 0x684   : > { %v3555_v1 = vpop.permute.xlu0 %3554  ;;  %v4077_v2 = vsel %vm1808_vm9, %v4045_v0, %v3681_v4  ;;  %v9371_v4 = vld [vmem:[#allocation158_spill] sm:$0xff] }
 0x685   : > { %v3905_v55 = vsel %vm1643_vm3, %v3873_v50, %v9371_v4  ;;  %v9375_v0 = vld [vmem:[#allocation78_spill] sm:$0xff]  ;;  %v9376_v4 = vld [vmem:[#allocation75_spill] sm:$0xff] }
 0x687   : > { %3436 = vrot.lane.b32.xlu2 %v7965_v25, %s4973_s19  ;;  %v3886_v25 = vsel %vm177_vm0, %v7439_v13, %v9368_v47 }
 0x688   : > { %3538 = vrot.lane.b32.xlu1 %v2758_v60, %s4974_s20  ;;  %v3918_v30 = vsel %vm1643_vm3, %v3886_v25, %v9369_v34 }
 0x689   : > { %v8059_v57 = vpop.permute.xlu2 %3530  ;;  %v3950_v33 = vsel %vm1676_vm4, %v3918_v30, %v7631_v16  ;;  %v3937_v16 = vsel %vm1676_vm4, %v3905_v55, %v7550_v11 }
 0x68a   : > { %v3809_v44 = vpop.permute.xlu1 %3808  ;;  %3540 = vrot.lane.b32.xlu0 %v2759_v48, %s4974_s20  ;;  %v3982_v13 = vsel %vm1709_vm6, %v3950_v33, %v7722_v43  ;;  %v3969_v10 = vsel %vm1709_vm6, %v3937_v16, %v7664_v17  ;;  %v2773_v16 = vld [vmem:[#allocation2 + $0x170] sm:$0xff] }
 0x68b   : > { %v4109_v58 = vsel %vm1841_vm8, %v4077_v2, %v3809_v44  ;;  %v4001_v43 = vsel %vm1742_vm5, %v3969_v10, %v8015_v51  ;;  %v2792_v10 = vld [vmem:[#allocation2 + $0xd9] sm:$0xff] }
 0x68c   : > { %4868 = vmatmul.msk.f32.gmra.mxu3 %vm1874_vm10, %v4109_v58  ;;  %v3811_v20 = vpop.permute.xlu0 %3810  ;;  %v4033_v27 = vsel %vm1775_vm7, %v4001_v43, %v3529_v46  ;;  %v4945_v46 = vld [vmem:[#allocation2 + $0x60] sm:$0xff]  ;;  %v9378_v43 = vld [vmem:[#allocation89_spill] sm:$0xff] }
 0x68d   : > { %v4065_v59 = vsel %vm1808_vm9, %v4033_v27, %v8033_v61  ;;  %v9372_v61 = vld [vmem:[#allocation57_spill] sm:$0xff] }
 0x68e   : > { %v3874_v36 = vsel %vm177_vm0, %v4945_v46, %v9372_v61 }
 0x68f   : > { %3794 = vrot.lane.b32.xlu2 %v8065_v21, %s4976_s22 }
 0x690   : > { %3564 = vrot.lane.b32.xlu1 %v2771_v8, %s4974_s20 }
 0x691   : > { %v8077_v62 = vpop.permute.xlu2 %3556 }
 0x692   : > { %v3427_v6 = vpop.permute.xlu1 %3426  ;;  %3566 = vrot.lane.b32.xlu0 %v2772_v45, %s4974_s20 }
 0x693   : > { %v4014_v31 = vsel %vm1742_vm5, %v3982_v13, %v3427_v6  ;;  %v4947_v6 = vld [vmem:[#allocation2 + $0x68] sm:$0xff] }
 0x694   : > { %v4046_v24 = vsel %vm1775_vm7, %v4014_v31, %v3555_v1  ;;  %v3429_v23 = vpop.permute.xlu0 %3428  ;;  %v3875_v55 = vsel %vm177_vm0, %v4947_v6, %v9376_v4  ;;  %v9387_v6 = vld [vmem:[#allocation137_spill] sm:$0xff] }
 0x695   : > { %v4078_v28 = vsel %vm1808_vm9, %v4046_v24, %v3683_v12  ;;  %v3906_v12 = vsel %vm1643_vm3, %v3874_v36, %v9373_v22  ;;  %v9377_v24 = vld [vmem:[#allocation80_spill] sm:$0xff] }
 0x696   : > { %v4110_v19 = vsel %vm1841_vm8, %v4078_v28, %v3811_v20  ;;  %v3938_v37 = vsel %vm1676_vm4, %v3906_v12, %v7582_v5  ;;  %v4946_v5 = vld [vmem:[#allocation2 + $0xf8] sm:$0xff] }
 0x697   : > { %4869 = vmatmul.msk.f32.gmra.mxu3 %vm1874_vm10, %v4110_v19  ;;  %3412 = vrot.lane.b32.xlu2 %v8003_v54, %s4973_s19  ;;  %v3970_v40 = vsel %vm1709_vm6, %v3938_v37, %v7681_v18  ;;  %v3887_v18 = vsel %vm177_vm0, %v4946_v5, %v9375_v0  ;;  %v2760_v20 = vld [vmem:[#allocation2 + $0xd8] sm:$0xff]  ;;  %v9384_v0 = vld [vmem:[#allocation102_spill] sm:$0xff] }
 0x698   : > { %3820 = vrot.lane.b32.xlu1 %v2835_v26, %s4976_s22  ;;  %v3919_v48 = vsel %vm1643_vm3, %v3887_v18, %v7482_v35  ;;  %v8182_v12 = vld [vmem:[#allocation2 + $0x172] sm:$0xff] }
 0x699   : > { %v3813_v11 = vpop.permute.xlu2 %3812 }
 0x69a   : > { %v3785_v17 = vpop.permute.xlu1 %3784  ;;  %3822 = vrot.lane.b32.xlu0 %v8102_v52, %s4976_s22 }
 0x69b   : > { %v4097_v51 = vsel %vm1841_vm8, %v4065_v59, %v3785_v17 }
 0x69c   : > { %4856 = vmatmul.msk.f32.gmra.mxu1 %vm1874_vm10, %v4097_v51  ;;  %v3787_v9 = vpop.permute.xlu0 %3786 }
 0x69f   : > { %3668 = vrot.lane.b32.xlu2 %v2791_v7, %s4975_s21 }
 0x6a0   : > { %3438 = vrot.lane.b32.xlu1 %v2834_v39, %s4973_s19 }
 0x6a1   : > { %v8112_v54 = vpop.permute.xlu2 %3430 }
 0x6a2   : > { %v3403_v14 = vpop.permute.xlu1 %3402  ;;  %3440 = vrot.lane.b32.xlu0 %v2835_v26, %s4973_s19  ;;  %v2793_v26 = vld [vmem:[#allocation2 + $0xe1] sm:$0xff] }
 0x6a3   : > { %v4002_v39 = vsel %vm1742_vm5, %v3970_v40, %v3403_v14  ;;  %v4948_v40 = vld [vmem:[#allocation2 + $0x108] sm:$0xff] }
 0x6a4   : > { %v3405_v56 = vpop.permute.xlu0 %3404  ;;  %v4034_v32 = vsel %vm1775_vm7, %v4002_v39, %v8059_v57  ;;  %v3951_v57 = vsel %vm1676_vm4, %v3919_v48, %v7592_v15  ;;  %v9380_v39 = vld [vmem:[#allocation62_spill] sm:$0xff] }
 0x6a5   : > { %v3983_v58 = vsel %vm1709_vm6, %v3951_v57, %v7769_v49 }
 0x6a6   : > { %v4015_v47 = vsel %vm1742_vm5, %v3983_v58, %v3429_v23  ;;  %v3907_v23 = vsel %vm1643_vm3, %v3875_v55, %v9377_v24  ;;  %v2775_v58 = vld [vmem:[#allocation2 + $0x188] sm:$0xff] }
 0x6a7   : > { %3694 = vrot.lane.b32.xlu2 %v9374_v63, %s4975_s21  ;;  %v4047_v15 = vsel %vm1775_vm7, %v4015_v47, %v8077_v62  ;;  %v3939_v28 = vsel %vm1676_vm4, %v3907_v23, %v7544_v3  ;;  %v9388_v24 = vld [vmem:[#allocation55_spill] sm:$0xff] }
 0x6a8   : > { %3796 = vrot.lane.b32.xlu1 %v2823_v38, %s4976_s22  ;;  %v3971_v19 = vsel %vm1709_vm6, %v3939_v28, %v9378_v43 }
 0x6a9   : > { %v3789_v53 = vpop.permute.xlu2 %3788 }
 0x6aa   : > { %v3659_v1 = vpop.permute.xlu1 %3658  ;;  %v4238_v29 = vpop.f32.mrf.mxu1  ;;  %3798 = vrot.lane.b32.xlu0 %v2824_v41, %s4976_s22  ;;  %v9381_v41 = vld [vmem:[#allocation50_spill] sm:$0xff] }
 0x6ab   : > { %v4066_v60 = vsel %vm1808_vm9, %v4034_v32, %v3659_v1  ;;  %4334 = vst.msk [vmem:[#allocation3] sm:$0xff] %vm177_vm0, %v4238_v29  ;;  %v4436_v35 = vmul.f32 %v4238_v29, %v4238_v29  ;;  %v4366_v49 = vsel %vm177_vm0, %v4238_v29, 0.0  ;;  %v9383_v32 = vld [vmem:[#allocation22_spill] sm:$0xff] }
 0x6ac   : > { %v4098_v44 = vsel %vm1841_vm8, %v4066_v60, %v3787_v9  ;;  %v3661_v2 = vpop.permute.xlu0 %3660 }
 0x6ad   : > { %4857 = vmatmul.msk.f32.gmra.mxu1 %vm1874_vm10, %v4098_v44  ;;  %v4468_v13 = vsel %vm177_vm0, %v4436_v35, 0.0  ;;  %v2761_v44 = vld [vmem:[#allocation2 + $0xe0] sm:$0xff] }
 0x6af   : > { %3542 = vrot.lane.b32.xlu2 %v2760_v20, %s4974_s20 }
 0x6b0   : > { %3414 = vrot.lane.b32.xlu1 %v8065_v21, %s4973_s19 }
 0x6b1   : > { %v8146_v25 = vpop.permute.xlu2 %3406 }
 0x6b2   : > { %v3685_v8 = vpop.permute.xlu1 %3684  ;;  %v4241_v34 = vpop.f32.mrf.mxu1  ;;  %3416 = vrot.lane.b32.xlu0 %v2823_v38, %s4973_s19  ;;  %v3888_v38 = vsel %vm177_vm0, %v4948_v40, %v9380_v39 }
 0x6b3   : > { %v4079_v30 = vsel %vm1808_vm9, %v4047_v15, %v3685_v8  ;;  %4335 = vst.msk [vmem:[#allocation3 + $0x8] sm:$0xff] %vm177_vm0, %v4241_v34  ;;  %v4367_v33 = vsel %vm177_vm0, %v4241_v34, 0.0  ;;  %v4437_v45 = vmul.f32 %v4241_v34, %v4241_v34 }
 0x6b4   : > { %v4368_v21 = vadd.f32 %v4367_v33, %v4366_v49  ;;  %v4111_v42 = vsel %vm1841_vm8, %v4079_v30, %v3813_v11  ;;  %v3687_v50 = vpop.permute.xlu0 %3686  ;;  %v4003_v11 = vsel %vm1742_vm5, %v3971_v19, %v3405_v56  ;;  %v9379_v56 = vld [vmem:[#allocation51_spill] sm:$0xff] }
 0x6b5   : > { %v4469_v62 = vsel %vm177_vm0, %v4437_v45, 0.0  ;;  %4870 = vmatmul.msk.f32.gmra.mxu3 %vm1874_vm10, %v4111_v42  ;;  %v2825_v33 = vld [vmem:[#allocation2 + $0xe2] sm:$0xff]  ;;  %v4949_v45 = vld [vmem:[#allocation2 + $0x110] sm:$0xff] }
 0x6b6   : > { %v4470_v31 = vadd.f32 %v4469_v62, %v4468_v13  ;;  %v9386_v13 = vld [vmem:[#allocation92_spill] sm:$0xff]  ;;  %v9390_v19 = vld [vmem:[#allocation67_spill] sm:$0xff] }
 0x6b7   : > { %3568 = vrot.lane.b32.xlu2 %v2773_v16, %s4974_s20  ;;  %v4950_v16 = vld [vmem:[#allocation2 + $0x78] sm:$0xff] }
 0x6b8   : > { %3670 = vrot.lane.b32.xlu1 %v2792_v10, %s4975_s21  ;;  %v3876_v23 = vsel %vm177_vm0, %v4950_v16, %v9388_v24  ;;  %v9389_v10 = vld [vmem:[#allocation125_spill] sm:$0xff] }
 0x6b9   : > { %v8169_v27 = vpop.permute.xlu2 %3662 }
 0x6ba   : > { %v3533_v17 = vpop.permute.xlu1 %3532  ;;  %v4244_v59 = vpop.f32.mrf.mxu1  ;;  %3672 = vrot.lane.b32.xlu0 %v2793_v26, %s4975_s21  ;;  %v3908_v26 = vsel %vm1643_vm3, %v3876_v23, %v9390_v19  ;;  %v9400_v19 = vld [vmem:[#allocation10_spill] sm:$0xff] }
 0x6bb   : > { %v4035_v51 = vsel %vm1775_vm7, %v4003_v11, %v3533_v17  ;;  %4336 = vst.msk [vmem:[#allocation3 + $0x10] sm:$0xff] %vm177_vm0, %v4244_v59  ;;  %v4369_v3 = vsel %vm177_vm0, %v4244_v59, 0.0  ;;  %v4438_v9 = vmul.f32 %v4244_v59, %v4244_v59  ;;  %v9391_v59 = vld [vmem:[#allocation36_spill] sm:$0xff] }
 0x6bc   : > { %v4370_v7 = vadd.f32 %v4369_v3, %v4368_v21  ;;  %v4067_v14 = vsel %vm1808_vm9, %v4035_v51, %v3661_v2  ;;  %v8177_v46 = vpop.permute.xlu0 %3534  ;;  %v9385_v21 = vld [vmem:[#allocation143_spill] sm:$0xff]  ;;  %v3940_v51 = vsel %vm1676_vm4, %v3908_v26, %v9391_v59 }
 0x6bd   : > { %v4471_v61 = vsel %vm177_vm0, %v4438_v9, 0.0  ;;  %v4099_v36 = vsel %vm1841_vm8, %v4067_v14, %v3789_v53  ;;  %v9382_v53 = vld [vmem:[#allocation68_spill] sm:$0xff]  ;;  %v3889_v42 = vsel %vm177_vm0, %v4949_v45, %v9385_v21  ;;  %v4952_v21 = vld [vmem:[#allocation2 + $0x120] sm:$0xff] }
 0x6be   : > { %v4472_v22 = vadd.f32 %v4471_v61, %v4470_v31  ;;  %4858 = vmatmul.msk.f32.gmra.mxu1 %vm1874_vm10, %v4099_v36  ;;  %v3920_v1 = vsel %vm1643_vm3, %v3888_v38, %v9382_v53  ;;  %v3921_v62 = vsel %vm1643_vm3, %v3889_v42, %v9386_v13  ;;  %v2838_v31 = vld [vmem:[#allocation2 + $0x182] sm:$0xff] }
 0x6bf   : > { %3824 = vrot.lane.b32.xlu2 %v8182_v12, %s4976_s22  ;;  %v3952_v29 = vsel %vm1676_vm4, %v3920_v1, %v9383_v32  ;;  %v3953_v4 = vsel %vm1676_vm4, %v3921_v62, %v9387_v6  ;;  %v9392_v61 = vld [vmem:[#allocation19_spill] sm:$0xff]  ;;  %v9397_v42 = vld [vmem:[#allocation110_spill] sm:$0xff] }
 0x6c0   : > { %3696 = vrot.lane.b32.xlu1 %v9379_v56, %s4975_s21  ;;  %v3984_v18 = vsel %vm1709_vm6, %v3952_v29, %v9384_v0  ;;  %v3985_v28 = vsel %vm1709_vm6, %v3953_v4, %v9389_v10  ;;  %v3972_v36 = vsel %vm1709_vm6, %v3940_v51, %v9392_v61  ;;  %v2839_v29 = vld [vmem:[#allocation2 + $0x18a] sm:$0xff]  ;;  %v9399_v10 = vld [vmem:[#allocation93_spill] sm:$0xff] }
 0x6c1   : > { %v3689_v37 = vpop.permute.xlu2 %3688  ;;  %v4016_v60 = vsel %vm1742_vm5, %v3984_v18, %v8112_v54  ;;  %v4004_v40 = vsel %vm1742_vm5, %v3972_v36, %v8146_v25  ;;  %v9398_v4 = vld [vmem:[#allocation115_spill] sm:$0xff]  ;;  %v4953_v36 = vld [vmem:[#allocation2 + $0x90] sm:$0xff] }
 0x6c2   : > { %v3559_v63 = vpop.permute.xlu1 %3558  ;;  %3698 = vrot.lane.b32.xlu0 %v9381_v41, %s4975_s21 }
 0x6c3   : > { %v4048_v48 = vsel %vm1775_vm7, %v4016_v60, %v3559_v63  ;;  %v4036_v63 = vsel %vm1775_vm7, %v4004_v40, %v8177_v46  ;;  %v9393_v60 = vld [vmem:[#allocation42_spill] sm:$0xff]  ;;  %v9402_v40 = vld [vmem:[#allocation123_spill] sm:$0xff] }
 0x6c4   : > { %v3561_v5 = vpop.permute.xlu0 %3560  ;;  %v4080_v54 = vsel %vm1808_vm9, %v4048_v48, %v3687_v50  ;;  %v2774_v50 = vld [vmem:[#allocation2 + $0x180] sm:$0xff]  ;;  %v4068_v25 = vsel %vm1808_vm9, %v4036_v63, %v8169_v27  ;;  %v9403_v63 = vld [vmem:[#allocation20_spill] sm:$0xff] }
 0x6c5   : > { %v4951_v27 = vld [vmem:[#allocation2 + $0x80] sm:$0xff] }
 0x6c6   : > { %v3877_v48 = vsel %vm177_vm0, %v4951_v27, %v9393_v60 }
 0x6c7   : > { %3442 = vrot.lane.b32.xlu2 %v8102_v52, %s4973_s19 }
 0x6c8   : > { %3544 = vrot.lane.b32.xlu1 %v2761_v44, %s4974_s20  ;;  %v9394_v44 = vld [vmem:[#allocation18_spill] sm:$0xff] }
 0x6c9   : > { %v4247_v2 = vpop.f32.mrf.mxu1  ;;  %v8204_v57 = vpop.permute.xlu2 %3536 }
 0x6ca   : > { %4337 = vst.msk [vmem:[#allocation3 + $0x18] sm:$0xff] %vm177_vm0, %v4247_v2  ;;  %v4371_v20 = vsel %vm177_vm0, %v4247_v2, 0.0  ;;  %v4439_v47 = vmul.f32 %v4247_v2, %v4247_v2  ;;  %v3815_v35 = vpop.permute.xlu1 %3814  ;;  %v8208_v8 = vpop.f32.mrf.mxu3  ;;  %3572 = vrot.lane.b32.xlu0 %v2775_v58, %s4974_s20  ;;  %v3909_v2 = vsel %vm1643_vm3, %v3877_v48, %v9394_v44 }
 0x6cb   : > { %v4372_v15 = vadd.f32 %v4371_v20, %v4370_v7  ;;  %4350 = vst.msk [vmem:[#allocation3 + $0x80] sm:$0xff] %vm177_vm0, %v8208_v8  ;;  %v4112_v52 = vsel %vm1841_vm8, %v4080_v54, %v3815_v35  ;;  %v9395_v20 = vld [vmem:[#allocation81_spill] sm:$0xff]  ;;  %v9396_v35 = vld [vmem:[#allocation70_spill] sm:$0xff] }
 0x6cc   : > { %v4473_v34 = vsel %vm177_vm0, %v4439_v47, 0.0  ;;  %4871 = vmatmul.msk.f32.gmra.mxu3 %vm1874_vm10, %v4112_v52  ;;  %v3817_v49 = vpop.permute.xlu0 %3816  ;;  %v3941_v47 = vsel %vm1676_vm4, %v3909_v2, %v9395_v20  ;;  %v9405_v20 = vld [vmem:[#allocation133_spill] sm:$0xff] }
 0x6cd   : > { %v4474_v30 = vadd.f32 %v4473_v34, %v4472_v22  ;;  %v3973_v54 = vsel %vm1709_vm6, %v3941_v47, %v9396_v35 }
 0x6cf   : > { %3800 = vrot.lane.b32.xlu2 %v2825_v33, %s4976_s22 }
 0x6d0   : > { %3570 = vrot.lane.b32.xlu1 %v2774_v50, %s4974_s20  ;;  %v3890_v50 = vsel %vm177_vm0, %v4952_v21, %v9397_v42 }
 0x6d1   : > { %v8225_v55 = vpop.permute.xlu2 %3562 }
 0x6d2   : > { %v3433_v43 = vpop.permute.xlu1 %3432  ;;  %3446 = vrot.lane.b32.xlu0 %v2838_v31, %s4973_s19 }
 0x6d3   : > { %v4017_v11 = vsel %vm1742_vm5, %v3985_v28, %v3433_v43  ;;  %v4250_v17 = vpop.f32.mrf.mxu1 }
 0x6d4   : > { %v4049_v3 = vsel %vm1775_vm7, %v4017_v11, %v3561_v5  ;;  %4338 = vst.msk [vmem:[#allocation3 + $0x20] sm:$0xff] %vm177_vm0, %v4250_v17  ;;  %v4373_v9 = vsel %vm177_vm0, %v4250_v17, 0.0  ;;  %v4440_v7 = vmul.f32 %v4250_v17, %v4250_v17  ;;  %v3435_v14 = vpop.permute.xlu0 %3434  ;;  %v2807_v5 = vld [vmem:[#allocation2 + $0x189] sm:$0xff]  ;;  %v2777_v17 = vld [vmem:[#allocation2 + $0x1a0] sm:$0xff] }
 0x6d5   : > { %v4374_v22 = vadd.f32 %v4373_v9, %v4372_v15  ;;  %v4081_v56 = vsel %vm1808_vm9, %v4049_v3, %v3689_v37  ;;  %v2840_v37 = vld [vmem:[#allocation2 + $0x19a] sm:$0xff] }
 0x6d6   : > { %v4475_v39 = vsel %vm177_vm0, %v4440_v7, 0.0  ;;  %v4113_v38 = vsel %vm1841_vm8, %v4081_v56, %v3817_v49  ;;  %v2808_v15 = vld [vmem:[#allocation2 + $0x199] sm:$0xff] }
 0x6d7   : > { %v4476_v41 = vadd.f32 %v4475_v39, %v4474_v30  ;;  %4872 = vmatmul.msk.f32.gmra.mxu3 %vm1874_vm10, %v4113_v38  ;;  %3444 = vrot.lane.b32.xlu2 %v8182_v12, %s4973_s19  ;;  %v2809_v12 = vld [vmem:[#allocation2 + $0x1a1] sm:$0xff]  ;;  %v2776_v49 = vld [vmem:[#allocation2 + $0x198] sm:$0xff] }
 0x6d8   : > { %3826 = vrot.lane.b32.xlu1 %v2838_v31, %s4976_s22  ;;  %v3922_v31 = vsel %vm1643_vm3, %v3890_v50, %v9398_v4  ;;  %v2841_v38 = vld [vmem:[#allocation2 + $0x1a2] sm:$0xff] }
 0x6d9   : > { %v3819_v53 = vpop.permute.xlu2 %3818  ;;  %v3954_v28 = vsel %vm1676_vm4, %v3922_v31, %v9399_v10  ;;  %v4955_v31 = vld [vmem:[#allocation2 + $0x138] sm:$0xff]  ;;  %v9411_v10 = vld [vmem:[#allocation159_spill] sm:$0xff] }
 0x6da   : > { %v3791_v1 = vpop.permute.xlu1 %3790  ;;  %3830 = vrot.lane.b32.xlu0 %v2840_v37, %s4976_s22  ;;  %v3986_v26 = vsel %vm1709_vm6, %v3954_v28, %v9400_v19  ;;  %v9412_v19 = vld [vmem:[#allocation7_spill] sm:$0xff] }
 0x6db   : > { %v4100_v32 = vsel %vm1841_vm8, %v4068_v25, %v3791_v1  ;;  %v4018_v59 = vsel %vm1742_vm5, %v3986_v26, %v3435_v14 }
 0x6dc   : > { %4859 = vmatmul.msk.f32.gmra.mxu1 %vm1874_vm10, %v4100_v32  ;;  %v3793_v46 = vpop.permute.xlu0 %3792  ;;  %v4050_v3 = vsel %vm1775_vm7, %v4018_v59, %v8225_v55 }
 0x6df   : > { %3828 = vrot.lane.b32.xlu2 %v2839_v29, %s4976_s22 }
 0x6e0   : > { %3700 = vrot.lane.b32.xlu1 %v2807_v5, %s4975_s21 }
 0x6e1   : > { %v8260_v18 = vpop.permute.xlu2 %3436 }
 0x6e2   : > { %v3409_v0 = vpop.permute.xlu1 %3408  ;;  %3704 = vrot.lane.b32.xlu0 %v2809_v12, %s4975_s21 }
 0x6e3   : > { %v4005_v52 = vsel %vm1742_vm5, %v3973_v54, %v3409_v0  ;;  %v9406_v54 = vld [vmem:[#allocation136_spill] sm:$0xff] }
 0x6e4   : > { %v3411_v58 = vpop.permute.xlu0 %3410  ;;  %v4037_v33 = vsel %vm1775_vm7, %v4005_v52, %v8204_v57  ;;  %v9407_v52 = vld [vmem:[#allocation116_spill] sm:$0xff] }
 0x6e7   : > { %v8272_v34 = vpop.f32.mrf.mxu3  ;;  %3702 = vrot.lane.b32.xlu2 %v2808_v15, %s4975_s21  ;;  %s8707_s21 = scalar_lea.vmem %s8831_s2, %s4883_s11 }
 0x6e8   : > { %4351 = vst.msk [vmem:[#allocation3 + $0x88] sm:$0xff] %vm177_vm0, %v8272_v34  ;;  %3574 = vrot.lane.b32.xlu1 %v2776_v49, %s4974_s20 }
 0x6e9   : > { %v3795_v24 = vpop.permute.xlu2 %3794 }
 0x6ea   : > { %v3665_v30 = vpop.permute.xlu1 %3664  ;;  %v4253_v45 = vpop.f32.mrf.mxu1 }
 0x6eb   : > { %v4069_v13 = vsel %vm1808_vm9, %v4037_v33, %v3665_v30  ;;  %4339 = vst.msk [vmem:[#allocation3 + $0x28] sm:$0xff] %vm177_vm0, %v4253_v45  ;;  %v4375_v62 = vsel %vm177_vm0, %v4253_v45, 0.0  ;;  %v4441_v6 = vmul.f32 %v4253_v45, %v4253_v45  ;;  %v9408_v33 = vld [vmem:[#allocation114_spill] sm:$0xff] }
 0x6ec   : > { %v4376_v16 = vadd.f32 %v4375_v62, %v4374_v22  ;;  %v4101_v23 = vsel %vm1841_vm8, %v4069_v13, %v3793_v46  ;;  %v3667_v57 = vpop.permute.xlu0 %3666  ;;  %v9401_v22 = vld [vmem:[#allocation27_spill] sm:$0xff] }
 0x6ed   : > { %v4477_v43 = vsel %vm177_vm0, %v4441_v6, 0.0  ;;  %4860 = vmatmul.msk.f32.gmra.mxu1 %vm1874_vm10, %v4101_v23  ;;  %v3878_v56 = vsel %vm177_vm0, %v4953_v36, %v9401_v22 }
 0x6ee   : > { %v4478_v11 = vadd.f32 %v4477_v43, %v4476_v41  ;;  %v3910_v39 = vsel %vm1643_vm3, %v3878_v56, %v9402_v40  ;;  %v4956_v43 = vld [vmem:[#allocation2 + $0x98] sm:$0xff] }
 0x6ef   : > { %3576 = vrot.lane.b32.xlu2 %v2777_v17, %s4974_s20  ;;  %v3942_v41 = vsel %vm1676_vm4, %v3910_v39, %v9403_v63  ;;  %v3879_v26 = vsel %vm177_vm0, %v4956_v43, %v9412_v19  ;;  %v9416_v56 = vld [vmem:[#allocation21_spill] sm:$0xff] }
 0x6f0   : > { %3448 = vrot.lane.b32.xlu1 %v2839_v29, %s4973_s19 }
 0x6f1   : > { %v3413_v14 = vpop.permute.xlu2 %3412 }
 0x6f2   : > { %v3691_v51 = vpop.permute.xlu1 %3690 }
 0x6f3   : > { %v4082_v9 = vsel %vm1808_vm9, %v4050_v3, %v3691_v51  ;;  %v9414_v51 = vld [vmem:[#allocation101_spill] sm:$0xff] }
 0x6f4   : > { %v4114_v7 = vsel %vm1841_vm8, %v4082_v9, %v3819_v53  ;;  %v3693_v61 = vpop.permute.xlu0 %3692  ;;  %v9404_v53 = vld [vmem:[#allocation113_spill] sm:$0xff]  ;;  %v3911_v3 = vsel %vm1643_vm3, %v3879_v26, %v9414_v51 }
 0x6f5   : > { %4873 = vmatmul.msk.f32.gmra.mxu3 %vm1874_vm10, %v4114_v7  ;;  %v3974_v37 = vsel %vm1709_vm6, %v3942_v41, %v9404_v53  ;;  %v9415_v7 = vld [vmem:[#allocation52_spill] sm:$0xff] }
 0x6f6   : > { %v4006_v1 = vsel %vm1742_vm5, %v3974_v37, %v3411_v58  ;;  %v4954_v58 = vld [vmem:[#allocation2 + $0x128] sm:$0xff] }
 0x6f7   : > { %v3891_v47 = vsel %vm177_vm0, %v4954_v58, %v9405_v20  ;;  %v4957_v20 = vld [vmem:[#allocation2 + $0xa8] sm:$0xff] }
 0x6f8   : > { %3832 = vrot.lane.b32.xlu1 %v2841_v38, %s4976_s22  ;;  %v8309_v55 = vpop.f32.mrf.mxu3  ;;  %v3923_v15 = vsel %vm1643_vm3, %v3891_v47, %v9406_v54  ;;  %v9417_v47 = vld [vmem:[#allocation15_spill] sm:$0xff]  ;;  %v9418_v54 = vld [vmem:[#allocation112_spill] sm:$0xff] }
 0x6f9   : > { %4352 = vst.msk [vmem:[#allocation3 + $0x90] sm:$0xff] %vm177_vm0, %v8309_v55  ;;  %v3669_v2 = vpop.permute.xlu2 %3668  ;;  %v3955_v49 = vsel %vm1676_vm4, %v3923_v15, %v9407_v52  ;;  %v9420_v52 = vld [vmem:[#allocation82_spill] sm:$0xff] }
 0x6fa   : > { %v3539_v25 = vpop.permute.xlu1 %3538  ;;  %v3987_v45 = vsel %vm1709_vm6, %v3955_v49, %v9408_v33 }
 0x6fb   : > { %v4038_v32 = vsel %vm1775_vm7, %v4006_v1, %v3539_v25  ;;  %v4256_v46 = vpop.f32.mrf.mxu1  ;;  %v4019_v21 = vsel %vm1742_vm5, %v3987_v45, %v8260_v18 }
 0x6fc   : > { %4340 = vst.msk [vmem:[#allocation3 + $0x30] sm:$0xff] %vm177_vm0, %v4256_v46  ;;  %v4377_v29 = vsel %vm177_vm0, %v4256_v46, 0.0  ;;  %v4442_v5 = vmul.f32 %v4256_v46, %v4256_v46  ;;  %v4070_v12 = vsel %vm1808_vm9, %v4038_v32, %v3667_v57  ;;  %v3541_v0 = vpop.permute.xlu0 %3540  ;;  %v9410_v57 = vld [vmem:[#allocation108_spill] sm:$0xff] }
 0x6fd   : > { %v4378_v27 = vadd.f32 %v4377_v29, %v4376_v16  ;;  %v4102_v60 = vsel %vm1841_vm8, %v4070_v12, %v3795_v24  ;;  %v9409_v16 = vld [vmem:[#allocation17_spill] sm:$0xff] }
 0x6fe   : > { %v4479_v48 = vsel %vm177_vm0, %v4442_v5, 0.0  ;;  %4861 = vmatmul.msk.f32.gmra.mxu1 %vm1874_vm10, %v4102_v60  ;;  %v3892_v24 = vsel %vm177_vm0, %v4955_v31, %v9409_v16 }
 0x6ff   : > { %v4480_v44 = vadd.f32 %v4479_v48, %v4478_v11  ;;  %v3924_v18 = vsel %vm1643_vm3, %v3892_v24, %v9410_v57  ;;  %v9413_v11 = vld [vmem:[#allocation147_spill] sm:$0xff]  ;;  %v9421_v24 = vld [vmem:[#allocation37_spill] sm:$0xff] }
 0x700   : > { %v3956_v28 = vsel %vm1676_vm4, %v3924_v18, %v9411_v10 }
 0x701   : > { %v3695_v50 = vpop.permute.xlu2 %3694  ;;  %v3988_v17 = vsel %vm1709_vm6, %v3956_v28, %v9413_v11 }
 0x702   : > { %v3565_v35 = vpop.permute.xlu1 %3564 }
 0x703   : > { %v4051_v42 = vsel %vm1775_vm7, %v4019_v21, %v3565_v35  ;;  %v3880_v35 = vsel %vm177_vm0, %v4957_v20, %v9417_v47 }
 0x704   : > { %v3567_v30 = vpop.permute.xlu0 %3566  ;;  %v4083_v62 = vsel %vm1808_vm9, %v4051_v42, %v3693_v61  ;;  %v3943_v61 = vsel %vm1676_vm4, %v3911_v3, %v9415_v7 }
 0x705   : > { %v3975_v40 = vsel %vm1709_vm6, %v3943_v61, %v9416_v56 }
 0x706   : > { %v4007_v63 = vsel %vm1742_vm5, %v3975_v40, %v3413_v14 }
 0x707   : > { %v4039_v53 = vsel %vm1775_vm7, %v4007_v63, %v3541_v0 }
 0x708   : > { %v4071_v29 = vsel %vm1808_vm9, %v4039_v53, %v3669_v2  ;;  %v9419_v2 = vld [vmem:[#allocation94_spill] sm:$0xff]  ;;  %v9423_v53 = vld [vmem:[#allocation152_spill] sm:$0xff] }
 0x709   : > { %v3543_v36 = vpop.permute.xlu2 %3542 }
 0x70a   : > { %v3821_v13 = vpop.permute.xlu1 %3820 }
 0x70b   : > { %v4115_v6 = vsel %vm1841_vm8, %v4083_v62, %v3821_v13 }
 0x70c   : > { %4874 = vmatmul.msk.f32.gmra.mxu3 %vm1874_vm10, %v4115_v6  ;;  %v3823_v4 = vpop.permute.xlu0 %3822 }
 0x70f   : > { %v8339_v23 = vpop.f32.mrf.mxu3 }
 0x710   : > { %4353 = vst.msk [vmem:[#allocation3 + $0x98] sm:$0xff] %vm177_vm0, %v8339_v23 }
 0x711   : > { %v3569_v60 = vpop.permute.xlu2 %3568 }
 0x712   : > { %v3439_v59 = vpop.permute.xlu1 %3438 }
 0x713   : > { %v4020_v9 = vsel %vm1742_vm5, %v3988_v17, %v3439_v59  ;;  %v9422_v17 = vld [vmem:[#allocation69_spill] sm:$0xff] }
 0x714   : > { %v4052_v22 = vsel %vm1775_vm7, %v4020_v9, %v3567_v30  ;;  %v3441_v38 = vpop.permute.xlu0 %3440 }
 0x715   : > { %v4084_v39 = vsel %vm1808_vm9, %v4052_v22, %v3695_v50  ;;  %v4021_v57 = vsel %vm1742_vm5, %v9421_v24, %v3441_v38 }
 0x716   : > { %v4116_v41 = vsel %vm1841_vm8, %v4084_v39, %v3823_v4  ;;  %v4053_v28 = vsel %vm1775_vm7, %v4021_v57, %v3569_v60 }
 0x717   : > { %4875 = vmatmul.msk.f32.gmra.mxu3 %vm1874_vm10, %v4116_v41  ;;  %v4958_v41 = vld [vmem:[#allocation2 + $0x150] sm:$0xff] }
 0x719   : > { %v4259_v37 = vpop.f32.mrf.mxu1  ;;  %v3825_v33 = vpop.permute.xlu2 %3824 }
 0x71a   : > { %4341 = vst.msk [vmem:[#allocation3 + $0x38] sm:$0xff] %vm177_vm0, %v4259_v37  ;;  %v4379_v1 = vsel %vm177_vm0, %v4259_v37, 0.0  ;;  %v4443_v25 = vmul.f32 %v4259_v37, %v4259_v37  ;;  %v3797_v32 = vpop.permute.xlu1 %3796  ;;  %v8366_v46 = vpop.f32.mrf.mxu3  ;;  %v3894_v37 = vsel %vm177_vm0, %v4958_v41, %v9423_v53  ;;  %v9435_v41 = vld [vmem:[#allocation160_spill] sm:$0xff] }
 0x71b   : > { %v4380_v5 = vadd.f32 %v4379_v1, %v4378_v27  ;;  %4354 = vst.msk [vmem:[#allocation3 + $0xa0] sm:$0xff] %vm177_vm0, %v8366_v46  ;;  %v4103_v14 = vsel %vm1841_vm8, %v4071_v29, %v3797_v32  ;;  %v3912_v27 = vsel %vm1643_vm3, %v3880_v35, %v9418_v54  ;;  %v9425_v29 = vld [vmem:[#allocation124_spill] sm:$0xff]  ;;  %v4959_v54 = vld [vmem:[#allocation2 + $0x158] sm:$0xff] }
 0x71c   : > { %v4481_v12 = vsel %vm177_vm0, %v4443_v25, 0.0  ;;  %4862 = vmatmul.msk.f32.gmra.mxu1 %vm1874_vm10, %v4103_v14  ;;  %v3799_v48 = vpop.permute.xlu0 %3798  ;;  %v3944_v15 = vsel %vm1676_vm4, %v3912_v27, %v9419_v2  ;;  %v9424_v25 = vld [vmem:[#allocation146_spill] sm:$0xff]  ;;  %v9426_v14 = vld [vmem:[#allocation132_spill] sm:$0xff] }
 0x71d   : > { %v4482_v0 = vadd.f32 %v4481_v12, %v4480_v44  ;;  %v3976_v49 = vsel %vm1709_vm6, %v3944_v15, %v9420_v52  ;;  %v3926_v32 = vsel %vm1643_vm3, %v3894_v37, %v9424_v25  ;;  %v9427_v27 = vld [vmem:[#allocation90_spill] sm:$0xff]  ;;  %v9428_v15 = vld [vmem:[#allocation64_spill] sm:$0xff] }
 0x71e   : > { %v3895_v2 = vsel %vm177_vm0, %v4959_v54, %v9427_v27 }
 0x71f   : > { %v3927_v52 = vsel %vm1643_vm3, %v3895_v2, %v9428_v15 }
 0x721   : > { %v3443_v18 = vpop.permute.xlu2 %3442 }
 0x722   : > { %v3415_v58 = vpop.permute.xlu1 %3414 }
 0x723   : > { %v4008_v30 = vsel %vm1742_vm5, %v3976_v49, %v3415_v58  ;;  %v9429_v49 = vld [vmem:[#allocation11_spill] sm:$0xff] }
 0x724   : > { %v3417_v44 = vpop.permute.xlu0 %3416  ;;  %v4040_v21 = vsel %vm1775_vm7, %v4008_v30, %v3543_v36  ;;  %v3959_v30 = vsel %vm1676_vm4, %v3927_v52, %v9429_v49 }
 0x725   : > { %v4009_v59 = vsel %vm1742_vm5, %v9422_v17, %v3417_v44  ;;  %v9430_v44 = vld [vmem:[#allocation161_spill] sm:$0xff] }
 0x729   : > { %v3801_v7 = vpop.permute.xlu2 %3800 }
 0x72a   : > { %v3671_v45 = vpop.permute.xlu1 %3670  ;;  %v4262_v42 = vpop.f32.mrf.mxu1 }
 0x72b   : > { %v4072_v50 = vsel %vm1808_vm9, %v4040_v21, %v3671_v45  ;;  %4342 = vst.msk [vmem:[#allocation3 + $0x40] sm:$0xff] %vm177_vm0, %v4262_v42  ;;  %v4381_v13 = vsel %vm177_vm0, %v4262_v42, 0.0  ;;  %v4444_v62 = vmul.f32 %v4262_v42, %v4262_v42  ;;  %v3991_v45 = vsel %vm1709_vm6, %v3959_v30, %v9430_v44 }
 0x72c   : > { %v4382_v6 = vadd.f32 %v4381_v13, %v4380_v5  ;;  %v4104_v4 = vsel %vm1841_vm8, %v4072_v50, %v3799_v48  ;;  %v3673_v19 = vpop.permute.xlu0 %3672  ;;  %v3958_v5 = vsel %vm1676_vm4, %v3926_v32, %v9425_v29 }
 0x72d   : > { %v4483_v31 = vsel %vm177_vm0, %v4444_v62, 0.0  ;;  %4863 = vmatmul.msk.f32.gmra.mxu1 %vm1874_vm10, %v4104_v4  ;;  %v3990_v12 = vsel %vm1709_vm6, %v3958_v5, %v9426_v14 }
 0x72e   : > { %v4484_v16 = vadd.f32 %v4483_v31, %v4482_v0  ;;  %v4022_v0 = vsel %vm1742_vm5, %v3990_v12, %v3443_v18 }
 0x731   : > { %v3445_v60 = vpop.permute.xlu2 %3444 }
 0x732   : > { %v3697_v10 = vpop.permute.xlu1 %3696  ;;  %v4023_v21 = vsel %vm1742_vm5, %v3991_v45, %v3445_v60 }
 0x733   : > { %v4085_v43 = vsel %vm1808_vm9, %v4053_v28, %v3697_v10 }
 0x734   : > { %v4117_v26 = vsel %vm1841_vm8, %v4085_v43, %v3825_v33  ;;  %v3699_v39 = vpop.permute.xlu0 %3698 }
 0x735   : > { %4876 = vmatmul.msk.f32.gmra.mxu3 %vm1874_vm10, %v4117_v26 }
 0x738   : > { %v8396_v11 = vpop.f32.mrf.mxu3 }
 0x739   : > { %4355 = vst.msk [vmem:[#allocation3 + $0xa8] sm:$0xff] %vm177_vm0, %v8396_v11  ;;  %v3829_v42 = vpop.permute.xlu2 %3828 }
 0x73a   : > { %v3545_v51 = vpop.permute.xlu1 %3544 }
 0x73b   : > { %v4041_v3 = vsel %vm1775_vm7, %v4009_v59, %v3545_v51  ;;  %v4265_v9 = vpop.f32.mrf.mxu1 }
 0x73c   : > { %4343 = vst.msk [vmem:[#allocation3 + $0x48] sm:$0xff] %vm177_vm0, %v4265_v9  ;;  %v4383_v61 = vsel %vm177_vm0, %v4265_v9, 0.0  ;;  %v4445_v36 = vmul.f32 %v4265_v9, %v4265_v9  ;;  %v4073_v22 = vsel %vm1808_vm9, %v4041_v3, %v3673_v19  ;;  %v3573_v58 = vpop.permute.xlu0 %3572 }
 0x73d   : > { %v4384_v56 = vadd.f32 %v4383_v61, %v4382_v6  ;;  %v4105_v40 = vsel %vm1841_vm8, %v4073_v22, %v3801_v7  ;;  %v4055_v50 = vsel %vm1775_vm7, %v4023_v21, %v3573_v58  ;;  %v4960_v7 = vld [vmem:[#allocation2 + $0x170] sm:$0xff]  ;;  %v9432_v61 = vld [vmem:[#allocation47_spill] sm:$0xff]  ;;  %v9433_v22 = vld [vmem:[#allocation154_spill] sm:$0xff] }
 0x73e   : > { %v4485_v38 = vsel %vm177_vm0, %v4445_v36, 0.0  ;;  %4864 = vmatmul.msk.f32.gmra.mxu1 %vm1874_vm10, %v4105_v40  ;;  %v3897_v36 = vsel %vm177_vm0, %v4960_v7, %v9432_v61  ;;  %v9434_v40 = vld [vmem:[#allocation138_spill] sm:$0xff]  ;;  %v4399_v7 = vsel %vm177_vm0, %v8272_v34, 0.0  ;;  %v4454_v61 = vmul.f32 %v8309_v55, %v8309_v55 }
 0x73f   : > { %v4486_v63 = vadd.f32 %v4485_v38, %v4484_v16  ;;  %v9431_v16 = vld [vmem:[#allocation71_spill] sm:$0xff] }
 0x741   : > { %v3703_v43 = vpop.permute.xlu2 %3702 }
 0x742   : > { %v3571_v1 = vpop.permute.xlu1 %3570 }
 0x743   : > { %v4054_v48 = vsel %vm1775_vm7, %v4022_v0, %v3571_v1 }
 0x744   : > { %v4086_v47 = vsel %vm1808_vm9, %v4054_v48, %v3699_v39  ;;  %v3447_v13 = vpop.permute.xlu0 %3446 }
 0x745   : > { %v4024_v24 = vsel %vm1742_vm5, %v9431_v16, %v3447_v13 }
 0x749   : > { %v3577_v37 = vpop.permute.xlu2 %3576 }
 0x74a   : > { %v3827_v20 = vpop.permute.xlu1 %3826 }
 0x74b   : > { %v4118_v35 = vsel %vm1841_vm8, %v4086_v47, %v3827_v20 }
 0x74c   : > { %4877 = vmatmul.msk.f32.gmra.mxu3 %vm1874_vm10, %v4118_v35  ;;  %v3831_v17 = vpop.permute.xlu0 %3830 }
 0x74f   : > { %v8428_v33 = vpop.f32.mrf.mxu3 }
 0x750   : > { %4356 = vst.msk [vmem:[#allocation3 + $0xb0] sm:$0xff] %vm177_vm0, %v8428_v33 }
 0x752   : > { %v3701_v62 = vpop.permute.xlu1 %3700 }
 0x753   : > { %v4087_v6 = vsel %vm1808_vm9, %v4055_v50, %v3701_v62 }
 0x754   : > { %v4119_v4 = vsel %vm1841_vm8, %v4087_v6, %v3829_v42  ;;  %v3705_v25 = vpop.permute.xlu0 %3704 }
 0x755   : > { %4878 = vmatmul.msk.f32.gmra.mxu3 %vm1874_vm10, %v4119_v4 }
 0x759   : > { %v4268_v31 = vpop.f32.mrf.mxu1 }
 0x75a   : > { %4344 = vst.msk [vmem:[#allocation3 + $0x50] sm:$0xff] %vm177_vm0, %v4268_v31  ;;  %v4385_v57 = vsel %vm177_vm0, %v4268_v31, 0.0  ;;  %v4446_v18 = vmul.f32 %v4268_v31, %v4268_v31  ;;  %v3575_v10 = vpop.permute.xlu1 %3574  ;;  %v8443_v28 = vpop.f32.mrf.mxu3 }
 0x75b   : > { %v4386_v19 = vadd.f32 %v4385_v57, %v4384_v56  ;;  %v4056_v26 = vsel %vm1775_vm7, %v4024_v24, %v3575_v10  ;;  %4357 = vst.msk [vmem:[#allocation3 + $0xb8] sm:$0xff] %vm177_vm0, %v8443_v28  ;;  %v3929_v56 = vsel %vm1643_vm3, %v3897_v36, %v9433_v22  ;;  %v4452_v57 = vmul.f32 %v8208_v8, %v8208_v8 }
 0x75c   : > { %v4487_v59 = vsel %vm177_vm0, %v4446_v18, 0.0  ;;  %v4088_v51 = vsel %vm1808_vm9, %v4056_v26, %v3703_v43  ;;  %v3961_v39 = vsel %vm1676_vm4, %v3929_v56, %v9434_v40  ;;  %v4397_v26 = vsel %vm177_vm0, %v8208_v8, 0.0 }
 0x75d   : > { %v4488_v3 = vadd.f32 %v4487_v59, %v4486_v63  ;;  %v4120_v9 = vsel %vm1841_vm8, %v4088_v51, %v3831_v17  ;;  %v3993_v53 = vsel %vm1709_vm6, %v3961_v39, %v9435_v41  ;;  %v4453_v17 = vmul.f32 %v8272_v34, %v8272_v34 }
 0x75e   : > { %4879 = vmatmul.msk.f32.gmra.mxu3 %vm1874_vm10, %v4120_v9  ;;  %v4499_v9 = vsel %vm177_vm0, %v4452_v57, 0.0  ;;  %v4401_v8 = vsel %vm177_vm0, %v8309_v55, 0.0  ;;  %v4455_v40 = vmul.f32 %v8339_v23, %v8339_v23  ;;  %v4503_v41 = vsel %vm177_vm0, %v4454_v61, 0.0 }
 0x75f   : > { %v4501_v56 = vsel %vm177_vm0, %v4453_v17, 0.0  ;;  %v4403_v34 = vsel %vm177_vm0, %v8339_v23, 0.0  ;;  %v4405_v55 = vsel %vm177_vm0, %v8366_v46, 0.0  ;;  %v4407_v23 = vsel %vm177_vm0, %v8396_v11, 0.0 }
 0x762   : > { %v3449_v38 = vpop.permute.xlu1 %3448 }
 0x763   : > { %v4025_v63 = vsel %vm1742_vm5, %v3993_v53, %v3449_v38  ;;  %v4456_v53 = vmul.f32 %v8366_v46, %v8366_v46  ;;  %v4409_v46 = vsel %vm177_vm0, %v8428_v33, 0.0 }
 0x764   : > { %v4057_v1 = vsel %vm1775_vm7, %v4025_v63, %v3577_v37 }
 0x765   : > { %v4089_v5 = vsel %vm1808_vm9, %v4057_v1, %v3705_v25  ;;  %v4505_v1 = vsel %vm177_vm0, %v4455_v40, 0.0  ;;  %v4457_v25 = vmul.f32 %v8396_v11, %v8396_v11  ;;  %v4411_v11 = vsel %vm177_vm0, %v8443_v28, 0.0 }
 0x76a   : > { %v3833_v32 = vpop.permute.xlu1 %3832  ;;  %v4271_v29 = vpop.f32.mrf.mxu1 }
 0x76b   : > { %4345 = vst.msk [vmem:[#allocation3 + $0x58] sm:$0xff] %vm177_vm0, %v4271_v29  ;;  %v4387_v14 = vsel %vm177_vm0, %v4271_v29, 0.0  ;;  %v4447_v12 = vmul.f32 %v4271_v29, %v4271_v29  ;;  %v4121_v0 = vsel %vm1841_vm8, %v4089_v5, %v3833_v32  ;;  %v4507_v5 = vsel %vm177_vm0, %v4456_v53, 0.0 }
 0x76c   : > { %v4388_v60 = vadd.f32 %v4387_v14, %v4386_v19  ;;  %4880 = vmatmul.msk.f32.gmra.mxu3 %vm1874_vm10, %v4121_v0  ;;  %v4458_v14 = vmul.f32 %v8428_v33, %v8428_v33 }
 0x76d   : > { %v4489_v48 = vsel %vm177_vm0, %v4447_v12, 0.0 }
 0x76e   : > { %v4490_v58 = vadd.f32 %v4489_v48, %v4488_v3  ;;  %v4459_v48 = vmul.f32 %v8443_v28, %v8443_v28 }
 0x778   : > { %v8468_v20 = vpop.f32.mrf.mxu3 }
 0x779   : > { %4358 = vst.msk [vmem:[#allocation3 + $0xc0] sm:$0xff] %vm177_vm0, %v8468_v20  ;;  %v4413_v33 = vsel %vm177_vm0, %v8468_v20, 0.0 }
 0x77b   : > { %v4274_v47 = vpop.f32.mrf.mxu1 }
 0x77c   : > { %4346 = vst.msk [vmem:[#allocation3 + $0x60] sm:$0xff] %vm177_vm0, %v4274_v47  ;;  %v4389_v35 = vsel %vm177_vm0, %v4274_v47, 0.0  ;;  %v4448_v54 = vmul.f32 %v4274_v47, %v4274_v47 }
 0x77d   : > { %v4390_v27 = vadd.f32 %v4389_v35, %v4388_v60  ;;  %v4509_v60 = vsel %vm177_vm0, %v4457_v25, 0.0  ;;  %v4511_v35 = vsel %vm177_vm0, %v4458_v14, 0.0 }
 0x77e   : > { %v4491_v2 = vsel %vm177_vm0, %v4448_v54, 0.0  ;;  %v4460_v54 = vmul.f32 %v8468_v20, %v8468_v20 }
 0x77f   : > { %v4492_v15 = vadd.f32 %v4491_v2, %v4490_v58 }
 0x78f   : > { %v8475_v52 = vpop.f32.mrf.mxu3 }
 0x790   : > { %4359 = vst.msk [vmem:[#allocation3 + $0xc8] sm:$0xff] %vm177_vm0, %v8475_v52  ;;  %v4415_v28 = vsel %vm177_vm0, %v8475_v52, 0.0 }
 0x799   : > { %v4277_v49 = vpop.f32.mrf.mxu1 }
 0x79a   : > { %4347 = vst.msk [vmem:[#allocation3 + $0x68] sm:$0xff] %vm177_vm0, %v4277_v49  ;;  %v8480_v30 = vpop.f32.mrf.mxu3  ;;  %v4449_v45 = vmul.f32 %v4277_v49, %v4277_v49  ;;  %v4391_v21 = vsel %vm177_vm0, %v4277_v49, 0.0  ;;  %v4461_v49 = vmul.f32 %v8475_v52, %v8475_v52 }
 0x79b   : > { %4360 = vst.msk [vmem:[#allocation3 + $0xd0] sm:$0xff] %vm177_vm0, %v8480_v30  ;;  %v4392_v6 = vadd.f32 %v4391_v21, %v4390_v27 }
 0x79c   : > { %v4493_v50 = vsel %vm177_vm0, %v4449_v45, 0.0  ;;  %v4517_v20 = vsel %vm177_vm0, %v4461_v49, 0.0  ;;  %v8581_v49 = vld [vmem:[#allocation3 + $0x10] sm:$0xff] }
 0x79d   : > { %v4494_v31 = vadd.f32 %v4493_v50, %v4492_v15  ;;  %v4513_v15 = vsel %vm177_vm0, %v4459_v48, 0.0  ;;  %v4462_v50 = vmul.f32 %v8480_v30, %v8480_v30 }
 0x7aa   : > { %v4280_v44 = vpop.f32.mrf.mxu1 }
 0x7ab   : > { %4348 = vst.msk [vmem:[#allocation3 + $0x70] sm:$0xff] %vm177_vm0, %v4280_v44  ;;  %v4450_v42 = vmul.f32 %v4280_v44, %v4280_v44  ;;  %v4393_v13 = vsel %vm177_vm0, %v4280_v44, 0.0 }
 0x7ac   : > { %v4394_v16 = vadd.f32 %v4393_v13, %v4392_v6 }
 0x7ad   : > { %v4495_v4 = vsel %vm177_vm0, %v4450_v42, 0.0  ;;  %v4515_v42 = vsel %vm177_vm0, %v4460_v54, 0.0 }
 0x7ae   : > { %v4496_v43 = vadd.f32 %v4495_v4, %v4494_v31  ;;  %v4417_v4 = vsel %vm177_vm0, %v8480_v30, 0.0 }
 0x7b8   : > { %v8488_v62 = vpop.f32.mrf.mxu3 }
 0x7b9   : > { %4361 = vst.msk [vmem:[#allocation3 + $0xd8] sm:$0xff] %vm177_vm0, %v8488_v62 }
 0x7bb   : > { %v4283_v24 = vpop.f32.mrf.mxu1 }
 0x7bc   : > { %4349 = vst.msk [vmem:[#allocation3 + $0x78] sm:$0xff] %vm177_vm0, %v4283_v24  ;;  %v4395_v18 = vsel %vm177_vm0, %v4283_v24, 0.0  ;;  %v4451_v10 = vmul.f32 %v4283_v24, %v4283_v24  ;;  %v4519_v24 = vsel %vm177_vm0, %v4462_v50, 0.0 }
 0x7bd   : > { %v4396_v19 = vadd.f32 %v4395_v18, %v4394_v16 }
 0x7be   : > { %v4497_v59 = vsel %vm177_vm0, %v4451_v10, 0.0  ;;  %v4463_v10 = vmul.f32 %v8488_v62, %v8488_v62 }
 0x7bf   : > { %v4398_v51 = vadd.f32 %v4397_v26, %v4396_v19  ;;  %v4498_v3 = vadd.f32 %v4497_v59, %v4496_v43  ;;  %v4419_v43 = vsel %vm177_vm0, %v8488_v62, 0.0 }
 0x7c0   : > { %v4521_v30 = vsel %vm177_vm0, %v4463_v10, 0.0  ;;  %v8614_v10 = vld [vmem:[#allocation3 + $0x88] sm:$0xff] }
 0x7c1   : > { %v4400_v36 = vadd.f32 %v4399_v7, %v4398_v51  ;;  %v4500_v22 = vadd.f32 %v4499_v9, %v4498_v3 }
 0x7c3   : > { %v4402_v39 = vadd.f32 %v4401_v8, %v4400_v36  ;;  %v4502_v38 = vadd.f32 %v4501_v56, %v4500_v22 }
 0x7c5   : > { %v4404_v63 = vadd.f32 %v4403_v34, %v4402_v39  ;;  %v4504_v37 = vadd.f32 %v4503_v41, %v4502_v38 }
 0x7c7   : > { %v4406_v32 = vadd.f32 %v4405_v55, %v4404_v63  ;;  %v4506_v29 = vadd.f32 %v4505_v1, %v4504_v37 }
 0x7c9   : > { %v4408_v12 = vadd.f32 %v4407_v23, %v4406_v32  ;;  %v4508_v0 = vadd.f32 %v4507_v5, %v4506_v29 }
 0x7cb   : > { %v4510_v58 = vadd.f32 %v4509_v60, %v4508_v0  ;;  %v4410_v47 = vadd.f32 %v4409_v46, %v4408_v12 }
 0x7cd   : > { %v4412_v27 = vadd.f32 %v4411_v11, %v4410_v47  ;;  %v4512_v2 = vadd.f32 %v4511_v35, %v4510_v58 }
 0x7cf   : > { %v4322_v44 = vpop.f32.mrf.mxu3  ;;  %v4414_v45 = vadd.f32 %v4413_v33, %v4412_v27  ;;  %v4514_v21 = vadd.f32 %v4513_v15, %v4512_v2  ;;  %v8577_v15 = vld [vmem:[#allocation3] sm:$0xff]  ;;  %v8579_v33 = vld [vmem:[#allocation3 + $0x8] sm:$0xff] }
 0x7d0   : > { %4362 = vst.msk [vmem:[#allocation3 + $0xe0] sm:$0xff] %vm177_vm0, %v4322_v44  ;;  %v4464_v26 = vmul.f32 %v4322_v44, %v4322_v44  ;;  %v4421_v59 = vsel %vm177_vm0, %v4322_v44, 0.0  ;;  %v8583_v44 = vld [vmem:[#allocation3 + $0x18] sm:$0xff] }
 0x7d1   : > { %v4416_v13 = vadd.f32 %v4415_v28, %v4414_v45  ;;  %v4516_v6 = vadd.f32 %v4515_v42, %v4514_v21  ;;  %v8587_v21 = vld [vmem:[#allocation3 + $0x20] sm:$0xff]  ;;  %v8589_v42 = vld [vmem:[#allocation3 + $0x28] sm:$0xff]  ;;  %v8591_v28 = vld [vmem:[#allocation3 + $0x30] sm:$0xff] }
 0x7d2   : > { %v4523_v9 = vsel %vm177_vm0, %v4464_v26, 0.0 }
 0x7d3   : > { %v4418_v31 = vadd.f32 %v4417_v4, %v4416_v13  ;;  %v4518_v16 = vadd.f32 %v4517_v20, %v4516_v6  ;;  %v8599_v20 = vld [vmem:[#allocation3 + $0x80] sm:$0xff]  ;;  %v8601_v4 = vld [vmem:[#allocation3 + $0x38] sm:$0xff] }
 0x7d5   : > { %v4520_v57 = vadd.f32 %v4519_v24, %v4518_v16  ;;  %v4420_v19 = vadd.f32 %v4419_v43, %v4418_v31  ;;  %v8603_v31 = vld [vmem:[#allocation3 + $0x40] sm:$0xff]  ;;  %v8605_v16 = vld [vmem:[#allocation3 + $0x48] sm:$0xff]  ;;  %v8616_v43 = vld [vmem:[#allocation3 + $0x50] sm:$0xff] }
 0x7d7   : > { %v4522_v17 = vadd.f32 %v4521_v30, %v4520_v57  ;;  %v4422_v3 = vadd.f32 %v4421_v59, %v4420_v19  ;;  %v8618_v19 = vld [vmem:[#allocation3 + $0x58] sm:$0xff]  ;;  %v8620_v30 = vld [vmem:[#allocation3 + $0x60] sm:$0xff] }
 0x7d8   : > { %v4325_v18 = vpop.f32.mrf.mxu3 }
 0x7d9   : > { %4363 = vst.msk [vmem:[#allocation3 + $0xe8] sm:$0xff] %vm177_vm0, %v4325_v18  ;;  %v4465_v51 = vmul.f32 %v4325_v18, %v4325_v18  ;;  %v4423_v7 = vsel %vm177_vm0, %v4325_v18, 0.0  ;;  %v4524_v36 = vadd.f32 %v4523_v9, %v4522_v17  ;;  %v4568_v9 = vld [vmem:[#allocation3 + $0x70] sm:$0xff] }
 0x7da   : > { %v4424_v62 = vadd.f32 %v4423_v7, %v4422_v3  ;;  %v4567_v3 = vld [vmem:[#allocation3 + $0x68] sm:$0xff]  ;;  %v4569_v7 = vld [vmem:[#allocation3 + $0x78] sm:$0xff] }
 0x7db   : > { %v4525_v22 = vsel %vm177_vm0, %v4465_v51, 0.0 }
 0x7dc   : > { %v4526_v40 = vadd.f32 %v4525_v22, %v4524_v36 }
 0x7e1   : > { %v4328_v52 = vpop.f32.mrf.mxu3 }
 0x7e2   : > { %4364 = vst.msk [vmem:[#allocation3 + $0xf0] sm:$0xff] %vm177_vm0, %v4328_v52  ;;  %v4466_v61 = vmul.f32 %v4328_v52, %v4328_v52  ;;  %v4425_v56 = vsel %vm177_vm0, %v4328_v52, 0.0 }
 0x7e3   : > { %v4426_v39 = vadd.f32 %v4425_v56, %v4424_v62  ;;  %v4572_v62 = vld [vmem:[#allocation3 + $0x90] sm:$0xff] }
 0x7e4   : > { %v4527_v8 = vsel %vm177_vm0, %v4466_v61, 0.0 }
 0x7e5   : > { %v4528_v53 = vadd.f32 %v4527_v8, %v4526_v40  ;;  %v4573_v8 = vld [vmem:[#allocation3 + $0x98] sm:$0xff]  ;;  %v4574_v40 = vld [vmem:[#allocation3 + $0xa0] sm:$0xff] }
 0x7ef   : > { %v4331_v38 = vpop.f32.mrf.mxu3 }
 0x7f0   : > { %4365 = vst.msk [vmem:[#allocation3 + $0xf8] sm:$0xff] %vm177_vm0, %v4331_v38  ;;  %v4427_v41 = vsel %vm177_vm0, %v4331_v38, 0.0  ;;  %v4467_v34 = vmul.f32 %v4331_v38, %v4331_v38 }
 0x7f1   : > { %v4428_v63 = vadd.f32 %v4427_v41, %v4426_v39 }
 0x7f2   : > { %v4529_v37 = vsel %vm177_vm0, %v4467_v34, 0.0 }
 0x7f3   : > { %v4429_v1 = vrot.slane %v4428_v63, 4  ;;  %v4530_v55 = vadd.f32 %v4529_v37, %v4528_v53  ;;  %v4575_v53 = vld [vmem:[#allocation3 + $0xa8] sm:$0xff]  ;;  %v4577_v37 = vld [vmem:[#allocation3 + $0xb8] sm:$0xff] }
 0x7f5   : > { %v4430_v25 = vadd.f32 %v4429_v1, %v4428_v63  ;;  %v4531_v32 = vrot.slane %v4530_v55, 4  ;;  %v4576_v63 = vld [vmem:[#allocation3 + $0xb0] sm:$0xff] }
 0x7f7   : > { %v4431_v29 = vrot.slane %v4430_v25, 2  ;;  %v4532_v5 = vadd.f32 %v4531_v32, %v4530_v55  ;;  %v4578_v32 = vld [vmem:[#allocation3 + $0xc0] sm:$0xff] }
 0x7f9   : > { %v4432_v23 = vadd.f32 %v4431_v29, %v4430_v25  ;;  %v4533_v14 = vrot.slane %v4532_v5, 2  ;;  %v4579_v29 = vld [vmem:[#allocation3 + $0xc8] sm:$0xff] }
 0x7fb   : > { %v4433_v12 = vrot.slane %v4432_v23, 1  ;;  %v4534_v0 = vadd.f32 %v4533_v14, %v4532_v5  ;;  %v4580_v5 = vld [vmem:[#allocation3 + $0xd0] sm:$0xff] }
 0x7fd   : > { %v4434_v60 = vadd.f32 %v4433_v12, %v4432_v23  ;;  %v4535_v46 = vrot.slane %v4534_v0, 1 }
 0x7ff   : > { %v4536_v48 = vadd.f32 %v4535_v46, %v4534_v0  ;;  %v8568_v58 = vmul.f32 0.00390625, %v4434_v60  ;;  %v4581_v60 = vld [vmem:[#allocation3 + $0xd8] sm:$0xff]  ;;  %v4582_v46 = vld [vmem:[#allocation3 + $0xe0] sm:$0xff] }
 0x801   : > { %v4539_v47 = vmul.f32 0.00390625, %v4536_v48  ;;  %v4540_v35 = vmul.f32 %v8568_v58, %v8568_v58  ;;  %v4586_v50 = vsub.f32 %v8577_v15, %v8568_v58  ;;  %v4587_v13 = vsub.f32 %v8579_v33, %v8568_v58  ;;  %v4583_v48 = vld [vmem:[#allocation3 + $0xe8] sm:$0xff] }
 0x802   : > { %v4588_v6 = vsub.f32 %v8581_v49, %v8568_v58  ;;  %v4589_v57 = vsub.f32 %v8583_v44, %v8568_v58  ;;  %v4590_v18 = vsub.f32 %v8587_v21, %v8568_v58  ;;  %v4591_v52 = vsub.f32 %v8589_v42, %v8568_v58  ;;  %v4585_v44 = vld [vmem:[#allocation3 + $0xf8] sm:$0xff] }
 0x803   : > { %v4541_v11 = vsub.f32 %v4539_v47, %v4540_v35  ;;  %v4592_v26 = vsub.f32 %v8591_v28, %v8568_v58  ;;  %v4593_v17 = vsub.f32 %v8601_v4, %v8568_v58  ;;  %v4594_v59 = vsub.f32 %v8603_v31, %v8568_v58 }
 0x804   : > { %v4595_v51 = vsub.f32 %v8605_v16, %v8568_v58  ;;  %v4596_v36 = vsub.f32 %v8616_v43, %v8568_v58  ;;  %v4597_v22 = vsub.f32 %v8618_v19, %v8568_v58  ;;  %v4598_v56 = vsub.f32 %v8620_v30, %v8568_v58 }
 0x805   : > { %v4542_v54 = vmax.f32 %v4541_v11, 0.0  ;;  %v4599_v39 = vsub.f32 %v4567_v3, %v8568_v58  ;;  %v4600_v38 = vsub.f32 %v4568_v9, %v8568_v58  ;;  %v4601_v41 = vsub.f32 %v4569_v7, %v8568_v58 }
 0x806   : > { %v4602_v34 = vsub.f32 %v8599_v20, %v8568_v58  ;;  %v4603_v55 = vsub.f32 %v8614_v10, %v8568_v58  ;;  %v4604_v25 = vsub.f32 %v4572_v62, %v8568_v58  ;;  %v4605_v23 = vsub.f32 %v4573_v8, %v8568_v58 }
 0x807   : > { %v8572_v27 = vadd.f32 1e-05, %v4542_v54  ;;  %v4606_v14 = vsub.f32 %v4574_v40, %v8568_v58  ;;  %v4607_v12 = vsub.f32 %v4575_v53, %v8568_v58  ;;  %v4608_v0 = vsub.f32 %v4576_v63, %v8568_v58  ;;  %v4584_v54 = vld [vmem:[#allocation3 + $0xf0] sm:$0xff] }
 0x808   : > { %v4609_v35 = vsub.f32 %v4577_v37, %v8568_v58  ;;  %v4610_v11 = vsub.f32 %v4578_v32, %v8568_v58  ;;  %v4612_v21 = vsub.f32 %v4580_v5, %v8568_v58  ;;  %v4613_v42 = vsub.f32 %v4581_v60, %v8568_v58  ;;  %v4654_v63 = vld [vmem:[%s5008_s14 + $0x20] sm:$0xff]  ;;  %v4655_v37 = vld [vmem:[%s5008_s14 + $0x28] sm:$0xff]  ;;  %v4656_v32 = vld [vmem:[%s5008_s14 + $0x30] sm:$0xff] }
 0x809   : > { %4913 = vrsqrt.f32 %v8572_v27  ;;  %vm4550_vm15 = vweird.f32 %v8572_v27  ;;  %v4614_v28 = vsub.f32 %v4582_v46, %v8568_v58  ;;  %v4616_v4 = vsub.f32 %v4584_v54, %v8568_v58  ;;  %v4657_v5 = vld [vmem:[%s5008_s14 + $0x38] sm:$0xff]  ;;  %v4660_v46 = vld [vmem:[%s5008_s14 + $0x50] sm:$0xff] }
 0x80a   : > { %v4617_v31 = vsub.f32 %v4585_v44, %v8568_v58  ;;  %v4663_v44 = vld [vmem:[%s5008_s14 + $0x68] sm:$0xff] }
 0x80f   : > { %v8575_v2 = vpop.eup %4913 }
 0x810   : > { %v4545_v45 = vmul.f32 %v8575_v2, %v8572_v27  ;;  %vm4551_vm14 = vweird.f32 %v8575_v2  ;;  %v4615_v27 = vsub.f32 %v4583_v48, %v8568_v58 }
 0x811   : > { %vm4552_vm1 = vmor %vm4550_vm15, %vm4551_vm14 }
 0x812   : > { %v4546_v24 = vmul.f32 %v8575_v2, %v4545_v45  ;;  %v4611_v45 = vsub.f32 %v4579_v29, %v8568_v58 }
 0x814   : > { %v4547_v61 = vmul.f32 0.5, %v4546_v24 }
 0x816   : > { %v4548_v1 = vsub.f32 1.5, %v4547_v61 }
 0x818   : > { %v4549_v47 = vmul.f32 %v8575_v2, %v4548_v1 }
 0x81a   : > { %v4553_v20 = vsel %vm4552_vm1, %v8575_v2, %v4549_v47  ;;  %v4661_v47 = vld [vmem:[%s5008_s14 + $0x58] sm:$0xff] }
 0x81b   : > { %v4618_v16 = vmul.f32 %v4586_v50, %v4553_v20  ;;  %v4619_v24 = vmul.f32 %v4587_v13, %v4553_v20  ;;  %v4620_v10 = vmul.f32 %v4588_v6, %v4553_v20  ;;  %v4621_v43 = vmul.f32 %v4589_v57, %v4553_v20 }
 0x81c   : > { %v4622_v2 = vmul.f32 %v4590_v18, %v4553_v20  ;;  %v4623_v19 = vmul.f32 %v4591_v52, %v4553_v20  ;;  %v4624_v30 = vmul.f32 %v4592_v26, %v4553_v20  ;;  %v4625_v3 = vmul.f32 %v4593_v17, %v4553_v20 }
 0x81d   : > { %v4626_v9 = vmul.f32 %v4594_v59, %v4553_v20  ;;  %v4627_v7 = vmul.f32 %v4595_v51, %v4553_v20  ;;  %v4628_v61 = vmul.f32 %v4596_v36, %v4553_v20  ;;  %v4629_v15 = vmul.f32 %v4597_v22, %v4553_v20  ;;  %v4650_v59 = vld [vmem:[%s5008_s14] sm:$0xff]  ;;  %v4651_v51 = vld [vmem:[%s5008_s14 + $0x8] sm:$0xff]  ;;  %v4652_v36 = vld [vmem:[%s5008_s14 + $0x10] sm:$0xff] }
 0x81e   : > { %v4630_v50 = vmul.f32 %v4598_v56, %v4553_v20  ;;  %v4631_v62 = vmul.f32 %v4599_v39, %v4553_v20  ;;  %v4632_v33 = vmul.f32 %v4600_v38, %v4553_v20  ;;  %v8672_v13 = vmul.f32 %v4601_v41, %v4553_v20  ;;  %v4653_v39 = vld [vmem:[%s5008_s14 + $0x18] sm:$0xff] }
 0x81f   : > { %v8674_v58 = vmul.f32 %v4602_v34, %v4553_v20  ;;  %v8676_v49 = vmul.f32 %v4603_v55, %v4553_v20  ;;  %v8678_v6 = vmul.f32 %v4604_v25, %v4553_v20  ;;  %v8680_v57 = vmul.f32 %v4605_v23, %v4553_v20 }
 0x820   : > { %v8682_v18 = vmul.f32 %v4606_v14, %v4553_v20  ;;  %v8684_v52 = vmul.f32 %v4607_v12, %v4553_v20  ;;  %v8686_v26 = vmul.f32 %v4608_v0, %v4553_v20  ;;  %v8688_v17 = vmul.f32 %v4609_v35, %v4553_v20  ;;  %v4658_v14 = vld [vmem:[%s5008_s14 + $0x40] sm:$0xff]  ;;  %v4659_v0 = vld [vmem:[%s5008_s14 + $0x48] sm:$0xff] }
 0x821   : > { %v8693_v22 = vmul.f32 %v4610_v11, %v4553_v20  ;;  %v8695_v56 = vmul.f32 %v4611_v45, %v4553_v20  ;;  %v8697_v8 = vmul.f32 %v4612_v21, %v4553_v20  ;;  %v8699_v40 = vmul.f32 %v4613_v42, %v4553_v20  ;;  %v4662_v11 = vld [vmem:[%s5008_s14 + $0x60] sm:$0xff]  ;;  %v4664_v21 = vld [vmem:[%s5008_s14 + $0x70] sm:$0xff] }
 0x822   : > { %v8709_v38 = vmul.f32 %v4614_v28, %v4553_v20  ;;  %v8711_v41 = vmul.f32 %v4615_v27, %v4553_v20  ;;  %v8713_v34 = vmul.f32 %v4616_v4, %v4553_v20  ;;  %v8715_v53 = vmul.f32 %v4617_v31, %v4553_v20  ;;  %v4665_v28 = vld [vmem:[%s5008_s14 + $0x78] sm:$0xff]  ;;  %v4666_v27 = vld [vmem:[%s5008_s14 + $0x80] sm:$0xff]  ;;  %v4667_v31 = vld [vmem:[%s5008_s14 + $0x88] sm:$0xff] }
 0x823   : > { %v4682_v1 = vadd.f32 %v4650_v59, %v4618_v16  ;;  %v4683_v55 = vadd.f32 %v4651_v51, %v4619_v24  ;;  %v4684_v25 = vadd.f32 %v4652_v36, %v4620_v10  ;;  %v4685_v29 = vadd.f32 %v4653_v39, %v4621_v43  ;;  %v4668_v24 = vld [vmem:[%s5008_s14 + $0x90] sm:$0xff]  ;;  %v4669_v43 = vld [vmem:[%s5008_s14 + $0x98] sm:$0xff]  ;;  %v4679_v59 = vld [vmem:[%s5008_s14 + $0xe8] sm:$0xff] }
 0x824   : > { %v4686_v23 = vadd.f32 %v4654_v63, %v4622_v2  ;;  %v4687_v12 = vadd.f32 %v4655_v37, %v4623_v19  ;;  %v4688_v60 = vadd.f32 %v4656_v32, %v4624_v30  ;;  %v4689_v48 = vadd.f32 %v4657_v5, %v4625_v3  ;;  %v4670_v19 = vld [vmem:[%s5008_s14 + $0xa0] sm:$0xff]  ;;  %v4671_v3 = vld [vmem:[%s5008_s14 + $0xa8] sm:$0xff]  ;;  %v4680_v51 = vld [vmem:[%s5008_s14 + $0xf0] sm:$0xff] }
 0x825   : > { %4714 = vst.msk [vmem:[%s8707_s21] sm:$0xff] %vm177_vm0, %v4682_v1  ;;  %v4690_v35 = vadd.f32 %v4658_v14, %v4626_v9  ;;  %v4691_v54 = vadd.f32 %v4659_v0, %v4627_v7  ;;  %v4692_v45 = vadd.f32 %v4660_v46, %v4628_v61  ;;  %v4693_v42 = vadd.f32 %v4661_v47, %v4629_v15  ;;  %v4672_v7 = vld [vmem:[%s5008_s14 + $0xb0] sm:$0xff]  ;;  %v4673_v15 = vld [vmem:[%s5008_s14 + $0xb8] sm:$0xff] }
 0x826   : > { %4715 = vst.msk [vmem:[%s8707_s21 + $0x8] sm:$0xff] %vm177_vm0, %v4683_v55  ;;  %v4694_v20 = vadd.f32 %v4662_v11, %v4630_v50  ;;  %v4695_v4 = vadd.f32 %v4663_v44, %v4631_v62  ;;  %v4696_v16 = vadd.f32 %v4664_v21, %v4632_v33  ;;  %v4697_v10 = vadd.f32 %v4665_v28, %v8672_v13  ;;  %v4674_v62 = vld [vmem:[%s5008_s14 + $0xc0] sm:$0xff]  ;;  %v4675_v13 = vld [vmem:[%s5008_s14 + $0xc8] sm:$0xff] }
 0x827   : > { %4716 = vst.msk [vmem:[%s8707_s21 + $0x10] sm:$0xff] %vm177_vm0, %v4684_v25  ;;  %v4698_v2 = vadd.f32 %v4666_v27, %v8674_v58  ;;  %v4699_v30 = vadd.f32 %v4667_v31, %v8676_v49  ;;  %v4700_v9 = vadd.f32 %v4668_v24, %v8678_v6  ;;  %v4701_v61 = vadd.f32 %v4669_v43, %v8680_v57  ;;  %v4676_v49 = vld [vmem:[%s5008_s14 + $0xd0] sm:$0xff]  ;;  %v4677_v57 = vld [vmem:[%s5008_s14 + $0xd8] sm:$0xff] }
 0x828   : > { %4717 = vst.msk [vmem:[%s8707_s21 + $0x18] sm:$0xff] %vm177_vm0, %v4685_v29  ;;  %v4702_v50 = vadd.f32 %v4670_v19, %v8682_v18  ;;  %v4703_v33 = vadd.f32 %v4671_v3, %v8684_v52  ;;  %v4704_v58 = vadd.f32 %v4672_v7, %v8686_v26  ;;  %v4705_v6 = vadd.f32 %v4673_v15, %v8688_v17  ;;  %v4678_v52 = vld [vmem:[%s5008_s14 + $0xe0] sm:$0xff] }
 0x829   : > { %4718 = vst.msk [vmem:[%s8707_s21 + $0x20] sm:$0xff] %vm177_vm0, %v4686_v23  ;;  %v4706_v18 = vadd.f32 %v4674_v62, %v8693_v22  ;;  %v4707_v26 = vadd.f32 %v4675_v13, %v8695_v56  ;;  %v4708_v17 = vadd.f32 %v4676_v49, %v8697_v8  ;;  %v4709_v36 = vadd.f32 %v4677_v57, %v8699_v40  ;;  %v4681_v22 = vld [vmem:[%s5008_s14 + $0xf8] sm:$0xff] }
 0x82a   : > { %4719 = vst.msk [vmem:[%s8707_s21 + $0x28] sm:$0xff] %vm177_vm0, %v4687_v12  ;;  %v4710_v56 = vadd.f32 %v4678_v52, %v8709_v38  ;;  %v4711_v39 = vadd.f32 %v4679_v59, %v8711_v41  ;;  %v4712_v8 = vadd.f32 %v4680_v51, %v8713_v34  ;;  %v4713_v63 = vadd.f32 %v4681_v22, %v8715_v53 }
 0x82b   : > { %4720 = vst.msk [vmem:[%s8707_s21 + $0x30] sm:$0xff] %vm177_vm0, %v4688_v60 }
 0x82c   : > { %4721 = vst.msk [vmem:[%s8707_s21 + $0x38] sm:$0xff] %vm177_vm0, %v4689_v48 }
 0x82d   : > { %4722 = vst.msk [vmem:[%s8707_s21 + $0x40] sm:$0xff] %vm177_vm0, %v4690_v35 }
 0x82e   : > { %4723 = vst.msk [vmem:[%s8707_s21 + $0x48] sm:$0xff] %vm177_vm0, %v4691_v54 }
 0x82f   : > { %4724 = vst.msk [vmem:[%s8707_s21 + $0x50] sm:$0xff] %vm177_vm0, %v4692_v45 }
 0x830   : > { %4725 = vst.msk [vmem:[%s8707_s21 + $0x58] sm:$0xff] %vm177_vm0, %v4693_v42 }
 0x831   : > { %4726 = vst.msk [vmem:[%s8707_s21 + $0x60] sm:$0xff] %vm177_vm0, %v4694_v20 }
 0x832   : > { %4727 = vst.msk [vmem:[%s8707_s21 + $0x68] sm:$0xff] %vm177_vm0, %v4695_v4 }
 0x833   : > { %4728 = vst.msk [vmem:[%s8707_s21 + $0x70] sm:$0xff] %vm177_vm0, %v4696_v16 }
 0x834   : > { %4729 = vst.msk [vmem:[%s8707_s21 + $0x78] sm:$0xff] %vm177_vm0, %v4697_v10 }
 0x835   : > { %4730 = vst.msk [vmem:[%s8707_s21 + $0x80] sm:$0xff] %vm177_vm0, %v4698_v2 }
 0x836   : > { %4731 = vst.msk [vmem:[%s8707_s21 + $0x88] sm:$0xff] %vm177_vm0, %v4699_v30 }
 0x837   : > { %4732 = vst.msk [vmem:[%s8707_s21 + $0x90] sm:$0xff] %vm177_vm0, %v4700_v9 }
 0x838   : > { %4733 = vst.msk [vmem:[%s8707_s21 + $0x98] sm:$0xff] %vm177_vm0, %v4701_v61 }
 0x839   : > { %4734 = vst.msk [vmem:[%s8707_s21 + $0xa0] sm:$0xff] %vm177_vm0, %v4702_v50 }
 0x83a   : > { %4735 = vst.msk [vmem:[%s8707_s21 + $0xa8] sm:$0xff] %vm177_vm0, %v4703_v33 }
 0x83b   : > { %4736 = vst.msk [vmem:[%s8707_s21 + $0xb0] sm:$0xff] %vm177_vm0, %v4704_v58 }
 0x83c   : > { %4737 = vst.msk [vmem:[%s8707_s21 + $0xb8] sm:$0xff] %vm177_vm0, %v4705_v6 }
 0x83d   : > { %4738 = vst.msk [vmem:[%s8707_s21 + $0xc0] sm:$0xff] %vm177_vm0, %v4706_v18 }
 0x83e   : > { %4739 = vst.msk [vmem:[%s8707_s21 + $0xc8] sm:$0xff] %vm177_vm0, %v4707_v26 }
 0x83f   : > { %4740 = vst.msk [vmem:[%s8707_s21 + $0xd0] sm:$0xff] %vm177_vm0, %v4708_v17 }
 0x840   : > { %4741 = vst.msk [vmem:[%s8707_s21 + $0xd8] sm:$0xff] %vm177_vm0, %v4709_v36 }
 0x841   : > { %4742 = vst.msk [vmem:[%s8707_s21 + $0xe0] sm:$0xff] %vm177_vm0, %v4710_v56 }
 0x842   : > { %4743 = vst.msk [vmem:[%s8707_s21 + $0xe8] sm:$0xff] %vm177_vm0, %v4711_v39 }
 0x843   : > { %4744 = vst.msk [vmem:[%s8707_s21 + $0xf0] sm:$0xff] %vm177_vm0, %v4712_v8 }
 0x844   : > { %4745 = vst.msk [vmem:[%s8707_s21 + $0xf8] sm:$0xff] %vm177_vm0, %v4713_v63 }
 0x845 PF: > { %s12_s9 = sadd.s32 1, %s4967_s9  }
 0x846   : > { %p9_p4 = scmp.ge.s32.totalorder %s12_s9, 4  }
 0x848   :  { %11 = sbr.rel (!%p9_p4) target bundleno = 1 (0x1), region = 63 }

</bundles_post_ra>
